<compile_context>
chip_gen: v7x
topology: tpu7x:2x2x1
jax: 0.10.0
libtpu: 0.0.40
codegen_flags: <defaults>
</compile_context>

<pallas_src>
import functools

import jax
import jax.numpy as jnp
from jax import lax
from jax.experimental import pallas as pl
from jax.experimental.pallas import tpu as pltpu


# Explicit scoped-VMEM budget: tiles below are sized so (inputs+outputs) x
# double-buffering stays well under this on v5e/v6e (128 MiB) and v7x (64 MiB).
_VMEM_LIMIT = 32 * 1024 * 1024
_LOG2E = 1.4426950408889634


def _pick_tile(n, block, *, min_steps=1, quantum=8):
    """Largest multiple-of-`quantum` divisor of n that is <= block and (when
    possible) leaves at least `min_steps` grid steps; falls back to the full
    (always layout-legal) dimension."""
    cap = min(block, n)
    if min_steps > 1 and n >= min_steps * quantum:
        cap = min(cap, n // min_steps)
    for t in range(cap, 0, -1):
        if n % t == 0 and t % quantum == 0:
            return t
    return n


# --------------------------------------------------------------------------
# Kernels
# --------------------------------------------------------------------------
def _qkv_matmul_kernel(x_ref, w_ref, o_ref, *, compute_dtype):
    # x_ref: (tm, C), w_ref: (C, tn) -> o_ref: (tm, tn).  qkv_bias=False.
    x = x_ref[...]
    if compute_dtype is not None:            # weight was pre-cast in the wrapper
        x = x.astype(compute_dtype)
    o_ref[...] = jnp.dot(x, w_ref[...],
                         preferred_element_type=jnp.float32).astype(o_ref.dtype)


def _attn_proj_single_kernel(q_ref, k_ref, v_ref, lepe_ref, wp_ref, bp_ref, o_ref, *,
                             num_heads, head_dim, scale_log2e, compute_dtype):
    # Single-pass (whole KV in one block) attention + fused (y+lepe)@Wp+b.
    # q_ref: (tq, C); k_ref/v_ref: (N, C); lepe_ref: (tq, C); o_ref: (tq, C).
    q = q_ref[...].astype(jnp.float32) * scale_log2e
    k = k_ref[...]
    v = v_ref[...]
    if compute_dtype is not None:
        q = q.astype(compute_dtype)
        k = k.astype(compute_dtype)
        v = v.astype(compute_dtype)
    else:
        q = q.astype(k.dtype)                # avoid implicit mixed-precision dot

    lepe = lepe_ref[...].astype(jnp.float32)
    parts = []
    for h in range(num_heads):               # static unroll over heads
        hs, he = h * head_dim, (h + 1) * head_dim
        s = lax.dot_general(q[:, hs:he], k[:, hs:he], (((1,), (1,)), ((), ())),
                            preferred_element_type=jnp.float32)       # (tq, N)
        m = jnp.max(s, axis=-1, keepdims=True)
        p = jnp.exp2(s - m)                  # scale*log2(e) folded into q
        l = jnp.sum(p, axis=-1, keepdims=True)
        pv = jnp.dot(p.astype(v.dtype), v[:, hs:he],
                     preferred_element_type=jnp.float32)               # (tq, hd)
        parts.append(pv * pl.reciprocal(l, approx=False) + lepe[:, hs:he])

    y = jnp.concatenate(parts, axis=-1)      # once per output tile
    wp = wp_ref[...]
    out = jnp.dot(y.astype(wp.dtype), wp, preferred_element_type=jnp.float32)
    o_ref[...] = (out + bp_ref[...].astype(jnp.float32)).astype(o_ref.dtype)


def _attn_proj_flash_kernel(q_ref, k_ref, v_ref, lepe_ref, wp_ref, bp_ref, o_ref,
                            q_sc, m_sc, l_sc, acc_sc, *,
                            num_heads, head_dim, scale_log2e, compute_dtype):
    # KV-blocked online-softmax attention with fused proj epilogue.
    # q_ref/lepe_ref/o_ref: (tq, C); k_ref/v_ref: (tk, C);
    # q_sc: (tq, C) staged scaled q; m_sc/l_sc: (tq, num_heads) f32;
    # acc_sc: (tq, C) f32.
    ki = pl.program_id(2)

    @pl.when(ki == 0)
    def _init():
        q0 = q_ref[...].astype(jnp.float32) * scale_log2e
        q_sc[...] = q0.astype(q_sc.dtype)            # scale/cast q exactly once
        m_sc[...] = jnp.full_like(m_sc, -jnp.inf)
        l_sc[...] = jnp.zeros_like(l_sc)
        acc_sc[...] = jnp.zeros_like(acc_sc)

    q = q_sc[...]
    k = k_ref[...]
    v = v_ref[...]
    if compute_dtype is not None:
        k = k.astype(compute_dtype)
        v = v.astype(compute_dtype)

    for h in range(num_heads):                       # static unroll over heads
        hs, he = h * head_dim, (h + 1) * head_dim
        s = lax.dot_general(q[:, hs:he], k[:, hs:he], (((1,), (1,)), ((), ())),
                            preferred_element_type=jnp.float32)       # (tq, tk)
        m_prev = m_sc[:, h:h + 1]
        m_new = jnp.maximum(m_prev, jnp.max(s, axis=-1, keepdims=True))
        alpha = jnp.exp2(m_prev - m_new)
        p = jnp.exp2(s - m_new)
        l_sc[:, h:h + 1] = alpha * l_sc[:, h:h + 1] + jnp.sum(p, axis=-1, keepdims=True)
        m_sc[:, h:h + 1] = m_new
        pv = jnp.dot(p.astype(v.dtype), v[:, hs:he],
                     preferred_element_type=jnp.float32)
        acc_sc[:, hs:he] = alpha * acc_sc[:, hs:he] + pv

    @pl.when(ki == pl.num_programs(2) - 1)
    def _finalize():
        inv_l = pl.reciprocal(l_sc[...], approx=False)               # (tq, nh)
        lepe = lepe_ref[...].astype(jnp.float32)
        parts = []
        for h in range(num_heads):
            hs, he = h * head_dim, (h + 1) * head_dim
            parts.append(acc_sc[:, hs:he] * inv_l[:, h:h + 1] + lepe[:, hs:he])
        y = jnp.concatenate(parts, axis=-1)          # once, in the finalize only
        wp = wp_ref[...]
        out = jnp.dot(y.astype(wp.dtype), wp, preferred_element_type=jnp.float32)
        o_ref[...] = (out + bp_ref[...].astype(jnp.float32)).astype(o_ref.dtype)


def _lepe_kernel(x_ref, w_ref, b_ref, o_ref, pad_sc, *, K, H, W, C, pad):
    # Depthwise KxK conv on one batch, lane-dense (H, W*C) layout.
    # Only the halo strips of the padded slab are zeroed.
    WC = W * C
    WpC = (W + 2 * pad) * C
    pad_sc[0:pad, :] = jnp.zeros((pad, WpC), jnp.float32)
    pad_sc[pad + H:pad + H + pad, :] = jnp.zeros((pad, WpC), jnp.float32)
    pad_sc[pad:pad + H, 0:pad * C] = jnp.zeros((H, pad * C), jnp.float32)
    pad_sc[pad:pad + H, pad * C + WC:pad * C + WC + pad * C] = jnp.zeros(
        (H, pad * C), jnp.float32)
    pad_sc[pad:pad + H, pad * C:pad * C + WC] = x_ref[...].astype(jnp.float32)
    # TODO(synk): a pltpu.roll + border-mask variant would avoid the padded
    # scratch entirely; kept the slab form for lowering robustness.

    acc = jnp.zeros((H, WC), jnp.float32)
    for kh in range(K):
        for kw in range(K):
            t = kh * K + kw
            acc = acc + (pad_sc[kh:kh + H, kw * C:kw * C + WC]
                         * w_ref[t:t + 1, :].astype(jnp.float32))
    o_ref[...] = (acc + b_ref[...].astype(jnp.float32)).astype(o_ref.dtype)


# --------------------------------------------------------------------------
# Pallas wrappers
# --------------------------------------------------------------------------
def _qkv_linear(x2d, w, *, compute_dtype=None, out_dtype=None,
                block_m=512, block_n=1024):
    M, C = x2d.shape
    _, Nout = w.shape
    out_dtype = out_dtype if out_dtype is not None else x2d.dtype
    tm = _pick_tile(M, block_m, min_steps=2, quantum=8)     # >=2 steps for megacore
    tn = _pick_tile(Nout, block_n, quantum=128)
    # TODO(synk): add K-tiling with an f32 acc scratch (and single-buffer the
    # resident weight) for very large C on v7x's 64 MiB VMEM.
    return pl.pallas_call(
        functools.partial(_qkv_matmul_kernel, compute_dtype=compute_dtype),
        out_shape=jax.ShapeDtypeStruct((M, Nout), out_dtype),
        grid=(M // tm, Nout // tn),
        in_specs=[pl.BlockSpec((tm, C), lambda i, j: (i, 0)),
                  pl.BlockSpec((C, tn), lambda i, j: (0, j))],
        out_specs=pl.BlockSpec((tm, tn), lambda i, j: (i, j)),
        compiler_params=pltpu.CompilerParams(
            dimension_semantics=("parallel", "parallel"),
            vmem_limit_bytes=_VMEM_LIMIT),
    )(x2d, w)


def _attention_proj(qkv, lepe, w_proj, b_proj, num_heads, head_dim, scale, *,
                    compute_dtype=None, out_dtype=None, q_block=256, kv_block=256):
    """Fused attention + (y + lepe) @ W_proj + b_proj; output (B, N, C)."""
    B, N, threeC = qkv.shape
    C = threeC // 3
    out_dtype = out_dtype if out_dtype is not None else qkv.dtype
    tq = _pick_tile(N, q_block, quantum=8)
    nq = N // tq
    scale_log2e = float(scale) * _LOG2E
    bp = b_proj.reshape(1, C)

    direct = (C % 128 == 0)
    if not direct:
        # TODO(synk): use element-offset index maps (or pad C to a multiple of
        # 128) to read q/k/v straight from the qkv slab for non-128-multiple C.
        q_in = qkv[:, :, 0 * C:1 * C]
        k_in = qkv[:, :, 1 * C:2 * C]
        v_in = qkv[:, :, 2 * C:3 * C]

    tail_specs_2 = [pl.BlockSpec((None, tq, C), lambda b, qi: (b, qi, 0)),
                    pl.BlockSpec((C, C), lambda b, qi: (0, 0)),
                    pl.BlockSpec((1, C), lambda b, qi: (0, 0))]
    tail_specs_3 = [pl.BlockSpec((None, tq, C), lambda b, qi, ki: (b, qi, 0)),
                    pl.BlockSpec((C, C), lambda b, qi, ki: (0, 0)),
                    pl.BlockSpec((1, C), lambda b, qi, ki: (0, 0))]

    if N <= kv_block:
        # -------- single-pass fast path (no online-softmax bookkeeping) -----
        kern = functools.partial(_attn_proj_single_kernel, num_heads=num_heads,
                                 head_dim=head_dim, scale_log2e=scale_log2e,
                                 compute_dtype=compute_dtype)
        if direct:
            qkv_specs = [pl.BlockSpec((None, tq, C), lambda b, qi: (b, qi, 0)),
                         pl.BlockSpec((None, N, C), lambda b, qi: (b, 0, 1)),
                         pl.BlockSpec((None, N, C), lambda b, qi: (b, 0, 2))]
            qkv_args = (qkv, qkv, qkv)
        else:
            qkv_specs = [pl.BlockSpec((None, tq, C), lambda b, qi: (b, qi, 0)),
                         pl.BlockSpec((None, N, C), lambda b, qi: (b, 0, 0)),
                         pl.BlockSpec((None, N, C), lambda b, qi: (b, 0, 0))]
            qkv_args = (q_in, k_in, v_in)
        return pl.pallas_call(
            kern,
            out_shape=jax.ShapeDtypeStruct((B, N, C), out_dtype),
            grid=(B, nq),
            in_specs=qkv_specs + tail_specs_2,
            out_specs=pl.BlockSpec((None, tq, C), lambda b, qi: (b, qi, 0)),
            compiler_params=pltpu.CompilerParams(
                dimension_semantics=("parallel", "parallel"),
                vmem_limit_bytes=_VMEM_LIMIT),
        )(*qkv_args, lepe, w_proj, bp)

    # -------- flash (kv-blocked) path ----------------------------------------
    tk = _pick_tile(N, kv_block, quantum=8)
    nk = N // tk
    kern = functools.partial(_attn_proj_flash_kernel, num_heads=num_heads,
                             head_dim=head_dim, scale_log2e=scale_log2e,
                             compute_dtype=compute_dtype)
    if direct:
        qkv_specs = [pl.BlockSpec((None, tq, C), lambda b, qi, ki: (b, qi, 0)),
                     pl.BlockSpec((None, tk, C), lambda b, qi, ki: (b, ki, 1)),
                     pl.BlockSpec((None, tk, C), lambda b, qi, ki: (b, ki, 2))]
        qkv_args = (qkv, qkv, qkv)
    else:
        qkv_specs = [pl.BlockSpec((None, tq, C), lambda b, qi, ki: (b, qi, 0)),
                     pl.BlockSpec((None, tk, C), lambda b, qi, ki: (b, ki, 0)),
                     pl.BlockSpec((None, tk, C), lambda b, qi, ki: (b, ki, 0))]
        qkv_args = (q_in, k_in, v_in)
    q_sc_dtype = compute_dtype if compute_dtype is not None else qkv.dtype
    return pl.pallas_call(
        kern,
        out_shape=jax.ShapeDtypeStruct((B, N, C), out_dtype),
        grid=(B, nq, nk),
        in_specs=qkv_specs + tail_specs_3,
        out_specs=pl.BlockSpec((None, tq, C), lambda b, qi, ki: (b, qi, 0)),
        scratch_shapes=[pltpu.VMEM((tq, C), q_sc_dtype),
                        pltpu.VMEM((tq, num_heads), jnp.float32),
                        pltpu.VMEM((tq, num_heads), jnp.float32),
                        pltpu.VMEM((tq, C), jnp.float32)],
        compiler_params=pltpu.CompilerParams(
            dimension_semantics=("parallel", "parallel", "arbitrary"),
            vmem_limit_bytes=_VMEM_LIMIT),
    )(*qkv_args, lepe, w_proj, bp)


def _lepe(x_flat, w_dw, b_dw, H, W, C):
    # x_flat: (B, H, W*C) view of the NHWC activation (no extra copy).
    B = x_flat.shape[0]
    K = w_dw.shape[0]
    pad = K // 2
    WC = W * C
    Hp, WpC = H + 2 * pad, (W + 2 * pad) * C
    # Per-tap weights / bias tiled over W so they broadcast over the (H, W*C)
    # lane-dense layout:  w_flat[kh*K+kw, j*C + c] == w_dw[kh, kw, c].
    w_flat = jnp.tile(w_dw, (1, 1, W)).reshape(K * K, WC)
    b_flat = jnp.tile(b_dw, W).reshape(1, WC)

    return pl.pallas_call(
        functools.partial(_lepe_kernel, K=K, H=H, W=W, C=C, pad=pad),
        out_shape=jax.ShapeDtypeStruct((B, H, WC), x_flat.dtype),
        grid=(B,),
        in_specs=[pl.BlockSpec((None, H, WC), lambda b: (b, 0, 0)),
                  pl.BlockSpec((K * K, WC), lambda b: (0, 0)),
                  pl.BlockSpec((1, WC), lambda b: (0, 0))],
        out_specs=pl.BlockSpec((None, H, WC), lambda b: (b, 0, 0)),
        scratch_shapes=[pltpu.VMEM((Hp, WpC), jnp.float32)],
        compiler_params=pltpu.CompilerParams(
            dimension_semantics=("parallel",),
            vmem_limit_bytes=_VMEM_LIMIT),
    )(x_flat, w_flat, b_flat)


# --------------------------------------------------------------------------
# Full forward
# --------------------------------------------------------------------------
def attention_lepe_forward(x_nchw, params, num_heads, *, mxu_dtype=None,
                           q_block=256, kv_block=256, block_m=512, block_n=1024):
    """AttentionLePE forward.  mxu_dtype=jnp.bfloat16 enables bf16 MXU operands
    (weights pre-cast once, bf16 qkv activation, f32 accumulation & softmax
    stats).  Recommended on v5e, v6e and v7x."""
    B, C, H, W = x_nchw.shape
    N = H * W
    hd = C // num_heads
    scale = hd ** (-0.5)

    # Single NCHW->NHWC transpose; everything below is a free view of it.
    x_nhwc = jnp.transpose(x_nchw, (0, 2, 3, 1))                 # (B, H, W, C)
    x_tok2d = x_nhwc.reshape(B * N, C)                           # n c h w -> n (h w) c

    w_qkv = params["w_qkv"]
    w_proj = params["w_proj"]
    if mxu_dtype is not None:                 # one-time weight cast (resident tiles)
        w_qkv = w_qkv.astype(mxu_dtype)
        w_proj = w_proj.astype(mxu_dtype)
    qkv_store_dtype = mxu_dtype if mxu_dtype is not None else x_nchw.dtype

    # QKV projection (qkv_bias=False), M/N-tiled & pipelined; bf16 slab in the
    # bf16 path (largest intermediate -> half the HBM traffic).
    qkv = _qkv_linear(x_tok2d, w_qkv, compute_dtype=mxu_dtype,
                      out_dtype=qkv_store_dtype, block_m=block_m, block_n=block_n)
    qkv = qkv.reshape(B, N, 3 * C)

    # LePE 5x5 depthwise conv, lane-dense (H, W*C) layout, halo-only padding.
    lepe = _lepe(x_nhwc.reshape(B, H, W * C), params["w_lepe"], params["b_lepe"],
                 H, W, C)
    lepe = lepe.reshape(B, N, C)

    # Attention reading q/k/v straight from the qkv slab, with the proj
    # (+ lepe, + bias) fused into its finalize.  Output is (B, N, C) in x dtype.
    out = _attention_proj(qkv, lepe, w_proj, params["b_proj"], num_heads, hd, scale,
                          compute_dtype=mxu_dtype, out_dtype=x_nchw.dtype,
                          q_block=q_block, kv_block=kv_block)
    out = out.reshape(B, H, W, C)
    return jnp.transpose(out, (0, 3, 1, 2))                      # back to NCHW


# --------------------------------------------------------------------------
# Pure-JAX reference (for correctness check); HIGHEST precision so the f32
# Pallas path can be checked tightly.
# --------------------------------------------------------------------------
def reference_forward(x_nchw, params, num_heads):
    P = lax.Precision.HIGHEST
    B, C, H, W = x_nchw.shape
    N = H * W
    hd = C // num_heads
    scale = hd ** (-0.5)
    x_nhwc = jnp.transpose(x_nchw, (0, 2, 3, 1))
    x_tok = x_nhwc.reshape(B, N, C)

    qkv = jnp.dot(x_tok, params["w_qkv"], precision=P)
    qkv = qkv.reshape(B, N, 3, num_heads, hd)
    q = jnp.transpose(qkv[:, :, 0], (0, 2, 1, 3))
    k = jnp.transpose(qkv[:, :, 1], (0, 2, 1, 3))
    v = jnp.transpose(qkv[:, :, 2], (0, 2, 1, 3))

    K = params["w_lepe"].shape[0]
    rhs = params["w_lepe"].reshape(K, K, 1, C)
    lepe = lax.conv_general_dilated(
        x_nhwc, rhs, window_strides=(1, 1), padding="SAME",
        dimension_numbers=("NHWC", "HWIO", "NHWC"), feature_group_count=C,
        precision=P,
    ) + params["b_lepe"]
    lepe = lepe.reshape(B, N, C)

    s = jnp.einsum("bhnd,bhmd->bhnm", q, k, precision=P) * scale
    p = jax.nn.softmax(s, axis=-1)
    o = jnp.einsum("bhnm,bhmd->bhnd", p, v, precision=P)
    o = jnp.transpose(o, (0, 2, 1, 3)).reshape(B, N, C) + lepe
    out = jnp.dot(o, params["w_proj"], precision=P) + params["b_proj"]
    return jnp.transpose(out.reshape(B, H, W, C), (0, 3, 1, 2))


# --------------------------------------------------------------------------
# Main
# --------------------------------------------------------------------------
if __name__ == "__main__":
    num_heads = 8
    side_dwconv = 5

    def make_params(key, C):
        k1, k2, k3, k4, k5 = jax.random.split(key, 5)
        return {
            "w_qkv": 0.05 * jax.random.normal(k1, (C, 3 * C), jnp.float32),
            "w_proj": 0.05 * jax.random.normal(k2, (C, C), jnp.float32),
            "b_proj": 0.01 * jax.random.normal(k3, (C,), jnp.float32),
            "w_lepe": 0.05 * jax.random.normal(k4, (side_dwconv, side_dwconv, C),
                                               jnp.float32),
            "b_lepe": 0.01 * jax.random.normal(k5, (C,), jnp.float32),
        }

    key = jax.random.PRNGKey(0)
    kx1, kx2, kp = jax.random.split(key, 3)

    # ---- Config 1: shipped size (single-pass fast path) ----------------------
    B, C, H, W = 2, 128, 8, 8          # dim=128, 8 heads -> head_dim=16
    x = jax.random.normal(kx1, (B, C, H, W), jnp.float32)
    params = make_params(kp, C)

    fwd_f32 = jax.jit(lambda xx, pp: attention_lepe_forward(xx, pp, num_heads))
    fwd_bf16 = jax.jit(lambda xx, pp: attention_lepe_forward(
        xx, pp, num_heads, mxu_dtype=jnp.bfloat16))

    out = jax.block_until_ready(fwd_f32(x, params))
    ref = reference_forward(x, params, num_heads)
    assert out.shape == (B, C, H, W)
    err = float(jnp.max(jnp.abs(out - ref)))
    assert jnp.allclose(out, ref, atol=5e-3, rtol=5e-3), f"f32 mismatch: {err:.3e}"

    # bf16-MXU-operand path (recommended on v5e/v6e/v7x): operand rounding only;
    # accumulation and softmax stats stay f32.
    out_bf = jax.block_until_ready(fwd_bf16(x, params))
    err_bf = float(jnp.max(jnp.abs(out_bf - ref)))
    assert jnp.allclose(out_bf, ref, atol=5e-2, rtol=5e-2), f"bf16 mismatch: {err_bf:.3e}"

    # ---- Config 2: larger N, kv_block=128 -> exercises the flash path --------
    B2, H2, W2 = 1, 16, 16
    x2 = jax.random.normal(kx2, (B2, C, H2, W2), jnp.float32)
    fwd_flash = jax.jit(lambda xx, pp: attention_lepe_forward(
        xx, pp, num_heads, q_block=128, kv_block=128))
    out2 = jax.block_until_ready(fwd_flash(x2, params))
    ref2 = reference_forward(x2, params, num_heads)
    err2 = float(jnp.max(jnp.abs(out2 - ref2)))
    assert jnp.allclose(out2, ref2, atol=5e-3, rtol=5e-3), f"flash mismatch: {err2:.3e}"

    print("KERNEL_OK")
</pallas_src>

<mosaic_0001>
module attributes {stable_mosaic.version = 11 : i64} {
  func.func @_qkv_matmul_kernel(%arg0: i32, %arg1: i32, %arg2: memref<64x128xf32, #tpu.memory_space<vmem>>, %arg3: memref<128x384xf32, #tpu.memory_space<vmem>>, %arg4: memref<64x384xf32, #tpu.memory_space<vmem>>) attributes {dimension_semantics = [#tpu.dimension_semantics<parallel>, #tpu.dimension_semantics<parallel>], iteration_bounds = array<i64: 2, 1>, scalar_prefetch = 0 : i64, scratch_operands = 0 : i64, tpu.core_type = #tpu.core_type<tc>, window_params = [{transform_indices = @transform_0, window_bounds = array<i64: 64, 128>}, {transform_indices = @transform_1, window_bounds = array<i64: 128, 384>}, {transform_indices = @transform_2, window_bounds = array<i64: 64, 384>}]} {
    %c0 = arith.constant 0 : index
    %c0_0 = arith.constant 0 : index
    %0 = vector.load %arg2[%c0, %c0_0] : memref<64x128xf32, #tpu.memory_space<vmem>>, vector<64x128xf32>
    %c0_1 = arith.constant 0 : index
    %c0_2 = arith.constant 0 : index
    %1 = vector.load %arg3[%c0_1, %c0_2] : memref<128x384xf32, #tpu.memory_space<vmem>>, vector<128x384xf32>
    %cst = arith.constant dense<0.000000e+00> : vector<64x384xf32>
    %2 = tpu.matmul %0, %1, %cst {dimension_numbers = #tpu.dot_dimension_numbers<[1], [0], [0], [1], [0, 0, 1, 1], [], []>} : vector<64x128xf32>, vector<128x384xf32>, vector<64x384xf32> -> vector<64x384xf32>
    %c0_3 = arith.constant 0 : index
    %c0_4 = arith.constant 0 : index
    %3 = vector.load %arg4[%c0_3, %c0_4] : memref<64x384xf32, #tpu.memory_space<vmem>>, vector<64x384xf32>
    tpu.vector_store %arg4[%c0_3, %c0_4], %2 {strides = array<i32>} : memref<64x384xf32, #tpu.memory_space<vmem>>, vector<64x384xf32>,
    return
  }
  func.func @transform_0(%arg0: i32, %arg1: i32) -> (i32, i32) {
    %c0_i32 = arith.constant 0 : i32
    %c0_i32_0 = arith.constant 0 : i32
    return %arg0, %c0_i32 : i32, i32
  }
  func.func @transform_1(%arg0: i32, %arg1: i32) -> (i32, i32) {
    %c0_i32 = arith.constant 0 : i32
    %c0_i32_0 = arith.constant 0 : i32
    return %c0_i32, %arg1 : i32, i32
  }
  func.func @transform_2(%arg0: i32, %arg1: i32) -> (i32, i32) {
    %c0_i32 = arith.constant 0 : i32
    return %arg0, %arg1 : i32, i32
  }
}

module attributes {stable_mosaic.version = 11 : i64} {
  func.func @_lepe_kernel(%arg0: i32, %arg1: memref<1x8x1024xf32, #tpu.memory_space<vmem>>, %arg2: memref<25x1024xf32, #tpu.memory_space<vmem>>, %arg3: memref<1x1024xf32, #tpu.memory_space<vmem>>, %arg4: memref<1x8x1024xf32, #tpu.memory_space<vmem>>, %arg5: memref<12x1536xf32, #tpu.memory_space<vmem>>) attributes {dimension_semantics = [#tpu.dimension_semantics<parallel>], iteration_bounds = array<i64: 2>, scalar_prefetch = 0 : i64, scratch_operands = 1 : i64, tpu.core_type = #tpu.core_type<tc>, window_params = [{transform_indices = @transform_0, window_bounds = array<i64: 1, 8, 1024>}, {pipeline_mode = #tpu.pipeline_mode<synchronous>, transform_indices = @transform_1, window_bounds = array<i64: 25, 1024>}, {pipeline_mode = #tpu.pipeline_mode<synchronous>, transform_indices = @transform_2, window_bounds = array<i64: 1, 1024>}, {transform_indices = @transform_3, window_bounds = array<i64: 1, 8, 1024>}]} {
    %cst = arith.constant 0.000000e+00 : f32
    %0 = vector.broadcast %cst : f32 to vector<2x1536xf32>
    %c0 = arith.constant 0 : index
    %c0_0 = arith.constant 0 : index
    %1 = vector.load %arg5[%c0, %c0_0] : memref<12x1536xf32, #tpu.memory_space<vmem>>, vector<2x1536xf32>
    tpu.vector_store %arg5[%c0, %c0_0], %0 {strides = array<i32>} : memref<12x1536xf32, #tpu.memory_space<vmem>>, vector<2x1536xf32>,
    %cst_1 = arith.constant 0.000000e+00 : f32
    %2 = vector.broadcast %cst_1 : f32 to vector<2x1536xf32>
    %c10 = arith.constant 10 : index
    %c0_2 = arith.constant 0 : index
    %3 = vector.load %arg5[%c10, %c0_2] : memref<12x1536xf32, #tpu.memory_space<vmem>>, vector<2x1536xf32>
    tpu.vector_store %arg5[%c10, %c0_2], %2 {strides = array<i32>} : memref<12x1536xf32, #tpu.memory_space<vmem>>, vector<2x1536xf32>,
    %cst_3 = arith.constant 0.000000e+00 : f32
    %4 = vector.broadcast %cst_3 : f32 to vector<8x256xf32>
    %c2 = arith.constant 2 : index
    %c0_4 = arith.constant 0 : index
    %5 = vector.load %arg5[%c2, %c0_4] : memref<12x1536xf32, #tpu.memory_space<vmem>>, vector<8x256xf32>
    tpu.vector_store %arg5[%c2, %c0_4], %4 {strides = array<i32>} : memref<12x1536xf32, #tpu.memory_space<vmem>>, vector<8x256xf32>,
    %cst_5 = arith.constant 0.000000e+00 : f32
    %6 = vector.broadcast %cst_5 : f32 to vector<8x256xf32>
    %c2_6 = arith.constant 2 : index
    %c1280 = arith.constant 1280 : index
    %7 = vector.load %arg5[%c2_6, %c1280] : memref<12x1536xf32, #tpu.memory_space<vmem>>, vector<8x256xf32>
    tpu.vector_store %arg5[%c2_6, %c1280], %6 {strides = array<i32>} : memref<12x1536xf32, #tpu.memory_space<vmem>>, vector<8x256xf32>,
    %c0_7 = arith.constant 0 : index
    %c0_8 = arith.constant 0 : index
    %c0_9 = arith.constant 0 : index
    %8 = vector.load %arg1[%c0_7, %c0_8, %c0_9] : memref<1x8x1024xf32, #tpu.memory_space<vmem>>, vector<1x8x1024xf32>
    %9 = vector.shape_cast %8 : vector<1x8x1024xf32> to vector<8x1024xf32>
    %c2_10 = arith.constant 2 : index
    %c256 = arith.constant 256 : index
    %10 = vector.load %arg5[%c2_10, %c256] : memref<12x1536xf32, #tpu.memory_space<vmem>>, vector<8x1024xf32>
    tpu.vector_store %arg5[%c2_10, %c256], %9 {strides = array<i32>} : memref<12x1536xf32, #tpu.memory_space<vmem>>, vector<8x1024xf32>,
    %cst_11 = arith.constant 0.000000e+00 : f32
    %11 = vector.broadcast %cst_11 : f32 to vector<8x1024xf32>
    %c0_12 = arith.constant 0 : index
    %c0_13 = arith.constant 0 : index
    %12 = vector.load %arg5[%c0_12, %c0_13] : memref<12x1536xf32, #tpu.memory_space<vmem>>, vector<8x1024xf32>
    %c0_14 = arith.constant 0 : index
    %c0_15 = arith.constant 0 : index
    %13 = vector.load %arg2[%c0_14, %c0_15] : memref<25x1024xf32, #tpu.memory_space<vmem>>, vector<1x1024xf32>
    %14 = vector.broadcast %13 : vector<1x1024xf32> to vector<8x1024xf32>
    %15 = arith.mulf %12, %14 : vector<8x1024xf32>
    %16 = arith.addf %11, %15 : vector<8x1024xf32>
    %c0_16 = arith.constant 0 : index
    %c128 = arith.constant 128 : index
    %17 = vector.load %arg5[%c0_16, %c128] : memref<12x1536xf32, #tpu.memory_space<vmem>>, vector<8x1024xf32>
    %c1 = arith.constant 1 : index
    %c0_17 = arith.constant 0 : index
    %18 = vector.load %arg2[%c1, %c0_17] : memref<25x1024xf32, #tpu.memory_space<vmem>>, vector<1x1024xf32>
    %19 = vector.broadcast %18 : vector<1x1024xf32> to vector<8x1024xf32>
    %20 = arith.mulf %17, %19 : vector<8x1024xf32>
    %21 = arith.addf %16, %20 : vector<8x1024xf32>
    %c0_18 = arith.constant 0 : index
    %c256_19 = arith.constant 256 : index
    %22 = vector.load %arg5[%c0_18, %c256_19] : memref<12x1536xf32, #tpu.memory_space<vmem>>, vector<8x1024xf32>
    %c2_20 = arith.constant 2 : index
    %c0_21 = arith.constant 0 : index
    %23 = vector.load %arg2[%c2_20, %c0_21] : memref<25x1024xf32, #tpu.memory_space<vmem>>, vector<1x1024xf32>
    %24 = vector.broadcast %23 : vector<1x1024xf32> to vector<8x1024xf32>
    %25 = arith.mulf %22, %24 : vector<8x1024xf32>
    %26 = arith.addf %21, %25 : vector<8x1024xf32>
    %c0_22 = arith.constant 0 : index
    %c384 = arith.constant 384 : index
    %27 = vector.load %arg5[%c0_22, %c384] : memref<12x1536xf32, #tpu.memory_space<vmem>>, vector<8x1024xf32>
    %c3 = arith.constant 3 : index
    %c0_23 = arith.constant 0 : index
    %28 = vector.load %arg2[%c3, %c0_23] : memref<25x1024xf32, #tpu.memory_space<vmem>>, vector<1x1024xf32>
    %29 = vector.broadcast %28 : vector<1x1024xf32> to vector<8x1024xf32>
    %30 = arith.mulf %27, %29 : vector<8x1024xf32>
    %31 = arith.addf %26, %30 : vector<8x1024xf32>
    %c0_24 = arith.constant 0 : index
    %c512 = arith.constant 512 : index
    %32 = vector.load %arg5[%c0_24, %c512] : memref<12x1536xf32, #tpu.memory_space<vmem>>, vector<8x1024xf32>
    %c4 = arith.constant 4 : index
    %c0_25 = arith.constant 0 : index
    %33 = vector.load %arg2[%c4, %c0_25] : memref<25x1024xf32, #tpu.memory_space<vmem>>, vector<1x1024xf32>
    %34 = vector.broadcast %33 : vector<1x1024xf32> to vector<8x1024xf32>
    %35 = arith.mulf %32, %34 : vector<8x1024xf32>
    %36 = arith.addf %31, %35 : vector<8x1024xf32>
    %c1_26 = arith.constant 1 : index
    %c0_27 = arith.constant 0 : index
    %37 = vector.load %arg5[%c1_26, %c0_27] : memref<12x1536xf32, #tpu.memory_space<vmem>>, vector<8x1024xf32>
    %c5 = arith.constant 5 : index
    %c0_28 = arith.constant 0 : index
    %38 = vector.load %arg2[%c5, %c0_28] : memref<25x1024xf32, #tpu.memory_space<vmem>>, vector<1x1024xf32>
    %39 = vector.broadcast %38 : vector<1x1024xf32> to vector<8x1024xf32>
    %40 = arith.mulf %37, %39 : vector<8x1024xf32>
    %41 = arith.addf %36, %40 : vector<8x1024xf32>
    %c1_29 = arith.constant 1 : index
    %c128_30 = arith.constant 128 : index
    %42 = vector.load %arg5[%c1_29, %c128_30] : memref<12x1536xf32, #tpu.memory_space<vmem>>, vector<8x1024xf32>
    %c6 = arith.constant 6 : index
    %c0_31 = arith.constant 0 : index
    %43 = vector.load %arg2[%c6, %c0_31] : memref<25x1024xf32, #tpu.memory_space<vmem>>, vector<1x1024xf32>
    %44 = vector.broadcast %43 : vector<1x1024xf32> to vector<8x1024xf32>
    %45 = arith.mulf %42, %44 : vector<8x1024xf32>
    %46 = arith.addf %41, %45 : vector<8x1024xf32>
    %c1_32 = arith.constant 1 : index
    %c256_33 = arith.constant 256 : index
    %47 = vector.load %arg5[%c1_32, %c256_33] : memref<12x1536xf32, #tpu.memory_space<vmem>>, vector<8x1024xf32>
    %c7 = arith.constant 7 : index
    %c0_34 = arith.constant 0 : index
    %48 = vector.load %arg2[%c7, %c0_34] : memref<25x1024xf32, #tpu.memory_space<vmem>>, vector<1x1024xf32>
    %49 = vector.broadcast %48 : vector<1x1024xf32> to vector<8x1024xf32>
    %50 = arith.mulf %47, %49 : vector<8x1024xf32>
    %51 = arith.addf %46, %50 : vector<8x1024xf32>
    %c1_35 = arith.constant 1 : index
    %c384_36 = arith.constant 384 : index
    %52 = vector.load %arg5[%c1_35, %c384_36] : memref<12x1536xf32, #tpu.memory_space<vmem>>, vector<8x1024xf32>
    %c8 = arith.constant 8 : index
    %c0_37 = arith.constant 0 : index
    %53 = vector.load %arg2[%c8, %c0_37] : memref<25x1024xf32, #tpu.memory_space<vmem>>, vector<1x1024xf32>
    %54 = vector.broadcast %53 : vector<1x1024xf32> to vector<8x1024xf32>
    %55 = arith.mulf %52, %54 : vector<8x1024xf32>
    %56 = arith.addf %51, %55 : vector<8x1024xf32>
    %c1_38 = arith.constant 1 : index
    %c512_39 = arith.constant 512 : index
    %57 = vector.load %arg5[%c1_38, %c512_39] : memref<12x1536xf32, #tpu.memory_space<vmem>>, vector<8x1024xf32>
    %c9 = arith.constant 9 : index
    %c0_40 = arith.constant 0 : index
    %58 = vector.load %arg2[%c9, %c0_40] : memref<25x1024xf32, #tpu.memory_space<vmem>>, vector<1x1024xf32>
    %59 = vector.broadcast %58 : vector<1x1024xf32> to vector<8x1024xf32>
    %60 = arith.mulf %57, %59 : vector<8x1024xf32>
    %61 = arith.addf %56, %60 : vector<8x1024xf32>
    %c2_41 = arith.constant 2 : index
    %c0_42 = arith.constant 0 : index
    %62 = vector.load %arg5[%c2_41, %c0_42] : memref<12x1536xf32, #tpu.memory_space<vmem>>, vector<8x1024xf32>
    %c10_43 = arith.constant 10 : index
    %c0_44 = arith.constant 0 : index
    %63 = vector.load %arg2[%c10_43, %c0_44] : memref<25x1024xf32, #tpu.memory_space<vmem>>, vector<1x1024xf32>
    %64 = vector.broadcast %63 : vector<1x1024xf32> to vector<8x1024xf32>
    %65 = arith.mulf %62, %64 : vector<8x1024xf32>
    %66 = arith.addf %61, %65 : vector<8x1024xf32>
    %c2_45 = arith.constant 2 : index
    %c128_46 = arith.constant 128 : index
    %67 = vector.load %arg5[%c2_45, %c128_46] : memref<12x1536xf32, #tpu.memory_space<vmem>>, vector<8x1024xf32>
    %c11 = arith.constant 11 : index
    %c0_47 = arith.constant 0 : index
    %68 = vector.load %arg2[%c11, %c0_47] : memref<25x1024xf32, #tpu.memory_space<vmem>>, vector<1x1024xf32>
    %69 = vector.broadcast %68 : vector<1x1024xf32> to vector<8x1024xf32>
    %70 = arith.mulf %67, %69 : vector<8x1024xf32>
    %71 = arith.addf %66, %70 : vector<8x1024xf32>
    %c2_48 = arith.constant 2 : index
    %c256_49 = arith.constant 256 : index
    %72 = vector.load %arg5[%c2_48, %c256_49] : memref<12x1536xf32, #tpu.memory_space<vmem>>, vector<8x1024xf32>
    %c12 = arith.constant 12 : index
    %c0_50 = arith.constant 0 : index
    %73 = vector.load %arg2[%c12, %c0_50] : memref<25x1024xf32, #tpu.memory_space<vmem>>, vector<1x1024xf32>
    %74 = vector.broadcast %73 : vector<1x1024xf32> to vector<8x1024xf32>
    %75 = arith.mulf %72, %74 : vector<8x1024xf32>
    %76 = arith.addf %71, %75 : vector<8x1024xf32>
    %c2_51 = arith.constant 2 : index
    %c384_52 = arith.constant 384 : index
    %77 = vector.load %arg5[%c2_51, %c384_52] : memref<12x1536xf32, #tpu.memory_space<vmem>>, vector<8x1024xf32>
    %c13 = arith.constant 13 : index
    %c0_53 = arith.constant 0 : index
    %78 = vector.load %arg2[%c13, %c0_53] : memref<25x1024xf32, #tpu.memory_space<vmem>>, vector<1x1024xf32>
    %79 = vector.broadcast %78 : vector<1x1024xf32> to vector<8x1024xf32>
    %80 = arith.mulf %77, %79 : vector<8x1024xf32>
    %81 = arith.addf %76, %80 : vector<8x1024xf32>
    %c2_54 = arith.constant 2 : index
    %c512_55 = arith.constant 512 : index
    %82 = vector.load %arg5[%c2_54, %c512_55] : memref<12x1536xf32, #tpu.memory_space<vmem>>, vector<8x1024xf32>
    %c14 = arith.constant 14 : index
    %c0_56 = arith.constant 0 : index
    %83 = vector.load %arg2[%c14, %c0_56] : memref<25x1024xf32, #tpu.memory_space<vmem>>, vector<1x1024xf32>
    %84 = vector.broadcast %83 : vector<1x1024xf32> to vector<8x1024xf32>
    %85 = arith.mulf %82, %84 : vector<8x1024xf32>
    %86 = arith.addf %81, %85 : vector<8x1024xf32>
    %c3_57 = arith.constant 3 : index
    %c0_58 = arith.constant 0 : index
    %87 = vector.load %arg5[%c3_57, %c0_58] : memref<12x1536xf32, #tpu.memory_space<vmem>>, vector<8x1024xf32>
    %c15 = arith.constant 15 : index
    %c0_59 = arith.constant 0 : index
    %88 = vector.load %arg2[%c15, %c0_59] : memref<25x1024xf32, #tpu.memory_space<vmem>>, vector<1x1024xf32>
    %89 = vector.broadcast %88 : vector<1x1024xf32> to vector<8x1024xf32>
    %90 = arith.mulf %87, %89 : vector<8x1024xf32>
    %91 = arith.addf %86, %90 : vector<8x1024xf32>
    %c3_60 = arith.constant 3 : index
    %c128_61 = arith.constant 128 : index
    %92 = vector.load %arg5[%c3_60, %c128_61] : memref<12x1536xf32, #tpu.memory_space<vmem>>, vector<8x1024xf32>
    %c16 = arith.constant 16 : index
    %c0_62 = arith.constant 0 : index
    %93 = vector.load %arg2[%c16, %c0_62] : memref<25x1024xf32, #tpu.memory_space<vmem>>, vector<1x1024xf32>
    %94 = vector.broadcast %93 : vector<1x1024xf32> to vector<8x1024xf32>
    %95 = arith.mulf %92, %94 : vector<8x1024xf32>
    %96 = arith.addf %91, %95 : vector<8x1024xf32>
    %c3_63 = arith.constant 3 : index
    %c256_64 = arith.constant 256 : index
    %97 = vector.load %arg5[%c3_63, %c256_64] : memref<12x1536xf32, #tpu.memory_space<vmem>>, vector<8x1024xf32>
    %c17 = arith.constant 17 : index
    %c0_65 = arith.constant 0 : index
    %98 = vector.load %arg2[%c17, %c0_65] : memref<25x1024xf32, #tpu.memory_space<vmem>>, vector<1x1024xf32>
    %99 = vector.broadcast %98 : vector<1x1024xf32> to vector<8x1024xf32>
    %100 = arith.mulf %97, %99 : vector<8x1024xf32>
    %101 = arith.addf %96, %100 : vector<8x1024xf32>
    %c3_66 = arith.constant 3 : index
    %c384_67 = arith.constant 384 : index
    %102 = vector.load %arg5[%c3_66, %c384_67] : memref<12x1536xf32, #tpu.memory_space<vmem>>, vector<8x1024xf32>
    %c18 = arith.constant 18 : index
    %c0_68 = arith.constant 0 : index
    %103 = vector.load %arg2[%c18, %c0_68] : memref<25x1024xf32, #tpu.memory_space<vmem>>, vector<1x1024xf32>
    %104 = vector.broadcast %103 : vector<1x1024xf32> to vector<8x1024xf32>
    %105 = arith.mulf %102, %104 : vector<8x1024xf32>
    %106 = arith.addf %101, %105 : vector<8x1024xf32>
    %c3_69 = arith.constant 3 : index
    %c512_70 = arith.constant 512 : index
    %107 = vector.load %arg5[%c3_69, %c512_70] : memref<12x1536xf32, #tpu.memory_space<vmem>>, vector<8x1024xf32>
    %c19 = arith.constant 19 : index
    %c0_71 = arith.constant 0 : index
    %108 = vector.load %arg2[%c19, %c0_71] : memref<25x1024xf32, #tpu.memory_space<vmem>>, vector<1x1024xf32>
    %109 = vector.broadcast %108 : vector<1x1024xf32> to vector<8x1024xf32>
    %110 = arith.mulf %107, %109 : vector<8x1024xf32>
    %111 = arith.addf %106, %110 : vector<8x1024xf32>
    %c4_72 = arith.constant 4 : index
    %c0_73 = arith.constant 0 : index
    %112 = vector.load %arg5[%c4_72, %c0_73] : memref<12x1536xf32, #tpu.memory_space<vmem>>, vector<8x1024xf32>
    %c20 = arith.constant 20 : index
    %c0_74 = arith.constant 0 : index
    %113 = vector.load %arg2[%c20, %c0_74] : memref<25x1024xf32, #tpu.memory_space<vmem>>, vector<1x1024xf32>
    %114 = vector.broadcast %113 : vector<1x1024xf32> to vector<8x1024xf32>
    %115 = arith.mulf %112, %114 : vector<8x1024xf32>
    %116 = arith.addf %111, %115 : vector<8x1024xf32>
    %c4_75 = arith.constant 4 : index
    %c128_76 = arith.constant 128 : index
    %117 = vector.load %arg5[%c4_75, %c128_76] : memref<12x1536xf32, #tpu.memory_space<vmem>>, vector<8x1024xf32>
    %c21 = arith.constant 21 : index
    %c0_77 = arith.constant 0 : index
    %118 = vector.load %arg2[%c21, %c0_77] : memref<25x1024xf32, #tpu.memory_space<vmem>>, vector<1x1024xf32>
    %119 = vector.broadcast %118 : vector<1x1024xf32> to vector<8x1024xf32>
    %120 = arith.mulf %117, %119 : vector<8x1024xf32>
    %121 = arith.addf %116, %120 : vector<8x1024xf32>
    %c4_78 = arith.constant 4 : index
    %c256_79 = arith.constant 256 : index
    %122 = vector.load %arg5[%c4_78, %c256_79] : memref<12x1536xf32, #tpu.memory_space<vmem>>, vector<8x1024xf32>
    %c22 = arith.constant 22 : index
    %c0_80 = arith.constant 0 : index
    %123 = vector.load %arg2[%c22, %c0_80] : memref<25x1024xf32, #tpu.memory_space<vmem>>, vector<1x1024xf32>
    %124 = vector.broadcast %123 : vector<1x1024xf32> to vector<8x1024xf32>
    %125 = arith.mulf %122, %124 : vector<8x1024xf32>
    %126 = arith.addf %121, %125 : vector<8x1024xf32>
    %c4_81 = arith.constant 4 : index
    %c384_82 = arith.constant 384 : index
    %127 = vector.load %arg5[%c4_81, %c384_82] : memref<12x1536xf32, #tpu.memory_space<vmem>>, vector<8x1024xf32>
    %c23 = arith.constant 23 : index
    %c0_83 = arith.constant 0 : index
    %128 = vector.load %arg2[%c23, %c0_83] : memref<25x1024xf32, #tpu.memory_space<vmem>>, vector<1x1024xf32>
    %129 = vector.broadcast %128 : vector<1x1024xf32> to vector<8x1024xf32>
    %130 = arith.mulf %127, %129 : vector<8x1024xf32>
    %131 = arith.addf %126, %130 : vector<8x1024xf32>
    %c4_84 = arith.constant 4 : index
    %c512_85 = arith.constant 512 : index
    %132 = vector.load %arg5[%c4_84, %c512_85] : memref<12x1536xf32, #tpu.memory_space<vmem>>, vector<8x1024xf32>
    %c24 = arith.constant 24 : index
    %c0_86 = arith.constant 0 : index
    %133 = vector.load %arg2[%c24, %c0_86] : memref<25x1024xf32, #tpu.memory_space<vmem>>, vector<1x1024xf32>
    %134 = vector.broadcast %133 : vector<1x1024xf32> to vector<8x1024xf32>
    %135 = arith.mulf %132, %134 : vector<8x1024xf32>
    %136 = arith.addf %131, %135 : vector<8x1024xf32>
    %c0_87 = arith.constant 0 : index
    %c0_88 = arith.constant 0 : index
    %137 = vector.load %arg3[%c0_87, %c0_88] : memref<1x1024xf32, #tpu.memory_space<vmem>>, vector<1x1024xf32>
    %138 = vector.broadcast %137 : vector<1x1024xf32> to vector<8x1024xf32>
    %139 = arith.addf %136, %138 : vector<8x1024xf32>
    %c0_89 = arith.constant 0 : index
    %c0_90 = arith.constant 0 : index
    %c0_91 = arith.constant 0 : index
    %140 = vector.load %arg4[%c0_89, %c0_90, %c0_91] : memref<1x8x1024xf32, #tpu.memory_space<vmem>>, vector<1x8x1024xf32>
    %141 = vector.shape_cast %140 : vector<1x8x1024xf32> to vector<8x1024xf32>
    %142 = vector.shape_cast %139 : vector<8x1024xf32> to vector<1x8x1024xf32>
    tpu.vector_store %arg4[%c0_89, %c0_90, %c0_91], %142 {strides = array<i32>} : memref<1x8x1024xf32, #tpu.memory_space<vmem>>, vector<1x8x1024xf32>,
    return
  }
  func.func @transform_0(%arg0: i32) -> (i32, i32, i32) {
    %c0_i32 = arith.constant 0 : i32
    %c0_i32_0 = arith.constant 0 : i32
    %c0_i32_1 = arith.constant 0 : i32
    return %arg0, %c0_i32, %c0_i32_0 : i32, i32, i32
  }
  func.func @transform_1(%arg0: i32) -> (i32, i32) {
    %c0_i32 = arith.constant 0 : i32
    %c0_i32_0 = arith.constant 0 : i32
    %c0_i32_1 = arith.constant 0 : i32
    return %c0_i32, %c0_i32_0 : i32, i32
  }
  func.func @transform_2(%arg0: i32) -> (i32, i32) {
    %c0_i32 = arith.constant 0 : i32
    %c0_i32_0 = arith.constant 0 : i32
    %c0_i32_1 = arith.constant 0 : i32
    return %c0_i32, %c0_i32_0 : i32, i32
  }
  func.func @transform_3(%arg0: i32) -> (i32, i32, i32) {
    %c0_i32 = arith.constant 0 : i32
    %c0_i32_0 = arith.constant 0 : i32
    %c0_i32_1 = arith.constant 0 : i32
    return %arg0, %c0_i32, %c0_i32_0 : i32, i32, i32
  }
}

module attributes {stable_mosaic.version = 11 : i64} {
  func.func @_attn_proj_single_kernel(%arg0: i32, %arg1: i32, %arg2: memref<1x64x128xf32, #tpu.memory_space<vmem>>, %arg3: memref<1x64x128xf32, #tpu.memory_space<vmem>>, %arg4: memref<1x64x128xf32, #tpu.memory_space<vmem>>, %arg5: memref<1x64x128xf32, #tpu.memory_space<vmem>>, %arg6: memref<128x128xf32, #tpu.memory_space<vmem>>, %arg7: memref<1x128xf32, #tpu.memory_space<vmem>>, %arg8: memref<1x64x128xf32, #tpu.memory_space<vmem>>) attributes {dimension_semantics = [#tpu.dimension_semantics<parallel>, #tpu.dimension_semantics<parallel>], iteration_bounds = array<i64: 2, 1>, scalar_prefetch = 0 : i64, scratch_operands = 0 : i64, tpu.core_type = #tpu.core_type<tc>, window_params = [{transform_indices = @transform_0, window_bounds = array<i64: 1, 64, 128>}, {transform_indices = @transform_1, window_bounds = array<i64: 1, 64, 128>}, {transform_indices = @transform_2, window_bounds = array<i64: 1, 64, 128>}, {transform_indices = @transform_3, window_bounds = array<i64: 1, 64, 128>}, {pipeline_mode = #tpu.pipeline_mode<synchronous>, transform_indices = @transform_4, window_bounds = array<i64: 128, 128>}, {pipeline_mode = #tpu.pipeline_mode<synchronous>, transform_indices = @transform_5, window_bounds = array<i64: 1, 128>}, {transform_indices = @transform_6, window_bounds = array<i64: 1, 64, 128>}]} {
    %c0 = arith.constant 0 : index
    %c0_0 = arith.constant 0 : index
    %c0_1 = arith.constant 0 : index
    %0 = vector.load %arg2[%c0, %c0_0, %c0_1] : memref<1x64x128xf32, #tpu.memory_space<vmem>>, vector<1x64x128xf32>
    %1 = vector.shape_cast %0 : vector<1x64x128xf32> to vector<64x128xf32>
    %cst = arith.constant 0.360673755 : f32
    %2 = vector.broadcast %cst : f32 to vector<64x128xf32>
    %3 = arith.mulf %1, %2 : vector<64x128xf32>
    %c0_2 = arith.constant 0 : index
    %c0_3 = arith.constant 0 : index
    %c0_4 = arith.constant 0 : index
    %4 = vector.load %arg3[%c0_2, %c0_3, %c0_4] : memref<1x64x128xf32, #tpu.memory_space<vmem>>, vector<1x64x128xf32>
    %5 = vector.shape_cast %4 : vector<1x64x128xf32> to vector<64x128xf32>
    %c0_5 = arith.constant 0 : index
    %c0_6 = arith.constant 0 : index
    %c0_7 = arith.constant 0 : index
    %6 = vector.load %arg4[%c0_5, %c0_6, %c0_7] : memref<1x64x128xf32, #tpu.memory_space<vmem>>, vector<1x64x128xf32>
    %7 = vector.shape_cast %6 : vector<1x64x128xf32> to vector<64x128xf32>
    %c0_8 = arith.constant 0 : index
    %c0_9 = arith.constant 0 : index
    %c0_10 = arith.constant 0 : index
    %8 = vector.load %arg5[%c0_8, %c0_9, %c0_10] : memref<1x64x128xf32, #tpu.memory_space<vmem>>, vector<1x64x128xf32>
    %9 = vector.shape_cast %8 : vector<1x64x128xf32> to vector<64x128xf32>
    %10 = vector.extract_strided_slice %3 {offsets = [0, 0], sizes = [64, 16], strides = [1, 1]} : vector<64x128xf32> to vector<64x16xf32>
    %11 = vector.extract_strided_slice %5 {offsets = [0, 0], sizes = [64, 16], strides = [1, 1]} : vector<64x128xf32> to vector<64x16xf32>
    %cst_11 = arith.constant dense<0.000000e+00> : vector<64x64xf32>
    %12 = tpu.matmul %10, %11, %cst_11 {dimension_numbers = #tpu.dot_dimension_numbers<[1], [1], [0], [0], [0, 0, 1, 0], [], []>} : vector<64x16xf32>, vector<64x16xf32>, vector<64x64xf32> -> vector<64x64xf32>
    %cst_12 = arith.constant dense<0xFF800000> : vector<64xf32>
    %13 = vector.multi_reduction <maximumf>, %12, %cst_12 [1] : vector<64x64xf32> to vector<64xf32>
    %14 = vector.shape_cast %13 : vector<64xf32> to vector<64x1xf32>
    %15 = vector.broadcast %14 : vector<64x1xf32> to vector<64x64xf32>
    %16 = arith.subf %12, %15 : vector<64x64xf32>
    %17 = math.exp2 %16 : vector<64x64xf32>
    %cst_13 = arith.constant dense<0.000000e+00> : vector<64xf32>
    %18 = vector.multi_reduction <add>, %17, %cst_13 [1] : vector<64x64xf32> to vector<64xf32>
    %19 = vector.shape_cast %18 : vector<64xf32> to vector<64x1xf32>
    %20 = vector.extract_strided_slice %7 {offsets = [0, 0], sizes = [64, 16], strides = [1, 1]} : vector<64x128xf32> to vector<64x16xf32>
    %cst_14 = arith.constant dense<0.000000e+00> : vector<64x16xf32>
    %21 = tpu.matmul %17, %20, %cst_14 {dimension_numbers = #tpu.dot_dimension_numbers<[1], [0], [0], [1], [0, 0, 1, 1], [], []>} : vector<64x64xf32>, vector<64x16xf32>, vector<64x16xf32> -> vector<64x16xf32>
    %22 = tpu.reciprocal %19 : vector<64x1xf32> -> vector<64x1xf32>
    %23 = vector.broadcast %22 : vector<64x1xf32> to vector<64x16xf32>
    %24 = arith.mulf %21, %23 : vector<64x16xf32>
    %25 = vector.extract_strided_slice %9 {offsets = [0, 0], sizes = [64, 16], strides = [1, 1]} : vector<64x128xf32> to vector<64x16xf32>
    %26 = arith.addf %24, %25 : vector<64x16xf32>
    %27 = vector.extract_strided_slice %3 {offsets = [0, 16], sizes = [64, 16], strides = [1, 1]} : vector<64x128xf32> to vector<64x16xf32>
    %28 = vector.extract_strided_slice %5 {offsets = [0, 16], sizes = [64, 16], strides = [1, 1]} : vector<64x128xf32> to vector<64x16xf32>
    %cst_15 = arith.constant dense<0.000000e+00> : vector<64x64xf32>
    %29 = tpu.matmul %27, %28, %cst_15 {dimension_numbers = #tpu.dot_dimension_numbers<[1], [1], [0], [0], [0, 0, 1, 0], [], []>} : vector<64x16xf32>, vector<64x16xf32>, vector<64x64xf32> -> vector<64x64xf32>
    %cst_16 = arith.constant dense<0xFF800000> : vector<64xf32>
    %30 = vector.multi_reduction <maximumf>, %29, %cst_16 [1] : vector<64x64xf32> to vector<64xf32>
    %31 = vector.shape_cast %30 : vector<64xf32> to vector<64x1xf32>
    %32 = vector.broadcast %31 : vector<64x1xf32> to vector<64x64xf32>
    %33 = arith.subf %29, %32 : vector<64x64xf32>
    %34 = math.exp2 %33 : vector<64x64xf32>
    %cst_17 = arith.constant dense<0.000000e+00> : vector<64xf32>
    %35 = vector.multi_reduction <add>, %34, %cst_17 [1] : vector<64x64xf32> to vector<64xf32>
    %36 = vector.shape_cast %35 : vector<64xf32> to vector<64x1xf32>
    %37 = vector.extract_strided_slice %7 {offsets = [0, 16], sizes = [64, 16], strides = [1, 1]} : vector<64x128xf32> to vector<64x16xf32>
    %cst_18 = arith.constant dense<0.000000e+00> : vector<64x16xf32>
    %38 = tpu.matmul %34, %37, %cst_18 {dimension_numbers = #tpu.dot_dimension_numbers<[1], [0], [0], [1], [0, 0, 1, 1], [], []>} : vector<64x64xf32>, vector<64x16xf32>, vector<64x16xf32> -> vector<64x16xf32>
    %39 = tpu.reciprocal %36 : vector<64x1xf32> -> vector<64x1xf32>
    %40 = vector.broadcast %39 : vector<64x1xf32> to vector<64x16xf32>
    %41 = arith.mulf %38, %40 : vector<64x16xf32>
    %42 = vector.extract_strided_slice %9 {offsets = [0, 16], sizes = [64, 16], strides = [1, 1]} : vector<64x128xf32> to vector<64x16xf32>
    %43 = arith.addf %41, %42 : vector<64x16xf32>
    %44 = vector.extract_strided_slice %3 {offsets = [0, 32], sizes = [64, 16], strides = [1, 1]} : vector<64x128xf32> to vector<64x16xf32>
    %45 = vector.extract_strided_slice %5 {offsets = [0, 32], sizes = [64, 16], strides = [1, 1]} : vector<64x128xf32> to vector<64x16xf32>
    %cst_19 = arith.constant dense<0.000000e+00> : vector<64x64xf32>
    %46 = tpu.matmul %44, %45, %cst_19 {dimension_numbers = #tpu.dot_dimension_numbers<[1], [1], [0], [0], [0, 0, 1, 0], [], []>} : vector<64x16xf32>, vector<64x16xf32>, vector<64x64xf32> -> vector<64x64xf32>
    %cst_20 = arith.constant dense<0xFF800000> : vector<64xf32>
    %47 = vector.multi_reduction <maximumf>, %46, %cst_20 [1] : vector<64x64xf32> to vector<64xf32>
    %48 = vector.shape_cast %47 : vector<64xf32> to vector<64x1xf32>
    %49 = vector.broadcast %48 : vector<64x1xf32> to vector<64x64xf32>
    %50 = arith.subf %46, %49 : vector<64x64xf32>
    %51 = math.exp2 %50 : vector<64x64xf32>
    %cst_21 = arith.constant dense<0.000000e+00> : vector<64xf32>
    %52 = vector.multi_reduction <add>, %51, %cst_21 [1] : vector<64x64xf32> to vector<64xf32>
    %53 = vector.shape_cast %52 : vector<64xf32> to vector<64x1xf32>
    %54 = vector.extract_strided_slice %7 {offsets = [0, 32], sizes = [64, 16], strides = [1, 1]} : vector<64x128xf32> to vector<64x16xf32>
    %cst_22 = arith.constant dense<0.000000e+00> : vector<64x16xf32>
    %55 = tpu.matmul %51, %54, %cst_22 {dimension_numbers = #tpu.dot_dimension_numbers<[1], [0], [0], [1], [0, 0, 1, 1], [], []>} : vector<64x64xf32>, vector<64x16xf32>, vector<64x16xf32> -> vector<64x16xf32>
    %56 = tpu.reciprocal %53 : vector<64x1xf32> -> vector<64x1xf32>
    %57 = vector.broadcast %56 : vector<64x1xf32> to vector<64x16xf32>
    %58 = arith.mulf %55, %57 : vector<64x16xf32>
    %59 = vector.extract_strided_slice %9 {offsets = [0, 32], sizes = [64, 16], strides = [1, 1]} : vector<64x128xf32> to vector<64x16xf32>
    %60 = arith.addf %58, %59 : vector<64x16xf32>
    %61 = vector.extract_strided_slice %3 {offsets = [0, 48], sizes = [64, 16], strides = [1, 1]} : vector<64x128xf32> to vector<64x16xf32>
    %62 = vector.extract_strided_slice %5 {offsets = [0, 48], sizes = [64, 16], strides = [1, 1]} : vector<64x128xf32> to vector<64x16xf32>
    %cst_23 = arith.constant dense<0.000000e+00> : vector<64x64xf32>
    %63 = tpu.matmul %61, %62, %cst_23 {dimension_numbers = #tpu.dot_dimension_numbers<[1], [1], [0], [0], [0, 0, 1, 0], [], []>} : vector<64x16xf32>, vector<64x16xf32>, vector<64x64xf32> -> vector<64x64xf32>
    %cst_24 = arith.constant dense<0xFF800000> : vector<64xf32>
    %64 = vector.multi_reduction <maximumf>, %63, %cst_24 [1] : vector<64x64xf32> to vector<64xf32>
    %65 = vector.shape_cast %64 : vector<64xf32> to vector<64x1xf32>
    %66 = vector.broadcast %65 : vector<64x1xf32> to vector<64x64xf32>
    %67 = arith.subf %63, %66 : vector<64x64xf32>
    %68 = math.exp2 %67 : vector<64x64xf32>
    %cst_25 = arith.constant dense<0.000000e+00> : vector<64xf32>
    %69 = vector.multi_reduction <add>, %68, %cst_25 [1] : vector<64x64xf32> to vector<64xf32>
    %70 = vector.shape_cast %69 : vector<64xf32> to vector<64x1xf32>
    %71 = vector.extract_strided_slice %7 {offsets = [0, 48], sizes = [64, 16], strides = [1, 1]} : vector<64x128xf32> to vector<64x16xf32>
    %cst_26 = arith.constant dense<0.000000e+00> : vector<64x16xf32>
    %72 = tpu.matmul %68, %71, %cst_26 {dimension_numbers = #tpu.dot_dimension_numbers<[1], [0], [0], [1], [0, 0, 1, 1], [], []>} : vector<64x64xf32>, vector<64x16xf32>, vector<64x16xf32> -> vector<64x16xf32>
    %73 = tpu.reciprocal %70 : vector<64x1xf32> -> vector<64x1xf32>
    %74 = vector.broadcast %73 : vector<64x1xf32> to vector<64x16xf32>
    %75 = arith.mulf %72, %74 : vector<64x16xf32>
    %76 = vector.extract_strided_slice %9 {offsets = [0, 48], sizes = [64, 16], strides = [1, 1]} : vector<64x128xf32> to vector<64x16xf32>
    %77 = arith.addf %75, %76 : vector<64x16xf32>
    %78 = vector.extract_strided_slice %3 {offsets = [0, 64], sizes = [64, 16], strides = [1, 1]} : vector<64x128xf32> to vector<64x16xf32>
    %79 = vector.extract_strided_slice %5 {offsets = [0, 64], sizes = [64, 16], strides = [1, 1]} : vector<64x128xf32> to vector<64x16xf32>
    %cst_27 = arith.constant dense<0.000000e+00> : vector<64x64xf32>
    %80 = tpu.matmul %78, %79, %cst_27 {dimension_numbers = #tpu.dot_dimension_numbers<[1], [1], [0], [0], [0, 0, 1, 0], [], []>} : vector<64x16xf32>, vector<64x16xf32>, vector<64x64xf32> -> vector<64x64xf32>
    %cst_28 = arith.constant dense<0xFF800000> : vector<64xf32>
    %81 = vector.multi_reduction <maximumf>, %80, %cst_28 [1] : vector<64x64xf32> to vector<64xf32>
    %82 = vector.shape_cast %81 : vector<64xf32> to vector<64x1xf32>
    %83 = vector.broadcast %82 : vector<64x1xf32> to vector<64x64xf32>
    %84 = arith.subf %80, %83 : vector<64x64xf32>
    %85 = math.exp2 %84 : vector<64x64xf32>
    %cst_29 = arith.constant dense<0.000000e+00> : vector<64xf32>
    %86 = vector.multi_reduction <add>, %85, %cst_29 [1] : vector<64x64xf32> to vector<64xf32>
    %87 = vector.shape_cast %86 : vector<64xf32> to vector<64x1xf32>
    %88 = vector.extract_strided_slice %7 {offsets = [0, 64], sizes = [64, 16], strides = [1, 1]} : vector<64x128xf32> to vector<64x16xf32>
    %cst_30 = arith.constant dense<0.000000e+00> : vector<64x16xf32>
    %89 = tpu.matmul %85, %88, %cst_30 {dimension_numbers = #tpu.dot_dimension_numbers<[1], [0], [0], [1], [0, 0, 1, 1], [], []>} : vector<64x64xf32>, vector<64x16xf32>, vector<64x16xf32> -> vector<64x16xf32>
    %90 = tpu.reciprocal %87 : vector<64x1xf32> -> vector<64x1xf32>
    %91 = vector.broadcast %90 : vector<64x1xf32> to vector<64x16xf32>
    %92 = arith.mulf %89, %91 : vector<64x16xf32>
    %93 = vector.extract_strided_slice %9 {offsets = [0, 64], sizes = [64, 16], strides = [1, 1]} : vector<64x128xf32> to vector<64x16xf32>
    %94 = arith.addf %92, %93 : vector<64x16xf32>
    %95 = vector.extract_strided_slice %3 {offsets = [0, 80], sizes = [64, 16], strides = [1, 1]} : vector<64x128xf32> to vector<64x16xf32>
    %96 = vector.extract_strided_slice %5 {offsets = [0, 80], sizes = [64, 16], strides = [1, 1]} : vector<64x128xf32> to vector<64x16xf32>
    %cst_31 = arith.constant dense<0.000000e+00> : vector<64x64xf32>
    %97 = tpu.matmul %95, %96, %cst_31 {dimension_numbers = #tpu.dot_dimension_numbers<[1], [1], [0], [0], [0, 0, 1, 0], [], []>} : vector<64x16xf32>, vector<64x16xf32>, vector<64x64xf32> -> vector<64x64xf32>
    %cst_32 = arith.constant dense<0xFF800000> : vector<64xf32>
    %98 = vector.multi_reduction <maximumf>, %97, %cst_32 [1] : vector<64x64xf32> to vector<64xf32>
    %99 = vector.shape_cast %98 : vector<64xf32> to vector<64x1xf32>
    %100 = vector.broadcast %99 : vector<64x1xf32> to vector<64x64xf32>
    %101 = arith.subf %97, %100 : vector<64x64xf32>
    %102 = math.exp2 %101 : vector<64x64xf32>
    %cst_33 = arith.constant dense<0.000000e+00> : vector<64xf32>
    %103 = vector.multi_reduction <add>, %102, %cst_33 [1] : vector<64x64xf32> to vector<64xf32>
    %104 = vector.shape_cast %103 : vector<64xf32> to vector<64x1xf32>
    %105 = vector.extract_strided_slice %7 {offsets = [0, 80], sizes = [64, 16], strides = [1, 1]} : vector<64x128xf32> to vector<64x16xf32>
    %cst_34 = arith.constant dense<0.000000e+00> : vector<64x16xf32>
    %106 = tpu.matmul %102, %105, %cst_34 {dimension_numbers = #tpu.dot_dimension_numbers<[1], [0], [0], [1], [0, 0, 1, 1], [], []>} : vector<64x64xf32>, vector<64x16xf32>, vector<64x16xf32> -> vector<64x16xf32>
    %107 = tpu.reciprocal %104 : vector<64x1xf32> -> vector<64x1xf32>
    %108 = vector.broadcast %107 : vector<64x1xf32> to vector<64x16xf32>
    %109 = arith.mulf %106, %108 : vector<64x16xf32>
    %110 = vector.extract_strided_slice %9 {offsets = [0, 80], sizes = [64, 16], strides = [1, 1]} : vector<64x128xf32> to vector<64x16xf32>
    %111 = arith.addf %109, %110 : vector<64x16xf32>
    %112 = vector.extract_strided_slice %3 {offsets = [0, 96], sizes = [64, 16], strides = [1, 1]} : vector<64x128xf32> to vector<64x16xf32>
    %113 = vector.extract_strided_slice %5 {offsets = [0, 96], sizes = [64, 16], strides = [1, 1]} : vector<64x128xf32> to vector<64x16xf32>
    %cst_35 = arith.constant dense<0.000000e+00> : vector<64x64xf32>
    %114 = tpu.matmul %112, %113, %cst_35 {dimension_numbers = #tpu.dot_dimension_numbers<[1], [1], [0], [0], [0, 0, 1, 0], [], []>} : vector<64x16xf32>, vector<64x16xf32>, vector<64x64xf32> -> vector<64x64xf32>
    %cst_36 = arith.constant dense<0xFF800000> : vector<64xf32>
    %115 = vector.multi_reduction <maximumf>, %114, %cst_36 [1] : vector<64x64xf32> to vector<64xf32>
    %116 = vector.shape_cast %115 : vector<64xf32> to vector<64x1xf32>
    %117 = vector.broadcast %116 : vector<64x1xf32> to vector<64x64xf32>
    %118 = arith.subf %114, %117 : vector<64x64xf32>
    %119 = math.exp2 %118 : vector<64x64xf32>
    %cst_37 = arith.constant dense<0.000000e+00> : vector<64xf32>
    %120 = vector.multi_reduction <add>, %119, %cst_37 [1] : vector<64x64xf32> to vector<64xf32>
    %121 = vector.shape_cast %120 : vector<64xf32> to vector<64x1xf32>
    %122 = vector.extract_strided_slice %7 {offsets = [0, 96], sizes = [64, 16], strides = [1, 1]} : vector<64x128xf32> to vector<64x16xf32>
    %cst_38 = arith.constant dense<0.000000e+00> : vector<64x16xf32>
    %123 = tpu.matmul %119, %122, %cst_38 {dimension_numbers = #tpu.dot_dimension_numbers<[1], [0], [0], [1], [0, 0, 1, 1], [], []>} : vector<64x64xf32>, vector<64x16xf32>, vector<64x16xf32> -> vector<64x16xf32>
    %124 = tpu.reciprocal %121 : vector<64x1xf32> -> vector<64x1xf32>
    %125 = vector.broadcast %124 : vector<64x1xf32> to vector<64x16xf32>
    %126 = arith.mulf %123, %125 : vector<64x16xf32>
    %127 = vector.extract_strided_slice %9 {offsets = [0, 96], sizes = [64, 16], strides = [1, 1]} : vector<64x128xf32> to vector<64x16xf32>
    %128 = arith.addf %126, %127 : vector<64x16xf32>
    %129 = vector.extract_strided_slice %3 {offsets = [0, 112], sizes = [64, 16], strides = [1, 1]} : vector<64x128xf32> to vector<64x16xf32>
    %130 = vector.extract_strided_slice %5 {offsets = [0, 112], sizes = [64, 16], strides = [1, 1]} : vector<64x128xf32> to vector<64x16xf32>
    %cst_39 = arith.constant dense<0.000000e+00> : vector<64x64xf32>
    %131 = tpu.matmul %129, %130, %cst_39 {dimension_numbers = #tpu.dot_dimension_numbers<[1], [1], [0], [0], [0, 0, 1, 0], [], []>} : vector<64x16xf32>, vector<64x16xf32>, vector<64x64xf32> -> vector<64x64xf32>
    %cst_40 = arith.constant dense<0xFF800000> : vector<64xf32>
    %132 = vector.multi_reduction <maximumf>, %131, %cst_40 [1] : vector<64x64xf32> to vector<64xf32>
    %133 = vector.shape_cast %132 : vector<64xf32> to vector<64x1xf32>
    %134 = vector.broadcast %133 : vector<64x1xf32> to vector<64x64xf32>
    %135 = arith.subf %131, %134 : vector<64x64xf32>
    %136 = math.exp2 %135 : vector<64x64xf32>
    %cst_41 = arith.constant dense<0.000000e+00> : vector<64xf32>
    %137 = vector.multi_reduction <add>, %136, %cst_41 [1] : vector<64x64xf32> to vector<64xf32>
    %138 = vector.shape_cast %137 : vector<64xf32> to vector<64x1xf32>
    %139 = vector.extract_strided_slice %7 {offsets = [0, 112], sizes = [64, 16], strides = [1, 1]} : vector<64x128xf32> to vector<64x16xf32>
    %cst_42 = arith.constant dense<0.000000e+00> : vector<64x16xf32>
    %140 = tpu.matmul %136, %139, %cst_42 {dimension_numbers = #tpu.dot_dimension_numbers<[1], [0], [0], [1], [0, 0, 1, 1], [], []>} : vector<64x64xf32>, vector<64x16xf32>, vector<64x16xf32> -> vector<64x16xf32>
    %141 = tpu.reciprocal %138 : vector<64x1xf32> -> vector<64x1xf32>
    %142 = vector.broadcast %141 : vector<64x1xf32> to vector<64x16xf32>
    %143 = arith.mulf %140, %142 : vector<64x16xf32>
    %144 = vector.extract_strided_slice %9 {offsets = [0, 112], sizes = [64, 16], strides = [1, 1]} : vector<64x128xf32> to vector<64x16xf32>
    %145 = arith.addf %143, %144 : vector<64x16xf32>
    %146 = tpu.concatenate %26, %43, %60, %77, %94, %111, %128, %145 in 1 : vector<64x16xf32>, vector<64x16xf32>, vector<64x16xf32>, vector<64x16xf32>, vector<64x16xf32>, vector<64x16xf32>, vector<64x16xf32>, vector<64x16xf32> -> vector<64x128xf32>
    %c0_43 = arith.constant 0 : index
    %c0_44 = arith.constant 0 : index
    %147 = vector.load %arg6[%c0_43, %c0_44] : memref<128x128xf32, #tpu.memory_space<vmem>>, vector<128x128xf32>
    %cst_45 = arith.constant dense<0.000000e+00> : vector<64x128xf32>
    %148 = tpu.matmul %146, %147, %cst_45 {dimension_numbers = #tpu.dot_dimension_numbers<[1], [0], [0], [1], [0, 0, 1, 1], [], []>} : vector<64x128xf32>, vector<128x128xf32>, vector<64x128xf32> -> vector<64x128xf32>
    %c0_46 = arith.constant 0 : index
    %c0_47 = arith.constant 0 : index
    %149 = vector.load %arg7[%c0_46, %c0_47] : memref<1x128xf32, #tpu.memory_space<vmem>>, vector<1x128xf32>
    %150 = vector.broadcast %149 : vector<1x128xf32> to vector<64x128xf32>
    %151 = arith.addf %148, %150 : vector<64x128xf32>
    %c0_48 = arith.constant 0 : index
    %c0_49 = arith.constant 0 : index
    %c0_50 = arith.constant 0 : index
    %152 = vector.load %arg8[%c0_48, %c0_49, %c0_50] : memref<1x64x128xf32, #tpu.memory_space<vmem>>, vector<1x64x128xf32>
    %153 = vector.shape_cast %152 : vector<1x64x128xf32> to vector<64x128xf32>
    %154 = vector.shape_cast %151 : vector<64x128xf32> to vector<1x64x128xf32>
    tpu.vector_store %arg8[%c0_48, %c0_49, %c0_50], %154 {strides = array<i32>} : memref<1x64x128xf32, #tpu.memory_space<vmem>>, vector<1x64x128xf32>,
    return
  }
  func.func @transform_0(%arg0: i32, %arg1: i32) -> (i32, i32, i32) {
    %c0_i32 = arith.constant 0 : i32
    %c0_i32_0 = arith.constant 0 : i32
    return %arg0, %arg1, %c0_i32 : i32, i32, i32
  }
  func.func @transform_1(%arg0: i32, %arg1: i32) -> (i32, i32, i32) {
    %c0_i32 = arith.constant 0 : i32
    %c1_i32 = arith.constant 1 : i32
    %c0_i32_0 = arith.constant 0 : i32
    return %arg0, %c0_i32, %c1_i32 : i32, i32, i32
  }
  func.func @transform_2(%arg0: i32, %arg1: i32) -> (i32, i32, i32) {
    %c0_i32 = arith.constant 0 : i32
    %c2_i32 = arith.constant 2 : i32
    %c0_i32_0 = arith.constant 0 : i32
    return %arg0, %c0_i32, %c2_i32 : i32, i32, i32
  }
  func.func @transform_3(%arg0: i32, %arg1: i32) -> (i32, i32, i32) {
    %c0_i32 = arith.constant 0 : i32
    %c0_i32_0 = arith.constant 0 : i32
    return %arg0, %arg1, %c0_i32 : i32, i32, i32
  }
  func.func @transform_4(%arg0: i32, %arg1: i32) -> (i32, i32) {
    %c0_i32 = arith.constant 0 : i32
    %c0_i32_0 = arith.constant 0 : i32
    %c0_i32_1 = arith.constant 0 : i32
    return %c0_i32, %c0_i32_0 : i32, i32
  }
  func.func @transform_5(%arg0: i32, %arg1: i32) -> (i32, i32) {
    %c0_i32 = arith.constant 0 : i32
    %c0_i32_0 = arith.constant 0 : i32
    %c0_i32_1 = arith.constant 0 : i32
    return %c0_i32, %c0_i32_0 : i32, i32
  }
  func.func @transform_6(%arg0: i32, %arg1: i32) -> (i32, i32, i32) {
    %c0_i32 = arith.constant 0 : i32
    %c0_i32_0 = arith.constant 0 : i32
    return %arg0, %arg1, %c0_i32 : i32, i32, i32
  }
}

</mosaic_0001>

<bundles_post_ra>
// kernel: tile.18
= control target key start
LH: loop header
LB: loop body
LE: loop exit
PB: predicated region body
PF: predicated region fallthrough
CT: control target
= control target key end

     0   :  { %s22_s0 = inlined_call_operand.vmem [shape: f32[128], index: 0, kind: input, shape index: {}]   ;;  %s23_s1 = inlined_call_operand.vmem [shape: f32[8,128], index: 1, kind: output, shape index: {}]  }
   0x1   :  { %v4_v0 = vld [vmem:[%s22_s0] ss:$0 sm:$0xff] }
   0x2   :  { %5 = vst [vmem:[%s23_s1] sm:$0xff] %v4_v0 }

// kernel: _lambda_.3
= control target key start
LH: loop header
LB: loop body
LE: loop exit
PB: predicated region body
PF: predicated region fallthrough
CT: control target
= control target key end

     0   :  { %s801_s9 = smov 0   ;;  %s803_s10 = smov 0   ;;  %s1029_s0 = inlined_call_operand.vmem [shape: f32[128,128], index: 0, kind: input, shape index: {}]   ;;  %s1030_s1 = inlined_call_operand.vmem [shape: f32[128,384], index: 1, kind: input, shape index: {}]   ;;  %s1031_s2 = inlined_call_operand.vmem [shape: f32[128,384], index: 2, kind: output, shape index: {}]  }
   0x1   :  { %s805_s11 = smov 0  }
   0x2 LB: > { %s24_s12 = sadd.s32 1, %s779_s10  ;;  %p596_p0 = scmp.ge.s32.totalorder %s783_s11, 1  ;;  %s783_s11 = sphi %s805_s11, %s12_s11   ;;  %s779_s10 = sphi %s803_s10, %s1033_s10   ;;  %s775_s9 = sphi %s801_s9, %s1032_s9  }
   0x3   : > { %p26_p1 = scmp.ge.s32.totalorder %s24_s12, 2  ;;  %p138_p2 = scmp.lt.s32.totalorder %s783_s11, 3 }
   0x5   : > { %s1035_s12 = smov (%p26_p1, %s24_s12), 0  ;;  %p139_p3 = pnand %p596_p0, %p138_p2 }
   0x6   : > { %v203_v0 = vld [vmem:[%s1030_s1 + $0x8] sm:$0xff] (!%p139_p3)  ;;  %v206_v1 = vld [vmem:[%s1030_s1 + $0x20] sm:$0xff] (!%p139_p3)  ;;  %s597_s19 = sshll.u32 (!%p139_p3), %s775_s9, 3  ;;  %v205_v4 = vld [vmem:[%s1030_s1 + $0x18] sm:$0xff] (!%p139_p3)  ;;  %v785_v7 = vmov (!%p139_p3), 0.0  }
   0x7   : > { %142 = sbr.rel (%p139_p3) target bundleno = 283 (0x11b), region = 28  ;;  %v202_v2 = vld [vmem:[%s1030_s1] sm:$0xff] (!%p139_p3)  ;;  %v671_v3 = vpack.c.bf16 (!%p139_p3), %v206_v1, %v203_v0  ;;  %v209_v5 = vld [vmem:[%s1030_s1 + $0x38] sm:$0xff] (!%p139_p3)  ;;  %v212_v6 = vld [vmem:[%s1030_s1 + $0x50] sm:$0xff] (!%p139_p3)  ;;  %314 = vmatprep.mubr.f32.mxu0 (!%p139_p3), %v785_v7  ;;  %p171_p4 = scmp.lt.s32.totalorder (!%p139_p3), %s597_s19, 15 }
   0x8   : > { %v673_v8 = vpack.c.bf16 (!%p139_p3), %v205_v4, %v202_v2  ;;  %v675_v9 = vpack.c.bf16 (!%p139_p3), %v212_v6, %v209_v5  ;;  %v208_v10 = vld [vmem:[%s1030_s1 + $0x30] sm:$0xff] (!%p139_p3)  ;;  %v211_v11 = vld [vmem:[%s1030_s1 + $0x48] sm:$0xff] (!%p139_p3)  ;;  %v218_v13 = vld [vmem:[%s1030_s1 + $0x80] sm:$0xff] (!%p139_p3) }
   0x9   : > { %v215_v12 = vld [vmem:[%s1030_s1 + $0x68] sm:$0xff] (!%p139_p3)  ;;  %672 = vmatprep.subr.bf16.mxu0 (!%p139_p3), %v671_v3  ;;  %v677_v14 = vpack.c.bf16 (!%p139_p3), %v211_v11, %v208_v10  ;;  %v214_v15 = vld [vmem:[%s1030_s1 + $0x60] sm:$0xff] (!%p139_p3)  ;;  %v217_v17 = vld [vmem:[%s1030_s1 + $0x78] sm:$0xff] (!%p139_p3) }
   0xa   : > { %674 = vmatpush1.bf16.msra.mxu0 (!%p139_p3), %v673_v8  ;;  %v679_v16 = vpack.c.bf16 (!%p139_p3), %v218_v13, %v215_v12  ;;  %v204_v18 = vld [vmem:[%s1030_s1 + $0x10] sm:$0xff] (!%p139_p3)  ;;  %v207_v19 = vld [vmem:[%s1030_s1 + $0x28] sm:$0xff] (!%p139_p3)  ;;  %v221_v20 = vld [vmem:[%s1030_s1 + $0x98] sm:$0xff] (!%p139_p3)  ;;  %v681_v25 = vpack.c.bf16 (!%p139_p3), %v217_v17, %v214_v15 }
   0xb   : > { %676 = vmatprep.subr.bf16.mxu0 (!%p139_p3), %v675_v9  ;;  %v224_v21 = vld [vmem:[%s1030_s1 + $0xb0] sm:$0xff] (!%p139_p3)  ;;  %v703_v22 = vpack.c.bf16 (!%p139_p3), %v207_v19, %v204_v18  ;;  %v210_v23 = vld [vmem:[%s1030_s1 + $0x40] sm:$0xff] (!%p139_p3)  ;;  %v213_v24 = vld [vmem:[%s1030_s1 + $0x58] sm:$0xff] (!%p139_p3) }
   0xc   : > { %v220_v26 = vld [vmem:[%s1030_s1 + $0x90] sm:$0xff] (!%p139_p3)  ;;  %v707_v27 = vpack.c.bf16 (!%p139_p3), %v213_v24, %v210_v23  ;;  %v683_v28 = vpack.c.bf16 (!%p139_p3), %v224_v21, %v221_v20  ;;  %v223_v29 = vld [vmem:[%s1030_s1 + $0xa8] sm:$0xff] (!%p139_p3)  ;;  %v230_v33 = vld [vmem:[%s1030_s1 + $0xe0] sm:$0xff] (!%p139_p3) }
   0xd   : > { %704 = vmatprep.subr.bf16.mxu1 (!%p139_p3), %v703_v22  ;;  %v216_v30 = vld [vmem:[%s1030_s1 + $0x70] sm:$0xff] (!%p139_p3)  ;;  %v219_v31 = vld [vmem:[%s1030_s1 + $0x88] sm:$0xff] (!%p139_p3)  ;;  %v222_v35 = vld [vmem:[%s1030_s1 + $0xa0] sm:$0xff] (!%p139_p3)  ;;  %v685_v37 = vpack.c.bf16 (!%p139_p3), %v223_v29, %v220_v26 }
   0xe   : > { %s1037_s19 = smov (!%p171_p4, %s597_s19), 15  ;;  %678 = vmatpush1.bf16.msra.mxu0 %v677_v14  ;;  %706 = vmatpush3.bf16.msra.mxu1 %v703_v22  ;;  %v227_v32 = vld [vmem:[%s1030_s1 + $0xc8] sm:$0xff]  ;;  %v711_v34 = vpack.c.bf16 %v219_v31, %v216_v30  ;;  %v225_v36 = vld [vmem:[%s1030_s1 + $0xb8] sm:$0xff]  ;;  %v226_v39 = vld [vmem:[%s1030_s1 + $0xc0] sm:$0xff] }
   0xf   : > { %s598_s28 = sshll.u32 %s1037_s19, 3  ;;  %680 = vmatprep.subr.bf16.mxu0 %v679_v16  ;;  %708 = vmatprep.subr.bf16.mxu1 %v707_v27  ;;  %v687_v38 = vpack.c.bf16 %v230_v33, %v227_v32  ;;  %v229_v40 = vld [vmem:[%s1030_s1 + $0xd8] sm:$0xff]  ;;  %v236_v42 = vld [vmem:[%s1030_s1 + $0x110] sm:$0xff]  ;;  %v715_v43 = vpack.c.bf16 %v225_v36, %v222_v35  ;;  %v231_v46 = vld [vmem:[%s1030_s1 + $0xe8] sm:$0xff]  ;;  %s735_s18 = smul.u32 24, %s1037_s19 }
  0x10   : > { %s907_s21 = scalar_lea.vmem %s1029_s0, %s598_s28  ;;  %v233_v41 = vld [vmem:[%s1030_s1 + $0xf8] sm:$0xff]  ;;  %v228_v45 = vld [vmem:[%s1030_s1 + $0xd0] sm:$0xff]  ;;  %v689_v47 = vpack.c.bf16 %v229_v40, %v226_v39  ;;  %v235_v50 = vld [vmem:[%s1030_s1 + $0x108] sm:$0xff] }
  0x11   : > { %v194_v44 = vld [vmem:[%s907_s21] sm:$0xff]  ;;  %v691_v48 = vpack.c.bf16 %v236_v42, %v233_v41  ;;  %v232_v49 = vld [vmem:[%s1030_s1 + $0xf0] sm:$0xff]  ;;  %v239_v51 = vld [vmem:[%s1030_s1 + $0x128] sm:$0xff]  ;;  %v719_v53 = vpack.c.bf16 %v231_v46, %v228_v45  ;;  %s994_s23 = scalar_lea.vmem %s1031_s2, %s735_s18 }
  0x12   : > { %682 = vmatpush1.bf16.msra.mxu0 %v681_v25  ;;  %710 = vmatpush3.bf16.msra.mxu1 %v707_v27  ;;  %v242_v52 = vld [vmem:[%s1030_s1 + $0x140] sm:$0xff]  ;;  %v237_v55 = vld [vmem:[%s1030_s1 + $0x118] sm:$0xff]  ;;  %v693_v56 = vpack.c.bf16 %v235_v50, %v232_v49  ;;  %v248_v61 = vld [vmem:[%s1030_s1 + $0x170] sm:$0xff] }
  0x13   : > { %684 = vmatprep.subr.bf16.mxu0 %v683_v28  ;;  %712 = vmatprep.subr.bf16.mxu1 %v711_v34  ;;  %v234_v54 = vld [vmem:[%s1030_s1 + $0x100] sm:$0xff]  ;;  %v695_v57 = vpack.c.bf16 %v242_v52, %v239_v51  ;;  %v241_v59 = vld [vmem:[%s1030_s1 + $0x138] sm:$0xff]  ;;  %v240_v63 = vld [vmem:[%s1030_s1 + $0x130] sm:$0xff] }
  0x14   : > { %659 = vmatprep.mubr.f32.mxu1 %v194_v44  ;;  %v238_v58 = vld [vmem:[%s1030_s1 + $0x120] sm:$0xff]  ;;  %v245_v60 = vld [vmem:[%s1030_s1 + $0x158] sm:$0xff]  ;;  %v723_v62 = vpack.c.bf16 %v237_v55, %v234_v54  ;;  %v243_v0 = vld [vmem:[%s1030_s1 + $0x148] sm:$0xff] }
  0x15   : > { %v697_v1 = vpack.c.bf16 %v241_v59, %v238_v58  ;;  %v699_v2 = vpack.c.bf16 %v248_v61, %v245_v60  ;;  %v244_v3 = vld [vmem:[%s1030_s1 + $0x150] sm:$0xff]  ;;  %v247_v4 = vld [vmem:[%s1030_s1 + $0x168] sm:$0xff]  ;;  %v727_v5 = vpack.c.bf16 %v243_v0, %v240_v63  ;;  %v246_v6 = vld [vmem:[%s1030_s1 + $0x160] sm:$0xff] }
  0x16   : > { %686 = vmatpush1.bf16.msra.mxu0 %v685_v37  ;;  %714 = vmatpush3.bf16.msra.mxu1 %v711_v34  ;;  %v249_v8 = vld [vmem:[%s1030_s1 + $0x178] sm:$0xff]  ;;  %v701_v9 = vpack.c.bf16 %v247_v4, %v244_v3  ;;  %v195_v11 = vld [vmem:[%s907_s21 + $0x8] sm:$0xff]  ;;  %v196_v12 = vld [vmem:[%s907_s21 + $0x10] sm:$0xff] }
  0x17   : > { %688 = vmatprep.subr.bf16.mxu0 %v687_v38  ;;  %716 = vmatprep.subr.bf16.mxu1 %v715_v43  ;;  %v731_v10 = vpack.c.bf16 %v249_v8, %v246_v6  ;;  %v197_v13 = vld [vmem:[%s907_s21 + $0x18] sm:$0xff]  ;;  %v198_v14 = vld [vmem:[%s907_s21 + $0x20] sm:$0xff]  ;;  %v199_v15 = vld [vmem:[%s907_s21 + $0x28] sm:$0xff] }
  0x18   : > { %v200_v16 = vld [vmem:[%s907_s21 + $0x30] sm:$0xff]  ;;  %v201_v17 = vld [vmem:[%s907_s21 + $0x38] sm:$0xff] }
  0x1a   : > { %690 = vmatpush1.bf16.msra.mxu0 %v689_v47  ;;  %718 = vmatpush3.bf16.msra.mxu1 %v715_v43 }
  0x1b   : > { %692 = vmatprep.subr.bf16.mxu0 %v691_v48  ;;  %720 = vmatprep.subr.bf16.mxu1 %v719_v53 }
  0x1e   : > { %694 = vmatpush1.bf16.msra.mxu0 %v693_v56  ;;  %722 = vmatpush3.bf16.msra.mxu1 %v719_v53 }
  0x1f   : > { %696 = vmatprep.subr.bf16.mxu0 %v695_v57  ;;  %724 = vmatprep.subr.bf16.mxu1 %v723_v62 }
  0x22   : > { %698 = vmatpush1.bf16.msra.mxu0 %v697_v1  ;;  %726 = vmatpush3.bf16.msra.mxu1 %v723_v62 }
  0x23   : > { %700 = vmatprep.subr.bf16.mxu0 %v699_v2  ;;  %728 = vmatprep.subr.bf16.mxu1 %v727_v5 }
  0x26   : > { %702 = vmatpush1.bf16.msra.mxu0 %v701_v9  ;;  %730 = vmatpush3.bf16.msra.mxu1 %v727_v5 }
  0x27   : > { %732 = vmatprep.subr.bf16.mxu1 %v731_v10 }
  0x29   : > { %315 = vmatmul.mubr.f32.vlgmr.msra.gmra.mrb[0].mxu0 %v194_v44 }
  0x2a   : > { %320 = vmatprep.mubr.f32.mxu0 %v785_v7  ;;  %734 = vmatpush3.bf16.msra.mxu1 %v731_v10 }
  0x2d   : > { %321 = vmatmul.mubr.f32.gmra.mrb[2].mxu0 %v195_v11  ;;  %660 = vmatmul.mubr.f32.vlgmr.msra.gmra.mrb[0].mxu1 %v195_v11 }
  0x2e   : > { %326 = vmatprep.mubr.f32.mxu0 %v785_v7  ;;  %662 = vmatprep.mubr.f32.mxu1 %v196_v12 }
  0x31   : > { %327 = vmatmul.mubr.f32.gmra.mrb[4].mxu0 %v196_v12  ;;  %663 = vmatmul.mubr.f32.gmra.mrb[2].mxu1 %v197_v13 }
  0x32   : > { %332 = vmatprep.mubr.f32.mxu0 %v785_v7  ;;  %665 = vmatprep.mubr.f32.mxu1 %v198_v14 }
  0x35   : > { %333 = vmatmul.mubr.f32.gmra.mrb[6].mxu0 %v197_v13  ;;  %666 = vmatmul.mubr.f32.gmra.mrb[4].mxu1 %v199_v15 }
  0x36   : > { %338 = vmatprep.mubr.f32.mxu0 %v785_v7  ;;  %668 = vmatprep.mubr.f32.mxu1 %v200_v16 }
  0x39   : > { %339 = vmatmul.mubr.f32.gmra.mrb[8].mxu0 %v198_v14  ;;  %669 = vmatmul.mubr.f32.gmra.mrb[6].mxu1 %v201_v17 }
  0x3a   : > { %344 = vmatprep.mubr.f32.mxu0 %v785_v7 }
  0x3d   : > { %345 = vmatmul.mubr.f32.gmra.mrb[10].mxu0 %v199_v15 }
  0x3e   : > { %350 = vmatprep.mubr.f32.mxu0 %v785_v7 }
  0x41   : > { %351 = vmatmul.mubr.f32.gmra.mrb[12].mxu0 %v200_v16 }
  0x42   : > { %356 = vmatprep.mubr.f32.mxu0 %v785_v7 }
  0x45   : > { %357 = vmatmul.mubr.f32.gmra.mrb[14].mxu0 %v201_v17 }
  0xfc   : > { %v316_v18 = vpop.f32.mrb[0].mxu0 }
  0xfd   : > { %468 = vst [vmem:[%s994_s23] sm:$0xff] %v316_v18  ;;  %v318_v19 = vpop.f32.mrb[1].mxu0 }
  0xfe   : > { %469 = vst [vmem:[%s994_s23 + $0x8] sm:$0xff] %v318_v19 }
 0x100   : > { %v322_v7 = vpop.f32.mrb[2].mxu0  ;;  %v661_v21 = vpop.f32.mrb[0].mxu1 }
 0x101   : > { %471 = vst [vmem:[%s994_s23 + $0x18] sm:$0xff] %v322_v7  ;;  %v324_v20 = vpop.f32.mrb[3].mxu0  ;;  %473 = vst [vmem:[%s994_s23 + $0x28] sm:$0xff] %v661_v21  ;;  %v429_v22 = vpop.f32.mrb[1].mxu1 }
 0x102   : > { %472 = vst [vmem:[%s994_s23 + $0x20] sm:$0xff] %v324_v20  ;;  %470 = vst [vmem:[%s994_s23 + $0x10] sm:$0xff] %v429_v22 }
 0x104   : > { %v328_v23 = vpop.f32.mrb[4].mxu0  ;;  %v664_v25 = vpop.f32.mrb[2].mxu1 }
 0x105   : > { %474 = vst [vmem:[%s994_s23 + $0x30] sm:$0xff] %v328_v23  ;;  %v330_v24 = vpop.f32.mrb[5].mxu0  ;;  %479 = vst [vmem:[%s994_s23 + $0x58] sm:$0xff] %v664_v25  ;;  %v439_v26 = vpop.f32.mrb[3].mxu1 }
 0x106   : > { %475 = vst [vmem:[%s994_s23 + $0x38] sm:$0xff] %v330_v24  ;;  %476 = vst [vmem:[%s994_s23 + $0x40] sm:$0xff] %v439_v26 }
 0x108   : > { %v334_v27 = vpop.f32.mrb[6].mxu0  ;;  %v667_v29 = vpop.f32.mrb[4].mxu1 }
 0x109   : > { %477 = vst [vmem:[%s994_s23 + $0x48] sm:$0xff] %v334_v27  ;;  %v336_v28 = vpop.f32.mrb[7].mxu0  ;;  %485 = vst [vmem:[%s994_s23 + $0x88] sm:$0xff] %v667_v29  ;;  %v449_v30 = vpop.f32.mrb[5].mxu1 }
 0x10a   : > { %478 = vst [vmem:[%s994_s23 + $0x50] sm:$0xff] %v336_v28  ;;  %482 = vst [vmem:[%s994_s23 + $0x70] sm:$0xff] %v449_v30 }
 0x10c   : > { %v340_v31 = vpop.f32.mrb[8].mxu0  ;;  %v670_v33 = vpop.f32.mrb[6].mxu1 }
 0x10d   : > { %480 = vst [vmem:[%s994_s23 + $0x60] sm:$0xff] %v340_v31  ;;  %v342_v32 = vpop.f32.mrb[9].mxu0  ;;  %491 = vst [vmem:[%s994_s23 + $0xb8] sm:$0xff] %v670_v33  ;;  %v459_v34 = vpop.f32.mrb[7].mxu1 }
 0x10e   : > { %481 = vst [vmem:[%s994_s23 + $0x68] sm:$0xff] %v342_v32  ;;  %488 = vst [vmem:[%s994_s23 + $0xa0] sm:$0xff] %v459_v34 }
 0x110   : > { %v346_v35 = vpop.f32.mrb[10].mxu0 }
 0x111   : > { %483 = vst [vmem:[%s994_s23 + $0x78] sm:$0xff] %v346_v35  ;;  %v348_v36 = vpop.f32.mrb[11].mxu0 }
 0x112   : > { %484 = vst [vmem:[%s994_s23 + $0x80] sm:$0xff] %v348_v36 }
 0x114   : > { %v352_v37 = vpop.f32.mrb[12].mxu0 }
 0x115   : > { %486 = vst [vmem:[%s994_s23 + $0x90] sm:$0xff] %v352_v37  ;;  %v354_v38 = vpop.f32.mrb[13].mxu0 }
 0x116   : > { %487 = vst [vmem:[%s994_s23 + $0x98] sm:$0xff] %v354_v38 }
 0x118   : > { %v358_v39 = vpop.f32.mrb[14].mxu0 }
 0x119   : > { %489 = vst [vmem:[%s994_s23 + $0xa8] sm:$0xff] %v358_v39  ;;  %v360_v40 = vpop.f32.mrb[15].mxu0 }
 0x11a   : > { %490 = vst [vmem:[%s994_s23 + $0xb0] sm:$0xff] %v360_v40 }
 0x11b PF: > { %s12_s11 = sadd.s32 1, %s783_s11   ;;  %s1032_s9 = smov %s779_s10 }
 0x11c   : > { %p9_p5 = scmp.ge.s32.totalorder %s12_s11, 4   ;;  %s1033_s10 = smov %s1035_s12 }
 0x11e   :  { %11 = sbr.rel (!%p9_p5) target bundleno = 2 (0x2), region = 61 }

// kernel: _lambda_.5
= control target key start
LH: loop header
LB: loop body
LE: loop exit
PB: predicated region body
PF: predicated region fallthrough
CT: control target
= control target key end

     0   :  { %11 = vsyncpa [#allocation6], 0  ;;  %s9039_s0 = inlined_call_operand.vmem [shape: f32[2,64,384], index: 0, kind: input, shape index: {}, may-alias: {0,1,2}]   ;;  %s9040_s1 = inlined_call_operand.vmem [shape: f32[2,64,384], index: 1, kind: input, shape index: {}, may-alias: {0,1,2}]   ;;  %s9041_s2 = inlined_call_operand.vmem [shape: f32[2,64,384], index: 2, kind: input, shape index: {}, may-alias: {0,1,2}]   ;;  %s9042_s3 = inlined_call_operand.vmem [shape: f32[2,64,128], index: 3, kind: input, shape index: {}]   ;;  %s9043_s4 = inlined_call_operand.vmem [shape: f32[128,128], index: 4, kind: input, shape index: {}]   ;;  %s9044_s5 = inlined_call_operand.vmem [shape: f32[1,128], index: 5, kind: input, shape index: {}]   ;;  %s9045_s6 = inlined_call_operand.hbm [shape: f32[2,64,128], index: 6, kind: output, shape index: {}]  }
   0x1   :  { %13 = vsyncpa [#allocation6 + $0x1], 0  ;;  %s6828_s21 = smov 0   ;;  %s6830_s22 = smov 0  }
   0x2   :  { %s6832_s23 = smov 0   ;;  %s6834_s24 = smov 0  }
   0x3   :  { %s6836_s25 = smov 0   ;;  %s6838_s26 = smov 0  }
   0x4 LB: > { %s4581_s27 = sadd.s32 4294967295, %s6781_s26   ;;  %s4582_s28 = sadd.s32 4294967294, %s6781_s26   ;;  %s6781_s26 = sphi %s6838_s26, %s19_s26   ;;  %s6777_s25 = sphi %s6836_s25, %s9238_s25   ;;  %s6773_s24 = sphi %s6834_s24, %s9237_s24   ;;  %s6769_s23 = sphi %s6832_s23, %s9236_s23   ;;  %s6765_s22 = sphi %s6830_s22, %s9235_s22   ;;  %s6761_s21 = sphi %s6828_s21, %s9234_s21  }
   0x5   : > { %s31_s29 = sadd.s32 1, %s6777_s25  ;;  %s40_s30 = sadd.s32 1, %s6769_s23 }
   0x6   : > { %p33_p0 = scmp.ge.s32.totalorder %s31_s29, 2  ;;  %p47_p1 = scmp.ne.s32.totalorder %s6769_s23, %s6765_s22 }
   0x7   : > { %p48_p2 = scmp.eq.s32.totalorder %s6781_s26, 0  ;;  %p201_p3 = scmp.eq.s32.totalorder %s4581_s27, 1 }
   0x8   : > { %s9240_s29 = smov (%p33_p0, %s31_s29), 0  ;;  %p206_p6 = scmp.ne.s32.totalorder %s6765_s22, %s6761_s21 }
   0x9   : > { %p6867_p4 = por %p48_p2, %p47_p1  ;;  %p6871_p5 = por %p201_p3, %p47_p1 }
   0xa   : > { %s35_s9 = ssub.s32 %s6777_s25, %s9240_s29  ;;  %p207_p8 = scmp.eq.s32.totalorder %s4582_s28, 1 }
   0xb   : > { %p38_p7 = scmp.eq.s32.totalorder %s35_s9, 0  ;;  %p4584_p10 = scmp.ge.s32.totalorder %s6781_s26, 2 }
   0xc   : > { %p6882_p9 = por %p207_p8, %p206_p6 }
   0xd   : > { %s6880_s10 = scalar_select %p38_p7, %s6769_s23, %s40_s30  }
   0xe   : > { %229 = sbr.rel (%p4584_p10) target bundleno = 48 (0x30), region = 24 }
  0x15   : > { %232 = sbr.rel (!%p6867_p4) target bundleno = 30 (0x1e), region = 28  ;;  %s234_s12 = sand.u32 (%p6867_p4), 1, %s6769_s23  }
  0x16   : > { %s5938_s13 = smul.u32 (%p6867_p4), 192, %s6777_s25  ;;  %s4585_s14 = sshll.u32 (%p6867_p4), %s234_s12, 6 }
  0x17   : > { %s236_s18 = scalar_lea.vmem (%p6867_p4), [#allocation2], %s4585_s14 }
  0x18   : > { %s242_s17 = scalar_lea.vmem (%p6867_p4), %s9039_s0, %s5938_s13 }
  0x19   : > { %v284_v0 = vld [vmem:[%s242_s17] sm:$0xff] (%p6867_p4)  ;;  %v286_v1 = vld [vmem:[%s242_s17 + $0x18] sm:$0xff] (%p6867_p4)  ;;  %v288_v2 = vld [vmem:[%s242_s17 + $0x30] sm:$0xff] (%p6867_p4) }
  0x1a   : > { %285 = vst [vmem:[%s236_s18] sm:$0xff] (%p6867_p4), %v284_v0  ;;  %287 = vst [vmem:[%s236_s18 + $0x8] sm:$0xff] (%p6867_p4), %v286_v1  ;;  %v290_v3 = vld [vmem:[%s242_s17 + $0x48] sm:$0xff] (%p6867_p4)  ;;  %v292_v4 = vld [vmem:[%s242_s17 + $0x60] sm:$0xff] (%p6867_p4) }
  0x1b   : > { %289 = vst [vmem:[%s236_s18 + $0x10] sm:$0xff] (%p6867_p4), %v288_v2  ;;  %v294_v5 = vld [vmem:[%s242_s17 + $0x78] sm:$0xff] (%p6867_p4)  ;;  %291 = vst [vmem:[%s236_s18 + $0x18] sm:$0xff] (%p6867_p4), %v290_v3  ;;  %v296_v6 = vld [vmem:[%s242_s17 + $0x90] sm:$0xff] (%p6867_p4) }
  0x1c   : > { %293 = vst [vmem:[%s236_s18 + $0x20] sm:$0xff] %v292_v4  ;;  %295 = vst [vmem:[%s236_s18 + $0x28] sm:$0xff] %v294_v5  ;;  %v298_v7 = vld [vmem:[%s242_s17 + $0xa8] sm:$0xff] }
  0x1d   : > { %297 = vst [vmem:[%s236_s18 + $0x30] sm:$0xff] %v296_v6  ;;  %299 = vst [vmem:[%s236_s18 + $0x38] sm:$0xff] %v298_v7 }
  0x1e PF: > { %305 = sbr.rel (!%p6867_p4) target bundleno = 39 (0x27), region = 66  ;;  %s307_s19 = sand.u32 (%p6867_p4), 1, %s6769_s23  }
  0x1f   : > { %s4588_s20 = smul.u32 (%p6867_p4), 192, %s6777_s25  ;;  %s4587_s27 = sshll.u32 (%p6867_p4), %s307_s19, 6 }
  0x20   : > { %s309_s12 = scalar_lea.vmem (%p6867_p4), [#allocation3], %s4587_s27 }
  0x21   : > { %s4476_s9 = scalar_lea.vmem (%p6867_p4), %s9040_s1, %s4588_s20 }
  0x22   : > { %v4589_v8 = vld [vmem:[%s4476_s9 + $0x8] sm:$0xff] (%p6867_p4)  ;;  %v4590_v9 = vld [vmem:[%s4476_s9 + $0x20] sm:$0xff] (%p6867_p4)  ;;  %v4591_v10 = vld [vmem:[%s4476_s9 + $0x38] sm:$0xff] (%p6867_p4) }
  0x23   : > { %356 = vst [vmem:[%s309_s12] sm:$0xff] (%p6867_p4), %v4589_v8  ;;  %358 = vst [vmem:[%s309_s12 + $0x8] sm:$0xff] (%p6867_p4), %v4590_v9  ;;  %v4592_v11 = vld [vmem:[%s4476_s9 + $0x50] sm:$0xff] (%p6867_p4)  ;;  %v4593_v12 = vld [vmem:[%s4476_s9 + $0x68] sm:$0xff] (%p6867_p4) }
  0x24   : > { %360 = vst [vmem:[%s309_s12 + $0x10] sm:$0xff] (%p6867_p4), %v4591_v10  ;;  %v4594_v13 = vld [vmem:[%s4476_s9 + $0x80] sm:$0xff] (%p6867_p4)  ;;  %362 = vst [vmem:[%s309_s12 + $0x18] sm:$0xff] (%p6867_p4), %v4592_v11  ;;  %v4595_v14 = vld [vmem:[%s4476_s9 + $0x98] sm:$0xff] (%p6867_p4) }
  0x25   : > { %364 = vst [vmem:[%s309_s12 + $0x20] sm:$0xff] %v4593_v12  ;;  %366 = vst [vmem:[%s309_s12 + $0x28] sm:$0xff] %v4594_v13  ;;  %v4596_v15 = vld [vmem:[%s4476_s9 + $0xb0] sm:$0xff] }
  0x26   : > { %368 = vst [vmem:[%s309_s12 + $0x30] sm:$0xff] %v4595_v14  ;;  %370 = vst [vmem:[%s309_s12 + $0x38] sm:$0xff] %v4596_v15 }
  0x27 PF: > { %376 = sbr.rel (!%p6867_p4) target bundleno = 48 (0x30), region = 104  ;;  %s378_s13 = sand.u32 (%p6867_p4), 1, %s6769_s23  }
  0x28   : > { %s4598_s14 = smul.u32 (%p6867_p4), 192, %s6777_s25  ;;  %s4597_s15 = sshll.u32 (%p6867_p4), %s378_s13, 6 }
  0x29   : > { %s380_s19 = scalar_lea.vmem (%p6867_p4), [#allocation4], %s4597_s15 }
  0x2a   : > { %s4482_s18 = scalar_lea.vmem (%p6867_p4), %s9041_s2, %s4598_s14 }
  0x2b   : > { %v4599_v16 = vld [vmem:[%s4482_s18 + $0x10] sm:$0xff] (%p6867_p4)  ;;  %v4600_v17 = vld [vmem:[%s4482_s18 + $0x28] sm:$0xff] (%p6867_p4)  ;;  %v4601_v18 = vld [vmem:[%s4482_s18 + $0x40] sm:$0xff] (%p6867_p4) }
  0x2c   : > { %427 = vst [vmem:[%s380_s19] sm:$0xff] (%p6867_p4), %v4599_v16  ;;  %429 = vst [vmem:[%s380_s19 + $0x8] sm:$0xff] (%p6867_p4), %v4600_v17  ;;  %v4602_v19 = vld [vmem:[%s4482_s18 + $0x58] sm:$0xff] (%p6867_p4)  ;;  %v4603_v20 = vld [vmem:[%s4482_s18 + $0x70] sm:$0xff] (%p6867_p4) }
  0x2d   : > { %431 = vst [vmem:[%s380_s19 + $0x10] sm:$0xff] (%p6867_p4), %v4601_v18  ;;  %v4604_v21 = vld [vmem:[%s4482_s18 + $0x88] sm:$0xff] (%p6867_p4)  ;;  %433 = vst [vmem:[%s380_s19 + $0x18] sm:$0xff] (%p6867_p4), %v4602_v19  ;;  %v4605_v22 = vld [vmem:[%s4482_s18 + $0xa0] sm:$0xff] (%p6867_p4) }
  0x2e   : > { %435 = vst [vmem:[%s380_s19 + $0x20] sm:$0xff] %v4603_v20  ;;  %437 = vst [vmem:[%s380_s19 + $0x28] sm:$0xff] %v4604_v21  ;;  %v4606_v23 = vld [vmem:[%s4482_s18 + $0xb8] sm:$0xff] }
  0x2f   : > { %439 = vst [vmem:[%s380_s19 + $0x30] sm:$0xff] %v4605_v22  ;;  %441 = vst [vmem:[%s380_s19 + $0x38] sm:$0xff] %v4606_v23 }
  0x30 PF: > { %p4607_p11 = scmp.ge.s32.totalorder %s6781_s26, 1  ;;  %p459_p12 = scmp.lt.s32.totalorder %s6781_s26, 3 }
  0x32   : > { %p460_p13 = pnand %p4607_p11, %p459_p12 }
  0x34   : > { %463 = sbr.rel (%p460_p13) target bundleno = 3687 (0xe67), region = 146 }
  0x3b   : > { %s9066_s7 = sand.u32 1, %s6765_s22   ;;  %vm578_vm0 = vcmask 130048   ;;  %s6783_s30 = smov 112   ;;  %vm732_vm2 = vcmask 523264   ;;  %vm4236_vm3 = vcmask 261120   ;;  %vm4245_vm4 = vcmask 392192  }
  0x3c   : > { %s6915_s20 = sshll.u32 %s9066_s7, 6  ;;  %vm6919_vm1 = vmpackc.low %vm578_vm0, %vm578_vm0  ;;  %s6784_s9 = smov 96   ;;  %vm4262_vm5 = vcmask 654336   ;;  %vm4271_vm6 = vcmask 785408   ;;  %vm4280_vm7 = vcmask 916480  }
  0x3d   : > { %s6924_s27 = scalar_lea.vmem [#allocation3], %s6915_s20  ;;  %s6933_s28 = scalar_lea.vmem [#allocation2], %s6915_s20 }
  0x3e   : > { %v554_v25 = vld [vmem:[%s6924_s27] sm:$0xff]  ;;  %v555_v26 = vld [vmem:[%s6924_s27 + $0x8] sm:$0xff]  ;;  %v556_v27 = vld [vmem:[%s6924_s27 + $0x10] sm:$0xff]  ;;  %s7018_s12 = scalar_lea.vmem [#allocation4], %s6915_s20  ;;  %s6785_s13 = smov 80  }
  0x3f   : > { %v5586_v28 = vpack.c.bf16 %v555_v26, %v554_v25  ;;  %v557_v29 = vld [vmem:[%s6924_s27 + $0x18] sm:$0xff]  ;;  %v6930_v30 = vpack.i.bf16 %v555_v26, %v554_v25  ;;  %v538_v32 = vld [vmem:[%s6933_s28] sm:$0xff]  ;;  %v6956_v36 = vld [vmem:[%s6924_s27 + $0x28] sm:$0xff]  ;;  %s6786_s14 = smov 64   ;;  %s6787_s15 = smov 48  }
  0x40   : > { %v5592_v31 = vpack.c.bf16 %v557_v29, %v556_v27  ;;  %v6936_v33 = vpack.i.bf16 %v557_v29, %v556_v27  ;;  %v6940_v34 = vmul.f32 0.36067376, %v538_v32  ;;  %v6953_v35 = vld [vmem:[%s6924_s27 + $0x20] sm:$0xff]  ;;  %v6967_v38 = vld [vmem:[%s6924_s27 + $0x30] sm:$0xff]  ;;  %v6970_v39 = vld [vmem:[%s6924_s27 + $0x38] sm:$0xff]  ;;  %s6788_s16 = smov 32  }
  0x41   : > { %5588 = vmatprep.subr.msk.bf16.mxu0 %vm6919_vm1, %v5586_v28  ;;  %6004 = vrot.lane.b32.xlu0 %v6930_v30, %s6783_s30  ;;  %v5598_v37 = vpack.c.bf16 %v6956_v36, %v6953_v35  ;;  %v5604_v40 = vpack.c.bf16 %v6970_v39, %v6967_v38  ;;  %v539_v41 = vld [vmem:[%s6933_s28 + $0x8] sm:$0xff]  ;;  %v540_v42 = vld [vmem:[%s6933_s28 + $0x10] sm:$0xff]  ;;  %v541_v45 = vld [vmem:[%s6933_s28 + $0x18] sm:$0xff]  ;;  %v7077_v26 = vpack.i.bf16 %v6956_v36, %v6953_v35  ;;  %s6789_s17 = smov 16   ;;  %p528_p0 = scmp.lt.s32.totalorder %s6773_s24, 1 }
  0x42   : > { %5591 = vmatpush3.bf16.xpose.msk.msra.mxu0 %vm6919_vm1, %v5586_v28  ;;  %6009 = vrot.lane.b32.xlu1 %v6936_v33, %s6783_s30  ;;  %v6982_v43 = vmul.f32 0.36067376, %v539_v41  ;;  %v6984_v44 = vmul.f32 0.36067376, %v540_v42  ;;  %v542_v46 = vld [vmem:[%s6933_s28 + $0x20] sm:$0xff]  ;;  %v543_v49 = vld [vmem:[%s6933_s28 + $0x28] sm:$0xff] }
  0x43   : > { %5594 = vmatprep.subr.msk.bf16.mxu0 %vm6919_vm1, %v5592_v31  ;;  %5110 = vmatprep.mubr.msk.f32.mxu0 %vm578_vm0, %v6940_v34  ;;  %v6990_v47 = vmul.f32 0.36067376, %v541_v45  ;;  %v6994_v48 = vmul.f32 0.36067376, %v542_v46  ;;  %v544_v50 = vld [vmem:[%s6933_s28 + $0x30] sm:$0xff]  ;;  %v545_v53 = vld [vmem:[%s6933_s28 + $0x38] sm:$0xff] }
  0x44   : > { %v7000_v51 = vmul.f32 0.36067376, %v543_v49  ;;  %v7004_v52 = vmul.f32 0.36067376, %v544_v50  ;;  %v7009_v54 = vmul.f32 0.36067376, %v545_v53 }
  0x45   : > { %v7021_v56 = vld [vmem:[%s7018_s12] sm:$0xff]  ;;  %v7024_v57 = vld [vmem:[%s7018_s12 + $0x8] sm:$0xff]  ;;  %v7027_v58 = vld [vmem:[%s7018_s12 + $0x10] sm:$0xff]  ;;  %s529_s18 = scalar_select %p528_p0, %s6773_s24, 1 }
  0x46   : > { %6019 = vrot.lane.b32.xlu1 %v6930_v30, %s6784_s9  ;;  %v5610_v59 = vpack.c.bf16 %v7024_v57, %v7021_v56  ;;  %v7032_v60 = vld [vmem:[%s7018_s12 + $0x18] sm:$0xff]  ;;  %v7037_v62 = vld [vmem:[%s7018_s12 + $0x20] sm:$0xff]  ;;  %v7040_v63 = vld [vmem:[%s7018_s12 + $0x28] sm:$0xff]  ;;  %s6790_s7 = smov [#allocation5]  }
  0x47   : > { %v5614_v61 = vpack.c.bf16 %v7032_v60, %v7027_v58  ;;  %v5618_v3 = vpack.c.bf16 %v7040_v63, %v7037_v62  ;;  %v7045_v6 = vld [vmem:[%s7018_s12 + $0x30] sm:$0xff]  ;;  %v7048_v7 = vld [vmem:[%s7018_s12 + $0x38] sm:$0xff]  ;;  %s4812_s19 = sshll.u32 %s529_s18, 6  ;;  %s6707_s28 = sshll.u32 %s6790_s7, 4  ;;  %s6708_s28 = int_to_ptr.vmem [resolvable:$false] %s6707_s28 }
  0x48   : > { %5611 = vmatprep.subr.bf16.mxu1 %v5610_v59  ;;  %v5622_v10 = vpack.c.bf16 %v7048_v7, %v7045_v6 }
  0x49   : > { %5613 = vmatpush3.bf16.msra.mxu1 %v5610_v59 }
  0x4a   : > { %5597 = vmatpush3.bf16.xpose.msk.msra.mxu0 %vm6919_vm1, %v5592_v31  ;;  %5615 = vmatprep.subr.bf16.mxu1 %v5614_v61  ;;  %v7091_v31 = vpack.i.bf16 %v6970_v39, %v6967_v38 }
  0x4b   : > { %5600 = vmatprep.subr.msk.bf16.mxu0 %vm6919_vm1, %v5598_v37 }
  0x4d   : > { %5617 = vmatpush3.bf16.msra.mxu1 %v5614_v61 }
  0x4e   : > { %5619 = vmatprep.subr.bf16.mxu1 %v5618_v3 }
  0x51   : > { %5621 = vmatpush3.bf16.msra.mxu1 %v5618_v3 }
  0x52   : > { %5603 = vmatpush3.bf16.xpose.msk.msra.mxu0 %vm6919_vm1, %v5598_v37  ;;  %5623 = vmatprep.subr.bf16.mxu1 %v5622_v10 }
  0x53   : > { %5606 = vmatprep.subr.msk.bf16.mxu0 %vm6919_vm1, %v5604_v40 }
  0x55   : > { %5625 = vmatpush3.bf16.msra.mxu1 %v5622_v10 }
  0x5a   : > { %5609 = vmatpush3.bf16.xpose.msk.msra.mxu0 %vm6919_vm1, %v5604_v40 }
  0x61   : > { %5111 = vmatmul.mubr.msk.f32.vlgmr.msra.gmra.mrb[0].mxu0 %vm578_vm0, %v6982_v43 }
  0x62   : > { %5113 = vmatprep.mubr.msk.f32.mxu0 %vm578_vm0, %v6984_v44 }
  0x65   : > { %5114 = vmatmul.mubr.msk.f32.gmra.mrb[2].mxu0 %vm578_vm0, %v6990_v47 }
  0x66   : > { %5116 = vmatprep.mubr.msk.f32.mxu0 %vm578_vm0, %v6994_v48 }
  0x69   : > { %5117 = vmatmul.mubr.msk.f32.gmra.mrb[4].mxu0 %vm578_vm0, %v7000_v51 }
  0x6a   : > { %5119 = vmatprep.mubr.msk.f32.mxu0 %vm578_vm0, %v7004_v52 }
  0x6d   : > { %5120 = vmatmul.mubr.msk.f32.gmra.mrb[6].mxu0 %vm578_vm0, %v7009_v54 }
  0xb3   : > { %v6005_v5 = vpop.permute.xlu0 %6004 }
  0xb4   : > { %v7015_v55 = vpop.permute.xlu1 %6009  ;;  %v6007_v8 = vunpack.i.h.bf16 %v6005_v5  ;;  %v6006_v9 = vunpack.i.l.bf16 %v6005_v5 }
  0xb5   : > { %v6012_v45 = vunpack.i.h.bf16 %v7015_v55  ;;  %v6011_v46 = vunpack.i.l.bf16 %v7015_v55 }
  0xb6   : > { %v7056_v11 = vpack.c.bf16 %v6007_v8, %v6006_v9 }
  0xb8   : > { %v6020_v0 = vpop.permute.xlu1 %6019  ;;  %5628 = vmatprep.subr.msk.bf16.mxu1 %vm6919_vm1, %v7056_v11 }
  0xb9   : > { %v6022_v1 = vunpack.i.h.bf16 %v6020_v0  ;;  %v6021_v2 = vunpack.i.l.bf16 %v6020_v0  ;;  %v5632_v0 = vpack.c.bf16 %v6012_v45, %v6011_v46 }
  0xbb   : > { %v5666_v4 = vpack.c.bf16 %v6022_v1, %v6021_v2 }
  0xbd   : > { %5668 = vmatprep.subr.msk.bf16.mxu0 %vm6919_vm1, %v5666_v4 }
  0xbe   : > { %5671 = vmatpush3.bf16.xpose.msk.msra.mxu0 %vm6919_vm1, %v5666_v4 }
 0x134   : > { %v5112_v12 = vpop.f32.mrb[0].mxu0 }
 0x135   : > { %v693_v13 = vpop.f32.mrb[1].mxu0  ;;  %v736_v14 = vsel %vm732_vm2, %v5112_v12, -inf }
 0x136   : > { %737 = vmax.xlane.f32.xlu0 %v736_v14  ;;  %v733_v17 = vsel %vm732_vm2, %v693_v13, -inf }
 0x138   : > { %v5115_v15 = vpop.f32.mrb[2].mxu0 }
 0x139   : > { %v703_v16 = vpop.f32.mrb[3].mxu0  ;;  %v742_v18 = vsel %vm732_vm2, %v5115_v15, -inf }
 0x13a   : > { %734 = vmax.xlane.f32.xlu0 %v733_v17  ;;  %743 = vmax.xlane.f32.xlu1 %v742_v18  ;;  %v739_v20 = vsel %vm732_vm2, %v703_v16, -inf }
 0x13c   : > { %v7064_v19 = vpop.f32.mrb[4].mxu0 }
 0x13d   : > { %v7067_v21 = vpop.f32.mrb[5].mxu0  ;;  %v748_v22 = vsel %vm732_vm2, %v7064_v19, -inf }
 0x13e   : > { %740 = vmax.xlane.f32.xlu1 %v739_v20  ;;  %v745_v27 = vsel %vm732_vm2, %v7067_v21, -inf }
 0x140   : > { %v7071_v23 = vpop.f32.mrb[6].mxu0 }
 0x141   : > { %v7073_v25 = vpop.f32.mrb[7].mxu0  ;;  %v754_v28 = vsel %vm732_vm2, %v7071_v23, -inf }
 0x142   : > { %749 = vmax.xlane.f32.xlu1 %v748_v22  ;;  %v751_v29 = vsel %vm732_vm2, %v7073_v25, -inf }
 0x150   : > { %6014 = vrot.lane.b32.xlu0 %v7077_v26, %s6783_s30 }
 0x153   : > { %6029 = vrot.lane.b32.xlu1 %v6936_v33, %s6784_s9 }
 0x16f   : > { %746 = vmax.xlane.f32.xlu0 %v745_v27 }
 0x177   : > { %755 = vmax.xlane.f32.xlu1 %v754_v28 }
 0x17b   : > { %752 = vmax.xlane.f32.xlu1 %v751_v29 }
 0x185   : > { %6024 = vrot.lane.b32.xlu0 %v7091_v31, %s6783_s30 }
 0x189   : > { %950 = vrot.lane.b32.xlu0 %v6940_v34, %s6783_s30 }
 0x18c   : > { %952 = vrot.lane.b32.xlu1 %v6982_v43, %s6783_s30 }
 0x18d   : > { %6034 = vrot.lane.b32.xlu0 %v7077_v26, %s6784_s9 }
 0x190   : > { %954 = vrot.lane.b32.xlu1 %v6984_v44, %s6783_s30 }
 0x191   : > { %956 = vrot.lane.b32.xlu0 %v6990_v47, %s6783_s30 }
 0x194   : > { %6039 = vrot.lane.b32.xlu1 %v7091_v31, %s6784_s9 }
 0x195   : > { %958 = vrot.lane.b32.xlu0 %v6994_v48, %s6783_s30 }
 0x198   : > { %960 = vrot.lane.b32.xlu1 %v7000_v51, %s6783_s30 }
 0x199   : > { %962 = vrot.lane.b32.xlu0 %v7004_v52, %s6783_s30 }
 0x19c   : > { %964 = vrot.lane.b32.xlu1 %v7009_v54, %s6783_s30 }
 0x19d   : > { %1400 = vrot.lane.b32.xlu0 %v6940_v34, %s6784_s9 }
 0x1a0   : > { %1402 = vrot.lane.b32.xlu1 %v6982_v43, %s6784_s9 }
 0x1a1   : > { %1404 = vrot.lane.b32.xlu0 %v6984_v44, %s6784_s9 }
 0x1a4   : > { %1406 = vrot.lane.b32.xlu1 %v6990_v47, %s6784_s9 }
 0x1a5   : > { %1408 = vrot.lane.b32.xlu0 %v6994_v48, %s6784_s9 }
 0x1a8   : > { %1410 = vrot.lane.b32.xlu1 %v7000_v51, %s6784_s9 }
 0x1a9   : > { %1412 = vrot.lane.b32.xlu0 %v7004_v52, %s6784_s9 }
 0x1ac   : > { %1414 = vrot.lane.b32.xlu1 %v7009_v54, %s6784_s9 }
 0x1c3   : > { %v738_v32 = vpop.xlane.xlu0 %737 }
 0x1c4   : > { %v758_v35 = vsub.f32 %v5112_v12, %v738_v32 }
 0x1c7   : > { %v735_v36 = vpop.xlane.xlu0 %734  ;;  %v744_v37 = vpop.xlane.xlu1 %743 }
 0x1c8   : > { %v757_v38 = vsub.f32 %v693_v13, %v735_v36  ;;  %v760_v39 = vsub.f32 %v5115_v15, %v744_v37 }
 0x1ca   : > { %6423 = vpow2.f32 %v757_v38 }
 0x1cb   : > { %6425 = vpow2.f32 %v758_v35  ;;  %v741_v40 = vpop.xlane.xlu1 %740  ;;  %v6015_v2 = vpop.permute.xlu0 %6014 }
 0x1cc   : > { %v759_v41 = vsub.f32 %v703_v16, %v741_v40  ;;  %v6017_v4 = vunpack.i.h.bf16 %v6015_v2  ;;  %v6016_v5 = vunpack.i.l.bf16 %v6015_v2 }
 0x1ce   : > { %6427 = vpow2.f32 %v759_v41  ;;  %v5638_v8 = vpack.c.bf16 %v6017_v4, %v6016_v5 }
 0x1cf   : > { %6429 = vpow2.f32 %v760_v39  ;;  %v750_v42 = vpop.xlane.xlu1 %749 }
 0x1d0   : > { %v762_v9 = vsub.f32 %v7064_v19, %v750_v42 }
 0x1d3   : > { %v6030_v49 = vpop.permute.xlu1 %6029 }
 0x1d4   : > { %v7133_v50 = vpop.eup %6423  ;;  %v6032_v53 = vunpack.i.h.bf16 %v6030_v49  ;;  %v6031_v59 = vunpack.i.l.bf16 %v6030_v49 }
 0x1d5   : > { %9072 = vst [vmem:[#allocation8_spill] sm:$0xff] %v7133_v50  ;;  %v7135_v61 = vpop.eup %6425  ;;  %5138 = vmatprep.mubr.msk.f32.mxu1 %vm732_vm2, %v7133_v50 }
 0x1d6   : > { %9073 = vst [vmem:[#allocation9_spill] sm:$0xff] %v7135_v61  ;;  %v5672_v1 = vpack.c.bf16 %v6032_v53, %v6031_v59  ;;  %5139 = vmatmul.mubr.msk.f32.vlgmr.msra.gmra.mrb[0].mxu1 %vm732_vm2, %v7135_v61 }
 0x1d7   : > { %5631 = vmatpush3.bf16.xpose.msk.msra.mxu1 %vm6919_vm1, %v7056_v11 }
 0x1d8   : > { %v7144_v55 = vpop.eup %6427  ;;  %5634 = vmatprep.subr.msk.bf16.mxu1 %vm6919_vm1, %v5632_v0  ;;  %5674 = vmatprep.subr.msk.bf16.mxu0 %vm6919_vm1, %v5672_v1 }
 0x1d9   : > { %9074 = vst [vmem:[#allocation10_spill] sm:$0xff] %v7144_v55  ;;  %v7150_v3 = vpop.eup %6429  ;;  %5141 = vmatprep.mubr.msk.f32.mxu1 %vm732_vm2, %v7144_v55  ;;  %5677 = vmatpush3.bf16.xpose.msk.msra.mxu0 %vm6919_vm1, %v5672_v1 }
 0x1da   : > { %9075 = vst [vmem:[#allocation11_spill] sm:$0xff] %v7150_v3  ;;  %5142 = vmatmul.mubr.msk.f32.gmra.mrb[2].mxu1 %vm732_vm2, %v7150_v3 }
 0x1df   : > { %5637 = vmatpush3.bf16.xpose.msk.msra.mxu1 %vm6919_vm1, %v5632_v0 }
 0x1e0   : > { %5640 = vmatprep.subr.msk.bf16.mxu1 %vm6919_vm1, %v5638_v8 }
 0x1e7   : > { %5643 = vmatpush3.bf16.xpose.msk.msra.mxu1 %vm6919_vm1, %v5638_v8 }
 0x1fc   : > { %v747_v10 = vpop.xlane.xlu0 %746 }
 0x1fd   : > { %v761_v11 = vsub.f32 %v7067_v21, %v747_v10  ;;  %v7218_v10 = vpack.i.bf16 %v7032_v60, %v7027_v58 }
 0x1ff   : > { %6431 = vpow2.f32 %v761_v11  ;;  %6049 = vrot.lane.b32.xlu1 %v7218_v10, %s6783_s30  ;;  %v7226_v11 = vpack.i.bf16 %v7040_v63, %v7037_v62 }
 0x200   : > { %6433 = vpow2.f32 %v762_v9  ;;  %v6025_v12 = vpop.permute.xlu0 %6024  ;;  %v7214_v9 = vpack.i.bf16 %v7024_v57, %v7021_v56 }
 0x201   : > { %v6027_v13 = vunpack.i.h.bf16 %v6025_v12  ;;  %v6026_v14 = vunpack.i.l.bf16 %v6025_v12  ;;  %v7230_v12 = vpack.i.bf16 %v7048_v7, %v7045_v6 }
 0x202   : > { %6044 = vrot.lane.b32.xlu0 %v7214_v9, %s6783_s30 }
 0x203   : > { %v5644_v15 = vpack.c.bf16 %v6027_v13, %v6026_v14  ;;  %6059 = vrot.lane.b32.xlu1 %v7230_v12, %s6783_s30 }
 0x204   : > { %v756_v16 = vpop.xlane.xlu1 %755  ;;  %v951_v17 = vpop.permute.xlu0 %950 }
 0x205   : > { %5646 = vmatprep.subr.msk.bf16.mxu1 %vm6919_vm1, %v5644_v15  ;;  %v764_v18 = vsub.f32 %v7071_v23, %v756_v16 }
 0x206   : > { %5649 = vmatpush3.bf16.xpose.msk.msra.mxu1 %vm6919_vm1, %v5644_v15  ;;  %6054 = vrot.lane.b32.xlu0 %v7226_v11, %s6783_s30 }
 0x207   : > { %6069 = vrot.lane.b32.xlu1 %v7218_v10, %s6784_s9 }
 0x208   : > { %v753_v19 = vpop.xlane.xlu1 %752  ;;  %v6035_v20 = vpop.permute.xlu0 %6034 }
 0x209   : > { %v7171_v22 = vpop.eup %6431  ;;  %v763_v21 = vsub.f32 %v7073_v25, %v753_v19  ;;  %v6037_v27 = vunpack.i.h.bf16 %v6035_v20  ;;  %v6036_v28 = vunpack.i.l.bf16 %v6035_v20 }
 0x20a   : > { %9076 = vst [vmem:[#allocation12_spill] sm:$0xff] %v7171_v22  ;;  %v7174_v29 = vpop.eup %6433  ;;  %5144 = vmatprep.mubr.msk.f32.mxu1 %vm732_vm2, %v7171_v22  ;;  %6064 = vrot.lane.b32.xlu0 %v7214_v9, %s6784_s9 }
 0x20b   : > { %9077 = vst [vmem:[#allocation13_spill] sm:$0xff] %v7174_v29  ;;  %6435 = vpow2.f32 %v763_v21  ;;  %5145 = vmatmul.mubr.msk.f32.gmra.mrb[4].mxu1 %vm732_vm2, %v7174_v29  ;;  %v5678_v32 = vpack.c.bf16 %v6037_v27, %v6036_v28 }
 0x20c   : > { %6437 = vpow2.f32 %v764_v18  ;;  %v953_v23 = vpop.permute.xlu1 %952  ;;  %v957_v35 = vpop.permute.xlu0 %956 }
 0x20d   : > { %5680 = vmatprep.subr.msk.bf16.mxu0 %vm6919_vm1, %v5678_v32 }
 0x20e   : > { %5683 = vmatpush3.bf16.xpose.msk.msra.mxu0 %vm6919_vm1, %v5678_v32  ;;  %6074 = vrot.lane.b32.xlu0 %v7226_v11, %s6784_s9 }
 0x210   : > { %v955_v25 = vpop.permute.xlu1 %954  ;;  %v959_v36 = vpop.permute.xlu0 %958 }
 0x212   : > { %6079 = vrot.lane.b32.xlu0 %v7230_v12, %s6784_s9 }
 0x214   : > { %v6040_v37 = vpop.permute.xlu1 %6039  ;;  %v963_v38 = vpop.permute.xlu0 %962 }
 0x215   : > { %v7184_v39 = vpop.eup %6435  ;;  %v6042_v40 = vunpack.i.h.bf16 %v6040_v37  ;;  %v6041_v41 = vunpack.i.l.bf16 %v6040_v37 }
 0x216   : > { %9078 = vst [vmem:[#allocation14_spill] sm:$0xff] %v7184_v39  ;;  %v7186_v42 = vpop.eup %6437  ;;  %5147 = vmatprep.mubr.msk.f32.mxu1 %vm732_vm2, %v7184_v39 }
 0x217   : > { %9079 = vst [vmem:[#allocation15_spill] sm:$0xff] %v7186_v42  ;;  %v5684_v45 = vpack.c.bf16 %v6042_v40, %v6041_v41  ;;  %5148 = vmatmul.mubr.msk.f32.gmra.mrb[6].mxu1 %vm732_vm2, %v7186_v42 }
 0x218   : > { %5166 = vmatprep.mubr.msk.f32.mxu1 %vm578_vm0, %v951_v17  ;;  %v961_v46 = vpop.permute.xlu1 %960  ;;  %v1401_v49 = vpop.permute.xlu0 %1400 }
 0x219   : > { %5686 = vmatprep.subr.msk.bf16.mxu0 %vm6919_vm1, %v5684_v45  ;;  %5222 = vmatprep.mubr.msk.f32.mxu0 %vm578_vm0, %v1401_v49 }
 0x21a   : > { %5689 = vmatpush3.bf16.xpose.msk.msra.mxu0 %vm6919_vm1, %v5684_v45 }
 0x21b   : > { %5167 = vmatmul.mubr.msk.f32.vlgmr.msra.gmra.mrb[8].mxu1 %vm578_vm0, %v953_v23 }
 0x21c   : > { %5169 = vmatprep.mubr.msk.f32.mxu1 %vm578_vm0, %v955_v25  ;;  %v965_v53 = vpop.permute.xlu1 %964  ;;  %v1405_v59 = vpop.permute.xlu0 %1404 }
 0x21f   : > { %5170 = vmatmul.mubr.msk.f32.gmra.mrb[10].mxu1 %vm578_vm0, %v957_v35 }
 0x220   : > { %5172 = vmatprep.mubr.msk.f32.mxu1 %vm578_vm0, %v959_v36  ;;  %v1403_v0 = vpop.permute.xlu1 %1402  ;;  %v1409_v1 = vpop.permute.xlu0 %1408 }
 0x221   : > { %5223 = vmatmul.mubr.msk.f32.vlgmr.msra.gmra.mrb[8].mxu0 %vm578_vm0, %v1403_v0 }
 0x222   : > { %5225 = vmatprep.mubr.msk.f32.mxu0 %vm578_vm0, %v1405_v59 }
 0x223   : > { %5173 = vmatmul.mubr.msk.f32.gmra.mrb[12].mxu1 %vm578_vm0, %v961_v46 }
 0x224   : > { %5175 = vmatprep.mubr.msk.f32.mxu1 %vm578_vm0, %v963_v38  ;;  %v1407_v2 = vpop.permute.xlu1 %1406  ;;  %v1413_v4 = vpop.permute.xlu0 %1412 }
 0x225   : > { %5226 = vmatmul.mubr.msk.f32.gmra.mrb[10].mxu0 %vm578_vm0, %v1407_v2 }
 0x226   : > { %5228 = vmatprep.mubr.msk.f32.mxu0 %vm578_vm0, %v1409_v1 }
 0x227   : > { %5176 = vmatmul.mubr.msk.f32.gmra.mrb[14].mxu1 %vm578_vm0, %v965_v53 }
 0x228   : > { %v1411_v5 = vpop.permute.xlu1 %1410 }
 0x229   : > { %5229 = vmatmul.mubr.msk.f32.gmra.mrb[12].mxu0 %vm578_vm0, %v1411_v5 }
 0x22a   : > { %5231 = vmatprep.mubr.msk.f32.mxu0 %vm578_vm0, %v1413_v4 }
 0x22c   : > { %v1415_v8 = vpop.permute.xlu1 %1414 }
 0x22d   : > { %5232 = vmatmul.mubr.msk.f32.gmra.mrb[14].mxu0 %vm578_vm0, %v1415_v8 }
 0x271   : > { %v6050_v57 = vpop.permute.xlu1 %6049 }
 0x272   : > { %v6052_v62 = vunpack.i.h.bf16 %v6050_v57  ;;  %v6051_v63 = vunpack.i.l.bf16 %v6050_v57 }
 0x274   : > { %v6045_v56 = vpop.permute.xlu0 %6044  ;;  %v5654_v7 = vpack.c.bf16 %v6052_v62, %v6051_v63 }
 0x275   : > { %v6047_v58 = vunpack.i.h.bf16 %v6045_v56  ;;  %v6046_v60 = vunpack.i.l.bf16 %v6045_v56  ;;  %v6060_v14 = vpop.permute.xlu1 %6059 }
 0x276   : > { %v6062_v18 = vunpack.i.h.bf16 %v6060_v14  ;;  %v6061_v19 = vunpack.i.l.bf16 %v6060_v14 }
 0x277   : > { %v5650_v6 = vpack.c.bf16 %v6047_v58, %v6046_v60 }
 0x278   : > { %v6055_v13 = vpop.permute.xlu0 %6054  ;;  %v5662_v35 = vpack.c.bf16 %v6062_v18, %v6061_v19 }
 0x279   : > { %5651 = vmatprep.subr.bf16.mxu1 %v5650_v6  ;;  %v6057_v15 = vunpack.i.h.bf16 %v6055_v13  ;;  %v6056_v16 = vunpack.i.l.bf16 %v6055_v13 }
 0x27a   : > { %5653 = vmatpush3.bf16.msra.mxu1 %v5650_v6 }
 0x27b   : > { %5655 = vmatprep.subr.bf16.mxu1 %v5654_v7  ;;  %v5658_v20 = vpack.c.bf16 %v6057_v15, %v6056_v16 }
 0x27c   : > { %v6065_v27 = vpop.permute.xlu0 %6064 }
 0x27d   : > { %v6067_v32 = vunpack.i.h.bf16 %v6065_v27  ;;  %v6066_v23 = vunpack.i.l.bf16 %v6065_v27 }
 0x27e   : > { %5657 = vmatpush3.bf16.msra.mxu1 %v5654_v7 }
 0x27f   : > { %5659 = vmatprep.subr.bf16.mxu1 %v5658_v20  ;;  %v7252_v36 = vpack.c.bf16 %v6067_v32, %v6066_v23 }
 0x282   : > { %5661 = vmatpush3.bf16.msra.mxu1 %v5658_v20 }
 0x283   : > { %5663 = vmatprep.subr.bf16.mxu1 %v5662_v35 }
 0x286   : > { %5665 = vmatpush3.bf16.msra.mxu1 %v5662_v35 }
 0x287   : > { %5691 = vmatprep.subr.bf16.mxu1 %v7252_v36 }
 0x2a9   : > { %v7244_v17 = vpop.f32.mrb[0].mxu1 }
 0x2aa   : > { %9080 = vst [vmem:[#allocation16_spill] sm:$0xff] %v7244_v17  ;;  %v7246_v21 = vpop.f32.mrb[1].mxu1 }
 0x2ab   : > { %9081 = vst [vmem:[#allocation17_spill] sm:$0xff] %v7246_v21  ;;  %v6681_v21 = vld [vmem:[%s6924_s27 + $0x30] sm:$0xff] }
 0x2ad   : > { %v7248_v28 = vpop.f32.mrb[2].mxu1 }
 0x2ae   : > { %9082 = vst [vmem:[#allocation18_spill] sm:$0xff] %v7248_v28  ;;  %v7250_v25 = vpop.f32.mrb[3].mxu1 }
 0x2af   : > { %9083 = vst [vmem:[#allocation19_spill] sm:$0xff] %v7250_v25 }
 0x2de   : > { %v7255_v37 = vpop.f32.mrb[4].mxu1 }
 0x2df   : > { %9084 = vst [vmem:[#allocation20_spill] sm:$0xff] %v7255_v37  ;;  %v7257_v38 = vpop.f32.mrb[5].mxu1 }
 0x2e0   : > { %9085 = vst [vmem:[#allocation21_spill] sm:$0xff] %v7257_v38 }
 0x2ea   : > { %v7259_v40 = vpop.f32.mrb[6].mxu1 }
 0x2eb   : > { %9086 = vst [vmem:[#allocation22_spill] sm:$0xff] %v7259_v40  ;;  %v7261_v41 = vpop.f32.mrb[7].mxu1 }
 0x2ec   : > { %9087 = vst [vmem:[#allocation23_spill] sm:$0xff] %v7261_v41 }
 0x2ee   : > { %v7263_v45 = vpop.f32.mrb[8].mxu1 }
 0x2ef   : > { %v7265_v46 = vpop.f32.mrb[9].mxu1  ;;  %v1122_v6 = vsel %vm732_vm2, %v7263_v45, -inf }
 0x2f0   : > { %v1119_v13 = vsel %vm732_vm2, %v7265_v46, -inf }
 0x2f2   : > { %v7267_v49 = vpop.f32.mrb[10].mxu1 }
 0x2f3   : > { %v7269_v53 = vpop.f32.mrb[11].mxu1  ;;  %v1128_v15 = vsel %vm732_vm2, %v7267_v49, -inf }
 0x2f4   : > { %v7271_v59 = vpop.f32.mrb[8].mxu0  ;;  %v1125_v20 = vsel %vm732_vm2, %v7269_v53, -inf }
 0x2f5   : > { %v7273_v0 = vpop.f32.mrb[9].mxu0  ;;  %v1572_v1 = vsel %vm732_vm2, %v7271_v59, -inf }
 0x2f6   : > { %v7277_v2 = vpop.f32.mrb[12].mxu1  ;;  %1573 = vmax.xlane.f32.xlu1 %v1572_v1  ;;  %v1569_v4 = vsel %vm732_vm2, %v7273_v0, -inf }
 0x2f7   : > { %v7281_v5 = vpop.f32.mrb[13].mxu1  ;;  %1570 = vmax.xlane.f32.xlu0 %v1569_v4  ;;  %v1134_v32 = vsel %vm732_vm2, %v7277_v2, -inf }
 0x2f8   : > { %v7283_v8 = vpop.f32.mrb[10].mxu0  ;;  %v1131_v27 = vsel %vm732_vm2, %v7281_v5, -inf }
 0x2f9   : > { %v7285_v56 = vpop.f32.mrb[11].mxu0  ;;  %v1578_v57 = vsel %vm732_vm2, %v7283_v8, -inf }
 0x2fa   : > { %v7289_v58 = vpop.f32.mrb[14].mxu1  ;;  %1579 = vmax.xlane.f32.xlu1 %v1578_v57  ;;  %v1575_v60 = vsel %vm732_vm2, %v7285_v56, -inf }
 0x2fb   : > { %v7293_v62 = vpop.f32.mrb[15].mxu1  ;;  %1576 = vmax.xlane.f32.xlu0 %v1575_v60  ;;  %v1140_v23 = vsel %vm732_vm2, %v7289_v58, -inf }
 0x2fc   : > { %v7295_v63 = vpop.f32.mrb[12].mxu0  ;;  %v1137_v1 = vsel %vm732_vm2, %v7293_v62, -inf }
 0x2fd   : > { %v7299_v7 = vpop.f32.mrb[13].mxu0  ;;  %v1584_v35 = vsel %vm732_vm2, %v7295_v63, -inf }
 0x2fe   : > { %1123 = vmax.xlane.f32.xlu1 %v1122_v6  ;;  %v1581_v18 = vsel %vm732_vm2, %v7299_v7, -inf }
 0x2ff   : > { %1120 = vmax.xlane.f32.xlu0 %v1119_v13 }
 0x300   : > { %v7303_v14 = vpop.f32.mrb[14].mxu0 }
 0x301   : > { %v7307_v16 = vpop.f32.mrb[15].mxu0  ;;  %v1590_v4 = vsel %vm732_vm2, %v7303_v14, -inf }
 0x302   : > { %1129 = vmax.xlane.f32.xlu1 %v1128_v15  ;;  %v1587_v19 = vsel %vm732_vm2, %v7307_v16, -inf }
 0x303   : > { %1582 = vmax.xlane.f32.xlu0 %v1581_v18 }
 0x306   : > { %1588 = vmax.xlane.f32.xlu1 %v1587_v19 }
 0x307   : > { %1126 = vmax.xlane.f32.xlu0 %v1125_v20 }
 0x30a   : > { %1132 = vmax.xlane.f32.xlu1 %v1131_v27 }
 0x30b   : > { %1135 = vmax.xlane.f32.xlu0 %v1134_v32 }
 0x30e   : > { %1141 = vmax.xlane.f32.xlu1 %v1140_v23 }
 0x30f   : > { %1585 = vmax.xlane.f32.xlu0 %v1584_v35 }
 0x312   : > { %1138 = vmax.xlane.f32.xlu1 %v1137_v1 }
 0x316   : > { %1591 = vmax.xlane.f32.xlu1 %v1590_v4 }
 0x325   : > { %6084 = vrot.lane.b32.xlu0 %v6930_v30, %s6785_s13  ;;  %v6075_v30 = vpop.permute.xlu0 %6074 }
 0x327   : > { %6089 = vrot.lane.b32.xlu1 %v6936_v33, %s6785_s13 }
 0x329   : > { %6094 = vrot.lane.b32.xlu0 %v7077_v26, %s6785_s13  ;;  %v6070_v26 = vpop.permute.xlu1 %6069 }
 0x32a   : > { %v6072_v40 = vunpack.i.h.bf16 %v6070_v26  ;;  %v6071_v41 = vunpack.i.l.bf16 %v6070_v26 }
 0x32b   : > { %6099 = vrot.lane.b32.xlu1 %v7091_v31, %s6785_s13  ;;  %v6080_v31 = vpop.permute.xlu0 %6079 }
 0x32d   : > { %1834 = vrot.lane.b32.xlu0 %v6940_v34, %s6785_s13 }
 0x32f   : > { %1836 = vrot.lane.b32.xlu1 %v6982_v43, %s6785_s13 }
 0x331   : > { %1838 = vrot.lane.b32.xlu0 %v6984_v44, %s6785_s13 }
 0x333   : > { %1840 = vrot.lane.b32.xlu1 %v6990_v47, %s6785_s13 }
 0x335   : > { %1842 = vrot.lane.b32.xlu0 %v6994_v48, %s6785_s13 }
 0x337   : > { %1844 = vrot.lane.b32.xlu1 %v7000_v51, %s6785_s13 }
 0x339   : > { %1846 = vrot.lane.b32.xlu0 %v7004_v52, %s6785_s13 }
 0x33b   : > { %1848 = vrot.lane.b32.xlu1 %v7009_v54, %s6785_s13 }
 0x33d   : > { %6104 = vrot.lane.b32.xlu0 %v7214_v9, %s6785_s13 }
 0x33f   : > { %6109 = vrot.lane.b32.xlu1 %v7218_v10, %s6785_s13 }
 0x341   : > { %6114 = vrot.lane.b32.xlu0 %v7226_v11, %s6785_s13 }
 0x343   : > { %6119 = vrot.lane.b32.xlu1 %v7230_v12, %s6785_s13 }
 0x347   : > { %6129 = vrot.lane.b32.xlu1 %v6936_v33, %s6786_s14 }
 0x383   : > { %v7351_v57 = vpop.xlane.xlu1 %1573 }
 0x384   : > { %v1571_v60 = vpop.xlane.xlu0 %1570 }
 0x387   : > { %v7353_v6 = vpop.xlane.xlu1 %1579 }
 0x388   : > { %v7355_v13 = vpop.xlane.xlu0 %1576 }
 0x38b   : > { %v1124_v15 = vpop.xlane.xlu1 %1123 }
 0x38c   : > { %v1144_v18 = vsub.f32 %v7263_v45, %v1124_v15  ;;  %v1121_v19 = vpop.xlane.xlu0 %1120 }
 0x38d   : > { %v1143_v20 = vsub.f32 %v7265_v46, %v1121_v19 }
 0x38f   : > { %6439 = vpow2.f32 %v1143_v20  ;;  %v1130_v27 = vpop.xlane.xlu1 %1129  ;;  %v5694_v20 = vpack.c.bf16 %v6072_v40, %v6071_v41 }
 0x390   : > { %6441 = vpow2.f32 %v1144_v18  ;;  %v7359_v32 = vpop.xlane.xlu0 %1582  ;;  %v1146_v35 = vsub.f32 %v7267_v49, %v1130_v27  ;;  %v6077_v49 = vunpack.i.h.bf16 %v6075_v30 }
 0x393   : > { %v7361_v23 = vpop.xlane.xlu1 %1588 }
 0x394   : > { %v1127_v1 = vpop.xlane.xlu0 %1126 }
 0x395   : > { %v1145_v4 = vsub.f32 %v7269_v53, %v1127_v1  ;;  %v6076_v53 = vunpack.i.l.bf16 %v6075_v30 }
 0x397   : > { %6443 = vpow2.f32 %v1145_v4  ;;  %v1133_v37 = vpop.xlane.xlu1 %1132  ;;  %v5698_v1 = vpack.c.bf16 %v6077_v49, %v6076_v53  ;;  %v1593_v4 = vsub.f32 %v7273_v0, %v1571_v60 }
 0x398   : > { %6445 = vpow2.f32 %v1146_v35  ;;  %v1147_v45 = vsub.f32 %v7281_v5, %v1133_v37  ;;  %v1136_v46 = vpop.xlane.xlu0 %1135  ;;  %v6082_v5 = vunpack.i.h.bf16 %v6080_v31 }
 0x399   : > { %v7366_v15 = vpop.eup %6439  ;;  %v1148_v18 = vsub.f32 %v7277_v2, %v1136_v46  ;;  %v6081_v2 = vunpack.i.l.bf16 %v6080_v31  ;;  %v1595_v31 = vsub.f32 %v7285_v56, %v7355_v13  ;;  %v1597_v56 = vsub.f32 %v7299_v7, %v7359_v32 }
 0x39a   : > { %v7369_v19 = vpop.eup %6441  ;;  %6447 = vpow2.f32 %v1147_v45  ;;  %5194 = vmatprep.mubr.msk.f32.mxu1 %vm732_vm2, %v7366_v15 }
 0x39b   : > { %6449 = vpow2.f32 %v1148_v18  ;;  %5195 = vmatmul.mubr.msk.f32.vlgmr.msra.gmra.mrb[16].mxu1 %vm732_vm2, %v7369_v19  ;;  %v1142_v26 = vpop.xlane.xlu1 %1141  ;;  %v5702_v0 = vpack.c.bf16 %v6082_v5, %v6081_v2 }
 0x39c   : > { %5693 = vmatpush3.bf16.msra.mxu1 %v7252_v36  ;;  %v1586_v37 = vpop.xlane.xlu0 %1585  ;;  %v1150_v27 = vsub.f32 %v7289_v58, %v1142_v26  ;;  %v1594_v58 = vsub.f32 %v7271_v59, %v7351_v57  ;;  %v1596_v57 = vsub.f32 %v7283_v8, %v7353_v6  ;;  %v1599_v8 = vsub.f32 %v7307_v16, %v7361_v23 }
 0x39d   : > { %5695 = vmatprep.subr.bf16.mxu1 %v5694_v20  ;;  %v1598_v49 = vsub.f32 %v7295_v63, %v1586_v37 }
 0x39f   : > { %v1139_v35 = vpop.xlane.xlu1 %1138 }
 0x3a0   : > { %5697 = vmatpush3.bf16.msra.mxu1 %v5694_v20  ;;  %v1149_v30 = vsub.f32 %v7293_v62, %v1139_v35  ;;  %v6085_v45 = vpop.permute.xlu0 %6084 }
 0x3a1   : > { %v7379_v46 = vpop.eup %6443  ;;  %5699 = vmatprep.subr.bf16.mxu1 %v5698_v1  ;;  %v6087_v40 = vunpack.i.h.bf16 %v6085_v45  ;;  %v6086_v41 = vunpack.i.l.bf16 %v6085_v45 }
 0x3a2   : > { %v7381_v36 = vpop.eup %6445  ;;  %6451 = vpow2.f32 %v1149_v30  ;;  %5197 = vmatprep.mubr.msk.f32.mxu1 %vm732_vm2, %v7379_v46 }
 0x3a3   : > { %6453 = vpow2.f32 %v1150_v27  ;;  %5198 = vmatmul.mubr.msk.f32.gmra.mrb[18].mxu1 %vm732_vm2, %v7381_v36  ;;  %v1592_v18 = vpop.xlane.xlu1 %1591  ;;  %v5706_v59 = vpack.c.bf16 %v6087_v40, %v6086_v41 }
 0x3a4   : > { %v7389_v62 = vpop.eup %6447  ;;  %6455 = vpow2.f32 %v1593_v4  ;;  %5701 = vmatpush3.bf16.msra.mxu1 %v5698_v1  ;;  %v1600_v63 = vsub.f32 %v7303_v14, %v1592_v18  ;;  %v6095_v23 = vpop.permute.xlu0 %6094 }
 0x3a5   : > { %v7393_v60 = vpop.eup %6449  ;;  %5703 = vmatprep.subr.bf16.mxu1 %v5702_v0  ;;  %5200 = vmatprep.mubr.msk.f32.mxu1 %vm732_vm2, %v7389_v62  ;;  %6457 = vpow2.f32 %v1594_v58  ;;  %v6097_v14 = vunpack.i.h.bf16 %v6095_v23  ;;  %v6096_v5 = vunpack.i.l.bf16 %v6095_v23 }
 0x3a6   : > { %6459 = vpow2.f32 %v1595_v31 }
 0x3a7   : > { %5201 = vmatmul.mubr.msk.f32.gmra.mrb[20].mxu1 %vm732_vm2, %v7393_v60  ;;  %v6090_v13 = vpop.permute.xlu1 %6089  ;;  %6461 = vpow2.f32 %v1596_v57  ;;  %v5718_v35 = vpack.c.bf16 %v6097_v14, %v6096_v5 }
 0x3a8   : > { %5705 = vmatpush3.bf16.msra.mxu1 %v5702_v0  ;;  %6463 = vpow2.f32 %v1597_v56  ;;  %v6092_v6 = vunpack.i.h.bf16 %v6090_v13  ;;  %v6091_v26 = vunpack.i.l.bf16 %v6090_v13  ;;  %v1835_v41 = vpop.permute.xlu0 %1834 }
 0x3a9   : > { %5708 = vmatprep.subr.msk.bf16.mxu1 %vm6919_vm1, %v5706_v59  ;;  %6465 = vpow2.f32 %v1598_v49 }
 0x3aa   : > { %6467 = vpow2.f32 %v1599_v8  ;;  %v5712_v16 = vpack.c.bf16 %v6092_v6, %v6091_v26  ;;  %v6679_v8 = vld [vmem:[%s6924_s27] sm:$0xff]  ;;  %v6680_v6 = vld [vmem:[%s6924_s27 + $0x8] sm:$0xff] }
 0x3ab   : > { %6469 = vpow2.f32 %v1600_v63  ;;  %v6100_v4 = vpop.permute.xlu1 %6099  ;;  %v7483_v26 = vpack.i.bf16 %v6680_v6, %v6679_v8 }
 0x3ac   : > { %v7406_v53 = vpop.eup %6451  ;;  %v6102_v45 = vunpack.i.h.bf16 %v6100_v4  ;;  %v6101_v40 = vunpack.i.l.bf16 %v6100_v4  ;;  %v1839_v18 = vpop.permute.xlu0 %1838 }
 0x3ad   : > { %9088 = vst [vmem:[#allocation24_spill] sm:$0xff] %v7406_v53  ;;  %v7410_v20 = vpop.eup %6453  ;;  %5203 = vmatprep.mubr.msk.f32.mxu1 %vm732_vm2, %v7406_v53  ;;  %6124 = vrot.lane.b32.xlu0 %v7483_v26, %s6786_s14 }
 0x3ae   : > { %9089 = vst [vmem:[#allocation25_spill] sm:$0xff] %v7410_v20  ;;  %v7414_v7 = vpop.eup %6455  ;;  %5204 = vmatmul.mubr.msk.f32.gmra.mrb[22].mxu1 %vm732_vm2, %v7410_v20  ;;  %v5724_v0 = vpack.c.bf16 %v6102_v45, %v6101_v40 }
 0x3af   : > { %5250 = vmatprep.mubr.msk.f32.mxu1 %vm732_vm2, %v7414_v7  ;;  %v7421_v32 = vpop.eup %6457  ;;  %v1837_v31 = vpop.permute.xlu1 %1836 }
 0x3b0   : > { %v7423_v37 = vpop.eup %6459  ;;  %v1843_v57 = vpop.permute.xlu0 %1842 }
 0x3b1   : > { %v7433_v2 = vpop.eup %6461 }
 0x3b2   : > { %5251 = vmatmul.mubr.msk.f32.vlgmr.msra.gmra.mrb[24].mxu1 %vm732_vm2, %v7421_v32  ;;  %v7435_v27 = vpop.eup %6463 }
 0x3b3   : > { %5711 = vmatpush3.bf16.xpose.msk.msra.mxu1 %vm6919_vm1, %v5706_v59  ;;  %5253 = vmatprep.mubr.msk.f32.mxu1 %vm732_vm2, %v7423_v37  ;;  %v7441_v1 = vpop.eup %6465  ;;  %v1841_v59 = vpop.permute.xlu1 %1840 }
 0x3b4   : > { %5714 = vmatprep.subr.msk.bf16.mxu1 %vm6919_vm1, %v5712_v16  ;;  %v7443_v30 = vpop.eup %6467  ;;  %v1847_v13 = vpop.permute.xlu0 %1846 }
 0x3b5   : > { %9090 = vst [vmem:[#allocation26_spill] sm:$0xff] %v7443_v30  ;;  %v7453_v58 = vpop.eup %6469 }
 0x3b6   : > { %5254 = vmatmul.mubr.msk.f32.gmra.mrb[26].mxu1 %vm732_vm2, %v7433_v2  ;;  %9091 = vst [vmem:[#allocation27_spill] sm:$0xff] %v7453_v58 }
 0x3b7   : > { %5256 = vmatprep.mubr.msk.f32.mxu1 %vm732_vm2, %v7435_v27  ;;  %v1845_v56 = vpop.permute.xlu1 %1844 }
 0x3b8   : > { %v6105_v9 = vpop.permute.xlu0 %6104 }
 0x3b9   : > { %v6107_v63 = vunpack.i.h.bf16 %v6105_v9  ;;  %v6106_v10 = vunpack.i.l.bf16 %v6105_v9 }
 0x3ba   : > { %5257 = vmatmul.mubr.msk.f32.gmra.mrb[28].mxu1 %vm732_vm2, %v7441_v1 }
 0x3bb   : > { %5717 = vmatpush3.bf16.xpose.msk.msra.mxu1 %vm6919_vm1, %v5712_v16  ;;  %5259 = vmatprep.mubr.msk.f32.mxu1 %vm732_vm2, %v7443_v30  ;;  %v1849_v49 = vpop.permute.xlu1 %1848  ;;  %v5730_v14 = vpack.c.bf16 %v6107_v63, %v6106_v10 }
 0x3bc   : > { %5720 = vmatprep.subr.msk.bf16.mxu1 %vm6919_vm1, %v5718_v35  ;;  %v6115_v12 = vpop.permute.xlu0 %6114 }
 0x3bd   : > { %5731 = vmatprep.subr.bf16.mxu0 %v5730_v14  ;;  %v6117_v33 = vunpack.i.h.bf16 %v6115_v12 }
 0x3be   : > { %5260 = vmatmul.mubr.msk.f32.gmra.mrb[30].mxu1 %vm732_vm2, %v7453_v58  ;;  %5733 = vmatpush3.bf16.msra.mxu0 %v5730_v14 }
 0x3bf   : > { %5278 = vmatprep.mubr.msk.f32.mxu1 %vm578_vm0, %v1835_v41  ;;  %v6110_v16 = vpop.permute.xlu1 %6109 }
 0x3c0   : > { %v6112_v23 = vunpack.i.h.bf16 %v6110_v16  ;;  %v6111_v11 = vunpack.i.l.bf16 %v6110_v16 }
 0x3c2   : > { %v5734_v5 = vpack.c.bf16 %v6112_v23, %v6111_v11 }
 0x3c3   : > { %5723 = vmatpush3.bf16.xpose.msk.msra.mxu1 %vm6919_vm1, %v5718_v35  ;;  %v6116_v35 = vunpack.i.l.bf16 %v6115_v12  ;;  %v6120_v41 = vpop.permute.xlu1 %6119 }
 0x3c4   : > { %5726 = vmatprep.subr.msk.bf16.mxu1 %vm6919_vm1, %v5724_v0  ;;  %5735 = vmatprep.subr.bf16.mxu0 %v5734_v5 }
 0x3c5   : > { %5737 = vmatpush3.bf16.msra.mxu0 %v5734_v5  ;;  %v5738_v45 = vpack.c.bf16 %v6117_v33, %v6116_v35 }
 0x3c7   : > { %5739 = vmatprep.subr.bf16.mxu0 %v5738_v45 }
 0x3c9   : > { %5741 = vmatpush3.bf16.msra.mxu0 %v5738_v45 }
 0x3cb   : > { %5729 = vmatpush3.bf16.xpose.msk.msra.mxu1 %vm6919_vm1, %v5724_v0  ;;  %v6122_v0 = vunpack.i.h.bf16 %v6120_v41 }
 0x3d2   : > { %5279 = vmatmul.mubr.msk.f32.vlgmr.msra.gmra.mrb[32].mxu1 %vm578_vm0, %v1837_v31  ;;  %v6121_v31 = vunpack.i.l.bf16 %v6120_v41 }
 0x3d3   : > { %5281 = vmatprep.mubr.msk.f32.mxu1 %vm578_vm0, %v1839_v18 }
 0x3d4   : > { %v5742_v18 = vpack.c.bf16 %v6122_v0, %v6121_v31 }
 0x3d6   : > { %5282 = vmatmul.mubr.msk.f32.gmra.mrb[34].mxu1 %vm578_vm0, %v1841_v59  ;;  %5743 = vmatprep.subr.bf16.mxu0 %v5742_v18 }
 0x3d7   : > { %5284 = vmatprep.mubr.msk.f32.mxu1 %vm578_vm0, %v1843_v57  ;;  %5745 = vmatpush3.bf16.msra.mxu0 %v5742_v18 }
 0x3da   : > { %5285 = vmatmul.mubr.msk.f32.gmra.mrb[36].mxu1 %vm578_vm0, %v1845_v56 }
 0x3db   : > { %5287 = vmatprep.mubr.msk.f32.mxu1 %vm578_vm0, %v1847_v13 }
 0x3de   : > { %5288 = vmatmul.mubr.msk.f32.gmra.mrb[38].mxu1 %vm578_vm0, %v1849_v49 }
 0x41f   : > { %v6125_v49 = vpop.permute.xlu0 %6124 }
 0x420   : > { %v6127_v8 = vunpack.i.h.bf16 %v6125_v49  ;;  %v6126_v6 = vunpack.i.l.bf16 %v6125_v49 }
 0x422   : > { %v7499_v9 = vpack.c.bf16 %v6127_v8, %v6126_v6 }
 0x424   : > { %5748 = vmatprep.subr.msk.bf16.mxu0 %vm6919_vm1, %v7499_v9 }
 0x46e   : > { %v7487_v4 = vpop.f32.mrb[16].mxu1 }
 0x46f   : > { %9092 = vst [vmem:[#allocation28_spill] sm:$0xff] %v7487_v4  ;;  %v7489_v40 = vpop.f32.mrb[17].mxu1 }
 0x470   : > { %9093 = vst [vmem:[#allocation29_spill] sm:$0xff] %v7489_v40 }
 0x476   : > { %v7491_v59 = vpop.f32.mrb[18].mxu1 }
 0x477   : > { %9094 = vst [vmem:[#allocation30_spill] sm:$0xff] %v7491_v59  ;;  %v7493_v57 = vpop.f32.mrb[19].mxu1 }
 0x478   : > { %9095 = vst [vmem:[#allocation31_spill] sm:$0xff] %v7493_v57 }
 0x47a   : > { %v7495_v56 = vpop.f32.mrb[20].mxu1 }
 0x47b   : > { %9096 = vst [vmem:[#allocation32_spill] sm:$0xff] %v7495_v56  ;;  %v7497_v13 = vpop.f32.mrb[21].mxu1 }
 0x47c   : > { %9097 = vst [vmem:[#allocation33_spill] sm:$0xff] %v7497_v13 }
 0x481   : > { %v7501_v63 = vpop.f32.mrb[22].mxu1 }
 0x482   : > { %9098 = vst [vmem:[#allocation34_spill] sm:$0xff] %v7501_v63  ;;  %v7503_v10 = vpop.f32.mrb[23].mxu1 }
 0x483   : > { %9099 = vst [vmem:[#allocation35_spill] sm:$0xff] %v7503_v10 }
 0x485   : > { %v7508_v16 = vpop.f32.mrb[24].mxu1 }
 0x486   : > { %9100 = vst [vmem:[#allocation36_spill] sm:$0xff] %v7508_v16  ;;  %v7510_v23 = vpop.f32.mrb[25].mxu1 }
 0x487   : > { %9101 = vst [vmem:[#allocation37_spill] sm:$0xff] %v7510_v23 }
 0x489   : > { %v7512_v11 = vpop.f32.mrb[26].mxu1 }
 0x48a   : > { %9102 = vst [vmem:[#allocation38_spill] sm:$0xff] %v7512_v11  ;;  %v7514_v14 = vpop.f32.mrb[27].mxu1 }
 0x48b   : > { %9103 = vst [vmem:[#allocation39_spill] sm:$0xff] %v7514_v14 }
 0x48d   : > { %v7516_v5 = vpop.f32.mrb[28].mxu1 }
 0x48e   : > { %9104 = vst [vmem:[#allocation40_spill] sm:$0xff] %v7516_v5  ;;  %v7518_v12 = vpop.f32.mrb[29].mxu1 }
 0x48f   : > { %9105 = vst [vmem:[#allocation41_spill] sm:$0xff] %v7518_v12 }
 0x491   : > { %v7520_v33 = vpop.f32.mrb[30].mxu1 }
 0x492   : > { %9106 = vst [vmem:[#allocation42_spill] sm:$0xff] %v7520_v33  ;;  %v7522_v35 = vpop.f32.mrb[31].mxu1 }
 0x493   : > { %9107 = vst [vmem:[#allocation43_spill] sm:$0xff] %v7522_v35  ;;  %v6682_v35 = vld [vmem:[%s6924_s27 + $0x38] sm:$0xff] }
 0x494   : > { %v7536_v33 = vpack.i.bf16 %v6682_v35, %v6681_v21  ;;  %v6130_v35 = vpop.permute.xlu1 %6129 }
 0x495   : > { %v6132_v42 = vunpack.i.h.bf16 %v6130_v35  ;;  %v6131_v56 = vunpack.i.l.bf16 %v6130_v35 }
 0x4a5   : > { %v5280_v45 = vpop.f32.mrb[32].mxu1 }
 0x4a6   : > { %v1964_v41 = vpop.f32.mrb[33].mxu1  ;;  %v2006_v0 = vsel %vm732_vm2, %v5280_v45, -inf }
 0x4a7   : > { %2007 = vmax.xlane.f32.xlu1 %v2006_v0  ;;  %v2003_v31 = vsel %vm732_vm2, %v1964_v41, -inf }
 0x4a8   : > { %2004 = vmax.xlane.f32.xlu0 %v2003_v31 }
 0x4a9   : > { %v5283_v18 = vpop.f32.mrb[34].mxu1 }
 0x4aa   : > { %v1974_v49 = vpop.f32.mrb[35].mxu1  ;;  %v2012_v8 = vsel %vm732_vm2, %v5283_v18, -inf }
 0x4ab   : > { %2013 = vmax.xlane.f32.xlu1 %v2012_v8  ;;  %v2009_v6 = vsel %vm732_vm2, %v1974_v49, -inf  ;;  %v6683_v8 = vld [vmem:[%s6924_s27 + $0x20] sm:$0xff] }
 0x4ac   : > { %2010 = vmax.xlane.f32.xlu0 %v2009_v6  ;;  %v6684_v6 = vld [vmem:[%s6924_s27 + $0x28] sm:$0xff] }
 0x4ad   : > { %v5286_v38 = vpop.f32.mrb[36].mxu1  ;;  %v7542_v10 = vpack.i.bf16 %v6684_v6, %v6683_v8 }
 0x4ae   : > { %v2018_v17 = vsel %vm732_vm2, %v5286_v38, -inf  ;;  %v1984_v28 = vpop.f32.mrb[37].mxu1 }
 0x4af   : > { %v2015_v0 = vsel %vm732_vm2, %v1984_v28, -inf }
 0x4b0   : > { %2019 = vmax.xlane.f32.xlu0 %v2018_v17 }
 0x4b1   : > { %v7530_v25 = vpop.f32.mrb[38].mxu1 }
 0x4b2   : > { %v7532_v31 = vpop.f32.mrb[39].mxu1  ;;  %v2024_v17 = vsel %vm732_vm2, %v7530_v25, -inf }
 0x4b3   : > { %v2021_v21 = vsel %vm732_vm2, %v7532_v31, -inf }
 0x4b4   : > { %2016 = vmax.xlane.f32.xlu0 %v2015_v0 }
 0x4bc   : > { %6139 = vrot.lane.b32.xlu1 %v7536_v33, %s6786_s14 }
 0x4ca   : > { %6134 = vrot.lane.b32.xlu0 %v7542_v10, %s6786_s14 }
 0x4ce   : > { %2268 = vrot.lane.b32.xlu0 %v6940_v34, %s6786_s14 }
 0x4d2   : > { %2272 = vrot.lane.b32.xlu0 %v6984_v44, %s6786_s14 }
 0x4d6   : > { %2276 = vrot.lane.b32.xlu0 %v6994_v48, %s6786_s14 }
 0x4da   : > { %2280 = vrot.lane.b32.xlu0 %v7004_v52, %s6786_s14 }
 0x4e0   : > { %2025 = vmax.xlane.f32.xlu1 %v2024_v17 }
 0x4e4   : > { %2022 = vmax.xlane.f32.xlu1 %v2021_v21 }
 0x4f5   : > { %2270 = vrot.lane.b32.xlu1 %v6982_v43, %s6786_s14 }
 0x4f9   : > { %2274 = vrot.lane.b32.xlu1 %v6990_v47, %s6786_s14 }
 0x4fd   : > { %2278 = vrot.lane.b32.xlu1 %v7000_v51, %s6786_s14 }
 0x501   : > { %2282 = vrot.lane.b32.xlu1 %v7009_v54, %s6786_s14 }
 0x534   : > { %v2008_v0 = vpop.xlane.xlu1 %2007 }
 0x535   : > { %v2028_v8 = vsub.f32 %v5280_v45, %v2008_v0  ;;  %v2005_v6 = vpop.xlane.xlu0 %2004  ;;  %v5752_v45 = vpack.c.bf16 %v6132_v42, %v6131_v56 }
 0x536   : > { %v2027_v17 = vsub.f32 %v1964_v41, %v2005_v6 }
 0x538   : > { %6471 = vpow2.f32 %v2027_v17  ;;  %v2014_v63 = vpop.xlane.xlu1 %2013 }
 0x539   : > { %6473 = vpow2.f32 %v2028_v8  ;;  %v2030_v21 = vsub.f32 %v5283_v18, %v2014_v63  ;;  %v2011_v12 = vpop.xlane.xlu0 %2010 }
 0x53a   : > { %v2029_v5 = vsub.f32 %v1974_v49, %v2011_v12 }
 0x53c   : > { %6475 = vpow2.f32 %v2029_v5  ;;  %v6140_v42 = vpop.permute.xlu1 %6139 }
 0x53d   : > { %6477 = vpow2.f32 %v2030_v21  ;;  %v2020_v13 = vpop.xlane.xlu0 %2019  ;;  %v6141_v5 = vunpack.i.l.bf16 %v6140_v42 }
 0x53e   : > { %v2032_v39 = vsub.f32 %v5286_v38, %v2020_v13 }
 0x541   : > { %v2017_v29 = vpop.xlane.xlu0 %2016 }
 0x542   : > { %v7566_v22 = vpop.eup %6471  ;;  %v2031_v14 = vsub.f32 %v1984_v28, %v2017_v29 }
 0x543   : > { %v7568_v11 = vpop.eup %6473  ;;  %5306 = vmatprep.mubr.msk.f32.mxu0 %vm732_vm2, %v7566_v22 }
 0x544   : > { %6479 = vpow2.f32 %v2031_v14  ;;  %5307 = vmatmul.mubr.msk.f32.vlgmr.msra.gmra.mrb[16].mxu0 %vm732_vm2, %v7568_v11  ;;  %v6142_v14 = vunpack.i.h.bf16 %v6140_v42 }
 0x545   : > { %6481 = vpow2.f32 %v2032_v39  ;;  %5751 = vmatpush3.bf16.xpose.msk.msra.mxu0 %vm6919_vm1, %v7499_v9  ;;  %v6135_v38 = vpop.permute.xlu0 %6134 }
 0x546   : > { %v7577_v13 = vpop.eup %6475  ;;  %5754 = vmatprep.subr.msk.bf16.mxu0 %vm6919_vm1, %v5752_v45  ;;  %v6137_v29 = vunpack.i.h.bf16 %v6135_v38  ;;  %v6136_v28 = vunpack.i.l.bf16 %v6135_v38  ;;  %v5764_v12 = vpack.c.bf16 %v6142_v14, %v6141_v5  ;;  %v6687_v14 = vld [vmem:[%s7018_s12 + $0x10] sm:$0xff]  ;;  %v6688_v5 = vld [vmem:[%s7018_s12 + $0x18] sm:$0xff] }
 0x547   : > { %v7581_v63 = vpop.eup %6477  ;;  %5309 = vmatprep.mubr.msk.f32.mxu0 %vm732_vm2, %v7577_v13 }
 0x548   : > { %5310 = vmatmul.mubr.msk.f32.gmra.mrb[18].mxu0 %vm732_vm2, %v7581_v63  ;;  %v5758_v39 = vpack.c.bf16 %v6137_v29, %v6136_v28  ;;  %v6685_v28 = vld [vmem:[%s7018_s12] sm:$0xff] }
 0x549   : > { %v2269_v0 = vpop.permute.xlu0 %2268 }
 0x54d   : > { %5757 = vmatpush3.bf16.xpose.msk.msra.mxu0 %vm6919_vm1, %v5752_v45 }
 0x54e   : > { %v7589_v56 = vpop.eup %6479  ;;  %5760 = vmatprep.subr.msk.bf16.mxu0 %vm6919_vm1, %v5758_v39 }
 0x54f   : > { %v7593_v9 = vpop.eup %6481  ;;  %5312 = vmatprep.mubr.msk.f32.mxu0 %vm732_vm2, %v7589_v56 }
 0x550   : > { %9108 = vst [vmem:[#allocation44_spill] sm:$0xff] %v7593_v9  ;;  %5313 = vmatmul.mubr.msk.f32.gmra.mrb[20].mxu0 %vm732_vm2, %v7593_v9 }
 0x555   : > { %5763 = vmatpush3.bf16.xpose.msk.msra.mxu0 %vm6919_vm1, %v5758_v39  ;;  %v6686_v39 = vld [vmem:[%s7018_s12 + $0x8] sm:$0xff] }
 0x556   : > { %5766 = vmatprep.subr.msk.bf16.mxu0 %vm6919_vm1, %v5764_v12  ;;  %v7625_v42 = vpack.i.bf16 %v6686_v39, %v6685_v28 }
 0x558   : > { %6144 = vrot.lane.b32.xlu0 %v7625_v42, %s6786_s14 }
 0x55d   : > { %5769 = vmatpush3.bf16.xpose.msk.msra.mxu0 %vm6919_vm1, %v5764_v12  ;;  %v7629_v12 = vpack.i.bf16 %v6688_v5, %v6687_v14 }
 0x55f   : > { %6149 = vrot.lane.b32.xlu1 %v7629_v12, %s6786_s14 }
 0x56d   : > { %v2026_v41 = vpop.xlane.xlu1 %2025 }
 0x56e   : > { %v2034_v18 = vsub.f32 %v7530_v25, %v2026_v41  ;;  %v2273_v25 = vpop.permute.xlu0 %2272  ;;  %v6689_v41 = vld [vmem:[%s7018_s12 + $0x20] sm:$0xff] }
 0x571   : > { %v2023_v49 = vpop.xlane.xlu1 %2022 }
 0x572   : > { %v2033_v35 = vsub.f32 %v7532_v31, %v2023_v49  ;;  %v2277_v21 = vpop.permute.xlu0 %2276 }
 0x574   : > { %6483 = vpow2.f32 %v2033_v35  ;;  %v6691_v35 = vld [vmem:[%s7018_s12 + $0x30] sm:$0xff] }
 0x575   : > { %6485 = vpow2.f32 %v2034_v18  ;;  %v2271_v8 = vpop.permute.xlu1 %2270  ;;  %v6690_v18 = vld [vmem:[%s7018_s12 + $0x28] sm:$0xff] }
 0x576   : > { %v2281_v38 = vpop.permute.xlu0 %2280  ;;  %v7635_v49 = vpack.i.bf16 %v6690_v18, %v6689_v41 }
 0x578   : > { %6154 = vrot.lane.b32.xlu0 %v7635_v49, %s6786_s14 }
 0x579   : > { %v2275_v31 = vpop.permute.xlu1 %2274 }
 0x57c   : > { %6164 = vrot.lane.b32.xlu0 %v7483_v26, %s6787_s15 }
 0x57d   : > { %v2279_v45 = vpop.permute.xlu1 %2278 }
 0x57e   : > { %v7607_v6 = vpop.eup %6483 }
 0x57f   : > { %9109 = vst [vmem:[#allocation45_spill] sm:$0xff] %v7607_v6  ;;  %v7609_v17 = vpop.eup %6485  ;;  %5315 = vmatprep.mubr.msk.f32.mxu0 %vm732_vm2, %v7607_v6 }
 0x580   : > { %9110 = vst [vmem:[#allocation46_spill] sm:$0xff] %v7609_v17  ;;  %5316 = vmatmul.mubr.msk.f32.gmra.mrb[22].mxu0 %vm732_vm2, %v7609_v17 }
 0x581   : > { %5334 = vmatprep.mubr.msk.f32.mxu0 %vm578_vm0, %v2269_v0  ;;  %v2283_v29 = vpop.permute.xlu1 %2282  ;;  %v6692_v0 = vld [vmem:[%s7018_s12 + $0x38] sm:$0xff]  ;;  %s8190_s12 = scalar_lea.vmem %s9042_s3, %s4812_s19 }
 0x584   : > { %5335 = vmatmul.mubr.msk.f32.vlgmr.msra.gmra.mrb[24].mxu0 %vm578_vm0, %v2271_v8  ;;  %v7641_v8 = vpack.i.bf16 %v6692_v0, %v6691_v35 }
 0x585   : > { %5337 = vmatprep.mubr.msk.f32.mxu0 %vm578_vm0, %v2273_v25  ;;  %v6693_v25 = vld [vmem:[%s6924_s27 + $0x10] sm:$0xff] }
 0x586   : > { %6159 = vrot.lane.b32.xlu1 %v7641_v8, %s6786_s14 }
 0x588   : > { %5338 = vmatmul.mubr.msk.f32.gmra.mrb[26].mxu0 %vm578_vm0, %v2275_v31  ;;  %v6694_v31 = vld [vmem:[%s6924_s27 + $0x18] sm:$0xff] }
 0x589   : > { %5340 = vmatprep.mubr.msk.f32.mxu0 %vm578_vm0, %v2277_v21  ;;  %v7649_v21 = vpack.i.bf16 %v6694_v31, %v6693_v25 }
 0x58b   : > { %6169 = vrot.lane.b32.xlu1 %v7649_v21, %s6787_s15 }
 0x58c   : > { %5341 = vmatmul.mubr.msk.f32.gmra.mrb[28].mxu0 %vm578_vm0, %v2279_v45 }
 0x58d   : > { %5343 = vmatprep.mubr.msk.f32.mxu0 %vm578_vm0, %v2281_v38 }
 0x590   : > { %5344 = vmatmul.mubr.msk.f32.gmra.mrb[30].mxu0 %vm578_vm0, %v2283_v29 }
 0x5ca   : > { %v6145_v38 = vpop.permute.xlu0 %6144 }
 0x5cb   : > { %v6147_v28 = vunpack.i.h.bf16 %v6145_v38  ;;  %v6146_v39 = vunpack.i.l.bf16 %v6145_v38 }
 0x5cd   : > { %v5770_v18 = vpack.c.bf16 %v6147_v28, %v6146_v39 }
 0x5cf   : > { %5771 = vmatprep.subr.bf16.mxu1 %v5770_v18 }
 0x5d0   : > { %5773 = vmatpush3.bf16.msra.mxu1 %v5770_v18 }
 0x5d1   : > { %v6150_v14 = vpop.permute.xlu1 %6149 }
 0x5d2   : > { %v6152_v5 = vunpack.i.h.bf16 %v6150_v14  ;;  %v6151_v41 = vunpack.i.l.bf16 %v6150_v14 }
 0x5d4   : > { %v5774_v25 = vpack.c.bf16 %v6152_v5, %v6151_v41 }
 0x5d6   : > { %5775 = vmatprep.subr.bf16.mxu1 %v5774_v25 }
 0x5d7   : > { %5777 = vmatpush3.bf16.msra.mxu1 %v5774_v25 }
 0x5ea   : > { %v6155_v0 = vpop.permute.xlu0 %6154 }
 0x5eb   : > { %v6157_v61 = vunpack.i.h.bf16 %v6155_v0  ;;  %v6156_v3 = vunpack.i.l.bf16 %v6155_v0 }
 0x5ee   : > { %v6165_v39 = vpop.permute.xlu0 %6164 }
 0x5ef   : > { %v6167_v5 = vunpack.i.h.bf16 %v6165_v39  ;;  %v6166_v41 = vunpack.i.l.bf16 %v6165_v39 }
 0x5f1   : > { %v7667_v0 = vpack.c.bf16 %v6167_v5, %v6166_v41 }
 0x5f8   : > { %v6160_v57 = vpop.permute.xlu1 %6159 }
 0x5f9   : > { %v6162_v59 = vunpack.i.h.bf16 %v6160_v57  ;;  %v6161_v55 = vunpack.i.l.bf16 %v6160_v57 }
 0x5fb   : > { %v5782_v38 = vpack.c.bf16 %v6162_v59, %v6161_v55 }
 0x617   : > { %v7655_v45 = vpop.f32.mrb[16].mxu0 }
 0x618   : > { %9111 = vst [vmem:[#allocation47_spill] sm:$0xff] %v7655_v45  ;;  %v7657_v29 = vpop.f32.mrb[17].mxu0  ;;  %v5778_v45 = vpack.c.bf16 %v6157_v61, %v6156_v3 }
 0x619   : > { %9112 = vst [vmem:[#allocation48_spill] sm:$0xff] %v7657_v29 }
 0x61a   : > { %5779 = vmatprep.subr.bf16.mxu1 %v5778_v45 }
 0x61b   : > { %v7659_v35 = vpop.f32.mrb[18].mxu0  ;;  %5781 = vmatpush3.bf16.msra.mxu1 %v5778_v45 }
 0x61c   : > { %9113 = vst [vmem:[#allocation49_spill] sm:$0xff] %v7659_v35  ;;  %v7661_v31 = vpop.f32.mrb[19].mxu0  ;;  %5783 = vmatprep.subr.bf16.mxu1 %v5782_v38 }
 0x61d   : > { %9114 = vst [vmem:[#allocation50_spill] sm:$0xff] %v7661_v31 }
 0x61f   : > { %5785 = vmatpush3.bf16.msra.mxu1 %v5782_v38 }
 0x620   : > { %5788 = vmatprep.subr.msk.bf16.mxu1 %vm6919_vm1, %v7667_v0 }
 0x623   : > { %v7663_v14 = vpop.f32.mrb[20].mxu0 }
 0x624   : > { %9115 = vst [vmem:[#allocation51_spill] sm:$0xff] %v7663_v14  ;;  %v7665_v28 = vpop.f32.mrb[21].mxu0 }
 0x625   : > { %9116 = vst [vmem:[#allocation52_spill] sm:$0xff] %v7665_v28 }
 0x653   : > { %v7672_v61 = vpop.f32.mrb[22].mxu0 }
 0x654   : > { %9117 = vst [vmem:[#allocation53_spill] sm:$0xff] %v7672_v61  ;;  %v7674_v3 = vpop.f32.mrb[23].mxu0 }
 0x655   : > { %9118 = vst [vmem:[#allocation54_spill] sm:$0xff] %v7674_v3 }
 0x657   : > { %v5336_v55 = vpop.f32.mrb[24].mxu0 }
 0x658   : > { %v2398_v59 = vpop.f32.mrb[25].mxu0  ;;  %v2440_v57 = vsel %vm732_vm2, %v5336_v55, -inf }
 0x659   : > { %2441 = vmax.xlane.f32.xlu1 %v2440_v57  ;;  %v2437_v45 = vsel %vm732_vm2, %v2398_v59, -inf }
 0x65a   : > { %2438 = vmax.xlane.f32.xlu0 %v2437_v45 }
 0x65b   : > { %v5339_v18 = vpop.f32.mrb[26].mxu0 }
 0x65c   : > { %v2408_v25 = vpop.f32.mrb[27].mxu0  ;;  %v2446_v38 = vsel %vm732_vm2, %v5339_v18, -inf }
 0x65d   : > { %2447 = vmax.xlane.f32.xlu1 %v2446_v38  ;;  %v2443_v39 = vsel %vm732_vm2, %v2408_v25, -inf  ;;  %v6170_v38 = vpop.permute.xlu1 %6169 }
 0x65e   : > { %2444 = vmax.xlane.f32.xlu0 %v2443_v39  ;;  %v6172_v16 = vunpack.i.h.bf16 %v6170_v38  ;;  %v6171_v23 = vunpack.i.l.bf16 %v6170_v38 }
 0x65f   : > { %v5342_v5 = vpop.f32.mrb[28].mxu0 }
 0x660   : > { %v2452_v41 = vsel %vm732_vm2, %v5342_v5, -inf  ;;  %v2418_v3 = vpop.f32.mrb[29].mxu0 }
 0x661   : > { %v2449_v61 = vsel %vm732_vm2, %v2418_v3, -inf }
 0x662   : > { %2453 = vmax.xlane.f32.xlu0 %v2452_v41 }
 0x663   : > { %v7682_v28 = vpop.f32.mrb[30].mxu0 }
 0x664   : > { %v7684_v57 = vpop.f32.mrb[31].mxu0 }
 0x665   : > { %v2455_v45 = vsel %vm732_vm2, %v7684_v57, -inf }
 0x666   : > { %2450 = vmax.xlane.f32.xlu0 %v2449_v61  ;;  %v2458_v61 = vsel %vm732_vm2, %v7682_v28, -inf }
 0x66e   : > { %6179 = vrot.lane.b32.xlu1 %v7536_v33, %s6787_s15 }
 0x67c   : > { %6174 = vrot.lane.b32.xlu0 %v7542_v10, %s6787_s15 }
 0x680   : > { %2702 = vrot.lane.b32.xlu0 %v6940_v34, %s6787_s15 }
 0x684   : > { %2706 = vrot.lane.b32.xlu0 %v6984_v44, %s6787_s15 }
 0x688   : > { %2710 = vrot.lane.b32.xlu0 %v6994_v48, %s6787_s15 }
 0x68c   : > { %2714 = vrot.lane.b32.xlu0 %v7004_v52, %s6787_s15 }
 0x690   : > { %6184 = vrot.lane.b32.xlu0 %v7625_v42, %s6787_s15 }
 0x692   : > { %2459 = vmax.xlane.f32.xlu1 %v2458_v61 }
 0x694   : > { %6194 = vrot.lane.b32.xlu0 %v7635_v49, %s6787_s15 }
 0x696   : > { %2456 = vmax.xlane.f32.xlu1 %v2455_v45 }
 0x698   : > { %6204 = vrot.lane.b32.xlu0 %v7483_v26, %s6788_s16 }
 0x6a7   : > { %2704 = vrot.lane.b32.xlu1 %v6982_v43, %s6787_s15 }
 0x6ab   : > { %2708 = vrot.lane.b32.xlu1 %v6990_v47, %s6787_s15 }
 0x6af   : > { %2712 = vrot.lane.b32.xlu1 %v7000_v51, %s6787_s15 }
 0x6b3   : > { %2716 = vrot.lane.b32.xlu1 %v7009_v54, %s6787_s15 }
 0x6b7   : > { %6189 = vrot.lane.b32.xlu1 %v7629_v12, %s6787_s15 }
 0x6bb   : > { %6199 = vrot.lane.b32.xlu1 %v7641_v8, %s6787_s15 }
 0x6bf   : > { %6209 = vrot.lane.b32.xlu1 %v7649_v21, %s6788_s16 }
 0x6e6   : > { %v2442_v39 = vpop.xlane.xlu1 %2441 }
 0x6e7   : > { %v2462_v41 = vsub.f32 %v5336_v55, %v2442_v39  ;;  %v2439_v61 = vpop.xlane.xlu0 %2438 }
 0x6e8   : > { %v2461_v14 = vsub.f32 %v2398_v59, %v2439_v61 }
 0x6ea   : > { %6487 = vpow2.f32 %v2461_v14  ;;  %v2448_v31 = vpop.xlane.xlu1 %2447  ;;  %v5792_v14 = vpack.c.bf16 %v6172_v16, %v6171_v23 }
 0x6eb   : > { %6489 = vpow2.f32 %v2462_v41  ;;  %v2464_v45 = vsub.f32 %v5339_v18, %v2448_v31  ;;  %v2445_v35 = vpop.xlane.xlu0 %2444 }
 0x6ec   : > { %v2463_v29 = vsub.f32 %v2408_v25, %v2445_v35 }
 0x6ee   : > { %6491 = vpow2.f32 %v2463_v29  ;;  %v6180_v16 = vpop.permute.xlu1 %6179 }
 0x6ef   : > { %6493 = vpow2.f32 %v2464_v45  ;;  %v2454_v50 = vpop.xlane.xlu0 %2453 }
 0x6f0   : > { %v2466_v4 = vsub.f32 %v5342_v5, %v2454_v50 }
 0x6f3   : > { %v2451_v40 = vpop.xlane.xlu0 %2450 }
 0x6f4   : > { %v7710_v17 = vpop.eup %6487  ;;  %v2465_v6 = vsub.f32 %v2418_v3, %v2451_v40  ;;  %v6181_v3 = vunpack.i.l.bf16 %v6180_v16 }
 0x6f5   : > { %v7712_v58 = vpop.eup %6489  ;;  %5362 = vmatprep.mubr.msk.f32.mxu1 %vm732_vm2, %v7710_v17 }
 0x6f6   : > { %6495 = vpow2.f32 %v2465_v6  ;;  %5363 = vmatmul.mubr.msk.f32.vlgmr.msra.gmra.mrb[40].mxu1 %vm732_vm2, %v7712_v58 }
 0x6f7   : > { %6497 = vpow2.f32 %v2466_v4  ;;  %5791 = vmatpush3.bf16.xpose.msk.msra.mxu1 %vm6919_vm1, %v7667_v0  ;;  %v6175_v50 = vpop.permute.xlu0 %6174  ;;  %v6182_v0 = vunpack.i.h.bf16 %v6180_v16 }
 0x6f8   : > { %v7721_v29 = vpop.eup %6491  ;;  %5794 = vmatprep.subr.msk.bf16.mxu1 %vm6919_vm1, %v5792_v14  ;;  %v6177_v40 = vunpack.i.h.bf16 %v6175_v50  ;;  %v6176_v35 = vunpack.i.l.bf16 %v6175_v50 }
 0x6f9   : > { %v7725_v31 = vpop.eup %6493  ;;  %5365 = vmatprep.mubr.msk.f32.mxu1 %vm732_vm2, %v7721_v29  ;;  %v5804_v55 = vpack.c.bf16 %v6182_v0, %v6181_v3 }
 0x6fa   : > { %5366 = vmatmul.mubr.msk.f32.gmra.mrb[42].mxu1 %vm732_vm2, %v7725_v31  ;;  %v5798_v4 = vpack.c.bf16 %v6177_v40, %v6176_v35 }
 0x6fb   : > { %v2703_v38 = vpop.permute.xlu0 %2702 }
 0x6ff   : > { %5797 = vmatpush3.bf16.xpose.msk.msra.mxu1 %vm6919_vm1, %v5792_v14  ;;  %v2707_v45 = vpop.permute.xlu0 %2706 }
 0x700   : > { %v7733_v23 = vpop.eup %6495  ;;  %5800 = vmatprep.subr.msk.bf16.mxu1 %vm6919_vm1, %v5798_v4 }
 0x701   : > { %9119 = vst [vmem:[#allocation55_spill] sm:$0xff] %v7733_v23  ;;  %v7737_v6 = vpop.eup %6497  ;;  %5368 = vmatprep.mubr.msk.f32.mxu1 %vm732_vm2, %v7733_v23 }
 0x702   : > { %9120 = vst [vmem:[#allocation56_spill] sm:$0xff] %v7737_v6  ;;  %5369 = vmatmul.mubr.msk.f32.gmra.mrb[44].mxu1 %vm732_vm2, %v7737_v6 }
 0x707   : > { %5803 = vmatpush3.bf16.xpose.msk.msra.mxu1 %vm6919_vm1, %v5798_v4 }
 0x708   : > { %5806 = vmatprep.subr.msk.bf16.mxu1 %vm6919_vm1, %v5804_v55 }
 0x70f   : > { %5809 = vmatpush3.bf16.xpose.msk.msra.mxu1 %vm6919_vm1, %v5804_v55 }
 0x71f   : > { %v2460_v59 = vpop.xlane.xlu1 %2459 }
 0x720   : > { %v2468_v18 = vsub.f32 %v7682_v28, %v2460_v59 }
 0x723   : > { %v2457_v25 = vpop.xlane.xlu1 %2456 }
 0x724   : > { %v2467_v5 = vsub.f32 %v7684_v57, %v2457_v25  ;;  %v2711_v57 = vpop.permute.xlu0 %2710 }
 0x726   : > { %6499 = vpow2.f32 %v2467_v5 }
 0x727   : > { %6501 = vpow2.f32 %v2468_v18  ;;  %v2705_v39 = vpop.permute.xlu1 %2704 }
 0x728   : > { %v2715_v50 = vpop.permute.xlu0 %2714 }
 0x72b   : > { %v2709_v28 = vpop.permute.xlu1 %2708 }
 0x72c   : > { %v6185_v4 = vpop.permute.xlu0 %6184 }
 0x72d   : > { %v6187_v0 = vunpack.i.h.bf16 %v6185_v4  ;;  %v6186_v3 = vunpack.i.l.bf16 %v6185_v4 }
 0x72f   : > { %v2713_v14 = vpop.permute.xlu1 %2712  ;;  %v5810_v25 = vpack.c.bf16 %v6187_v0, %v6186_v3 }
 0x730   : > { %v7751_v41 = vpop.eup %6499 }
 0x731   : > { %9121 = vst [vmem:[#allocation57_spill] sm:$0xff] %v7751_v41  ;;  %v7753_v61 = vpop.eup %6501  ;;  %5371 = vmatprep.mubr.msk.f32.mxu1 %vm732_vm2, %v7751_v41  ;;  %5811 = vmatprep.subr.bf16.mxu0 %v5810_v25 }
 0x732   : > { %9122 = vst [vmem:[#allocation58_spill] sm:$0xff] %v7753_v61  ;;  %5372 = vmatmul.mubr.msk.f32.gmra.mrb[46].mxu1 %vm732_vm2, %v7753_v61  ;;  %5813 = vmatpush3.bf16.msra.mxu0 %v5810_v25 }
 0x733   : > { %5390 = vmatprep.mubr.msk.f32.mxu1 %vm578_vm0, %v2703_v38  ;;  %v2717_v40 = vpop.permute.xlu1 %2716  ;;  %v6195_v38 = vpop.permute.xlu0 %6194 }
 0x736   : > { %5391 = vmatmul.mubr.msk.f32.vlgmr.msra.gmra.mrb[48].mxu1 %vm578_vm0, %v2705_v39 }
 0x737   : > { %5393 = vmatprep.mubr.msk.f32.mxu1 %vm578_vm0, %v2707_v45  ;;  %v6190_v55 = vpop.permute.xlu1 %6189  ;;  %v6205_v3 = vpop.permute.xlu0 %6204 }
 0x738   : > { %v6192_v59 = vunpack.i.h.bf16 %v6190_v55  ;;  %v6191_v18 = vunpack.i.l.bf16 %v6190_v55 }
 0x73a   : > { %5394 = vmatmul.mubr.msk.f32.gmra.mrb[50].mxu1 %vm578_vm0, %v2709_v28  ;;  %v5814_v39 = vpack.c.bf16 %v6192_v59, %v6191_v18  ;;  %v6197_v28 = vunpack.i.h.bf16 %v6195_v38  ;;  %v6207_v59 = vunpack.i.h.bf16 %v6205_v3  ;;  %v6206_v18 = vunpack.i.l.bf16 %v6205_v3 }
 0x73b   : > { %5396 = vmatprep.mubr.msk.f32.mxu1 %vm578_vm0, %v2711_v57  ;;  %v6196_v57 = vunpack.i.l.bf16 %v6195_v38 }
 0x73c   : > { %5815 = vmatprep.subr.bf16.mxu0 %v5814_v39  ;;  %v7791_v38 = vpack.c.bf16 %v6207_v59, %v6206_v18 }
 0x73d   : > { %5817 = vmatpush3.bf16.msra.mxu0 %v5814_v39 }
 0x73e   : > { %5397 = vmatmul.mubr.msk.f32.gmra.mrb[52].mxu1 %vm578_vm0, %v2713_v14  ;;  %v6200_v14 = vpop.permute.xlu1 %6199 }
 0x73f   : > { %5399 = vmatprep.mubr.msk.f32.mxu1 %vm578_vm0, %v2715_v50  ;;  %v6202_v50 = vunpack.i.h.bf16 %v6200_v14 }
 0x742   : > { %5400 = vmatmul.mubr.msk.f32.gmra.mrb[54].mxu1 %vm578_vm0, %v2717_v40  ;;  %v6201_v40 = vunpack.i.l.bf16 %v6200_v14 }
 0x744   : > { %v5822_v4 = vpack.c.bf16 %v6202_v50, %v6201_v40 }
 0x7c9   : > { %v7779_v35 = vpop.f32.mrb[40].mxu1 }
 0x7ca   : > { %9123 = vst [vmem:[#allocation59_spill] sm:$0xff] %v7779_v35  ;;  %v7781_v16 = vpop.f32.mrb[41].mxu1  ;;  %v5818_v35 = vpack.c.bf16 %v6197_v28, %v6196_v57 }
 0x7cb   : > { %9124 = vst [vmem:[#allocation60_spill] sm:$0xff] %v7781_v16 }
 0x7cc   : > { %5819 = vmatprep.subr.bf16.mxu0 %v5818_v35 }
 0x7cd   : > { %v7783_v5 = vpop.f32.mrb[42].mxu1  ;;  %5821 = vmatpush3.bf16.msra.mxu0 %v5818_v35 }
 0x7ce   : > { %9125 = vst [vmem:[#allocation61_spill] sm:$0xff] %v7783_v5  ;;  %v7785_v45 = vpop.f32.mrb[43].mxu1  ;;  %5823 = vmatprep.subr.bf16.mxu0 %v5822_v4 }
 0x7cf   : > { %9126 = vst [vmem:[#allocation62_spill] sm:$0xff] %v7785_v45 }
 0x7d1   : > { %5825 = vmatpush3.bf16.msra.mxu0 %v5822_v4 }
 0x7d2   : > { %5828 = vmatprep.subr.msk.bf16.mxu0 %vm6919_vm1, %v7791_v38 }
 0x7d5   : > { %v7787_v55 = vpop.f32.mrb[44].mxu1 }
 0x7d6   : > { %9127 = vst [vmem:[#allocation63_spill] sm:$0xff] %v7787_v55  ;;  %v7789_v0 = vpop.f32.mrb[45].mxu1 }
 0x7d7   : > { %9128 = vst [vmem:[#allocation64_spill] sm:$0xff] %v7789_v0 }
 0x805   : > { %v7796_v25 = vpop.f32.mrb[46].mxu1 }
 0x806   : > { %9129 = vst [vmem:[#allocation65_spill] sm:$0xff] %v7796_v25  ;;  %v7798_v39 = vpop.f32.mrb[47].mxu1 }
 0x807   : > { %9130 = vst [vmem:[#allocation66_spill] sm:$0xff] %v7798_v39 }
 0x809   : > { %v5392_v28 = vpop.f32.mrb[48].mxu1 }
 0x80a   : > { %v2832_v57 = vpop.f32.mrb[49].mxu1  ;;  %v2874_v14 = vsel %vm732_vm2, %v5392_v28, -inf }
 0x80b   : > { %2875 = vmax.xlane.f32.xlu1 %v2874_v14  ;;  %v2871_v35 = vsel %vm732_vm2, %v2832_v57, -inf }
 0x80c   : > { %2872 = vmax.xlane.f32.xlu0 %v2871_v35 }
 0x80d   : > { %v5395_v50 = vpop.f32.mrb[50].mxu1 }
 0x80e   : > { %v2842_v40 = vpop.f32.mrb[51].mxu1  ;;  %v2880_v4 = vsel %vm732_vm2, %v5395_v50, -inf }
 0x80f   : > { %2881 = vmax.xlane.f32.xlu1 %v2880_v4  ;;  %v2877_v3 = vsel %vm732_vm2, %v2842_v40, -inf  ;;  %v6210_v4 = vpop.permute.xlu1 %6209 }
 0x810   : > { %2878 = vmax.xlane.f32.xlu0 %v2877_v3  ;;  %v6212_v41 = vunpack.i.h.bf16 %v6210_v4  ;;  %v6211_v20 = vunpack.i.l.bf16 %v6210_v4 }
 0x811   : > { %v5398_v59 = vpop.f32.mrb[52].mxu1 }
 0x812   : > { %v2886_v18 = vsel %vm732_vm2, %v5398_v59, -inf  ;;  %v2852_v25 = vpop.f32.mrb[53].mxu1 }
 0x813   : > { %v2883_v39 = vsel %vm732_vm2, %v2852_v25, -inf }
 0x814   : > { %2887 = vmax.xlane.f32.xlu0 %v2886_v18 }
 0x815   : > { %v7806_v0 = vpop.f32.mrb[54].mxu1 }
 0x816   : > { %v7808_v14 = vpop.f32.mrb[55].mxu1 }
 0x817   : > { %v2889_v35 = vsel %vm732_vm2, %v7808_v14, -inf }
 0x818   : > { %2884 = vmax.xlane.f32.xlu0 %v2883_v39  ;;  %v2892_v39 = vsel %vm732_vm2, %v7806_v0, -inf }
 0x820   : > { %6219 = vrot.lane.b32.xlu1 %v7536_v33, %s6788_s16 }
 0x82e   : > { %6214 = vrot.lane.b32.xlu0 %v7542_v10, %s6788_s16 }
 0x832   : > { %3136 = vrot.lane.b32.xlu0 %v6940_v34, %s6788_s16 }
 0x836   : > { %3140 = vrot.lane.b32.xlu0 %v6984_v44, %s6788_s16 }
 0x83a   : > { %3144 = vrot.lane.b32.xlu0 %v6994_v48, %s6788_s16 }
 0x83e   : > { %3148 = vrot.lane.b32.xlu0 %v7004_v52, %s6788_s16 }
 0x842   : > { %6224 = vrot.lane.b32.xlu0 %v7625_v42, %s6788_s16 }
 0x844   : > { %2893 = vmax.xlane.f32.xlu1 %v2892_v39 }
 0x846   : > { %6234 = vrot.lane.b32.xlu0 %v7635_v49, %s6788_s16 }
 0x848   : > { %2890 = vmax.xlane.f32.xlu1 %v2889_v35 }
 0x84a   : > { %6244 = vrot.lane.b32.xlu0 %v7483_v26, %s6789_s17 }
 0x859   : > { %3138 = vrot.lane.b32.xlu1 %v6982_v43, %s6788_s16 }
 0x85d   : > { %3142 = vrot.lane.b32.xlu1 %v6990_v47, %s6788_s16 }
 0x861   : > { %3146 = vrot.lane.b32.xlu1 %v7000_v51, %s6788_s16 }
 0x865   : > { %3150 = vrot.lane.b32.xlu1 %v7009_v54, %s6788_s16 }
 0x869   : > { %6229 = vrot.lane.b32.xlu1 %v7629_v12, %s6788_s16 }
 0x86d   : > { %6239 = vrot.lane.b32.xlu1 %v7641_v8, %s6788_s16 }
 0x871   : > { %6249 = vrot.lane.b32.xlu1 %v7649_v21, %s6789_s17 }
 0x898   : > { %v2876_v3 = vpop.xlane.xlu1 %2875 }
 0x899   : > { %v2896_v18 = vsub.f32 %v5392_v28, %v2876_v3  ;;  %v2873_v39 = vpop.xlane.xlu0 %2872 }
 0x89a   : > { %v2895_v55 = vsub.f32 %v2832_v57, %v2873_v39 }
 0x89c   : > { %6503 = vpow2.f32 %v2895_v55  ;;  %v2882_v45 = vpop.xlane.xlu1 %2881  ;;  %v5832_v55 = vpack.c.bf16 %v6212_v41, %v6211_v20 }
 0x89d   : > { %6505 = vpow2.f32 %v2896_v18  ;;  %v2898_v35 = vsub.f32 %v5395_v50, %v2882_v45  ;;  %v2879_v5 = vpop.xlane.xlu0 %2878 }
 0x89e   : > { %v2897_v16 = vsub.f32 %v2842_v40, %v2879_v5 }
 0x8a0   : > { %6507 = vpow2.f32 %v2897_v16  ;;  %v6220_v20 = vpop.permute.xlu1 %6219 }
 0x8a1   : > { %6509 = vpow2.f32 %v2898_v35  ;;  %v2888_v61 = vpop.xlane.xlu0 %2887 }
 0x8a2   : > { %v2900_v6 = vsub.f32 %v5398_v59, %v2888_v61 }
 0x8a5   : > { %v2885_v30 = vpop.xlane.xlu0 %2884 }
 0x8a6   : > { %v7834_v9 = vpop.eup %6503  ;;  %v2899_v53 = vsub.f32 %v2852_v25, %v2885_v30  ;;  %v6221_v25 = vunpack.i.l.bf16 %v6220_v20 }
 0x8a7   : > { %v7836_v23 = vpop.eup %6505  ;;  %5418 = vmatprep.mubr.msk.f32.mxu0 %vm732_vm2, %v7834_v9 }
 0x8a8   : > { %6511 = vpow2.f32 %v2899_v53  ;;  %5419 = vmatmul.mubr.msk.f32.vlgmr.msra.gmra.mrb[32].mxu0 %vm732_vm2, %v7836_v23 }
 0x8a9   : > { %6513 = vpow2.f32 %v2900_v6  ;;  %5831 = vmatpush3.bf16.xpose.msk.msra.mxu0 %vm6919_vm1, %v7791_v38  ;;  %v6215_v61 = vpop.permute.xlu0 %6214  ;;  %v6222_v38 = vunpack.i.h.bf16 %v6220_v20 }
 0x8aa   : > { %v7845_v16 = vpop.eup %6507  ;;  %5834 = vmatprep.subr.msk.bf16.mxu0 %vm6919_vm1, %v5832_v55  ;;  %v6217_v30 = vunpack.i.h.bf16 %v6215_v61  ;;  %v6216_v5 = vunpack.i.l.bf16 %v6215_v61 }
 0x8ab   : > { %v7849_v45 = vpop.eup %6509  ;;  %5421 = vmatprep.mubr.msk.f32.mxu0 %vm732_vm2, %v7845_v16  ;;  %v5844_v28 = vpack.c.bf16 %v6222_v38, %v6221_v25 }
 0x8ac   : > { %5422 = vmatmul.mubr.msk.f32.gmra.mrb[34].mxu0 %vm732_vm2, %v7849_v45  ;;  %v5838_v53 = vpack.c.bf16 %v6217_v30, %v6216_v5 }
 0x8ad   : > { %v3137_v4 = vpop.permute.xlu0 %3136 }
 0x8b1   : > { %5837 = vmatpush3.bf16.xpose.msk.msra.mxu0 %vm6919_vm1, %v5832_v55  ;;  %v3141_v35 = vpop.permute.xlu0 %3140 }
 0x8b2   : > { %v7857_v6 = vpop.eup %6511  ;;  %5840 = vmatprep.subr.msk.bf16.mxu0 %vm6919_vm1, %v5838_v53 }
 0x8b3   : > { %v7861_v41 = vpop.eup %6513  ;;  %5424 = vmatprep.mubr.msk.f32.mxu0 %vm732_vm2, %v7857_v6 }
 0x8b4   : > { %5425 = vmatmul.mubr.msk.f32.gmra.mrb[36].mxu0 %vm732_vm2, %v7861_v41 }
 0x8b9   : > { %5843 = vmatpush3.bf16.xpose.msk.msra.mxu0 %vm6919_vm1, %v5838_v53 }
 0x8ba   : > { %5846 = vmatprep.subr.msk.bf16.mxu0 %vm6919_vm1, %v5844_v28 }
 0x8c1   : > { %5849 = vmatpush3.bf16.xpose.msk.msra.mxu0 %vm6919_vm1, %v5844_v28 }
 0x8d1   : > { %v2894_v57 = vpop.xlane.xlu1 %2893 }
 0x8d2   : > { %v2902_v50 = vsub.f32 %v7806_v0, %v2894_v57 }
 0x8d5   : > { %v2891_v40 = vpop.xlane.xlu1 %2890 }
 0x8d6   : > { %v2901_v59 = vsub.f32 %v7808_v14, %v2891_v40  ;;  %v3145_v14 = vpop.permute.xlu0 %3144 }
 0x8d8   : > { %6515 = vpow2.f32 %v2901_v59 }
 0x8d9   : > { %6517 = vpow2.f32 %v2902_v50  ;;  %v3139_v3 = vpop.permute.xlu1 %3138 }
 0x8da   : > { %v3149_v61 = vpop.permute.xlu0 %3148 }
 0x8dd   : > { %v3143_v0 = vpop.permute.xlu1 %3142 }
 0x8de   : > { %v6225_v53 = vpop.permute.xlu0 %6224 }
 0x8df   : > { %v6227_v38 = vunpack.i.h.bf16 %v6225_v53  ;;  %v6226_v25 = vunpack.i.l.bf16 %v6225_v53 }
 0x8e1   : > { %v3147_v55 = vpop.permute.xlu1 %3146  ;;  %v5850_v57 = vpack.c.bf16 %v6227_v38, %v6226_v25 }
 0x8e2   : > { %v7875_v18 = vpop.eup %6515 }
 0x8e3   : > { %v7877_v39 = vpop.eup %6517  ;;  %5427 = vmatprep.mubr.msk.f32.mxu0 %vm732_vm2, %v7875_v18  ;;  %5851 = vmatprep.subr.bf16.mxu1 %v5850_v57 }
 0x8e4   : > { %5428 = vmatmul.mubr.msk.f32.gmra.mrb[38].mxu0 %vm732_vm2, %v7877_v39  ;;  %5853 = vmatpush3.bf16.msra.mxu1 %v5850_v57 }
 0x8e5   : > { %5446 = vmatprep.mubr.msk.f32.mxu0 %vm578_vm0, %v3137_v4  ;;  %v3151_v30 = vpop.permute.xlu1 %3150  ;;  %v6235_v4 = vpop.permute.xlu0 %6234 }
 0x8e6   : > { %v6237_v26 = vunpack.i.h.bf16 %v6235_v4 }
 0x8e8   : > { %5447 = vmatmul.mubr.msk.f32.vlgmr.msra.gmra.mrb[40].mxu0 %vm578_vm0, %v3139_v3 }
 0x8e9   : > { %5449 = vmatprep.mubr.msk.f32.mxu0 %vm578_vm0, %v3141_v35  ;;  %v6230_v28 = vpop.permute.xlu1 %6229  ;;  %v6236_v35 = vunpack.i.l.bf16 %v6235_v4  ;;  %v6245_v25 = vpop.permute.xlu0 %6244 }
 0x8ea   : > { %v6232_v40 = vunpack.i.h.bf16 %v6230_v28  ;;  %v6231_v59 = vunpack.i.l.bf16 %v6230_v28  ;;  %v6247_v28 = vunpack.i.h.bf16 %v6245_v25  ;;  %v6246_v4 = vunpack.i.l.bf16 %v6245_v25 }
 0x8ec   : > { %5450 = vmatmul.mubr.msk.f32.gmra.mrb[42].mxu0 %vm578_vm0, %v3143_v0  ;;  %v5854_v21 = vpack.c.bf16 %v6232_v40, %v6231_v59  ;;  %v7915_v57 = vpack.c.bf16 %v6247_v28, %v6246_v4 }
 0x8ed   : > { %5452 = vmatprep.mubr.msk.f32.mxu0 %vm578_vm0, %v3145_v14  ;;  %v6240_v0 = vpop.permute.xlu1 %6239  ;;  %v5858_v14 = vpack.c.bf16 %v6237_v26, %v6236_v35 }
 0x8ee   : > { %5855 = vmatprep.subr.bf16.mxu1 %v5854_v21 }
 0x8ef   : > { %5857 = vmatpush3.bf16.msra.mxu1 %v5854_v21 }
 0x8f0   : > { %5453 = vmatmul.mubr.msk.f32.gmra.mrb[44].mxu0 %vm578_vm0, %v3147_v55  ;;  %v6242_v55 = vunpack.i.h.bf16 %v6240_v0  ;;  %5859 = vmatprep.subr.bf16.mxu1 %v5858_v14 }
 0x8f1   : > { %5455 = vmatprep.mubr.msk.f32.mxu0 %vm578_vm0, %v3149_v61  ;;  %v6241_v61 = vunpack.i.l.bf16 %v6240_v0 }
 0x8f3   : > { %5861 = vmatpush3.bf16.msra.mxu1 %v5858_v14 }
 0x8f4   : > { %5456 = vmatmul.mubr.msk.f32.gmra.mrb[46].mxu0 %vm578_vm0, %v3151_v30  ;;  %v5862_v30 = vpack.c.bf16 %v6242_v55, %v6241_v61 }
 0x8f6   : > { %5863 = vmatprep.subr.bf16.mxu1 %v5862_v30 }
 0x8f7   : > { %5865 = vmatpush3.bf16.msra.mxu1 %v5862_v30 }
 0x8f8   : > { %5868 = vmatprep.subr.msk.bf16.mxu1 %vm6919_vm1, %v7915_v57 }
 0x97b   : > { %v7903_v5 = vpop.f32.mrb[32].mxu0 }
 0x97c   : > { %v7905_v20 = vpop.f32.mrb[33].mxu0 }
 0x97f   : > { %v7907_v50 = vpop.f32.mrb[34].mxu0 }
 0x980   : > { %v7909_v3 = vpop.f32.mrb[35].mxu0 }
 0x987   : > { %v7911_v53 = vpop.f32.mrb[36].mxu0 }
 0x988   : > { %9131 = vst [vmem:[#allocation67_spill] sm:$0xff] %v7911_v53  ;;  %v7913_v38 = vpop.f32.mrb[37].mxu0 }
 0x989   : > { %9132 = vst [vmem:[#allocation68_spill] sm:$0xff] %v7913_v38 }
 0x9b7   : > { %v7917_v40 = vpop.f32.mrb[38].mxu0 }
 0x9b8   : > { %9133 = vst [vmem:[#allocation69_spill] sm:$0xff] %v7917_v40  ;;  %v7919_v59 = vpop.f32.mrb[39].mxu0 }
 0x9b9   : > { %9134 = vst [vmem:[#allocation70_spill] sm:$0xff] %v7919_v59 }
 0x9bb   : > { %v7924_v26 = vpop.f32.mrb[40].mxu0 }
 0x9bc   : > { %v7926_v35 = vpop.f32.mrb[41].mxu0  ;;  %v3308_v21 = vsel %vm732_vm2, %v7924_v26, -inf }
 0x9bd   : > { %3309 = vmax.xlane.f32.xlu1 %v3308_v21  ;;  %v3305_v0 = vsel %vm732_vm2, %v7926_v35, -inf }
 0x9be   : > { %3306 = vmax.xlane.f32.xlu0 %v3305_v0 }
 0x9bf   : > { %v7932_v14 = vpop.f32.mrb[42].mxu0 }
 0x9c0   : > { %v7934_v55 = vpop.f32.mrb[43].mxu0  ;;  %v3314_v61 = vsel %vm732_vm2, %v7932_v14, -inf }
 0x9c1   : > { %3315 = vmax.xlane.f32.xlu1 %v3314_v61  ;;  %v3311_v30 = vsel %vm732_vm2, %v7934_v55, -inf  ;;  %v2049_v61 = vsel %vm732_vm2, %v7577_v13, 0.0  ;;  %v2483_v13 = vsel %vm732_vm2, %v7721_v29, 0.0  ;;  %v1171_v29 = vsel %vm732_vm2, %v7389_v62, 0.0 }
 0x9c2   : > { %3312 = vmax.xlane.f32.xlu0 %v3311_v30 }
 0x9c3   : > { %v7940_v25 = vpop.f32.mrb[44].mxu0 }
 0x9c4   : > { %v3320_v28 = vsel %vm732_vm2, %v7940_v25, -inf  ;;  %v7944_v4 = vpop.f32.mrb[45].mxu0 }
 0x9c5   : > { %v3317_v21 = vsel %vm732_vm2, %v7944_v4, -inf }
 0x9c6   : > { %3321 = vmax.xlane.f32.xlu0 %v3320_v28 }
 0x9c7   : > { %v7948_v0 = vpop.f32.mrb[46].mxu0 }
 0x9c8   : > { %v7950_v40 = vpop.f32.mrb[47].mxu0 }
 0x9ca   : > { %3318 = vmax.xlane.f32.xlu0 %v3317_v21 }
 0x9d2   : > { %6259 = vrot.lane.b32.xlu1 %v7536_v33, %s6789_s17  ;;  %v6250_v33 = vpop.permute.xlu1 %6249 }
 0x9d6   : > { %3572 = vrot.lane.b32.xlu1 %v6982_v43, %s6789_s17  ;;  %v3326_v43 = vsel %vm732_vm2, %v7948_v0, -inf }
 0x9e0   : > { %6254 = vrot.lane.b32.xlu0 %v7542_v10, %s6789_s17  ;;  %v1162_v10 = vsel %vm732_vm2, %v7369_v19, 0.0 }
 0x9e4   : > { %3570 = vrot.lane.b32.xlu0 %v6940_v34, %s6789_s17  ;;  %v3323_v34 = vsel %vm732_vm2, %v7950_v40, -inf }
 0x9e8   : > { %3574 = vrot.lane.b32.xlu0 %v6984_v44, %s6789_s17  ;;  %v1159_v44 = vsel %vm732_vm2, %v7366_v15, 0.0  ;;  %v1168_v15 = vsel %vm732_vm2, %v7381_v36, 0.0  ;;  %v1174_v36 = vsel %vm732_vm2, %v7393_v60, 0.0  ;;  %v1165_v60 = vsel %vm732_vm2, %v7379_v46, 0.0 }
 0x9e9   : > { %v1615_v46 = vsel %vm732_vm2, %v7423_v37, 0.0 }
 0x9ec   : > { %3578 = vrot.lane.b32.xlu0 %v6994_v48, %s6789_s17  ;;  %v1609_v48 = vsel %vm732_vm2, %v7414_v7, 0.0  ;;  %v2914_v7 = vsel %vm732_vm2, %v7836_v23, 0.0 }
 0x9f0   : > { %3582 = vrot.lane.b32.xlu0 %v7004_v52, %s6789_s17  ;;  %v2477_v52 = vsel %vm732_vm2, %v7710_v17, 0.0 }
 0x9f4   : > { %6264 = vrot.lane.b32.xlu0 %v7625_v42, %s6789_s17  ;;  %v1624_v42 = vsel %vm732_vm2, %v7441_v1, 0.0 }
 0x9f8   : > { %6274 = vrot.lane.b32.xlu0 %v7635_v49, %s6789_s17 }
 0x9fa   : > { %3327 = vmax.xlane.f32.xlu1 %v3326_v43 }
 0x9fe   : > { %3324 = vmax.xlane.f32.xlu1 %v3323_v34 }
 0xa0f   : > { %3576 = vrot.lane.b32.xlu1 %v6990_v47, %s6789_s17  ;;  %v1612_v47 = vsel %vm732_vm2, %v7421_v32, 0.0  ;;  %v2052_v32 = vsel %vm732_vm2, %v7581_v63, 0.0  ;;  %v2046_v63 = vsel %vm732_vm2, %v7568_v11, 0.0  ;;  %v2911_v11 = vsel %vm732_vm2, %v7834_v9, 0.0 }
 0xa13   : > { %3580 = vrot.lane.b32.xlu1 %v7000_v51, %s6789_s17  ;;  %v2043_v51 = vsel %vm732_vm2, %v7566_v22, 0.0  ;;  %v1618_v22 = vsel %vm732_vm2, %v7433_v2, 0.0  ;;  %v2920_v2 = vsel %vm732_vm2, %v7849_v45, 0.0 }
 0xa17   : > { %1160 = vadd.xlane.f32.xlu0 %v1159_v44  ;;  %3584 = vrot.lane.b32.xlu1 %v7009_v54, %s6789_s17  ;;  %v2480_v54 = vsel %vm732_vm2, %v7712_v58, 0.0  ;;  %v2486_v58 = vsel %vm732_vm2, %v7725_v31, 0.0 }
 0xa1b   : > { %1610 = vadd.xlane.f32.xlu0 %v1609_v48  ;;  %6269 = vrot.lane.b32.xlu1 %v7629_v12, %s6789_s17  ;;  %v2917_v48 = vsel %vm732_vm2, %v7845_v16, 0.0  ;;  %v1621_v16 = vsel %vm732_vm2, %v7435_v27, 0.0 }
 0xa1f   : > { %1613 = vadd.xlane.f32.xlu0 %v1612_v47  ;;  %6279 = vrot.lane.b32.xlu1 %v7641_v8, %s6789_s17 }
 0xa23   : > { %2044 = vadd.xlane.f32.xlu0 %v2043_v51 }
 0xa27   : > { %2478 = vadd.xlane.f32.xlu0 %v2477_v52 }
 0xa2b   : > { %2481 = vadd.xlane.f32.xlu0 %v2480_v54 }
 0xa2f   : > { %1169 = vadd.xlane.f32.xlu0 %v1168_v15 }
 0xa33   : > { %2915 = vadd.xlane.f32.xlu0 %v2914_v7  ;;  %v2055_v7 = vsel %vm732_vm2, %v7589_v56, 0.0 }
 0xa37   : > { %1619 = vadd.xlane.f32.xlu0 %v1618_v22 }
 0xa3b   : > { %2053 = vadd.xlane.f32.xlu0 %v2052_v32 }
 0xa3f   : > { %2487 = vadd.xlane.f32.xlu0 %v2486_v58 }
 0xa43   : > { %1175 = vadd.xlane.f32.xlu0 %v1174_v36  ;;  %1163 = vadd.xlane.f32.xlu1 %v1162_v10 }
 0xa47   : > { %2921 = vadd.xlane.f32.xlu0 %v2920_v2  ;;  %2047 = vadd.xlane.f32.xlu1 %v2046_v63 }
 0xa4a   : > { %v3310_v17 = vpop.xlane.xlu1 %3309 }
 0xa4b   : > { %v3330_v19 = vsub.f32 %v7924_v26, %v3310_v17  ;;  %v3307_v12 = vpop.xlane.xlu0 %3306  ;;  %1625 = vadd.xlane.f32.xlu0 %v1624_v42  ;;  %1166 = vadd.xlane.f32.xlu1 %v1165_v60  ;;  %v6252_v26 = vunpack.i.h.bf16 %v6250_v33 }
 0xa4c   : > { %v3329_v49 = vsub.f32 %v7926_v35, %v3307_v12  ;;  %v6251_v35 = vunpack.i.l.bf16 %v6250_v33 }
 0xa4d   : > { %6519 = vpow2.f32 %v3330_v19 }
 0xa4e   : > { %6521 = vpow2.f32 %v3329_v49  ;;  %v3316_v8 = vpop.xlane.xlu1 %3315  ;;  %v5872_v37 = vpack.c.bf16 %v6252_v26, %v6251_v35 }
 0xa4f   : > { %v3332_v31 = vsub.f32 %v7932_v14, %v3316_v8  ;;  %v3313_v23 = vpop.xlane.xlu0 %3312  ;;  %2912 = vadd.xlane.f32.xlu1 %v2911_v11 }
 0xa50   : > { %v3331_v1 = vsub.f32 %v7934_v55, %v3313_v23 }
 0xa52   : > { %6523 = vpow2.f32 %v3331_v1  ;;  %v6260_v47 = vpop.permute.xlu1 %6259 }
 0xa53   : > { %6525 = vpow2.f32 %v3332_v31  ;;  %v3322_v45 = vpop.xlane.xlu0 %3321  ;;  %1616 = vadd.xlane.f32.xlu1 %v1615_v46  ;;  %v6262_v62 = vunpack.i.h.bf16 %v6260_v47  ;;  %v6261_v54 = vunpack.i.l.bf16 %v6260_v47 }
 0xa54   : > { %v3334_v9 = vsub.f32 %v7940_v25, %v3322_v45 }
 0xa55   : > { %v5884_v15 = vpack.c.bf16 %v6262_v62, %v6261_v54 }
 0xa56   : > { %v3573_v27 = vpop.permute.xlu1 %3572 }
 0xa57   : > { %v6520_v30 = vpop.eup %6519  ;;  %v3319_v14 = vpop.xlane.xlu0 %3318  ;;  %2050 = vadd.xlane.f32.xlu1 %v2049_v61 }
 0xa58   : > { %v6522_v28 = vpop.eup %6521  ;;  %v3333_v55 = vsub.f32 %v7944_v4, %v3319_v14  ;;  %v3348_v21 = vsel %vm732_vm2, %v6520_v30, 0.0 }
 0xa59   : > { %5474 = vmatprep.mubr.msk.f32.mxu1 %vm732_vm2, %v6522_v28  ;;  %3349 = vadd.xlane.f32.xlu0 %v3348_v21  ;;  %v3345_v22 = vsel %vm732_vm2, %v6522_v28, 0.0 }
 0xa5a   : > { %6527 = vpow2.f32 %v3333_v55  ;;  %5475 = vmatmul.mubr.msk.f32.vlgmr.msra.gmra.mrb[56].mxu1 %vm732_vm2, %v6520_v30 }
 0xa5b   : > { %6529 = vpow2.f32 %v3334_v9  ;;  %5871 = vmatpush3.bf16.xpose.msk.msra.mxu1 %vm6919_vm1, %v7915_v57  ;;  %2484 = vadd.xlane.f32.xlu1 %v2483_v13  ;;  %v6255_v25 = vpop.permute.xlu0 %6254 }
 0xa5c   : > { %v6524_v4 = vpop.eup %6523  ;;  %5874 = vmatprep.subr.msk.bf16.mxu1 %vm6919_vm1, %v5872_v37  ;;  %v6257_v43 = vunpack.i.h.bf16 %v6255_v25  ;;  %v6256_v34 = vunpack.i.l.bf16 %v6255_v25 }
 0xa5d   : > { %v8040_v44 = vpop.eup %6525  ;;  %5477 = vmatprep.mubr.msk.f32.mxu1 %vm732_vm2, %v6524_v4  ;;  %v3351_v32 = vsel %vm732_vm2, %v6524_v4, 0.0 }
 0xa5e   : > { %5478 = vmatmul.mubr.msk.f32.gmra.mrb[58].mxu1 %vm732_vm2, %v8040_v44  ;;  %v5878_v57 = vpack.c.bf16 %v6257_v43, %v6256_v34 }
 0xa5f   : > { %1172 = vadd.xlane.f32.xlu1 %v1171_v29  ;;  %v3571_v33 = vpop.permute.xlu0 %3570 }
 0xa63   : > { %5877 = vmatpush3.bf16.xpose.msk.msra.mxu1 %vm6919_vm1, %v5872_v37  ;;  %2918 = vadd.xlane.f32.xlu1 %v2917_v48  ;;  %v3575_v24 = vpop.permute.xlu0 %3574 }
 0xa64   : > { %v8051_v51 = vpop.eup %6527  ;;  %5880 = vmatprep.subr.msk.bf16.mxu1 %vm6919_vm1, %v5878_v57 }
 0xa65   : > { %v8055_v52 = vpop.eup %6529  ;;  %5480 = vmatprep.mubr.msk.f32.mxu1 %vm732_vm2, %v8051_v51 }
 0xa66   : > { %5481 = vmatmul.mubr.msk.f32.gmra.mrb[60].mxu1 %vm732_vm2, %v8055_v52 }
 0xa67   : > { %1622 = vadd.xlane.f32.xlu1 %v1621_v16 }
 0xa6b   : > { %5883 = vmatpush3.bf16.xpose.msk.msra.mxu1 %vm6919_vm1, %v5878_v57  ;;  %2056 = vadd.xlane.f32.xlu1 %v2055_v7 }
 0xa6c   : > { %5886 = vmatprep.subr.msk.bf16.mxu1 %vm6919_vm1, %v5884_v15 }
 0xa6f   : > { %3346 = vadd.xlane.f32.xlu1 %v3345_v22 }
 0xa73   : > { %5889 = vmatpush3.bf16.xpose.msk.msra.mxu1 %vm6919_vm1, %v5884_v15  ;;  %3352 = vadd.xlane.f32.xlu1 %v3351_v32 }
 0xa87   : > { %v3328_v58 = vpop.xlane.xlu1 %3327 }
 0xa88   : > { %v3336_v56 = vsub.f32 %v7948_v0, %v3328_v58 }
 0xa8b   : > { %v3325_v36 = vpop.xlane.xlu1 %3324 }
 0xa8c   : > { %v3335_v10 = vsub.f32 %v7950_v40, %v3325_v36  ;;  %v3579_v40 = vpop.permute.xlu0 %3578 }
 0xa8e   : > { %6531 = vpow2.f32 %v3335_v10  ;;  %v9140_v10 = vld [vmem:[#allocation24_spill] sm:$0xff] }
 0xa8f   : > { %6533 = vpow2.f32 %v3336_v56  ;;  %v3577_v0 = vpop.permute.xlu1 %3576 }
 0xa90   : > { %v3583_v42 = vpop.permute.xlu0 %3582 }
 0xa93   : > { %v3581_v17 = vpop.permute.xlu1 %3580 }
 0xa94   : > { %v6265_v19 = vpop.permute.xlu0 %6264 }
 0xa95   : > { %v6267_v12 = vunpack.i.h.bf16 %v6265_v19  ;;  %v6266_v49 = vunpack.i.l.bf16 %v6265_v19  ;;  %v9143_v19 = vld [vmem:[#allocation56_spill] sm:$0xff] }
 0xa97   : > { %v3585_v60 = vpop.permute.xlu1 %3584  ;;  %v5890_v23 = vpack.c.bf16 %v6267_v12, %v6266_v49  ;;  %v2492_v12 = vsel %vm732_vm2, %v9143_v19, 0.0  ;;  %v9144_v49 = vld [vmem:[#allocation25_spill] sm:$0xff] }
 0xa98   : > { %v8075_v2 = vpop.eup %6531  ;;  %v6275_v1 = vpop.permute.xlu0 %6274 }
 0xa99   : > { %v8077_v63 = vpop.eup %6533  ;;  %5483 = vmatprep.mubr.msk.f32.mxu1 %vm732_vm2, %v8075_v2  ;;  %5891 = vmatprep.subr.bf16.mxu0 %v5890_v23  ;;  %v6277_v46 = vunpack.i.h.bf16 %v6275_v1  ;;  %v6276_v45 = vunpack.i.l.bf16 %v6275_v1 }
 0xa9a   : > { %5484 = vmatmul.mubr.msk.f32.gmra.mrb[62].mxu1 %vm732_vm2, %v8077_v63  ;;  %5893 = vmatpush3.bf16.msra.mxu0 %v5890_v23  ;;  %v9145_v23 = vld [vmem:[#allocation27_spill] sm:$0xff] }
 0xa9b   : > { %5502 = vmatprep.mubr.msk.f32.mxu1 %vm578_vm0, %v3571_v33  ;;  %v6270_v8 = vpop.permute.xlu1 %6269  ;;  %v5898_v9 = vpack.c.bf16 %v6277_v46, %v6276_v45  ;;  %v1177_v33 = vsel %vm732_vm2, %v9140_v10, 0.0  ;;  %v1630_v1 = vsel %vm732_vm2, %v9145_v23, 0.0  ;;  %v9146_v46 = vld [vmem:[#allocation45_spill] sm:$0xff] }
 0xa9c   : > { %v6272_v11 = vunpack.i.h.bf16 %v6270_v8  ;;  %v6271_v31 = vunpack.i.l.bf16 %v6270_v8  ;;  %v2061_v45 = vsel %vm732_vm2, %v9146_v46, 0.0 }
 0xa9e   : > { %5503 = vmatmul.mubr.msk.f32.vlgmr.msra.gmra.mrb[64].mxu1 %vm578_vm0, %v3573_v27  ;;  %v5894_v26 = vpack.c.bf16 %v6272_v11, %v6271_v31  ;;  %v9139_v27 = vld [vmem:[#allocation55_spill] sm:$0xff]  ;;  %v2926_v11 = vsel %vm732_vm2, %v7861_v41, 0.0  ;;  %v3357_v31 = vsel %vm732_vm2, %v8051_v51, 0.0  ;;  %v9148_v51 = vld [vmem:[#allocation46_spill] sm:$0xff] }
 0xa9f   : > { %5505 = vmatprep.mubr.msk.f32.mxu1 %vm578_vm0, %v3575_v24  ;;  %v6280_v35 = vpop.permute.xlu1 %6279  ;;  %v2489_v58 = vsel %vm732_vm2, %v9139_v27, 0.0  ;;  %v3354_v24 = vsel %vm732_vm2, %v8040_v44, 0.0 }
 0xaa0   : > { %5895 = vmatprep.subr.bf16.mxu0 %v5894_v26  ;;  %v6282_v61 = vunpack.i.h.bf16 %v6280_v35  ;;  %v6281_v30 = vunpack.i.l.bf16 %v6280_v35  ;;  %v9147_v35 = vld [vmem:[#allocation57_spill] sm:$0xff] }
 0xaa1   : > { %5897 = vmatpush3.bf16.msra.mxu0 %v5894_v26  ;;  %v3360_v26 = vsel %vm732_vm2, %v8055_v52, 0.0  ;;  %v2495_v41 = vsel %vm732_vm2, %v9147_v35, 0.0  ;;  %v2932_v52 = vsel %vm732_vm2, %v7877_v39, 0.0 }
 0xaa2   : > { %5506 = vmatmul.mubr.msk.f32.gmra.mrb[66].mxu1 %vm578_vm0, %v3577_v0  ;;  %5899 = vmatprep.subr.bf16.mxu0 %v5898_v9  ;;  %v5902_v14 = vpack.c.bf16 %v6282_v61, %v6281_v30  ;;  %v2923_v0 = vsel %vm732_vm2, %v7857_v6, 0.0  ;;  %v1180_v6 = vsel %vm732_vm2, %v9144_v49, 0.0  ;;  %v2064_v61 = vsel %vm732_vm2, %v9148_v51, 0.0  ;;  %v9149_v30 = vld [vmem:[#allocation58_spill] sm:$0xff] }
 0xaa3   : > { %5508 = vmatprep.mubr.msk.f32.mxu1 %vm578_vm0, %v3579_v40  ;;  %v9141_v40 = vld [vmem:[#allocation44_spill] sm:$0xff] }
 0xaa5   : > { %5901 = vmatpush3.bf16.msra.mxu0 %v5898_v9  ;;  %v2498_v9 = vsel %vm732_vm2, %v9149_v30, 0.0 }
 0xaa6   : > { %5509 = vmatmul.mubr.msk.f32.gmra.mrb[68].mxu1 %vm578_vm0, %v3581_v17  ;;  %5903 = vmatprep.subr.bf16.mxu0 %v5902_v14  ;;  %v2058_v17 = vsel %vm732_vm2, %v9141_v40, 0.0 }
 0xaa7   : > { %5511 = vmatprep.mubr.msk.f32.mxu1 %vm578_vm0, %v3583_v42  ;;  %v9142_v42 = vld [vmem:[#allocation26_spill] sm:$0xff] }
 0xaa9   : > { %5905 = vmatpush3.bf16.msra.mxu0 %v5902_v14  ;;  %v2929_v14 = vsel %vm732_vm2, %v7875_v18, 0.0 }
 0xaaa   : > { %5512 = vmatmul.mubr.msk.f32.gmra.mrb[70].mxu1 %vm578_vm0, %v3585_v60  ;;  %v1627_v60 = vsel %vm732_vm2, %v9142_v42, 0.0 }
 0xad0   : > { %v8185_v18 = vpop.xlane.xlu1 %1163 }
 0xb2d   : > { %v8091_v28 = vpop.f32.mrb[56].mxu1 }
 0xb2e   : > { %v8093_v55 = vpop.f32.mrb[57].mxu1 }
 0xb31   : > { %v8095_v21 = vpop.f32.mrb[58].mxu1 }
 0xb32   : > { %v8097_v37 = vpop.f32.mrb[59].mxu1 }
 0xb39   : > { %v8099_v13 = vpop.f32.mrb[60].mxu1 }
 0xb3a   : > { %9135 = vst [vmem:[#allocation71_spill] sm:$0xff] %v8099_v13  ;;  %v8101_v25 = vpop.f32.mrb[61].mxu1 }
 0xb3b   : > { %9136 = vst [vmem:[#allocation72_spill] sm:$0xff] %v8101_v25 }
 0xb6d   : > { %v8103_v4 = vpop.f32.mrb[62].mxu1 }
 0xb6e   : > { %9137 = vst [vmem:[#allocation73_spill] sm:$0xff] %v8103_v4  ;;  %v8105_v43 = vpop.f32.mrb[63].mxu1 }
 0xb6f   : > { %9138 = vst [vmem:[#allocation74_spill] sm:$0xff] %v8105_v43 }
 0xb71   : > { %v8107_v34 = vpop.f32.mrb[64].mxu1 }
 0xb72   : > { %v8109_v29 = vpop.f32.mrb[65].mxu1  ;;  %v3742_v57 = vsel %vm732_vm2, %v8107_v34, -inf }
 0xb73   : > { %3743 = vmax.xlane.f32.xlu1 %v3742_v57  ;;  %v3739_v48 = vsel %vm732_vm2, %v8109_v29, -inf  ;;  %v3363_v57 = vsel %vm732_vm2, %v8075_v2, 0.0  ;;  %v571_v2 = vld [vmem:[%s8190_s12 + $0x8] sm:$0xff] }
 0xb74   : > { %3740 = vmax.xlane.f32.xlu0 %v3739_v48  ;;  %v3366_v48 = vsel %vm732_vm2, %v8077_v63, 0.0  ;;  %v8195_v63 = vpop.xlane.xlu1 %2047 }
 0xb75   : > { %v8115_v47 = vpop.f32.mrb[66].mxu1 }
 0xb76   : > { %v8117_v62 = vpop.f32.mrb[67].mxu1  ;;  %v3748_v54 = vsel %vm732_vm2, %v8115_v47, -inf }
 0xb77   : > { %v3745_v22 = vsel %vm732_vm2, %v8117_v62, -inf }
 0xb78   : > { %3749 = vmax.xlane.f32.xlu0 %v3748_v54  ;;  %v8179_v54 = vpop.xlane.xlu0 %1160 }
 0xb79   : > { %v8121_v16 = vpop.f32.mrb[68].mxu1 }
 0xb7a   : > { %v8123_v15 = vpop.f32.mrb[69].mxu1  ;;  %v3754_v7 = vsel %vm732_vm2, %v8121_v16, -inf }
 0xb7b   : > { %3755 = vmax.xlane.f32.xlu1 %v3754_v7  ;;  %v3751_v36 = vsel %vm732_vm2, %v8123_v15, -inf }
 0xb7c   : > { %3746 = vmax.xlane.f32.xlu0 %v3745_v22  ;;  %v8183_v7 = vpop.xlane.xlu0 %1610  ;;  %v570_v22 = vld [vmem:[%s8190_s12] sm:$0xff] }
 0xb7d   : > { %v8129_v32 = vpop.f32.mrb[70].mxu1 }
 0xb7e   : > { %v8133_v56 = vpop.f32.mrb[71].mxu1  ;;  %v3760_v44 = vsel %vm732_vm2, %v8129_v32, -inf }
 0xb7f   : > { %2490 = vadd.xlane.f32.xlu1 %v2489_v58  ;;  %v3757_v8 = vsel %vm732_vm2, %v8133_v56, -inf  ;;  %v8202_v58 = vpop.xlane.xlu1 %1166 }
 0xb80   : > { %3752 = vmax.xlane.f32.xlu0 %v3751_v36  ;;  %v8192_v39 = vpop.xlane.xlu0 %1613 }
 0xb83   : > { %1178 = vadd.xlane.f32.xlu1 %v1177_v33  ;;  %v8209_v10 = vpop.xlane.xlu1 %2912 }
 0xb84   : > { %3355 = vadd.xlane.f32.xlu0 %v3354_v24  ;;  %v8199_v27 = vpop.xlane.xlu0 %2044  ;;  %v572_v24 = vld [vmem:[%s8190_s12 + $0x10] sm:$0xff] }
 0xb87   : > { %2924 = vadd.xlane.f32.xlu1 %v2923_v0  ;;  %v573_v0 = vld [vmem:[%s8190_s12 + $0x18] sm:$0xff]  ;;  %v8218_v40 = vpop.xlane.xlu1 %1616 }
 0xb88   : > { %2059 = vadd.xlane.f32.xlu0 %v2058_v17  ;;  %v8206_v36 = vpop.xlane.xlu0 %2478 }
 0xb8b   : > { %1628 = vadd.xlane.f32.xlu1 %v1627_v60  ;;  %v8225_v42 = vpop.xlane.xlu1 %2050 }
 0xb8c   : > { %2493 = vadd.xlane.f32.xlu0 %v2492_v12  ;;  %v8213_v33 = vpop.xlane.xlu0 %2481 }
 0xb8f   : > { %3761 = vmax.xlane.f32.xlu1 %v3760_v44  ;;  %v8232_v19 = vpop.xlane.xlu1 %2484 }
 0xb90   : > { %1181 = vadd.xlane.f32.xlu0 %v1180_v6  ;;  %v8222_v17 = vpop.xlane.xlu0 %1169 }
 0xb93   : > { %3758 = vmax.xlane.f32.xlu1 %v3757_v8  ;;  %v8239_v44 = vpop.xlane.xlu1 %1172  ;;  %v8250_v8 = vld [vmem:[%s8190_s12 + $0x20] sm:$0xff] }
 0xb94   : > { %2927 = vadd.xlane.f32.xlu0 %v2926_v11  ;;  %v8229_v60 = vpop.xlane.xlu0 %2915 }
 0xb97   : > { %3358 = vadd.xlane.f32.xlu1 %v3357_v31  ;;  %v8246_v6 = vpop.xlane.xlu1 %2918  ;;  %v8256_v31 = vld [vmem:[%s8190_s12 + $0x28] sm:$0xff] }
 0xb98   : > { %1631 = vadd.xlane.f32.xlu0 %v1630_v1  ;;  %v8236_v12 = vpop.xlane.xlu0 %1619 }
 0xb9b   : > { %2062 = vadd.xlane.f32.xlu1 %v2061_v45  ;;  %v8260_v23 = vpop.xlane.xlu1 %1622 }
 0xb9c   : > { %3361 = vadd.xlane.f32.xlu0 %v3360_v26  ;;  %v8243_v49 = vpop.xlane.xlu0 %2053 }
 0xb9f   : > { %2496 = vadd.xlane.f32.xlu1 %v2495_v41  ;;  %v8268_v46 = vpop.xlane.xlu1 %2056 }
 0xba0   : > { %2065 = vadd.xlane.f32.xlu0 %v2064_v61  ;;  %v8253_v11 = vpop.xlane.xlu0 %2487 }
 0xba3   : > { %2499 = vadd.xlane.f32.xlu1 %v2498_v9  ;;  %v8277_v26 = vpop.xlane.xlu1 %3346 }
 0xba4   : > { %2930 = vadd.xlane.f32.xlu0 %v2929_v14  ;;  %v8265_v1 = vpop.xlane.xlu0 %1175  ;;  %v8296_v14 = vld [vmem:[%s8190_s12 + $0x30] sm:$0xff] }
 0xba7   : > { %2933 = vadd.xlane.f32.xlu1 %v2932_v52  ;;  %v8286_v41 = vpop.xlane.xlu1 %3352 }
 0xba8   : > { %3364 = vadd.xlane.f32.xlu0 %v3363_v57  ;;  %v8274_v45 = vpop.xlane.xlu0 %2921  ;;  %v8302_v57 = vld [vmem:[%s8190_s12 + $0x38] sm:$0xff] }
 0xbab   : > { %3367 = vadd.xlane.f32.xlu1 %v3366_v48 }
 0xbac   : > { %v8282_v35 = vpop.xlane.xlu0 %1625 }
 0xbb0   : > { %v8289_v51 = vpop.xlane.xlu0 %3349 }
 0xbbc   : > { %1370 = vrot.lane.b32.xlu1 %v571_v2, %s6783_s30 }
 0xbbe   : > { %1368 = vrot.lane.b32.xlu0 %v570_v22, %s6783_s30 }
 0xbc0   : > { %1802 = vrot.lane.b32.xlu1 %v570_v22, %s6784_s9 }
 0xbc2   : > { %2236 = vrot.lane.b32.xlu0 %v570_v22, %s6785_s13 }
 0xbc4   : > { %1804 = vrot.lane.b32.xlu1 %v571_v2, %s6784_s9 }
 0xbc6   : > { %2670 = vrot.lane.b32.xlu0 %v570_v22, %s6786_s14 }
 0xbc8   : > { %2238 = vrot.lane.b32.xlu1 %v571_v2, %s6785_s13 }
 0xbca   : > { %2672 = vrot.lane.b32.xlu0 %v571_v2, %s6786_s14 }
 0xbcc   : > { %1372 = vrot.lane.b32.xlu1 %v572_v24, %s6783_s30 }
 0xbce   : > { %1374 = vrot.lane.b32.xlu0 %v573_v0, %s6783_s30 }
 0xbd0   : > { %3104 = vrot.lane.b32.xlu1 %v570_v22, %s6787_s15 }
 0xbd2   : > { %3106 = vrot.lane.b32.xlu0 %v571_v2, %s6787_s15 }
 0xbd4   : > { %1806 = vrot.lane.b32.xlu1 %v572_v24, %s6784_s9 }
 0xbd6   : > { %1808 = vrot.lane.b32.xlu0 %v573_v0, %s6784_s9 }
 0xbd8   : > { %3538 = vrot.lane.b32.xlu1 %v570_v22, %s6788_s16 }
 0xbda   : > { %3540 = vrot.lane.b32.xlu0 %v571_v2, %s6788_s16 }
 0xbdc   : > { %2240 = vrot.lane.b32.xlu1 %v572_v24, %s6785_s13 }
 0xbde   : > { %2242 = vrot.lane.b32.xlu0 %v573_v0, %s6785_s13 }
 0xbe0   : > { %3972 = vrot.lane.b32.xlu1 %v570_v22, %s6789_s17 }
 0xbe2   : > { %3974 = vrot.lane.b32.xlu0 %v571_v2, %s6789_s17 }
 0xbe4   : > { %2674 = vrot.lane.b32.xlu1 %v572_v24, %s6786_s14 }
 0xbe6   : > { %2676 = vrot.lane.b32.xlu0 %v573_v0, %s6786_s14 }
 0xbe8   : > { %1376 = vrot.lane.b32.xlu1 %v8250_v8, %s6783_s30 }
 0xbea   : > { %1378 = vrot.lane.b32.xlu0 %v8256_v31, %s6783_s30 }
 0xbec   : > { %3108 = vrot.lane.b32.xlu1 %v572_v24, %s6787_s15 }
 0xbee   : > { %3110 = vrot.lane.b32.xlu0 %v573_v0, %s6787_s15 }
 0xbf0   : > { %1810 = vrot.lane.b32.xlu1 %v8250_v8, %s6784_s9 }
 0xbf2   : > { %1812 = vrot.lane.b32.xlu0 %v8256_v31, %s6784_s9 }
 0xbf4   : > { %3542 = vrot.lane.b32.xlu1 %v572_v24, %s6788_s16 }
 0xbf6   : > { %3544 = vrot.lane.b32.xlu0 %v573_v0, %s6788_s16 }
 0xbf8   : > { %2244 = vrot.lane.b32.xlu1 %v8250_v8, %s6785_s13 }
 0xbfa   : > { %2246 = vrot.lane.b32.xlu0 %v8256_v31, %s6785_s13 }
 0xbfc   : > { %3976 = vrot.lane.b32.xlu1 %v572_v24, %s6789_s17 }
 0xbfe   : > { %3978 = vrot.lane.b32.xlu0 %v573_v0, %s6789_s17 }
 0xc00   : > { %v3744_v61 = vpop.xlane.xlu1 %3743  ;;  %2678 = vrot.lane.b32.xlu1 %v8250_v8, %s6786_s14 }
 0xc01   : > { %v3764_v30 = vsub.f32 %v8107_v34, %v3744_v61  ;;  %v3741_v9 = vpop.xlane.xlu0 %3740 }
 0xc02   : > { %v3763_v52 = vsub.f32 %v8109_v29, %v3741_v9  ;;  %2680 = vrot.lane.b32.xlu0 %v8256_v31, %s6786_s14 }
 0xc04   : > { %6535 = vpow2.f32 %v3763_v52  ;;  %1380 = vrot.lane.b32.xlu1 %v8296_v14, %s6783_s30 }
 0xc05   : > { %6537 = vpow2.f32 %v3764_v30  ;;  %v3750_v48 = vpop.xlane.xlu0 %3749 }
 0xc06   : > { %1382 = vrot.lane.b32.xlu0 %v8302_v57, %s6783_s30  ;;  %v3766_v29 = vsub.f32 %v8115_v47, %v3750_v48 }
 0xc08   : > { %v3756_v34 = vpop.xlane.xlu1 %3755  ;;  %3112 = vrot.lane.b32.xlu1 %v8250_v8, %s6787_s15 }
 0xc09   : > { %v3747_v2 = vpop.xlane.xlu0 %3746  ;;  %v3768_v0 = vsub.f32 %v8121_v16, %v3756_v34 }
 0xc0a   : > { %v3765_v22 = vsub.f32 %v8117_v62, %v3747_v2  ;;  %3114 = vrot.lane.b32.xlu0 %v8256_v31, %s6787_s15 }
 0xc0c   : > { %6539 = vpow2.f32 %v3765_v22  ;;  %v8314_v24 = vpop.xlane.xlu1 %2490  ;;  %1814 = vrot.lane.b32.xlu1 %v8296_v14, %s6784_s9 }
 0xc0d   : > { %6541 = vpow2.f32 %v3766_v29  ;;  %v3753_v61 = vpop.xlane.xlu0 %3752 }
 0xc0e   : > { %v8319_v30 = vpop.eup %6535  ;;  %v3767_v47 = vsub.f32 %v8123_v15, %v3753_v61  ;;  %1816 = vrot.lane.b32.xlu0 %v8302_v57, %s6784_s9 }
 0xc0f   : > { %v8324_v62 = vpop.eup %6537  ;;  %5530 = vmatprep.mubr.msk.f32.mxu0 %vm732_vm2, %v8319_v30 }
 0xc10   : > { %6543 = vpow2.f32 %v3767_v47  ;;  %5531 = vmatmul.mubr.msk.f32.vlgmr.msra.gmra.mrb[48].mxu0 %vm732_vm2, %v8324_v62  ;;  %v8330_v9 = vpop.xlane.xlu1 %1178  ;;  %3546 = vrot.lane.b32.xlu1 %v8250_v8, %s6788_s16 }
 0xc11   : > { %6545 = vpow2.f32 %v3768_v0  ;;  %v8334_v16 = vpop.xlane.xlu0 %3355 }
 0xc12   : > { %3548 = vrot.lane.b32.xlu0 %v8256_v31, %s6788_s16 }
 0xc14   : > { %v8338_v15 = vpop.xlane.xlu1 %2924  ;;  %2248 = vrot.lane.b32.xlu1 %v8296_v14, %s6785_s13 }
 0xc15   : > { %v8342_v52 = vpop.xlane.xlu0 %2059 }
 0xc16   : > { %v8344_v48 = vpop.eup %6539  ;;  %2250 = vrot.lane.b32.xlu0 %v8302_v57, %s6785_s13 }
 0xc17   : > { %v8348_v34 = vpop.eup %6541  ;;  %5533 = vmatprep.mubr.msk.f32.mxu0 %vm732_vm2, %v8344_v48 }
 0xc18   : > { %5534 = vmatmul.mubr.msk.f32.gmra.mrb[50].mxu0 %vm732_vm2, %v8348_v34  ;;  %v8354_v29 = vpop.xlane.xlu1 %1628  ;;  %3980 = vrot.lane.b32.xlu1 %v8250_v8, %s6789_s17 }
 0xc19   : > { %9150 = vst [vmem:[#allocation55_spill] sm:$0xff] %v8354_v29  ;;  %v8358_v2 = vpop.xlane.xlu0 %2493 }
 0xc1a   : > { %v8360_v22 = vpop.eup %6543  ;;  %3982 = vrot.lane.b32.xlu0 %v8256_v31, %s6789_s17 }
 0xc1b   : > { %v8364_v0 = vpop.eup %6545  ;;  %5536 = vmatprep.mubr.msk.f32.mxu0 %vm732_vm2, %v8360_v22 }
 0xc1c   : > { %5537 = vmatmul.mubr.msk.f32.gmra.mrb[52].mxu0 %vm732_vm2, %v8364_v0  ;;  %v3762_v61 = vpop.xlane.xlu1 %3761  ;;  %2682 = vrot.lane.b32.xlu1 %v8296_v14, %s6786_s14 }
 0xc1d   : > { %v8372_v8 = vpop.xlane.xlu0 %1181  ;;  %v3770_v47 = vsub.f32 %v8129_v32, %v3762_v61 }
 0xc1e   : > { %3116 = vrot.lane.b32.xlu0 %v8296_v14, %s6787_s15 }
 0xc20   : > { %2684 = vrot.lane.b32.xlu1 %v8302_v57, %s6786_s14  ;;  %v3759_v31 = vpop.xlane.xlu1 %3758 }
 0xc21   : > { %v3769_v4 = vsub.f32 %v8133_v56, %v3759_v31  ;;  %v8380_v43 = vpop.xlane.xlu0 %2927 }
 0xc22   : > { %3550 = vrot.lane.b32.xlu0 %v8296_v14, %s6788_s16 }
 0xc23   : > { %6547 = vpow2.f32 %v3769_v4 }
 0xc24   : > { %6549 = vpow2.f32 %v3770_v47  ;;  %3118 = vrot.lane.b32.xlu1 %v8302_v57, %s6787_s15  ;;  %v8386_v59 = vpop.xlane.xlu1 %3358 }
 0xc25   : > { %9151 = vst [vmem:[#allocation24_spill] sm:$0xff] %v8386_v59  ;;  %v8388_v25 = vpop.xlane.xlu0 %1631  ;;  %6551 = vrcp.f32 %v8179_v54  ;;  %v9168_v59 = vld [vmem:[#allocation8_spill] sm:$0xff] }
 0xc26   : > { %9152 = vst [vmem:[#allocation44_spill] sm:$0xff] %v8388_v25  ;;  %3984 = vrot.lane.b32.xlu0 %v8296_v14, %s6789_s17  ;;  %6553 = vrcp.f32 %v8185_v18  ;;  %v9169_v25 = vld [vmem:[#allocation59_spill] sm:$0xff] }
 0xc27   : > { %6555 = vrcp.f32 %v8183_v7  ;;  %v9162_v7 = vld [vmem:[#allocation29_spill] sm:$0xff] }
 0xc28   : > { %3552 = vrot.lane.b32.xlu1 %v8302_v57, %s6788_s16  ;;  %v8394_v32 = vpop.xlane.xlu1 %2062  ;;  %6557 = vrcp.f32 %v8192_v39 }
 0xc29   : > { %9153 = vst [vmem:[#allocation26_spill] sm:$0xff] %v8394_v32  ;;  %v8396_v56 = vpop.xlane.xlu0 %3361  ;;  %6559 = vrcp.f32 %v8206_v36 }
 0xc2a   : > { %9154 = vst [vmem:[#allocation56_spill] sm:$0xff] %v8396_v56  ;;  %6561 = vrcp.f32 %v8213_v33 }
 0xc2b   : > { %6563 = vrcp.f32 %v8199_v27  ;;  %v773_v27 = vsel %vm732_vm2, %v9168_v59, 0.0 }
 0xc2c   : > { %3986 = vrot.lane.b32.xlu1 %v8302_v57, %s6789_s17  ;;  %v8400_v4 = vpop.xlane.xlu1 %2496  ;;  %6565 = vrcp.f32 %v8195_v63 }
 0xc2d   : > { %9155 = vst [vmem:[#allocation25_spill] sm:$0xff] %v8400_v4  ;;  %v8402_v61 = vpop.eup %6547  ;;  %v8405_v47 = vpop.xlane.xlu0 %2065  ;;  %6567 = vrcp.f32 %v8222_v17 }
 0xc2e   : > { %9156 = vst [vmem:[#allocation27_spill] sm:$0xff] %v8405_v47  ;;  %v8407_v31 = vpop.eup %6549  ;;  %5539 = vmatprep.mubr.msk.f32.mxu0 %vm732_vm2, %v8402_v61  ;;  %6569 = vrcp.f32 %v8202_v58 }
 0xc2f   : > { %5540 = vmatmul.mubr.msk.f32.gmra.mrb[54].mxu0 %vm732_vm2, %v8407_v31  ;;  %v6552_v18 = vpop.eup %6551  ;;  %6571 = vrcp.f32 %v8229_v60 }
 0xc30   : > { %v8414_v14 = vpop.xlane.xlu1 %2499  ;;  %v6554_v13 = vpop.eup %6553  ;;  %6573 = vrcp.f32 %v8209_v10 }
 0xc31   : > { %9157 = vst [vmem:[#allocation45_spill] sm:$0xff] %v8414_v14  ;;  %v8416_v57 = vpop.xlane.xlu0 %2930  ;;  %v6556_v47 = vpop.eup %6555  ;;  %6575 = vrcp.f32 %v8236_v12 }
 0xc32   : > { %9158 = vst [vmem:[#allocation57_spill] sm:$0xff] %v8416_v57  ;;  %v1352_v57 = vmul.f32 %v6552_v18, %v9162_v7  ;;  %6577 = vrcp.f32 %v8218_v40 }
 0xc33   : > { %6579 = vrcp.f32 %v8289_v51 }
 0xc34   : > { %v8419_v4 = vpop.xlane.xlu1 %2933  ;;  %6581 = vrcp.f32 %v8277_v26 }
 0xc35   : > { %9159 = vst [vmem:[#allocation46_spill] sm:$0xff] %v8419_v4  ;;  %v8422_v54 = vpop.xlane.xlu0 %3364  ;;  %v9163_v4 = vld [vmem:[#allocation28_spill] sm:$0xff]  ;;  %6583 = vrcp.f32 %v8243_v49 }
 0xc36   : > { %9160 = vst [vmem:[#allocation58_spill] sm:$0xff] %v8422_v54  ;;  %v1353_v53 = vmul.f32 %v6554_v13, %v9163_v4  ;;  %v9165_v4 = vld [vmem:[#allocation37_spill] sm:$0xff]  ;;  %6585 = vrcp.f32 %v8225_v42 }
 0xc37   : > { %6587 = vrcp.f32 %v8253_v11  ;;  %v3785_v11 = vsel %vm732_vm2, %v8344_v48, 0.0  ;;  %v9179_v48 = vld [vmem:[#allocation49_spill] sm:$0xff] }
 0xc38   : > { %v8426_v38 = vpop.xlane.xlu1 %3367 }
 0xc39   : > { %9161 = vst [vmem:[#allocation75_spill] sm:$0xff] %v8426_v38  ;;  %v1369_v14 = vpop.permute.xlu0 %1368  ;;  %v6558_v38 = vpop.eup %6557  ;;  %6589 = vrcp.f32 %v8232_v19 }
 0xc3a   : > { %v8433_v54 = vadd.f32 %v1369_v14, %v1352_v57  ;;  %v6560_v63 = vpop.eup %6559  ;;  %v9166_v14 = vld [vmem:[#allocation36_spill] sm:$0xff]  ;;  %6591 = vrcp.f32 %v8265_v1 }
 0xc3b   : > { %v6562_v18 = vpop.eup %6561  ;;  %v1795_v57 = vmul.f32 %v6558_v38, %v9166_v14  ;;  %6593 = vrcp.f32 %v8239_v44 }
 0xc3c   : > { %v1371_v39 = vpop.permute.xlu1 %1370  ;;  %9164 = vst [vmem:[#allocation29_spill] sm:$0xff] %v8433_v54  ;;  %v6564_v17 = vpop.eup %6563  ;;  %v2663_v29 = vmul.f32 %v6562_v18, %v9169_v25  ;;  %v9171_v25 = vld [vmem:[#allocation47_spill] sm:$0xff]  ;;  %v9172_v18 = vld [vmem:[#allocation10_spill] sm:$0xff]  ;;  %6595 = vrcp.f32 %v8274_v45  ;;  %v9181_v45 = vld [vmem:[#allocation12_spill] sm:$0xff] }
 0xc3d   : > { %v8435_v36 = vadd.f32 %v1371_v39, %v1353_v53  ;;  %v2237_v33 = vpop.permute.xlu0 %2236  ;;  %v1794_v53 = vmul.f32 %v6556_v47, %v9165_v4  ;;  %v6566_v7 = vpop.eup %6565  ;;  %v9167_v39 = vld [vmem:[#allocation60_spill] sm:$0xff]  ;;  %v779_v40 = vsel %vm732_vm2, %v9172_v18, 0.0  ;;  %v9176_v18 = vld [vmem:[#allocation9_spill] sm:$0xff]  ;;  %6597 = vrcp.f32 %v8246_v6 }
 0xc3e   : > { %v2662_v58 = vmul.f32 %v6560_v63, %v9167_v39  ;;  %v6568_v63 = vpop.eup %6567  ;;  %v9170_v4 = vld [vmem:[#allocation48_spill] sm:$0xff]  ;;  %v2229_v12 = vmul.f32 %v6566_v7, %v9171_v25  ;;  %v9173_v7 = vld [vmem:[#allocation30_spill] sm:$0xff]  ;;  %6599 = vrcp.f32 %v8282_v35 }
 0xc3f   : > { %v2228_v14 = vmul.f32 %v6564_v17, %v9170_v4  ;;  %v1355_v39 = vmul.f32 %v6568_v63, %v9173_v7 }
 0xc40   : > { %v1803_v32 = vpop.permute.xlu1 %1802 }
 0xc41   : > { %v2671_v13 = vpop.permute.xlu0 %2670  ;;  %v8449_v60 = vadd.f32 %v1803_v32, %v1794_v53  ;;  %v6570_v32 = vpop.eup %6569  ;;  %6601 = vrcp.f32 %v8260_v23 }
 0xc42   : > { %v8454_v38 = vadd.f32 %v2671_v13, %v2662_v58  ;;  %v8466_v13 = vadd.f32 %v2237_v33, %v2228_v14  ;;  %v6572_v17 = vpop.eup %6571  ;;  %v9174_v58 = vld [vmem:[#allocation31_spill] sm:$0xff]  ;;  %6603 = vrcp.f32 %v8334_v16 }
 0xc43   : > { %v6574_v4 = vpop.eup %6573  ;;  %v9175_v33 = vld [vmem:[#allocation11_spill] sm:$0xff]  ;;  %v3097_v26 = vmul.f32 %v6572_v17, %v7903_v5  ;;  %v9177_v17 = vld [vmem:[#allocation38_spill] sm:$0xff]  ;;  %6605 = vrcp.f32 %v8286_v41 }
 0xc44   : > { %v1805_v56 = vpop.permute.xlu1 %1804  ;;  %v782_v14 = vsel %vm732_vm2, %v9175_v33, 0.0  ;;  %v6576_v63 = vpop.eup %6575  ;;  %v3096_v7 = vmul.f32 %v6574_v4, %v7905_v20  ;;  %v3779_v20 = vsel %vm732_vm2, %v8319_v30, 0.0  ;;  %v9178_v4 = vld [vmem:[#allocation39_spill] sm:$0xff]  ;;  %6607 = vrcp.f32 %v8268_v46 }
 0xc45   : > { %v8451_v54 = vadd.f32 %v1805_v56, %v1795_v57  ;;  %774 = vadd.xlane.f32.xlu0 %v773_v27  ;;  %v2673_v10 = vpop.permute.xlu0 %2672  ;;  %v6578_v49 = vpop.eup %6577  ;;  %6609 = vrcp.f32 %v8342_v52 }
 0xc46   : > { %v8456_v47 = vadd.f32 %v2673_v10, %v2663_v29  ;;  %v1354_v10 = vmul.f32 %v6570_v32, %v9174_v58  ;;  %v1796_v33 = vmul.f32 %v6578_v49, %v9178_v4  ;;  %v9180_v4 = vld [vmem:[#allocation50_spill] sm:$0xff] }
 0xc47   : > { %v6288_v59 = vpack.i.bf16 %v8451_v54, %v8449_v60  ;;  %v9197_v60 = vld [vmem:[#allocation63_spill] sm:$0xff] }
 0xc48   : > { %v6298_v56 = vpack.i.bf16 %v8456_v47, %v8454_v38  ;;  %v2239_v27 = vpop.permute.xlu1 %2238 }
 0xc49   : > { %v8468_v29 = vadd.f32 %v2239_v27, %v2229_v12  ;;  %780 = vadd.xlane.f32.xlu0 %v779_v40  ;;  %v1375_v53 = vpop.permute.xlu0 %1374  ;;  %v776_v40 = vsel %vm732_vm2, %v9176_v18, 0.0 }
 0xc4a   : > { %v8479_v12 = vadd.f32 %v1375_v53, %v1355_v39  ;;  %v3782_v39 = vsel %vm732_vm2, %v8324_v62, 0.0  ;;  %v3788_v62 = vsel %vm732_vm2, %v8348_v34, 0.0 }
 0xc4b   : > { %v6293_v57 = vpack.i.bf16 %v8468_v29, %v8466_v13 }
 0xc4c   : > { %v1373_v25 = vpop.permute.xlu1 %1372 }
 0xc4d   : > { %v8481_v27 = vadd.f32 %v1373_v25, %v1354_v10  ;;  %783 = vadd.xlane.f32.xlu0 %v782_v14  ;;  %v3107_v51 = vpop.permute.xlu0 %3106  ;;  %v1797_v25 = vmul.f32 %v6576_v63, %v9177_v17 }
 0xc4e   : > { %v8492_v58 = vadd.f32 %v3107_v51, %v3097_v26  ;;  %v6580_v51 = vpop.eup %6579  ;;  %6611 = vrcp.f32 %v8314_v24 }
 0xc4f   : > { %v6303_v32 = vpack.i.bf16 %v8479_v12, %v8481_v27  ;;  %v6582_v63 = vpop.eup %6581  ;;  %6613 = vrcp.f32 %v8358_v2 }
 0xc50   : > { %777 = vadd.xlane.f32.xlu1 %v776_v40  ;;  %v3105_v53 = vpop.permute.xlu1 %3104  ;;  %v6584_v30 = vpop.eup %6583  ;;  %v3530_v49 = vmul.f32 %v6582_v63, %v8093_v55  ;;  %6615 = vrcp.f32 %v8330_v9 }
 0xc51   : > { %v8494_v42 = vadd.f32 %v3105_v53, %v3096_v7  ;;  %3783 = vadd.xlane.f32.xlu0 %v3782_v39  ;;  %v1809_v10 = vpop.permute.xlu0 %1808  ;;  %v3531_v7 = vmul.f32 %v6580_v51, %v8091_v28  ;;  %v6586_v53 = vpop.eup %6585  ;;  %6617 = vrcp.f32 %v8372_v8 }
 0xc52   : > { %v8505_v26 = vadd.f32 %v1809_v10, %v1797_v25  ;;  %v3794_v10 = vsel %vm732_vm2, %v8364_v0, 0.0  ;;  %v2231_v25 = vmul.f32 %v6584_v30, %v9179_v48  ;;  %v2230_v0 = vmul.f32 %v6586_v53, %v9180_v4  ;;  %v6588_v51 = vpop.eup %6587  ;;  %v9183_v53 = vld [vmem:[#allocation13_spill] sm:$0xff] }
 0xc53   : > { %v6308_v5 = vpack.i.bf16 %v8492_v58, %v8494_v42  ;;  %v6590_v63 = vpop.eup %6589  ;;  %v785_v30 = vsel %vm732_vm2, %v9181_v45, 0.0  ;;  %v9188_v45 = vld [vmem:[#allocation33_spill] sm:$0xff]  ;;  %6619 = vrcp.f32 %v8338_v15 }
 0xc54   : > { %3780 = vadd.xlane.f32.xlu1 %v3779_v20  ;;  %v1807_v14 = vpop.permute.xlu1 %1806  ;;  %v3791_v20 = vsel %vm732_vm2, %v8360_v22, 0.0  ;;  %v6592_v6 = vpop.eup %6591  ;;  %6621 = vrcp.f32 %v8380_v43  ;;  %v9193_v15 = vld [vmem:[#allocation29_spill] sm:$0xff]  ;;  %v9196_v43 = vld [vmem:[#allocation44_spill] sm:$0xff] }
 0xc55   : > { %v8507_v18 = vadd.f32 %v1807_v14, %v1796_v33  ;;  %3789 = vadd.xlane.f32.xlu0 %v3788_v62  ;;  %v3541_v40 = vpop.permute.xlu0 %3540  ;;  %v3797_v33 = vsel %vm732_vm2, %v8402_v61, 0.0 }
 0xc56   : > { %v8519_v19 = vadd.f32 %v3541_v40, %v3531_v7  ;;  %v3800_v40 = vsel %vm732_vm2, %v8407_v31, 0.0  ;;  %v9184_v31 = vld [vmem:[#allocation62_spill] sm:$0xff] }
 0xc57   : > { %v6313_v34 = vpack.i.bf16 %v8505_v26, %v8507_v18  ;;  %v9205_v26 = vld [vmem:[#allocation67_spill] sm:$0xff] }
 0xc58   : > { %3786 = vadd.xlane.f32.xlu1 %v3785_v11  ;;  %v3539_v39 = vpop.permute.xlu1 %3538 }
 0xc59   : > { %v8521_v17 = vadd.f32 %v3539_v39, %v3530_v49  ;;  %3795 = vadd.xlane.f32.xlu0 %v3794_v10  ;;  %v2243_v28 = vpop.permute.xlu0 %2242  ;;  %v9182_v49 = vld [vmem:[#allocation61_spill] sm:$0xff]  ;;  %v788_v39 = vsel %vm732_vm2, %v9183_v53, 0.0  ;;  %v2664_v10 = vmul.f32 %v6590_v63, %v9184_v31 }
 0xc5a   : > { %v8533_v14 = vadd.f32 %v2243_v28, %v2231_v25  ;;  %v2665_v11 = vmul.f32 %v6588_v51, %v9182_v49  ;;  %v6594_v28 = vpop.eup %6593  ;;  %v9185_v25 = vld [vmem:[#allocation14_spill] sm:$0xff] }
 0xc5b   : > { %v6318_v55 = vpack.i.bf16 %v8519_v19, %v8521_v17  ;;  %v6596_v23 = vpop.eup %6595 }
 0xc5c   : > { %3792 = vadd.xlane.f32.xlu1 %v3791_v20  ;;  %v2241_v1 = vpop.permute.xlu1 %2240  ;;  %v791_v20 = vsel %vm732_vm2, %v9185_v25, 0.0  ;;  %v6598_v49 = vpop.eup %6597  ;;  %v3099_v31 = vmul.f32 %v6596_v23, %v7907_v50 }
 0xc5d   : > { %v8535_v44 = vadd.f32 %v2241_v1, %v2230_v0  ;;  %v8537_v62 = vpop.permute.xlu0 %3974  ;;  %3798 = vadd.xlane.f32.xlu0 %v3797_v33  ;;  %v9186_v33 = vld [vmem:[#allocation32_spill] sm:$0xff] }
 0xc5e   : > { %v1357_v51 = vmul.f32 %v6592_v6, %v9186_v33  ;;  %v6600_v6 = vpop.eup %6599  ;;  %v9190_v33 = vld [vmem:[#allocation41_spill] sm:$0xff] }
 0xc5f   : > { %v6323_v22 = vpack.i.bf16 %v8533_v14, %v8535_v44  ;;  %v6602_v41 = vpop.eup %6601  ;;  %v9208_v14 = vld [vmem:[#allocation43_spill] sm:$0xff] }
 0xc60   : > { %3801 = vadd.xlane.f32.xlu1 %v3800_v40  ;;  %v8544_v61 = vpop.permute.xlu1 %3972  ;;  %v9187_v40 = vld [vmem:[#allocation15_spill] sm:$0xff] }
 0xc61   : > { %v2677_v7 = vpop.permute.xlu0 %2676  ;;  %786 = vadd.xlane.f32.xlu0 %v785_v30  ;;  %v794_v63 = vsel %vm732_vm2, %v9187_v40, 0.0  ;;  %v1356_v30 = vmul.f32 %v6594_v28, %v9188_v45  ;;  %v6604_v40 = vpop.eup %6603 }
 0xc62   : > { %v8556_v4 = vadd.f32 %v2677_v7, %v2665_v11  ;;  %v6606_v45 = vpop.eup %6605 }
 0xc64   : > { %789 = vadd.xlane.f32.xlu1 %v788_v39  ;;  %v2675_v48 = vpop.permute.xlu1 %2674 }
 0xc65   : > { %v8558_v35 = vadd.f32 %v2675_v48, %v2664_v10  ;;  %v1379_v0 = vpop.permute.xlu0 %1378  ;;  %792 = vadd.xlane.f32.xlu0 %v791_v20  ;;  %v3098_v10 = vmul.f32 %v6598_v49, %v7909_v3  ;;  %v3532_v49 = vmul.f32 %v6606_v45, %v8097_v37  ;;  %v9191_v37 = vld [vmem:[#allocation51_spill] sm:$0xff] }
 0xc66   : > { %v8569_v11 = vadd.f32 %v1379_v0, %v1357_v51  ;;  %v9189_v0 = vld [vmem:[#allocation40_spill] sm:$0xff]  ;;  %v1798_v51 = vmul.f32 %v6602_v41, %v9190_v33  ;;  %v9195_v45 = vld [vmem:[#allocation55_spill] sm:$0xff] }
 0xc67   : > { %v6328_v1 = vpack.i.bf16 %v8556_v4, %v8558_v35  ;;  %v1799_v52 = vmul.f32 %v6600_v6, %v9189_v0  ;;  %6623 = vrcp.f32 %v9195_v45  ;;  %v9210_v4 = vld [vmem:[#allocation72_spill] sm:$0xff] }
 0xc68   : > { %795 = vadd.xlane.f32.xlu1 %v794_v63  ;;  %v1377_v7 = vpop.permute.xlu1 %1376  ;;  %6625 = vrcp.f32 %v9196_v43 }
 0xc69   : > { %v8571_v16 = vadd.f32 %v1377_v7, %v1356_v30  ;;  %v3111_v53 = vpop.permute.xlu0 %3110  ;;  %v6608_v30 = vpop.eup %6607 }
 0xc6a   : > { %v8578_v48 = vadd.f32 %v3111_v53, %v3099_v31  ;;  %v3533_v53 = vmul.f32 %v6604_v40, %v8095_v21  ;;  %v6610_v6 = vpop.eup %6609  ;;  %v9194_v40 = vpack.i.bf16 %v8435_v36, %v9193_v15  ;;  %v9198_v36 = vld [vmem:[#allocation64_spill] sm:$0xff]  ;;  %v9204_v15 = vld [vmem:[#allocation27_spill] sm:$0xff] }
 0xc6b   : > { %v6333_v39 = vpack.i.bf16 %v8569_v11, %v8571_v16  ;;  %v6612_v8 = vpop.eup %6611  ;;  %v9212_v11 = vld [vmem:[#allocation45_spill] sm:$0xff] }
 0xc6c   : > { %v3109_v28 = vpop.permute.xlu1 %3108 }
 0xc6d   : > { %v8580_v46 = vadd.f32 %v3109_v28, %v3098_v10  ;;  %v1813_v25 = vpop.permute.xlu0 %1812  ;;  %v2233_v28 = vmul.f32 %v6610_v6, %v9191_v37 }
 0xc6e   : > { %v8587_v50 = vadd.f32 %v1813_v25, %v1799_v52  ;;  %v9192_v25 = vld [vmem:[#allocation52_spill] sm:$0xff] }
 0xc6f   : > { %v6338_v20 = vpack.i.bf16 %v8578_v48, %v8580_v46  ;;  %v2232_v0 = vmul.f32 %v6608_v30, %v9192_v25  ;;  %v9214_v46 = vld [vmem:[#allocation54_spill] sm:$0xff] }
 0xc70   : > { %v1811_v63 = vpop.permute.xlu1 %1810 }
 0xc71   : > { %v8589_v3 = vadd.f32 %v1811_v63, %v1798_v51  ;;  %v3545_v23 = vpop.permute.xlu0 %3544  ;;  %v6614_v63 = vpop.eup %6613 }
 0xc72   : > { %v8597_v24 = vadd.f32 %v3545_v23, %v3533_v53  ;;  %v6616_v54 = vpop.eup %6615 }
 0xc73   : > { %v6343_v7 = vpack.i.bf16 %v8587_v50, %v8589_v3  ;;  %v6618_v53 = vpop.eup %6617  ;;  %v9216_v50 = vld [vmem:[#allocation46_spill] sm:$0xff] }
 0xc74   : > { %v3543_v31 = vpop.permute.xlu1 %3542  ;;  %v6620_v12 = vpop.eup %6619 }
 0xc75   : > { %v8599_v10 = vadd.f32 %v3543_v31, %v3532_v49  ;;  %v2247_v41 = vpop.permute.xlu0 %2246  ;;  %v2666_v49 = vmul.f32 %v6612_v8, %v9198_v36  ;;  %v9199_v31 = vld [vmem:[#allocation24_spill] sm:$0xff]  ;;  %v9203_v8 = vld [vmem:[#allocation26_spill] sm:$0xff] }
 0xc76   : > { %v8607_v21 = vadd.f32 %v2247_v41, %v2233_v28  ;;  %6627 = vrcp.f32 %v9199_v31  ;;  %v9202_v28 = vld [vmem:[#allocation35_spill] sm:$0xff] }
 0xc77   : > { %v6348_v2 = vpack.i.bf16 %v8597_v24, %v8599_v10  ;;  %v1358_v25 = vmul.f32 %v6616_v54, %v9202_v28  ;;  %v9215_v28 = vld [vmem:[#allocation57_spill] sm:$0xff]  ;;  %v9217_v24 = vld [vmem:[#allocation58_spill] sm:$0xff]  ;;  %v9218_v10 = vld [vmem:[#allocation75_spill] sm:$0xff] }
 0xc78   : > { %v2245_v52 = vpop.permute.xlu1 %2244 }
 0xc79   : > { %v8609_v9 = vadd.f32 %v2245_v52, %v2232_v0  ;;  %v8611_v33 = vpop.permute.xlu0 %3978  ;;  %6289 = vrot.lane.b32.xlu1 %v6288_v59, %s6788_s16  ;;  %v2667_v59 = vmul.f32 %v6614_v63, %v9197_v60  ;;  %v6622_v0 = vpop.eup %6621 }
 0xc7a   : > { %v3101_v18 = vmul.f32 %v6622_v0, %v9205_v26 }
 0xc7b   : > { %v6353_v51 = vpack.i.bf16 %v8607_v21, %v8609_v9  ;;  %6284 = vrot.lane.b32.xlu0 %v9194_v40, %s6789_s17  ;;  %v6624_v40 = vpop.eup %6623 }
 0xc7c   : > { %v8624_v23 = vpop.permute.xlu1 %3976  ;;  %v1800_v44 = vmul.f32 %v6624_v40, %v9208_v14 }
 0xc7d   : > { %v2681_v30 = vpop.permute.xlu0 %2680  ;;  %6294 = vrot.lane.b32.xlu1 %v6293_v57, %s6787_s15  ;;  %v9200_v57 = vld [vmem:[#allocation56_spill] sm:$0xff] }
 0xc7e   : > { %v8639_v41 = vadd.f32 %v2681_v30, %v2667_v59  ;;  %6629 = vrcp.f32 %v9200_v57  ;;  %v6626_v30 = vpop.eup %6625 }
 0xc7f   : > { %6304 = vrot.lane.b32.xlu0 %v6303_v32, %s6789_s17  ;;  %v9201_v32 = vld [vmem:[#allocation34_spill] sm:$0xff]  ;;  %6631 = vrcp.f32 %v9203_v8 }
 0xc80   : > { %v2679_v6 = vpop.permute.xlu1 %2678  ;;  %v1359_v37 = vmul.f32 %v6618_v53, %v9201_v32  ;;  %6633 = vrcp.f32 %v9204_v15  ;;  %v6628_v58 = vpop.eup %6627  ;;  %v9213_v32 = vld [vmem:[#allocation53_spill] sm:$0xff]  ;;  %v9219_v8 = vld [vmem:[#allocation66_spill] sm:$0xff] }
 0xc81   : > { %v8641_v13 = vadd.f32 %v2679_v6, %v2666_v49  ;;  %v1383_v29 = vpop.permute.xlu0 %1382  ;;  %6299 = vrot.lane.b32.xlu1 %v6298_v56, %s6786_s14  ;;  %v3534_v35 = vmul.f32 %v6628_v58, %v9210_v4 }
 0xc82   : > { %v1399_v38 = vadd.f32 %v1383_v29, %v1359_v37  ;;  %v9211_v29 = vld [vmem:[#allocation25_spill] sm:$0xff] }
 0xc83   : > { %v6358_v27 = vpack.i.bf16 %v8639_v41, %v8641_v13  ;;  %6314 = vrot.lane.b32.xlu0 %v6313_v34, %s6788_s16  ;;  %v9206_v34 = vld [vmem:[#allocation68_spill] sm:$0xff]  ;;  %6635 = vrcp.f32 %v9211_v29  ;;  %v4296_v29 = vld [vmem:[%s9043_s4 + $0x38] sm:$0xff] }
 0xc84   : > { %v1381_v52 = vpop.permute.xlu1 %1380  ;;  %v3100_v45 = vmul.f32 %v6620_v12, %v9206_v34  ;;  %6637 = vrcp.f32 %v9212_v11  ;;  %v4290_v34 = vld [vmem:[%s9043_s4 + $0x8] sm:$0xff] }
 0xc85   : > { %v1398_v47 = vadd.f32 %v1381_v52, %v1358_v25  ;;  %v3115_v56 = vpop.permute.xlu0 %3114  ;;  %6309 = vrot.lane.b32.xlu1 %v6308_v5, %s6785_s13  ;;  %v9207_v5 = vld [vmem:[#allocation42_spill] sm:$0xff]  ;;  %6639 = vrcp.f32 %v9215_v28  ;;  %v4301_v28 = vld [vmem:[%s9043_s4 + $0x60] sm:$0xff] }
 0xc86   : > { %v3133_v54 = vadd.f32 %v3115_v56, %v3101_v18  ;;  %v1801_v36 = vmul.f32 %v6626_v30, %v9207_v5  ;;  %6641 = vrcp.f32 %v9216_v50  ;;  %v4289_v18 = vld [vmem:[%s9043_s4] sm:$0xff]  ;;  %v4292_v5 = vld [vmem:[%s9043_s4 + $0x18] sm:$0xff] }
 0xc87   : > { %v6363_v63 = vpack.i.bf16 %v1399_v38, %v1398_v47  ;;  %6324 = vrot.lane.b32.xlu0 %v6323_v22, %s6787_s15  ;;  %6643 = vrcp.f32 %v9217_v24  ;;  %v9220_v47 = vld [vmem:[#allocation65_spill] sm:$0xff] }
 0xc88   : > { %v3113_v43 = vpop.permute.xlu1 %3112  ;;  %v6630_v22 = vpop.eup %6629  ;;  %6645 = vrcp.f32 %v9218_v10 }
 0xc89   : > { %v3132_v60 = vadd.f32 %v3113_v43, %v3100_v45  ;;  %v1817_v59 = vpop.permute.xlu0 %1816  ;;  %6319 = vrot.lane.b32.xlu1 %v6318_v55, %s6784_s9  ;;  %v6632_v19 = vpop.eup %6631  ;;  %v9209_v55 = vld [vmem:[#allocation71_spill] sm:$0xff]  ;;  %v4291_v45 = vld [vmem:[%s9043_s4 + $0x10] sm:$0xff] }
 0xc8a   : > { %v1833_v53 = vadd.f32 %v1817_v59, %v1801_v36  ;;  %v3535_v41 = vmul.f32 %v6630_v22, %v9209_v55  ;;  %v9221_v43 = vld [vmem:[#allocation70_spill] sm:$0xff]  ;;  %v9222_v59 = vld [vmem:[#allocation69_spill] sm:$0xff]  ;;  %v4293_v22 = vld [vmem:[%s9043_s4 + $0x20] sm:$0xff] }
 0xc8b   : > { %v6368_v42 = vpack.i.bf16 %v3133_v54, %v3132_v60  ;;  %6329 = vrot.lane.b32.xlu0 %v6328_v1, %s6786_s14  ;;  %v6634_v1 = vpop.eup %6633 }
 0xc8c   : > { %v1815_v49 = vpop.permute.xlu1 %1814  ;;  %v2235_v48 = vmul.f32 %v6634_v1, %v9213_v32  ;;  %v4298_v32 = vld [vmem:[%s9043_s4 + $0x48] sm:$0xff] }
 0xc8d   : > { %v1832_v6 = vadd.f32 %v1815_v49, %v1800_v44  ;;  %v3549_v31 = vpop.permute.xlu0 %3548  ;;  %6334 = vrot.lane.b32.xlu1 %v6333_v39, %s6789_s17  ;;  %v6636_v52 = vpop.eup %6635  ;;  %v5910_v44 = vpack.c.bf16 %v4292_v5, %v4291_v45  ;;  %v4294_v49 = vld [vmem:[%s9043_s4 + $0x28] sm:$0xff]  ;;  %v4303_v45 = vld [vmem:[%s9043_s4 + $0x70] sm:$0xff] }
 0xc8e   : > { %v3567_v57 = vadd.f32 %v3549_v31, %v3535_v41  ;;  %v6638_v21 = vpop.eup %6637  ;;  %v2668_v38 = vmul.f32 %v6636_v52, %v9219_v8  ;;  %v9224_v41 = vld [vmem:[#allocation73_spill] sm:$0xff] }
 0xc8f   : > { %v6373_v17 = vpack.i.bf16 %v1833_v53, %v1832_v6  ;;  %6339 = vrot.lane.b32.xlu0 %v6338_v20, %s6785_s13  ;;  %v2234_v20 = vmul.f32 %v6632_v19, %v9214_v46  ;;  %v2669_v56 = vmul.f32 %v6638_v21, %v9220_v47  ;;  %v9223_v19 = vld [vmem:[#allocation74_spill] sm:$0xff] }
 0xc90   : > { %v3547_v13 = vpop.permute.xlu1 %3546  ;;  %v4299_v46 = vld [vmem:[%s9043_s4 + $0x50] sm:$0xff] }
 0xc91   : > { %v3566_v12 = vadd.f32 %v3547_v13, %v3534_v35  ;;  %6344 = vrot.lane.b32.xlu1 %v6343_v7, %s6788_s16  ;;  %v2251_v16 = vpop.permute.xlu0 %2250  ;;  %v5914_v35 = vpack.c.bf16 %v4294_v49, %v4293_v22  ;;  %v4295_v13 = vld [vmem:[%s9043_s4 + $0x30] sm:$0xff] }
 0xc92   : > { %v2267_v25 = vadd.f32 %v2251_v16, %v2235_v48  ;;  %v5918_v16 = vpack.c.bf16 %v4296_v29, %v4295_v13 }
 0xc93   : > { %v6378_v39 = vpack.i.bf16 %v3567_v57, %v3566_v12  ;;  %6349 = vrot.lane.b32.xlu0 %v6348_v2, %s6784_s9 }
 0xc94   : > { %v2249_v37 = vpop.permute.xlu1 %2248 }
 0xc95   : > { %v2266_v0 = vadd.f32 %v2249_v37, %v2234_v20  ;;  %6354 = vrot.lane.b32.xlu1 %v6353_v51, %s6787_s15  ;;  %v8712_v2 = vpop.permute.xlu0 %3982  ;;  %v6640_v51 = vpop.eup %6639  ;;  %v4300_v20 = vld [vmem:[%s9043_s4 + $0x58] sm:$0xff] }
 0xc96   : > { %v6642_v15 = vpop.eup %6641  ;;  %v3102_v54 = vmul.f32 %v6640_v51, %v9221_v43  ;;  %v5926_v37 = vpack.c.bf16 %v4300_v20, %v4299_v46  ;;  %v9225_v51 = vld [vmem:[#allocation17_spill] sm:$0xff] }
 0xc97   : > { %v6383_v3 = vpack.i.bf16 %v2267_v25, %v2266_v0  ;;  %6364 = vrot.lane.b32.xlu0 %v6363_v63, %s6789_s17  ;;  %v6644_v30 = vpop.eup %6643  ;;  %v3103_v58 = vmul.f32 %v6642_v15, %v9222_v59  ;;  %v4302_v25 = vld [vmem:[%s9043_s4 + $0x68] sm:$0xff]  ;;  %v9226_v15 = vld [vmem:[#allocation19_spill] sm:$0xff] }
 0xc98   : > { %v8707_v7 = vpop.permute.xlu1 %3980  ;;  %v6646_v36 = vpop.eup %6645  ;;  %v5930_v0 = vpack.c.bf16 %v4302_v25, %v4301_v28 }
 0xc99   : > { %6359 = vrot.lane.b32.xlu1 %v6358_v27, %s6786_s14  ;;  %v3117_v27 = vpop.permute.xlu0 %3116  ;;  %v3537_v4 = vmul.f32 %v6646_v36, %v9224_v41 }
 0xc9a   : > { %v8746_v53 = vadd.f32 %v3117_v27, %v3102_v54 }
 0xc9b   : > { %6374 = vrot.lane.b32.xlu0 %v6373_v17, %s6788_s16  ;;  %v3536_v17 = vmul.f32 %v6644_v30, %v9223_v19  ;;  %v4304_v30 = vld [vmem:[%s9043_s4 + $0x78] sm:$0xff]  ;;  %s6709_s16 = scalar_lea.vmem %s6708_s28, 2048 }
 0xc9c   : > { %v2683_v9 = vpop.permute.xlu1 %2682  ;;  %v5934_v59 = vpack.c.bf16 %v4304_v30, %v4303_v45 }
 0xc9d   : > { %6369 = vrot.lane.b32.xlu1 %v6368_v42, %s6785_s13  ;;  %v8719_v63 = vadd.f32 %v2683_v9, %v2668_v38  ;;  %v5906_v42 = vpack.c.bf16 %v4290_v34, %v4289_v18  ;;  %v3551_v31 = vpop.permute.xlu0 %3550 }
 0xc9e   : > { %v8760_v57 = vadd.f32 %v3551_v31, %v3536_v17 }
 0xc9f   : > { %6384 = vrot.lane.b32.xlu0 %v6383_v3, %s6787_s15  ;;  %5907 = vmatprep.subr.bf16.mxu0 %v5906_v42  ;;  %s9233_s15 = sand.u32 1, %s6765_s22  }
 0xca0   : > { %v2685_v40 = vpop.permute.xlu1 %2684  ;;  %5909 = vmatpush3.bf16.msra.mxu0 %v5906_v42  ;;  %s8992_s27 = scalar_lea.sflag [#allocation6], %s9233_s15 }
 0xca1   : > { %v8721_v26 = vadd.f32 %v2685_v40, %v2669_v56  ;;  %6379 = vrot.lane.b32.xlu1 %v6378_v39, %s6784_s9  ;;  %5911 = vmatprep.subr.bf16.mxu0 %v5910_v44  ;;  %v4297_v39 = vld [vmem:[%s9043_s4 + $0x40] sm:$0xff]  ;;  %v8784_v50 = vpop.permute.xlu0 %3984 }
 0xca2   : > { %v5922_v48 = vpack.c.bf16 %v4298_v32, %v4297_v39 }
 0xca3   : > { %v6398_v60 = vpack.i.bf16 %v8721_v26, %v8719_v63 }
 0xca4   : > { %v3119_v14 = vpop.permute.xlu1 %3118  ;;  %5913 = vmatpush3.bf16.msra.mxu0 %v5910_v44  ;;  %v9228_v44 = vld [vmem:[#allocation16_spill] sm:$0xff] }
 0xca5   : > { %v8748_v6 = vadd.f32 %v3119_v14, %v3103_v58  ;;  %5915 = vmatprep.subr.bf16.mxu0 %v5914_v35  ;;  %v9227_v58 = vld [vmem:[#allocation18_spill] sm:$0xff] }
 0xca7   : > { %v6403_v55 = vpack.i.bf16 %v8748_v6, %v8746_v53 }
 0xca8   : > { %v3553_v1 = vpop.permute.xlu1 %3552  ;;  %5917 = vmatpush3.bf16.msra.mxu0 %v5914_v35 }
 0xca9   : > { %v8762_v12 = vadd.f32 %v3553_v1, %v3537_v4  ;;  %5919 = vmatprep.subr.bf16.mxu0 %v5918_v16 }
 0xcab   : > { %v6413_v11 = vpack.i.bf16 %v8762_v12, %v8760_v57 }
 0xcac   : > { %5921 = vmatpush3.bf16.msra.mxu0 %v5918_v16  ;;  %v8786_v10 = vpop.permute.xlu1 %3986 }
 0xcad   : > { %5923 = vmatprep.subr.bf16.mxu0 %v5922_v48 }
 0xcb0   : > { %5925 = vmatpush3.bf16.msra.mxu0 %v5922_v48 }
 0xcb1   : > { %5927 = vmatprep.subr.bf16.mxu0 %v5926_v37 }
 0xcb4   : > { %5929 = vmatpush3.bf16.msra.mxu0 %v5926_v37 }
 0xcb5   : > { %5931 = vmatprep.subr.bf16.mxu0 %v5930_v0 }
 0xcb8   : > { %5933 = vmatpush3.bf16.msra.mxu0 %v5930_v0 }
 0xcb9   : > { %5935 = vmatprep.subr.bf16.mxu0 %v5934_v59 }
 0xcbc   : > { %5937 = vmatpush3.bf16.msra.mxu0 %v5934_v59 }
 0xcd2   : > { %v775_v3 = vpop.xlane.xlu0 %774 }
 0xcd3   : > { %6647 = vrcp.f32 %v775_v3 }
 0xcd6   : > { %v781_v24 = vpop.xlane.xlu0 %780 }
 0xcd7   : > { %6649 = vrcp.f32 %v781_v24 }
 0xcda   : > { %v784_v52 = vpop.xlane.xlu0 %783 }
 0xcdb   : > { %6651 = vrcp.f32 %v784_v52 }
 0xcdd   : > { %v6648_v21 = vpop.eup %6647  ;;  %v778_v9 = vpop.xlane.xlu1 %777 }
 0xcde   : > { %v8789_v8 = vmul.f32 %v6648_v21, %v9225_v51  ;;  %6653 = vrcp.f32 %v778_v9  ;;  %v3784_v38 = vpop.xlane.xlu0 %3783 }
 0xcdf   : > { %6655 = vrcp.f32 %v3784_v38 }
 0xce1   : > { %v6650_v47 = vpop.eup %6649  ;;  %v3781_v56 = vpop.xlane.xlu1 %3780 }
 0xce2   : > { %v8792_v27 = vmul.f32 %v6650_v47, %v9226_v15  ;;  %6657 = vrcp.f32 %v3781_v56  ;;  %v3790_v40 = vpop.xlane.xlu0 %3789 }
 0xce3   : > { %6659 = vrcp.f32 %v3790_v40  ;;  %v5532_v18 = vpop.f32.mrb[48].mxu0 }
 0xce4   : > { %v3917_v34 = vpop.f32.mrb[49].mxu0 }
 0xce5   : > { %v6652_v43 = vpop.eup %6651  ;;  %v3787_v54 = vpop.xlane.xlu1 %3786 }
 0xce6   : > { %v8801_v42 = vmul.f32 %v6652_v43, %v9227_v58  ;;  %6661 = vrcp.f32 %v3787_v54  ;;  %v3796_v5 = vpop.xlane.xlu0 %3795 }
 0xce7   : > { %6663 = vrcp.f32 %v3796_v5 }
 0xce8   : > { %v6654_v36 = vpop.eup %6653 }
 0xce9   : > { %v6656_v14 = vpop.eup %6655  ;;  %v8804_v22 = vmul.f32 %v6654_v36, %v9228_v44  ;;  %v3793_v49 = vpop.xlane.xlu1 %3792 }
 0xcea   : > { %6665 = vrcp.f32 %v3793_v49  ;;  %v3965_v31 = vmul.f32 %v6656_v14, %v5532_v18  ;;  %v3799_v52 = vpop.xlane.xlu0 %3798 }
 0xceb   : > { %v5535_v19 = vpop.f32.mrb[50].mxu0 }
 0xcec   : > { %v6658_v17 = vpop.eup %6657  ;;  %v3927_v41 = vpop.f32.mrb[51].mxu0  ;;  %v3997_v1 = vadd.f32 %v8537_v62, %v3965_v31 }
 0xced   : > { %v6660_v4 = vpop.eup %6659  ;;  %v3964_v35 = vmul.f32 %v6658_v17, %v3917_v34  ;;  %v3802_v24 = vpop.xlane.xlu1 %3801 }
 0xcee   : > { %v3967_v29 = vmul.f32 %v6660_v4, %v5535_v19  ;;  %6667 = vrcp.f32 %v3802_v24  ;;  %v9229_v19 = vld [vmem:[#allocation21_spill] sm:$0xff] }
 0xcef   : > { %v3996_v13 = vadd.f32 %v8544_v61, %v3964_v35  ;;  %v5538_v16 = vpop.f32.mrb[52].mxu0  ;;  %6669 = vrcp.f32 %v3799_v52  ;;  %v6696_v35 = vld [vmem:[%s8190_s12 + $0x8] sm:$0xff] }
 0xcf0   : > { %v6662_v39 = vpop.eup %6661  ;;  %v3937_v32 = vpop.f32.mrb[53].mxu0  ;;  %v3999_v37 = vadd.f32 %v8611_v33, %v3967_v29 }
 0xcf1   : > { %v6664_v48 = vpop.eup %6663  ;;  %v6388_v46 = vpack.i.bf16 %v3997_v1, %v3996_v13  ;;  %v3966_v20 = vmul.f32 %v6662_v39, %v3927_v41  ;;  %v790_v63 = vpop.xlane.xlu1 %789  ;;  %v6695_v41 = vld [vmem:[%s8190_s12] sm:$0xff]  ;;  %v943_v1 = vadd.f32 %v6696_v35, %v8804_v22 }
 0xcf2   : > { %v3969_v25 = vmul.f32 %v6664_v48, %v5538_v16  ;;  %v942_v4 = vadd.f32 %v6695_v41, %v8789_v8  ;;  %v9230_v16 = vld [vmem:[#allocation20_spill] sm:$0xff] }
 0xcf3   : > { %v3998_v28 = vadd.f32 %v8624_v23, %v3966_v20  ;;  %6389 = vrot.lane.b32.xlu1 %v6388_v46, %s6783_s30 }
 0xcf4   : > { %v6666_v0 = vpop.eup %6665  ;;  %v4001_v61 = vadd.f32 %v8712_v2, %v3969_v25 }
 0xcf5   : > { %v6393_v3 = vpack.i.bf16 %v3999_v37, %v3998_v28  ;;  %v3968_v62 = vmul.f32 %v6666_v0, %v3937_v32  ;;  %v796_v26 = vpop.xlane.xlu1 %795  ;;  %v6697_v32 = vld [vmem:[%s8190_s12 + $0x18] sm:$0xff] }
 0xcf6   : > { %v945_v48 = vadd.f32 %v6697_v32, %v8801_v42  ;;  %v6698_v42 = vld [vmem:[%s8190_s12 + $0x10] sm:$0xff] }
 0xcf7   : > { %v4000_v21 = vadd.f32 %v8707_v7, %v3968_v62  ;;  %6404 = vrot.lane.b32.xlu1 %v6403_v55, %s6785_s13  ;;  %6394 = vrot.lane.b32.xlu0 %v6393_v3, %s6783_s30  ;;  %v944_v3 = vadd.f32 %v6698_v42, %v8792_v27  ;;  %s525_s13 = scalar_lea.vmem [#allocation5], %s6915_s20 }
 0xcf8   : > { %v6668_v23 = vpop.eup %6667 }
 0xcf9   : > { %v6408_v33 = vpack.i.bf16 %v4001_v61, %v4000_v21  ;;  %v6670_v2 = vpop.eup %6669  ;;  %v6290_v47 = vpop.permute.xlu1 %6289  ;;  %v6699_v61 = vld [vmem:[%s8190_s12 + $0x20] sm:$0xff] }
 0xcfa   : > { %v6292_v49 = vunpack.i.h.bf16 %v6290_v47  ;;  %v6291_v31 = vunpack.i.l.bf16 %v6290_v47 }
 0xcfb   : > { %6399 = vrot.lane.b32.xlu0 %v6398_v60, %s6786_s14  ;;  %6409 = vrot.lane.b32.xlu1 %v6408_v33, %s6783_s30  ;;  %v787_v60 = vpop.xlane.xlu0 %786  ;;  %s4813_s14 = sshll.u32 %s6773_s24, 10 }
 0xcfc   : > { %6671 = vrcp.f32 %v787_v60  ;;  %s8986_s19 = scalar_lea.hbm %s9045_s6, %s4813_s14 }
 0xcfd   : > { %v8830_v57 = vpop.permute.xlu1 %6294  ;;  %6673 = vrcp.f32 %v790_v63 }
 0xcfe   : > { %v6297_v22 = vunpack.i.h.bf16 %v8830_v57  ;;  %v6296_v37 = vunpack.i.l.bf16 %v8830_v57 }
 0xcff   : > { %6414 = vrot.lane.b32.xlu0 %v6413_v11, %s6784_s9  ;;  %v793_v56 = vpop.xlane.xlu0 %792 }
 0xd00   : > { %6675 = vrcp.f32 %v793_v56 }
 0xd01   : > { %v8832_v11 = vpop.permute.xlu1 %6299  ;;  %6677 = vrcp.f32 %v796_v26 }
 0xd02   : > { %v5541_v7 = vpop.f32.mrb[54].mxu0 }
 0xd03   : > { %v3971_v53 = vmul.f32 %v6668_v23, %v5541_v7  ;;  %v3947_v6 = vpop.f32.mrb[55].mxu0  ;;  %v6285_v12 = vpop.permute.xlu0 %6284  ;;  %v6302_v23 = vunpack.i.h.bf16 %v8832_v11  ;;  %v6301_v7 = vunpack.i.l.bf16 %v8832_v11 }
 0xd04   : > { %v3970_v55 = vmul.f32 %v6670_v2, %v3947_v6  ;;  %v6287_v14 = vunpack.i.h.bf16 %v6285_v12  ;;  %v6286_v44 = vunpack.i.l.bf16 %v6285_v12  ;;  %v6700_v2 = vld [vmem:[%s8190_s12 + $0x28] sm:$0xff] }
 0xd05   : > { %v4003_v9 = vadd.f32 %v8786_v10, %v3971_v53  ;;  %v8834_v40 = vpop.permute.xlu1 %6309 }
 0xd06   : > { %v4002_v51 = vadd.f32 %v8784_v50, %v3970_v55  ;;  %v6672_v5 = vpop.eup %6671  ;;  %v4228_v20 = vsel %vm578_vm0, %v942_v4, %v6286_v44  ;;  %v4229_v8 = vsel %vm578_vm0, %v943_v1, %v6287_v14  ;;  %v6311_v63 = vunpack.i.l.bf16 %v8834_v40 }
 0xd07   : > { %v6305_v15 = vpop.permute.xlu0 %6304  ;;  %v6674_v36 = vpop.eup %6673  ;;  %v938_v17 = vmul.f32 %v6672_v5, %v9229_v19  ;;  %v4238_v25 = vsel %vm4236_vm3, %v4229_v8, %v6292_v49  ;;  %v4237_v0 = vsel %vm4236_vm3, %v4228_v20, %v6291_v31 }
 0xd08   : > { %v6418_v38 = vpack.i.bf16 %v4003_v9, %v4002_v51  ;;  %v6307_v13 = vunpack.i.h.bf16 %v6305_v15  ;;  %v939_v39 = vmul.f32 %v6674_v36, %v9230_v16  ;;  %v6306_v46 = vunpack.i.l.bf16 %v6305_v15 }
 0xd09   : > { %v8838_v10 = vpop.permute.xlu1 %6319  ;;  %v946_v21 = vadd.f32 %v6699_v61, %v938_v17  ;;  %v4246_v6 = vsel %vm4245_vm4, %v4237_v0, %v6296_v37  ;;  %v4247_v27 = vsel %vm4245_vm4, %v4238_v25, %v6297_v22 }
 0xd0a   : > { %6419 = vrot.lane.b32.xlu1 %v6418_v38, %s6783_s30  ;;  %v4231_v24 = vsel %vm578_vm0, %v945_v48, %v6307_v13  ;;  %v4230_v33 = vsel %vm578_vm0, %v944_v3, %v6306_v46  ;;  %v947_v53 = vadd.f32 %v6700_v2, %v939_v39  ;;  %v6312_v38 = vunpack.i.h.bf16 %v8834_v40  ;;  %v6676_v44 = vpop.eup %6675 }
 0xd0b   : > { %v8836_v18 = vpop.permute.xlu0 %6314  ;;  %v6322_v57 = vunpack.i.h.bf16 %v8838_v10  ;;  %v6321_v12 = vunpack.i.l.bf16 %v8838_v10  ;;  %v4254_v15 = vsel %vm732_vm2, %v4246_v6, %v6301_v7  ;;  %v6678_v1 = vpop.eup %6677 }
 0xd0c   : > { %v6317_v62 = vunpack.i.h.bf16 %v8836_v18  ;;  %v6316_v52 = vunpack.i.l.bf16 %v8836_v18  ;;  %v4255_v18 = vsel %vm732_vm2, %v4247_v27, %v6302_v23  ;;  %v4263_v19 = vsel %vm4262_vm5, %v4254_v15, %v6311_v63 }
 0xd0d   : > { %v8842_v34 = vpop.permute.xlu1 %6334  ;;  %v4264_v10 = vsel %vm4262_vm5, %v4255_v18, %v6312_v38  ;;  %v9232_v18 = vld [vmem:[#allocation22_spill] sm:$0xff] }
 0xd0e   : > { %v4240_v47 = vsel %vm4236_vm3, %v4231_v24, %v6317_v62  ;;  %v4239_v56 = vsel %vm4236_vm3, %v4230_v33, %v6316_v52  ;;  %v6337_v36 = vunpack.i.h.bf16 %v8842_v34  ;;  %v6336_v14 = vunpack.i.l.bf16 %v8842_v34 }
 0xd0f   : > { %v8840_v50 = vpop.permute.xlu0 %6324  ;;  %v4273_v17 = vsel %vm4271_vm6, %v4264_v10, %v6322_v57  ;;  %v4272_v34 = vsel %vm4271_vm6, %v4263_v19, %v6321_v12  ;;  %v6701_v10 = vld [vmem:[%s8190_s12 + $0x30] sm:$0xff] }
 0xd10   : > { %v6327_v55 = vunpack.i.h.bf16 %v8840_v50  ;;  %v6326_v9 = vunpack.i.l.bf16 %v8840_v50  ;;  %v4233_v48 = vsel %vm578_vm0, %v947_v53, %v6337_v36  ;;  %v4232_v46 = vsel %vm578_vm0, %v946_v21, %v6336_v14 }
 0xd11   : > { %v8846_v30 = vpop.permute.xlu1 %6344 }
 0xd12   : > { %v4248_v5 = vsel %vm4245_vm4, %v4239_v56, %v6326_v9  ;;  %v6347_v20 = vunpack.i.h.bf16 %v8846_v30 }
 0xd13   : > { %v8844_v45 = vpop.permute.xlu0 %6329 }
 0xd14   : > { %v6332_v26 = vunpack.i.h.bf16 %v8844_v45  ;;  %v6331_v60 = vunpack.i.l.bf16 %v8844_v45  ;;  %v4249_v45 = vsel %vm4245_vm4, %v4240_v47, %v6327_v55  ;;  %v4242_v23 = vsel %vm4236_vm3, %v4233_v48, %v6347_v20 }
 0xd15   : > { %v8850_v54 = vpop.permute.xlu1 %6354 }
 0xd16   : > { %v4257_v49 = vsel %vm732_vm2, %v4249_v45, %v6332_v26  ;;  %v4256_v31 = vsel %vm732_vm2, %v4248_v5, %v6331_v60  ;;  %v6357_v8 = vunpack.i.h.bf16 %v8850_v54  ;;  %v6356_v22 = vunpack.i.l.bf16 %v8850_v54 }
 0xd17   : > { %v8848_v43 = vpop.permute.xlu0 %6339 }
 0xd18   : > { %v6342_v40 = vunpack.i.h.bf16 %v8848_v43  ;;  %v6341_v50 = vunpack.i.l.bf16 %v8848_v43  ;;  %v4251_v53 = vsel %vm4245_vm4, %v4242_v23, %v6357_v8 }
 0xd19   : > { %v8854_v58 = vpop.permute.xlu1 %6359 }
 0xd1a   : > { %v4265_v39 = vsel %vm4262_vm5, %v4256_v31, %v6341_v50  ;;  %v4266_v32 = vsel %vm4262_vm5, %v4257_v49, %v6342_v40  ;;  %v6362_v0 = vunpack.i.h.bf16 %v8854_v58  ;;  %v6361_v42 = vunpack.i.l.bf16 %v8854_v58  ;;  %v6702_v31 = vld [vmem:[%s8190_s12 + $0x38] sm:$0xff]  ;;  %s4441_s12 = sshll.u32 %s525_s13, 4  ;;  %s8988_s12 = int_to_ptr.vmem [resolvable:$true] %s4441_s12 }
 0xd1b   : > { %v8852_v59 = vpop.permute.xlu0 %6349  ;;  %v941_v40 = vmul.f32 %v6678_v1, %v9232_v18  ;;  %s6703_s24 = scalar_lea.vmem %s8988_s12, 1024  ;;  %p6710_p4 = scmp.lt.s32.totalorder %s8988_s12, %s6708_s28 }
 0xd1c   : > { %v6352_v43 = vunpack.i.h.bf16 %v8852_v59  ;;  %v6351_v41 = vunpack.i.l.bf16 %v8852_v59  ;;  %v6346_v59 = vunpack.i.l.bf16 %v8846_v30  ;;  %v4259_v55 = vsel %vm732_vm2, %v4251_v53, %v6362_v0  ;;  %p6704_p1 = scmp.ne.s32.totalorder %s8988_s12, %s6703_s24  ;;  %p6711_p6 = scmp.lt.s32.totalorder %s6709_s16, %s6703_s24 }
 0xd1d   : > { %v8870_v28 = vpop.permute.xlu1 %6369  ;;  %v949_v19 = vadd.f32 %v6702_v31, %v941_v40 }
 0xd1e   : > { %v4274_v62 = vsel %vm4271_vm6, %v4265_v39, %v6351_v41  ;;  %v4275_v30 = vsel %vm4271_vm6, %v4266_v32, %v6352_v43  ;;  %v6372_v52 = vunpack.i.h.bf16 %v8870_v28  ;;  %v6371_v54 = vunpack.i.l.bf16 %v8870_v28  ;;  %p6705_p2 = pnand %p6704_p1, %p6871_p5  ;;  %p6712_p7 = por %p6711_p6, %p6710_p4 }
 0xd1f   : > { %v8861_v29 = vpop.permute.xlu0 %6364  ;;  %v4241_v33 = vsel %vm4236_vm3, %v4232_v46, %v6346_v59 }
 0xd20   : > { %v4250_v2 = vsel %vm4245_vm4, %v4241_v33, %v6356_v22  ;;  %v4268_v60 = vsel %vm4262_vm5, %v4259_v55, %v6372_v52  ;;  %v6367_v45 = vunpack.i.h.bf16 %v8861_v29  ;;  %v6366_v5 = vunpack.i.l.bf16 %v8861_v29  ;;  %p6706_p3 = pneg %p6705_p2 }
 0xd21   : > { %v8898_v11 = vpop.permute.xlu1 %6379  ;;  %v4258_v28 = vsel %vm732_vm2, %v4250_v2, %v6361_v42 }
 0xd22   : > { %v6382_v58 = vunpack.i.h.bf16 %v8898_v11  ;;  %v6381_v7 = vunpack.i.l.bf16 %v8898_v11  ;;  %v4267_v26 = vsel %vm4262_vm5, %v4258_v28, %v6371_v54  ;;  %v9231_v11 = vld [vmem:[#allocation23_spill] sm:$0xff]  ;;  %p6713_p8 = pnand %p6712_p7, %p6706_p3 }
 0xd23   : > { %v8888_v51 = vpop.permute.xlu0 %6374  ;;  %v940_v15 = vmul.f32 %v6676_v44, %v9231_v11 }
 0xd24   : > { %v4276_v47 = vsel %vm4271_vm6, %v4267_v26, %v6381_v7  ;;  %v4277_v56 = vsel %vm4271_vm6, %v4268_v60, %v6382_v58  ;;  %v6377_v36 = vunpack.i.h.bf16 %v8888_v51  ;;  %v6376_v14 = vunpack.i.l.bf16 %v8888_v51 }
 0xd25   : > { %v948_v49 = vadd.f32 %v6701_v10, %v940_v15 }
 0xd27   : > { %v8915_v4 = vpop.permute.xlu0 %6384 }
 0xd28   : > { %v6386_v44 = vunpack.i.l.bf16 %v8915_v4 }
 0xd65   : > { %v6390_v35 = vpop.permute.xlu1 %6389 }
 0xd66   : > { %v6392_v13 = vunpack.i.h.bf16 %v6390_v35  ;;  %v6391_v16 = vunpack.i.l.bf16 %v6390_v35  ;;  %v4234_v35 = vsel %vm578_vm0, %v948_v49, %v6366_v5 }
 0xd67   : > { %v4243_v29 = vsel %vm4236_vm3, %v4234_v35, %v6376_v14 }
 0xd68   : > { %v4281_v37 = vsel %vm4280_vm7, %v4272_v34, %v6391_v16  ;;  %v4282_v25 = vsel %vm4280_vm7, %v4273_v17, %v6392_v13  ;;  %v6387_v17 = vunpack.i.h.bf16 %v8915_v4  ;;  %v4235_v34 = vsel %vm578_vm0, %v949_v19, %v6367_v45 }
 0xd69   : > { %v6395_v3 = vpop.permute.xlu0 %6394  ;;  %v8930_v24 = vpop.permute.xlu1 %6404  ;;  %5574 = vmatprep.mubr.f32.mxu0 %v4281_v37  ;;  %v4244_v13 = vsel %vm4236_vm3, %v4235_v34, %v6377_v36  ;;  %v4252_v51 = vsel %vm4245_vm4, %v4243_v29, %v6386_v44 }
 0xd6a   : > { %v6397_v61 = vunpack.i.h.bf16 %v6395_v3  ;;  %v6396_v21 = vunpack.i.l.bf16 %v6395_v3  ;;  %5575 = vmatmul.mubr.f32.vlgmr.msra.gmra.mrb[56].mxu0 %v4282_v25  ;;  %v4253_v16 = vsel %vm4245_vm4, %v4244_v13, %v6387_v17  ;;  %v6407_v46 = vunpack.i.h.bf16 %v8930_v24 }
 0xd6b   : > { %v6406_v20 = vunpack.i.l.bf16 %v8930_v24  ;;  %v4806_v24 = vld [vmem:[%s9044_s5] ss:$0 sm:$0xff] }
 0xd6c   : > { %v4283_v6 = vsel %vm4280_vm7, %v4274_v62, %v6396_v21  ;;  %v4284_v27 = vsel %vm4280_vm7, %v4275_v30, %v6397_v61 }
 0xd6d   : > { %v6410_v9 = vpop.permute.xlu1 %6409  ;;  %5577 = vmatprep.mubr.f32.mxu0 %v4283_v6  ;;  %v6400_v50 = vpop.permute.xlu0 %6399 }
 0xd6e   : > { %v6412_v38 = vunpack.i.h.bf16 %v6410_v9  ;;  %v6411_v63 = vunpack.i.l.bf16 %v6410_v9  ;;  %5578 = vmatmul.mubr.f32.gmra.mrb[58].mxu0 %v4284_v27  ;;  %v6402_v43 = vunpack.i.h.bf16 %v6400_v50  ;;  %v6401_v41 = vunpack.i.l.bf16 %v6400_v50 }
 0xd70   : > { %v4285_v57 = vsel %vm4280_vm7, %v4276_v47, %v6411_v63  ;;  %v4286_v12 = vsel %vm4280_vm7, %v4277_v56, %v6412_v38  ;;  %v4260_v39 = vsel %vm732_vm2, %v4252_v51, %v6401_v41  ;;  %v4261_v32 = vsel %vm732_vm2, %v4253_v16, %v6402_v43 }
 0xd71   : > { %5580 = vmatprep.mubr.f32.mxu0 %v4285_v57  ;;  %v6415_v1 = vpop.permute.xlu0 %6414  ;;  %v4269_v37 = vsel %vm4262_vm5, %v4260_v39, %v6406_v20  ;;  %v4270_v25 = vsel %vm4262_vm5, %v4261_v32, %v6407_v46 }
 0xd72   : > { %5581 = vmatmul.mubr.f32.gmra.mrb[60].mxu0 %v4286_v12  ;;  %v6417_v4 = vunpack.i.h.bf16 %v6415_v1  ;;  %v6416_v48 = vunpack.i.l.bf16 %v6415_v1 }
 0xd74   : > { %v4278_v0 = vsel %vm4271_vm6, %v4269_v37, %v6416_v48  ;;  %v4279_v42 = vsel %vm4271_vm6, %v4270_v25, %v6417_v4 }
 0xd7c   : > { %v6420_v59 = vpop.permute.xlu1 %6419 }
 0xd7d   : > { %v6422_v8 = vunpack.i.h.bf16 %v6420_v59  ;;  %v6421_v22 = vunpack.i.l.bf16 %v6420_v59 }
 0xd7f   : > { %v4287_v3 = vsel %vm4280_vm7, %v4278_v0, %v6421_v22  ;;  %v4288_v62 = vsel %vm4280_vm7, %v4279_v42, %v6422_v8 }
 0xd80   : > { %5583 = vmatprep.mubr.f32.mxu0 %v4287_v3 }
 0xd81   : > { %5584 = vmatmul.mubr.f32.gmra.mrb[62].mxu0 %v4288_v62 }
 0xe3d   : > { %v5576_v30 = vpop.f32.mrb[56].mxu0 }
 0xe3e   : > { %v4384_v52 = vadd.f32 %v5576_v30, %v4806_v24  ;;  %v4378_v54 = vpop.f32.mrb[57].mxu0 }
 0xe3f   : > { %v4379_v61 = vadd.f32 %v4806_v24, %v4378_v54 }
 0xe40   : > { %4418 = vst [vmem:[%s525_s13 + $0x8] sm:$0xff] %v4384_v52 }
 0xe41   : > { %4417 = vst [vmem:[%s525_s13] sm:$0xff] %v4379_v61  ;;  %v5579_v21 = vpop.f32.mrb[58].mxu0 }
 0xe42   : > { %v4394_v33 = vadd.f32 %v5579_v21, %v4806_v24  ;;  %v4388_v23 = vpop.f32.mrb[59].mxu0 }
 0xe43   : > { %v4389_v58 = vadd.f32 %v4806_v24, %v4388_v23 }
 0xe44   : > { %4420 = vst [vmem:[%s525_s13 + $0x18] sm:$0xff] %v4394_v33 }
 0xe45   : > { %4419 = vst [vmem:[%s525_s13 + $0x10] sm:$0xff] %v4389_v58  ;;  %v5582_v7 = vpop.f32.mrb[60].mxu0 }
 0xe46   : > { %v4404_v2 = vadd.f32 %v5582_v7, %v4806_v24  ;;  %v4398_v53 = vpop.f32.mrb[61].mxu0 }
 0xe47   : > { %v4399_v6 = vadd.f32 %v4806_v24, %v4398_v53 }
 0xe48   : > { %4422 = vst [vmem:[%s525_s13 + $0x28] sm:$0xff] %v4404_v2 }
 0xe49   : > { %4421 = vst [vmem:[%s525_s13 + $0x20] sm:$0xff] %v4399_v6 }
 0xe54   : > { %v5585_v27 = vpop.f32.mrb[62].mxu0 }
 0xe55   : > { %v4414_v28 = vadd.f32 %v5585_v27, %v4806_v24  ;;  %v4408_v55 = vpop.f32.mrb[63].mxu0 }
 0xe56   : > { %v4409_v9 = vadd.f32 %v4806_v24, %v4408_v55 }
 0xe57   : > { %4424 = vst [vmem:[%s525_s13 + $0x38] sm:$0xff] %v4414_v28 }
 0xe58   : > { %4423 = vst [vmem:[%s525_s13 + $0x30] sm:$0xff] %v4409_v9 }
 0xe59   : > { %6716 = shalt.err (!%p6713_p8)
}
 0xe5a   : > { %s6717_s17 = scalar_lea.hbm %s8986_s19, 1024  ;;  %s6721_s13 = scalar_lea.hbm %s9045_s6, 2048 }
 0xe5b   : > { %p6718_p11 = scmp.ne.s32.totalorder %s8986_s19, %s6717_s17  ;;  %p6722_p0 = scmp.lt.u32.totalorder %s8986_s19, %s9045_s6 }
 0xe5c   : > { %p6723_p1 = scmp.lt.u32.totalorder %s6721_s13, %s6717_s17  ;;  %p6725_p3 = scmp.lt.u32.totalorder %s6717_s17, %s8986_s19 }
 0xe5d   : > { %p6719_p12 = pnand %p6718_p11, %p6871_p5 }
 0xe5e   : > { %p6724_p2 = por %p6723_p1, %p6722_p0 }
 0xe5f   : > { %p6720_p13 = pneg %p6719_p12 }
 0xe60   : > { %p6726_p4 = por %p6725_p3, %p6724_p2 }
 0xe62   : > { %p6727_p6 = pnand %p6726_p4, %p6720_p13 }
 0xe64   : > { %6730 = shalt.err (!%p6727_p6)
}
 0xe65   : > { %s6791_s18 = smov 128   ;;  %s6792_s15 = smov 8  }
 0xe66   : > { %5939 = dma.vmem_to_hbm [thread:$0]  (%p6871_p5), %s8988_s12, 1024, %s8986_s19, %s8992_s27, %s6791_s18, %s6791_s18, %s6792_s15  }
 0xe67 PF: > { %s4456_s24 = sand.u32 1, %s6761_s21   ;;  %p5942_p7 = pnand %p4584_p10, %p6882_p9 }
 0xe68   : > { %s4457_s7 = scalar_lea.sflag [#allocation6], %s4456_s24 }
 0xe69   : > { %6756 = dma.done.wait (!%p5942_p7), %s4457_s7, 1024  }
 0xe6a   : > { %6758 = vsyncadd (!%p5942_p7), %s4457_s7, 4294966272  ;;  %s19_s26 = sadd.s32 1, %s6781_s26   ;;  %s9234_s21 = smov %s6765_s22 }
 0xe6b   : > { %p16_p8 = scmp.ge.s32.totalorder %s19_s26, 4   ;;  %s9235_s22 = smov %s6769_s23 }
 0xe6c   : > { %s9236_s23 = smov %s6880_s10  ;;  %s9237_s24 = smov %s6777_s25 }
 0xe6d   : > { %s9238_s25 = smov %s9240_s29  ;;  %18 = sbr.rel (!%p16_p8) target bundleno = 4 (0x4), region = 217 }
 0xe74   :  { %4462 = vsyncpa [#allocation6], 1 }
 0xe75   :  { %4464 = vsyncpa [#allocation6 + $0x1], 1 }

// kernel: _lambda_.4
= control target key start
LH: loop header
LB: loop body
LE: loop exit
PB: predicated region body
PF: predicated region fallthrough
CT: control target
= control target key end

     0   :  { %s3223_s12 = smov 0   ;;  %s5081_s0 = inlined_call_operand.vmem [shape: f32[2,8,1024], index: 0, kind: input, shape index: {}]   ;;  %s5082_s1 = inlined_call_operand.vmem [shape: f32[25,1024], index: 1, kind: input, shape index: {}]   ;;  %s5083_s2 = inlined_call_operand.vmem [shape: f32[1,1024], index: 2, kind: input, shape index: {}]   ;;  %s5084_s3 = inlined_call_operand.vmem [shape: f32[2,8,1024], index: 3, kind: output, shape index: {}]  }
   0x1 LB: > { %s3120_s13 = sadd.s32 4294967295, %s3200_s12   ;;  %p3124_p0 = scmp.ge.s32.totalorder %s3200_s12, 1  ;;  %s3200_s12 = sphi %s3223_s12, %s13_s12  }
   0x2   : > { %p137_p1 = scmp.lt.s32.totalorder %s3200_s12, 3 }
   0x4   : > { %p138_p2 = pnand %p3124_p0, %p137_p1 }
   0x6   : > { %141 = sbr.rel (%p138_p2) target bundleno = 386 (0x182), region = 32 }
   0xd   : > { %v259_v0 = vld [vmem:[%s5082_s1] ss:$8 sm:$0xf]  ;;  %v263_v1 = vlaneseq  ;;  %p3236_p3 = scmp.lt.s32.totalorder %s3120_s13, 1  ;;  %v3202_v2 = vmov 0.0   ;;  %vm660_vm0 = vcmask 1046528  }
   0xe   : > { %171 = vst [vmem:[#allocation2] sm:$0x3] %v3202_v2  ;;  %172 = vst [vmem:[#allocation2 + $0x8] sm:$0x3] %v3202_v2  ;;  %vm1270_vm1 = vcmask 1045504   ;;  %vm1880_vm2 = vcmask 1044480  }
   0xf   : > { %173 = vst [vmem:[#allocation2 + $0x10] sm:$0x3] %v3202_v2  ;;  %174 = vst [vmem:[#allocation2 + $0x18] sm:$0x3] %v3202_v2  ;;  %v3248_v6 = vshrl.u32 %v263_v1, 7  ;;  %s5538_s13 = smov (!%p3236_p3, %s3120_s13), 1 }
  0x10   : > { %175 = vst [vmem:[#allocation2 + $0x20] sm:$0x3] %v3202_v2  ;;  %176 = vst [vmem:[#allocation2 + $0x28] sm:$0x3] %v3202_v2  ;;  %s3179_s29 = sshll.u32 %s5538_s13, 6  ;;  %vm2490_vm3 = vcmask 1043456  }
  0x11   : > { %177 = vst [vmem:[#allocation2 + $0x30] sm:$0x3] %v3202_v2  ;;  %178 = vst [vmem:[#allocation2 + $0x38] sm:$0x3] %v3202_v2  ;;  %v3268_v11 = vsub.s32 0, %v3248_v6  ;;  %v3271_v12 = vsub.s32 1, %v3248_v6  ;;  %s3290_s9 = scalar_lea.vmem %s5081_s0, %s3179_s29  ;;  %s4368_s26 = scalar_lea.vmem %s5084_s3, %s3179_s29 }
  0x12   : > { %179 = vst [vmem:[#allocation2 + $0x40] sm:$0x3] %v3202_v2  ;;  %180 = vst [vmem:[#allocation2 + $0x48] sm:$0x3] %v3202_v2  ;;  %v203_v27 = vld [vmem:[%s3290_s9] sm:$0xff]  ;;  %v204_v28 = vld [vmem:[%s3290_s9 + $0x8] sm:$0xff] }
  0x13   : > { %181 = vst [vmem:[#allocation2 + $0x50] sm:$0x3] %v3202_v2  ;;  %182 = vst [vmem:[#allocation2 + $0x58] sm:$0x3] %v3202_v2  ;;  %v219_v32 = vrot.slane %v203_v27, 6  ;;  %v3320_v33 = vsub.s32 2, %v3248_v6 }
  0x14   : > { %183 = vst [vmem:[#allocation2 + $0x60] sm:$0xc] %v3202_v2  ;;  %184 = vst [vmem:[#allocation2 + $0x68] sm:$0xc] %v3202_v2  ;;  %v220_v34 = vrot.slane %v204_v28, 6 }
  0x15   : > { %185 = vst [vmem:[#allocation2 + $0x70] sm:$0xc] %v3202_v2  ;;  %186 = vst [vmem:[#allocation2 + $0x78] sm:$0xc] %v3202_v2 }
  0x16   : > { %187 = vst [vmem:[#allocation2 + $0x80] sm:$0xc] %v3202_v2  ;;  %188 = vst [vmem:[#allocation2 + $0x88] sm:$0xc] %v3202_v2 }
  0x17   : > { %189 = vst [vmem:[#allocation2 + $0x90] sm:$0xc] %v3202_v2  ;;  %190 = vst [vmem:[#allocation2 + $0x98] sm:$0xc] %v3202_v2 }
  0x18   : > { %191 = vst [vmem:[#allocation2 + $0xa0] sm:$0xc] %v3202_v2  ;;  %192 = vst [vmem:[#allocation2 + $0xa8] sm:$0xc] %v3202_v2 }
  0x19   : > { %193 = vst [vmem:[#allocation2 + $0xb0] sm:$0xc] %v3202_v2  ;;  %194 = vst [vmem:[#allocation2 + $0xb8] sm:$0xc] %v3202_v2 }
  0x1a   : > { %195 = vst [vmem:[#allocation2] sm:$0xfc] %v3202_v2  ;;  %196 = vst [vmem:[#allocation2 + $0x8] sm:$0xfc] %v3202_v2 }
  0x1b   : > { %197 = vst [vmem:[#allocation2 + $0x60] sm:$0x3] %v3202_v2  ;;  %198 = vst [vmem:[#allocation2 + $0x68] sm:$0x3] %v3202_v2 }
  0x1c   : > { %199 = vst [vmem:[#allocation2 + $0x50] sm:$0xfc] %v3202_v2  ;;  %200 = vst [vmem:[#allocation2 + $0x58] sm:$0xfc] %v3202_v2 }
  0x1d   : > { %201 = vst [vmem:[#allocation2 + $0xb0] sm:$0x3] %v3202_v2  ;;  %202 = vst [vmem:[#allocation2 + $0xb8] sm:$0x3] %v3202_v2 }
  0x1e   : > { %v260_v3 = vld [vmem:[%s5082_s1] ss:$8 sm:$0xf0]  ;;  %v3129_v4 = vld [vmem:[%s5082_s1 + $0x1] ss:$8 sm:$0xf] }
  0x1f   : > { %v3246_v5 = vor.u32 %v260_v3, %v259_v0  ;;  %v3130_v7 = vld [vmem:[%s5082_s1 + $0x1] ss:$8 sm:$0xf0]  ;;  %v3137_v9 = vld [vmem:[%s5082_s1 + $0x5] ss:$8 sm:$0xf] }
  0x20   : > { %v3259_v8 = vor.u32 %v3130_v7, %v3129_v4  ;;  %v3138_v10 = vld [vmem:[%s5082_s1 + $0x5] ss:$8 sm:$0xf0]  ;;  %5213 = vst [vmem:[#allocation3_spill] sm:$0xff] %v3268_v11  ;;  %5214 = vst [vmem:[#allocation4_spill] sm:$0xff] %v3271_v12 }
  0x21   : > { %v3273_v13 = vor.u32 %v3138_v10, %v3137_v9  ;;  %v3139_v14 = vld [vmem:[%s5082_s1 + $0x6] ss:$8 sm:$0xf]  ;;  %v3147_v16 = vld [vmem:[%s5082_s1 + $0x42] ss:$8 sm:$0xf]  ;;  %v266_v17 = vrot.slane %v3246_v5, %v3268_v11  ;;  %v270_v18 = vrot.slane %v3246_v5, %v3271_v12 }
  0x22   : > { %v3140_v15 = vld [vmem:[%s5082_s1 + $0x6] ss:$8 sm:$0xf0]  ;;  %v3148_v20 = vld [vmem:[%s5082_s1 + $0x42] ss:$8 sm:$0xf0]  ;;  %v328_v22 = vrot.slane %v3259_v8, %v3268_v11  ;;  %v332_v40 = vrot.slane %v3259_v8, %v3271_v12 }
  0x23   : > { %v591_v19 = vrot.slane %v3273_v13, %v3268_v11  ;;  %v3149_v21 = vld [vmem:[%s5082_s1 + $0x43] ss:$8 sm:$0xf]  ;;  %v595_v23 = vrot.slane %v3273_v13, %v3271_v12  ;;  %v3308_v24 = vor.u32 %v3140_v15, %v3139_v14  ;;  %v3310_v25 = vor.u32 %v3148_v20, %v3147_v16  ;;  %5217 = vst [vmem:[#allocation7_spill] sm:$0xff] %v3320_v33  ;;  %v575_v41 = vld [vmem:[#allocation2 + $0x60] sm:$0x1] }
  0x24   : > { %v3150_v26 = vld [vmem:[%s5082_s1 + $0x43] ss:$8 sm:$0xf0]  ;;  %v576_v42 = vld [vmem:[#allocation2 + $0x68] sm:$0x1] }
  0x25   : > { %5215 = vst [vmem:[#allocation5_spill] sm:$0xff] %v3310_v25  ;;  %v251_v29 = vld [vmem:[#allocation2] sm:$0xff]  ;;  %v252_v30 = vld [vmem:[#allocation2 + $0x8] sm:$0xff]  ;;  %v3317_v31 = vor.u32 %v3150_v26, %v3149_v21  ;;  %v711_v39 = vrot.slane %v3308_v24, %v3268_v11  ;;  %v1201_v45 = vrot.slane %v3310_v25, %v3268_v11  ;;  %v1205_v46 = vrot.slane %v3310_v25, %v3271_v12 }
  0x26   : > { %v303_v35 = vmul.f32 %v266_v17, %v251_v29  ;;  %v3322_v36 = vmul.f32 %v270_v18, %v252_v30  ;;  %v567_v37 = vld [vmem:[#allocation2] sm:$0xfe]  ;;  %v568_v38 = vld [vmem:[#allocation2 + $0x8] sm:$0xfe]  ;;  %235 = vst [vmem:[#allocation2 + $0x10] sm:$0xfc] %v219_v32  ;;  %v365_v47 = vmul.f32 %v328_v22, %v252_v30  ;;  %v636_v48 = vmul.f32 %v591_v19, %v575_v41 }
  0x27   : > { %5216 = vst [vmem:[#allocation6_spill] sm:$0xff] %v3317_v31  ;;  %v628_v43 = vmul.f32 %v591_v19, %v567_v37  ;;  %v629_v44 = vmul.f32 %v595_v23, %v568_v38  ;;  %243 = vst [vmem:[#allocation2 + $0x70] sm:$0x3] %v219_v32  ;;  %v637_v49 = vmul.f32 %v595_v23, %v576_v42  ;;  %v1177_v54 = vld [vmem:[#allocation2] sm:$0xfc] }
  0x28   : > { %236 = vst [vmem:[#allocation2 + $0x18] sm:$0xfc] %v220_v34  ;;  %244 = vst [vmem:[#allocation2 + $0x78] sm:$0x3] %v220_v34  ;;  %v748_v50 = vmul.f32 %v711_v39, %v568_v38  ;;  %v756_v53 = vmul.f32 %v711_v39, %v576_v42  ;;  %v1178_v55 = vld [vmem:[#allocation2 + $0x8] sm:$0xfc]  ;;  %v1321_v56 = vrot.slane %v3317_v31, %v3268_v11 }
  0x29   : > { %v661_v51 = vrot.slane %v628_v43, 1  ;;  %v664_v52 = vrot.slane %v629_v44, 1  ;;  %v662_v57 = vrot.slane %v636_v48, 1  ;;  %v665_v58 = vrot.slane %v637_v49, 1  ;;  %v1185_v60 = vld [vmem:[#allocation2 + $0x60] sm:$0x3] }
  0x2a   : > { %v780_v59 = vrot.slane %v748_v50, 1  ;;  %v3334_v61 = vmul.f32 %v1201_v45, %v1177_v54  ;;  %v781_v62 = vrot.slane %v756_v53, 1  ;;  %v1186_v63 = vld [vmem:[#allocation2 + $0x68] sm:$0x3]  ;;  %v3336_v0 = vmul.f32 %v1205_v46, %v1178_v55 }
  0x2b   : > { %v3338_v1 = vmul.f32 %v1201_v45, %v1185_v60  ;;  %v3340_v2 = vmul.f32 %v1321_v56, %v1178_v55  ;;  %v3131_v3 = vld [vmem:[%s5082_s1 + $0x2] ss:$8 sm:$0xf]  ;;  %v373_v4 = vadd.f32 %v365_v47, %v303_v35  ;;  %v3346_v7 = vsel %vm660_vm0, %v661_v51, %v662_v57  ;;  %v3141_v19 = vld [vmem:[%s5082_s1 + $0x7] ss:$8 sm:$0xf] }
  0x2c   : > { %5218 = vst [vmem:[#allocation8_spill] sm:$0xff] %v3334_v61  ;;  %5219 = vst [vmem:[#allocation9_spill] sm:$0xff] %v3336_v0  ;;  %v3349_v9 = vsel %vm660_vm0, %v664_v52, %v665_v58  ;;  %v3351_v10 = vmul.f32 %v1205_v46, %v1186_v63  ;;  %v3132_v14 = vld [vmem:[%s5082_s1 + $0x2] ss:$8 sm:$0xf0]  ;;  %v3357_v15 = vsel %vm660_vm0, %v780_v59, %v781_v62  ;;  %v3417_v50 = vsub.s32 3, %v3248_v6 }
  0x2d   : > { %5220 = vst [vmem:[#allocation10_spill] sm:$0xff] %v3338_v1  ;;  %5221 = vst [vmem:[#allocation11_spill] sm:$0xff] %v3340_v2  ;;  %v3361_v18 = vmul.f32 %v1321_v56, %v1186_v63  ;;  %v253_v22 = vld [vmem:[#allocation2 + $0x10] sm:$0xff]  ;;  %v274_v23 = vrot.slane %v3246_v5, %v3320_v33  ;;  %v3370_v26 = vor.u32 %v3132_v14, %v3131_v3 }
  0x2e   : > { %5222 = vst [vmem:[#allocation12_spill] sm:$0xff] %v3346_v7  ;;  %5223 = vst [vmem:[#allocation13_spill] sm:$0xff] %v3349_v9  ;;  %v569_v27 = vld [vmem:[#allocation2 + $0x10] sm:$0xfe]  ;;  %v366_v29 = vmul.f32 %v332_v40, %v253_v22  ;;  %v3375_v30 = vrot.slane %v3273_v13, %v3320_v33  ;;  %v3379_v32 = vrot.slane %v3308_v24, %v3271_v12 }
  0x2f   : > { %5224 = vst [vmem:[#allocation14_spill] sm:$0xff] %v3351_v10  ;;  %5225 = vst [vmem:[#allocation15_spill] sm:$0xff] %v3357_v15  ;;  %v3142_v34 = vld [vmem:[%s5082_s1 + $0x7] ss:$8 sm:$0xf0]  ;;  %v390_v38 = vrot.slane %v3370_v26, %v3268_v11  ;;  %v3393_v40 = vrot.slane %v3310_v25, %v3320_v33  ;;  %v305_v41 = vmul.f32 %v274_v23, %v253_v22 }
  0x30   : > { %5226 = vst [vmem:[#allocation16_spill] sm:$0xff] %v3361_v18  ;;  %5227 = vst [vmem:[#allocation17_spill] sm:$0xff] %v3370_v26  ;;  %v3384_v35 = vld [vmem:[#allocation2 + $0x10] sm:$0xfc]  ;;  %v3389_v39 = vor.u32 %v3142_v34, %v3141_v19  ;;  %v3396_v42 = vmul.f32 %v3375_v30, %v569_v27  ;;  %v3399_v43 = vmul.f32 %v3379_v32, %v569_v27  ;;  %v254_v49 = vld [vmem:[#allocation2 + $0x18] sm:$0xff] }
  0x31   : > { %5228 = vst [vmem:[#allocation18_spill] sm:$0xff] %v3384_v35  ;;  %5230 = vst [vmem:[#allocation20_spill] sm:$0xff] %v3393_v40  ;;  %v3403_v44 = vrot.slane %v3317_v31, %v3271_v12  ;;  %v3133_v45 = vld [vmem:[%s5082_s1 + $0x3] ss:$8 sm:$0xf]  ;;  %v427_v46 = vmul.f32 %v390_v38, %v253_v22  ;;  %v3414_v48 = vmul.f32 %v3393_v40, %v3384_v35  ;;  %v3544_v31 = vsub.s32 5, %v3248_v6 }
  0x32   : > { %5229 = vst [vmem:[#allocation19_spill] sm:$0xff] %v3389_v39  ;;  %5231 = vst [vmem:[#allocation21_spill] sm:$0xff] %v3399_v43  ;;  %v3410_v47 = vrot.slane %v3389_v39, %v3268_v11  ;;  %v3134_v51 = vld [vmem:[%s5082_s1 + $0x3] ss:$8 sm:$0xf0]  ;;  %v374_v52 = vadd.f32 %v366_v29, %v3322_v36  ;;  %v336_v55 = vrot.slane %v3259_v8, %v3320_v33 }
  0x33   : > { %5232 = vst [vmem:[#allocation22_spill] sm:$0xff] %v3403_v44  ;;  %5233 = vst [vmem:[#allocation23_spill] sm:$0xff] %v3414_v48  ;;  %v3426_v54 = vmul.f32 %v3403_v44, %v3384_v35  ;;  %v435_v56 = vadd.f32 %v427_v46, %v373_v4  ;;  %v278_v59 = vrot.slane %v3246_v5, %v3417_v50  ;;  %v3143_v36 = vld [vmem:[%s5082_s1 + $0x40] ss:$8 sm:$0xf] }
  0x34   : > { %5234 = vst [vmem:[#allocation24_spill] sm:$0xff] %v3417_v50  ;;  %v3432_v58 = vmul.f32 %v3410_v47, %v569_v27  ;;  %v367_v62 = vmul.f32 %v336_v55, %v254_v49  ;;  %v394_v63 = vrot.slane %v3370_v26, %v3271_v12  ;;  %v3442_v3 = vor.u32 %v3134_v51, %v3133_v45  ;;  %v570_v4 = vld [vmem:[#allocation2 + $0x18] sm:$0xfe]  ;;  %v3144_v14 = vld [vmem:[%s5082_s1 + $0x40] ss:$8 sm:$0xf0] }
  0x35   : > { %5235 = vst [vmem:[#allocation25_spill] sm:$0xff] %v3426_v54  ;;  %v3448_v22 = vmul.f32 %v278_v59, %v254_v49  ;;  %v3452_v23 = vrot.slane %v3273_v13, %v3417_v50  ;;  %v3456_v27 = vrot.slane %v3308_v24, %v3320_v33  ;;  %v205_v29 = vld [vmem:[%s3290_s9 + $0x10] sm:$0xff]  ;;  %v3464_v46 = vrot.slane %v3389_v39, %v3271_v12  ;;  %v3466_v51 = vld [vmem:[#allocation2 + $0x18] sm:$0xfc]  ;;  %v207_v48 = vld [vmem:[%s3290_s9 + $0x20] sm:$0xff] }
  0x36   : > { %5236 = vst [vmem:[#allocation26_spill] sm:$0xff] %v3432_v58  ;;  %5237 = vst [vmem:[#allocation27_spill] sm:$0xff] %v3442_v3  ;;  %v428_v38 = vmul.f32 %v394_v63, %v254_v49  ;;  %v452_v45 = vrot.slane %v3442_v3, %v3268_v11  ;;  %v3474_v60 = vor.u32 %v3144_v14, %v3143_v36  ;;  %v3135_v19 = vld [vmem:[%s5082_s1 + $0x4] ss:$8 sm:$0xf]  ;;  %v221_v37 = vrot.slane %v205_v29, 6 }
  0x37   : > { %5238 = vst [vmem:[#allocation28_spill] sm:$0xff] %v3466_v51  ;;  %v3469_v55 = vmul.f32 %v3452_v23, %v570_v4  ;;  %v3472_v59 = vmul.f32 %v3456_v27, %v570_v4  ;;  %v3478_v63 = vrot.slane %v3310_v25, %v3417_v50  ;;  %v375_v20 = vadd.f32 %v367_v62, %v305_v41  ;;  %v3136_v16 = vld [vmem:[%s5082_s1 + $0x4] ss:$8 sm:$0xf0] }
  0x38   : > { %5240 = vst [vmem:[#allocation30_spill] sm:$0xff] %v3474_v60  ;;  %v489_v21 = vmul.f32 %v452_v45, %v254_v49  ;;  %v3484_v28 = vmul.f32 %v3464_v46, %v570_v4  ;;  %v436_v36 = vadd.f32 %v428_v38, %v374_v52  ;;  %v3492_v17 = vrot.slane %v3474_v60, %v3268_v11  ;;  %v3145_v49 = vld [vmem:[%s5082_s1 + $0x41] ss:$8 sm:$0xf] }
  0x39   : > { %5239 = vst [vmem:[#allocation29_spill] sm:$0xff] %v3472_v59  ;;  %5241 = vst [vmem:[#allocation31_spill] sm:$0xff] %v3478_v63  ;;  %v3496_v41 = vmul.f32 %v3478_v63, %v3466_v51  ;;  %v3503_v52 = vsub.s32 4, %v3248_v6  ;;  %v340_v38 = vrot.slane %v3259_v8, %v3417_v50  ;;  %v3146_v45 = vld [vmem:[%s5082_s1 + $0x41] ss:$8 sm:$0xf0]  ;;  %v3520_v14 = vor.u32 %v3136_v16, %v3135_v19 }
  0x3a   : > { %5242 = vst [vmem:[#allocation32_spill] sm:$0xff] %v3484_v28  ;;  %5243 = vst [vmem:[#allocation33_spill] sm:$0xff] %v3492_v17  ;;  %v497_v62 = vadd.f32 %v489_v21, %v435_v56  ;;  %v3512_v57 = vmul.f32 %v3492_v17, %v570_v4  ;;  %v398_v56 = vrot.slane %v3370_v26, %v3320_v33  ;;  %v206_v29 = vld [vmem:[%s3290_s9 + $0x18] sm:$0xff]  ;;  %v223_v2 = vrot.slane %v207_v48, 6 }
  0x3b   : > { %5244 = vst [vmem:[#allocation34_spill] sm:$0xff] %v3496_v41  ;;  %237 = vst [vmem:[#allocation2 + $0x20] sm:$0xfc] %v221_v37  ;;  %v282_v53 = vrot.slane %v3246_v5, %v3503_v52  ;;  %v3528_v4 = vrot.slane %v3308_v24, %v3417_v50  ;;  %v456_v21 = vrot.slane %v3442_v3, %v3271_v12  ;;  %v222_v19 = vrot.slane %v206_v29, 6 }
  0x3c   : > { %5245 = vst [vmem:[#allocation35_spill] sm:$0xff] %v3503_v52  ;;  %245 = vst [vmem:[#allocation2 + $0x80] sm:$0x3] %v221_v37  ;;  %v3524_v37 = vrot.slane %v3273_v13, %v3503_v52  ;;  %v3535_v25 = vrot.slane %v3389_v39, %v3320_v33  ;;  %v3537_v41 = vor.u32 %v3146_v45, %v3145_v49 }
  0x3d   : > { %5246 = vst [vmem:[#allocation36_spill] sm:$0xff] %v3512_v57  ;;  %5247 = vst [vmem:[#allocation37_spill] sm:$0xff] %v3520_v14  ;;  %v3541_v16 = vrot.slane %v3474_v60, %v3271_v12  ;;  %v344_v34 = vrot.slane %v3259_v8, %v3503_v52  ;;  %v514_v59 = vrot.slane %v3520_v14, %v3268_v11 }
  0x3e   : > { %5248 = vst [vmem:[#allocation38_spill] sm:$0xff] %v3535_v25  ;;  %5250 = vst [vmem:[#allocation40_spill] sm:$0xff] %v3544_v31  ;;  %v3553_v54 = vrot.slane %v3537_v41, %v3268_v11  ;;  %v402_v49 = vrot.slane %v3370_v26, %v3417_v50  ;;  %v460_v29 = vrot.slane %v3442_v3, %v3320_v33 }
  0x3f   : > { %5249 = vst [vmem:[#allocation39_spill] sm:$0xff] %v3541_v16  ;;  %238 = vst [vmem:[#allocation2 + $0x28] sm:$0xfc] %v222_v19  ;;  %v286_v45 = vrot.slane %v3246_v5, %v3544_v31  ;;  %v518_v0 = vrot.slane %v3520_v14, %v3271_v12  ;;  %v3565_v10 = vrot.slane %v3273_v13, %v3544_v31 }
  0x40   : > { %5251 = vst [vmem:[#allocation41_spill] sm:$0xff] %v3553_v54  ;;  %v3569_v28 = vrot.slane %v3308_v24, %v3503_v52  ;;  %246 = vst [vmem:[#allocation2 + $0x88] sm:$0x3] %v222_v19  ;;  %v3573_v35 = vrot.slane %v3389_v39, %v3417_v50  ;;  %v3577_v11 = vrot.slane %v3474_v60, %v3320_v33 }
  0x41   : > { %v348_v18 = vrot.slane %v3259_v8, %v3544_v31  ;;  %239 = vst [vmem:[#allocation2 + $0x30] sm:$0xfc] %v223_v2  ;;  %247 = vst [vmem:[#allocation2 + $0x90] sm:$0x3] %v223_v2  ;;  %v3622_v40 = vrot.slane %v3389_v39, %v3503_v52 }
  0x42   : > { %v255_v9 = vld [vmem:[#allocation2 + $0x20] sm:$0xff]  ;;  %5252 = vst [vmem:[#allocation42_spill] sm:$0xff] %v3573_v35  ;;  %5253 = vst [vmem:[#allocation43_spill] sm:$0xff] %v3577_v11 }
  0x43   : > { %v571_v51 = vld [vmem:[#allocation2 + $0x20] sm:$0xfe]  ;;  %v307_v15 = vmul.f32 %v282_v53, %v255_v9  ;;  %v368_v61 = vmul.f32 %v340_v38, %v255_v9  ;;  %v429_v1 = vmul.f32 %v398_v56, %v255_v9  ;;  %v490_v57 = vmul.f32 %v456_v21, %v255_v9  ;;  %5262 = vst [vmem:[#allocation52_spill] sm:$0xff] %v3622_v40 }
  0x44   : > { %v551_v58 = vmul.f32 %v514_v59, %v255_v9  ;;  %v3582_v19 = vmul.f32 %v3524_v37, %v571_v51  ;;  %v3585_v7 = vmul.f32 %v3528_v4, %v571_v51  ;;  %v3588_v44 = vmul.f32 %v3535_v25, %v571_v51 }
  0x45   : > { %v376_v48 = vadd.f32 %v368_v61, %v3448_v22  ;;  %v437_v63 = vadd.f32 %v429_v1, %v375_v20  ;;  %v3592_v53 = vmul.f32 %v3541_v16, %v571_v51  ;;  %v3596_v9 = vrot.slane %v3537_v41, %v3271_v12 }
  0x46   : > { %5254 = vst [vmem:[#allocation44_spill] sm:$0xff] %v3582_v19  ;;  %5255 = vst [vmem:[#allocation45_spill] sm:$0xff] %v3585_v7  ;;  %v498_v59 = vadd.f32 %v490_v57, %v436_v36  ;;  %v3598_v38 = vadd.f32 %v551_v58, %v497_v62  ;;  %v3605_v61 = vmul.f32 %v3553_v54, %v571_v51  ;;  %v3608_v1 = vsub.s32 6, %v3248_v6  ;;  %v256_v20 = vld [vmem:[#allocation2 + $0x28] sm:$0xff] }
  0x47   : > { %5256 = vst [vmem:[#allocation46_spill] sm:$0xff] %v3588_v44  ;;  %5257 = vst [vmem:[#allocation47_spill] sm:$0xff] %v3592_v53  ;;  %v572_v22 = vld [vmem:[#allocation2 + $0x28] sm:$0xfe]  ;;  %v406_v57 = vrot.slane %v3370_v26, %v3503_v52  ;;  %v464_v58 = vrot.slane %v3442_v3, %v3417_v50  ;;  %v522_v36 = vrot.slane %v3520_v14, %v3320_v33 }
  0x48   : > { %5258 = vst [vmem:[#allocation48_spill] sm:$0xff] %v3596_v9  ;;  %5259 = vst [vmem:[#allocation49_spill] sm:$0xff] %v3598_v38  ;;  %v3618_v62 = vrot.slane %v3308_v24, %v3544_v31  ;;  %v308_v51 = vmul.f32 %v286_v45, %v256_v20  ;;  %v369_v21 = vmul.f32 %v344_v34, %v256_v20 }
  0x49   : > { %5260 = vst [vmem:[#allocation50_spill] sm:$0xff] %v3605_v61  ;;  %5261 = vst [vmem:[#allocation51_spill] sm:$0xff] %v3608_v1  ;;  %v430_v56 = vmul.f32 %v402_v49, %v256_v20  ;;  %v491_v2 = vmul.f32 %v460_v29, %v256_v20  ;;  %v552_v19 = vmul.f32 %v518_v0, %v256_v20  ;;  %v257_v49 = vld [vmem:[#allocation2 + $0x30] sm:$0xff] }
  0x4a   : > { %v3625_v7 = vmul.f32 %v3565_v10, %v572_v22  ;;  %v3628_v44 = vmul.f32 %v3569_v28, %v572_v22  ;;  %v377_v12 = vadd.f32 %v369_v21, %v307_v15  ;;  %v3631_v38 = vmul.f32 %v3573_v35, %v572_v22  ;;  %v573_v20 = vld [vmem:[#allocation2 + $0x30] sm:$0xfe] }
  0x4b   : > { %v438_v53 = vadd.f32 %v430_v56, %v376_v48  ;;  %v3634_v34 = vmul.f32 %v3577_v11, %v572_v22  ;;  %v499_v54 = vadd.f32 %v491_v2, %v437_v63  ;;  %v3637_v0 = vadd.f32 %v552_v19, %v498_v59 }
  0x4c   : > { %5263 = vst [vmem:[#allocation53_spill] sm:$0xff] %v3625_v7  ;;  %5264 = vst [vmem:[#allocation54_spill] sm:$0xff] %v3628_v44  ;;  %v3643_v48 = vmul.f32 %v3596_v9, %v572_v22  ;;  %v290_v21 = vrot.slane %v3246_v5, %v3608_v1  ;;  %v370_v45 = vmul.f32 %v348_v18, %v257_v49  ;;  %v208_v22 = vld [vmem:[%s3290_s9 + $0x28] sm:$0xff] }
  0x4d   : > { %5265 = vst [vmem:[#allocation55_spill] sm:$0xff] %v3631_v38  ;;  %5266 = vst [vmem:[#allocation56_spill] sm:$0xff] %v3634_v34  ;;  %v431_v63 = vmul.f32 %v406_v57, %v257_v49  ;;  %v492_v2 = vmul.f32 %v464_v58, %v257_v49  ;;  %v553_v59 = vmul.f32 %v522_v36, %v257_v49 }
  0x4e   : > { %5267 = vst [vmem:[#allocation57_spill] sm:$0xff] %v3637_v0  ;;  %5268 = vst [vmem:[#allocation58_spill] sm:$0xff] %v3643_v48  ;;  %v3648_v19 = vmul.f32 %v290_v21, %v257_v49  ;;  %v3652_v29 = vrot.slane %v3273_v13, %v3608_v1  ;;  %v3655_v16 = vmul.f32 %v3618_v62, %v573_v20  ;;  %v443_v21 = vld [vmem:[#allocation2 + $0x50] sm:$0xff] }
  0x4f   : > { %v3659_v44 = vadd.f32 %v370_v45, %v308_v51  ;;  %v3661_v38 = vadd.f32 %v431_v63, %v377_v12  ;;  %v3663_v18 = vadd.f32 %v492_v2, %v438_v53  ;;  %v3665_v57 = vadd.f32 %v553_v59, %v499_v54  ;;  %v939_v45 = vld [vmem:[#allocation2 + $0x50] sm:$0xfe] }
  0x50   : > { %5269 = vst [vmem:[#allocation59_spill] sm:$0xff] %v3655_v16  ;;  %v3668_v58 = vmul.f32 %v3652_v29, %v573_v20  ;;  %v3671_v36 = vmul.f32 %v3622_v40, %v573_v20  ;;  %v3675_v49 = vrot.slane %v3474_v60, %v3417_v50  ;;  %v3679_v51 = vrot.slane %v3537_v41, %v3320_v33  ;;  %v209_v48 = vld [vmem:[%s3290_s9 + $0x30] sm:$0xff]  ;;  %v1058_v40 = vld [vmem:[#allocation2 + $0x58] sm:$0xfe] }
  0x51   : > { %v538_v12 = vrot.slane %v3520_v14, %v3608_v1  ;;  %v1092_v54 = vrot.slane %v3537_v41, %v3608_v1  ;;  %v224_v53 = vrot.slane %v208_v22, 6  ;;  %v3691_v2 = vsub.s32 7, %v3248_v6 }
  0x52   : > { %5270 = vst [vmem:[#allocation60_spill] sm:$0xff] %v3671_v36  ;;  %5271 = vst [vmem:[#allocation61_spill] sm:$0xff] %v3675_v49  ;;  %v3688_v63 = vmul.f32 %v3675_v49, %v573_v20  ;;  %v3695_v56 = vmul.f32 %v3679_v51, %v573_v20  ;;  %v352_v22 = vrot.slane %v3259_v8, %v3608_v1  ;;  %v940_v36 = vld [vmem:[#allocation2 + $0xb0] sm:$0x1] }
  0x53   : > { %5272 = vst [vmem:[#allocation62_spill] sm:$0xff] %v3679_v51  ;;  %5274 = vst [vmem:[#allocation64_spill] sm:$0xff] %v3691_v2  ;;  %v410_v15 = vrot.slane %v3370_v26, %v3544_v31  ;;  %v294_v6 = vrot.slane %v3246_v5, %v3691_v2  ;;  %v468_v59 = vrot.slane %v3442_v3, %v3503_v52 }
  0x54   : > { %5273 = vst [vmem:[#allocation63_spill] sm:$0xff] %v3688_v63  ;;  %5275 = vst [vmem:[#allocation65_spill] sm:$0xff] %v3695_v56  ;;  %v526_v20 = vrot.slane %v3520_v14, %v3417_v50  ;;  %v3709_v16 = vrot.slane %v3273_v13, %v3691_v2  ;;  %v3715_v34 = vrot.slane %v3308_v24, %v3608_v1  ;;  %v505_v63 = vld [vmem:[#allocation2 + $0x58] sm:$0xff] }
  0x55   : > { %240 = vst [vmem:[#allocation2 + $0x38] sm:$0xfc] %v224_v53  ;;  %248 = vst [vmem:[#allocation2 + $0x98] sm:$0x3] %v224_v53  ;;  %v3719_v5 = vrot.slane %v3389_v39, %v3544_v31  ;;  %v3724_v0 = vrot.slane %v3474_v60, %v3503_v52  ;;  %v3728_v13 = vrot.slane %v3537_v41, %v3417_v50  ;;  %v225_v50 = vrot.slane %v209_v48, 6 }
  0x56   : > { %v480_v33 = vrot.slane %v3442_v3, %v3691_v2  ;;  %v542_v53 = vrot.slane %v3520_v14, %v3691_v2  ;;  %v3734_v56 = vmul.f32 %v538_v12, %v443_v21  ;;  %v977_v61 = vrot.slane %v3474_v60, %v3691_v2 }
  0x57   : > { %v1096_v7 = vrot.slane %v3537_v41, %v3691_v2  ;;  %v3740_v51 = vmul.f32 %v1092_v54, %v939_v45  ;;  %v3742_v9 = vmul.f32 %v1092_v54, %v940_v36  ;;  %v356_v49 = vrot.slane %v3259_v8, %v3691_v2  ;;  %241 = vst [vmem:[#allocation2 + $0x40] sm:$0xfc] %v225_v50 }
  0x58   : > { %5276 = vst [vmem:[#allocation66_spill] sm:$0xff] %v3734_v56  ;;  %v414_v11 = vrot.slane %v3370_v26, %v3608_v1  ;;  %v472_v12 = vrot.slane %v3442_v3, %v3544_v31  ;;  %v530_v56 = vrot.slane %v3520_v14, %v3503_v52  ;;  %v3754_v17 = vrot.slane %v3308_v24, %v3691_v2 }
  0x59   : > { %5277 = vst [vmem:[#allocation67_spill] sm:$0xff] %v3740_v51  ;;  %5278 = vst [vmem:[#allocation68_spill] sm:$0xff] %v3742_v9  ;;  %v3758_v54 = vrot.slane %v3389_v39, %v3608_v1  ;;  %v3762_v8 = vrot.slane %v3474_v60, %v3544_v31  ;;  %v3766_v3 = vrot.slane %v3537_v41, %v3503_v52 }
  0x5a   : > { %249 = vst [vmem:[#allocation2 + $0xa0] sm:$0x3] %v225_v50  ;;  %v3768_v14 = vmul.f32 %v480_v33, %v443_v21  ;;  %v3770_v24 = vmul.f32 %v542_v53, %v505_v63  ;;  %v1059_v50 = vld [vmem:[#allocation2 + $0xb8] sm:$0x1] }
  0x5c   : > { %v258_v48 = vld [vmem:[#allocation2 + $0x38] sm:$0xff]  ;;  %5279 = vst [vmem:[#allocation69_spill] sm:$0xff] %v3768_v14  ;;  %5280 = vst [vmem:[#allocation70_spill] sm:$0xff] %v3770_v24  ;;  %v3800_v24 = vld [vmem:[#allocation2 + $0x80] sm:$0x1] }
  0x5d   : > { %v574_v43 = vld [vmem:[#allocation2 + $0x38] sm:$0xfe]  ;;  %v310_v26 = vmul.f32 %v294_v6, %v258_v48  ;;  %v371_v2 = vmul.f32 %v352_v22, %v258_v48  ;;  %v432_v39 = vmul.f32 %v410_v15, %v258_v48  ;;  %v493_v1 = vmul.f32 %v468_v59, %v258_v48  ;;  %v3789_v59 = vld [vmem:[#allocation2 + $0x70] sm:$0x1]  ;;  %v3791_v22 = vld [vmem:[#allocation2 + $0x78] sm:$0x1] }
  0x5e   : > { %v554_v35 = vmul.f32 %v526_v20, %v258_v48  ;;  %v3773_v25 = vmul.f32 %v3709_v16, %v574_v43  ;;  %v3776_v60 = vmul.f32 %v3715_v34, %v574_v43  ;;  %v3779_v52 = vmul.f32 %v3719_v5, %v574_v43  ;;  %v319_v53 = vld [vmem:[#allocation2 + $0x40] sm:$0xff] }
  0x5f   : > { %v3782_v33 = vmul.f32 %v3724_v0, %v574_v43  ;;  %v3785_v21 = vmul.f32 %v3728_v13, %v574_v43  ;;  %v379_v15 = vadd.f32 %v371_v2, %v3648_v19  ;;  %v440_v63 = vadd.f32 %v432_v39, %v3659_v44  ;;  %v3802_v43 = vld [vmem:[#allocation2 + $0x88] sm:$0x1] }
  0x60   : > { %5281 = vst [vmem:[#allocation71_spill] sm:$0xff] %v3779_v52  ;;  %v3794_v6 = vadd.f32 %v554_v35, %v3663_v18  ;;  %v682_v20 = vrot.slane %v3773_v25, 1  ;;  %v3798_v48 = vmul.f32 %v977_v61, %v939_v45  ;;  %v501_v2 = vadd.f32 %v493_v1, %v3661_v38  ;;  %v3839_v45 = vld [vmem:[#allocation2 + $0x98] sm:$0x1]  ;;  %v5342_v52 = vld [vmem:[#allocation12_spill] sm:$0xff] }
  0x61   : > { %5282 = vst [vmem:[#allocation72_spill] sm:$0xff] %v3782_v33  ;;  %5283 = vst [vmem:[#allocation73_spill] sm:$0xff] %v3785_v21  ;;  %v3808_v35 = vmul.f32 %v977_v61, %v940_v36  ;;  %v3810_v18 = vmul.f32 %v1096_v7, %v1058_v40  ;;  %v3812_v25 = vmul.f32 %v1096_v7, %v1059_v50  ;;  %v5367_v21 = vld [vmem:[#allocation28_spill] sm:$0xff] }
  0x62   : > { %5284 = vst [vmem:[#allocation74_spill] sm:$0xff] %v3794_v6  ;;  %5285 = vst [vmem:[#allocation75_spill] sm:$0xff] %v3798_v48  ;;  %v701_v6 = vld [vmem:[#allocation2 + $0x40] sm:$0xfe]  ;;  %v638_v14 = vmul.f32 %v3375_v30, %v3789_v59  ;;  %v639_v19 = vmul.f32 %v3452_v23, %v3791_v22  ;;  %v3821_v39 = vmul.f32 %v3524_v37, %v3800_v24  ;;  %v3837_v37 = vld [vmem:[#allocation2 + $0x90] sm:$0x1] }
  0x63   : > { %5286 = vst [vmem:[#allocation76_spill] sm:$0xff] %v3808_v35  ;;  %5287 = vst [vmem:[#allocation77_spill] sm:$0xff] %v3810_v18  ;;  %v3825_v40 = vmul.f32 %v3565_v10, %v3802_v43  ;;  %v372_v7 = vmul.f32 %v356_v49, %v319_v53  ;;  %v433_v38 = vmul.f32 %v414_v11, %v319_v53  ;;  %v3157_v18 = vld [vmem:[%s5082_s1 + $0x47] ss:$8 sm:$0xf] }
  0x64   : > { %5288 = vst [vmem:[#allocation78_spill] sm:$0xff] %v3812_v25  ;;  %5289 = vst [vmem:[#allocation79_spill] sm:$0xff] %v3821_v39  ;;  %v494_v61 = vmul.f32 %v472_v12, %v319_v53  ;;  %v555_v1 = vmul.f32 %v530_v56, %v319_v53  ;;  %v755_v36 = vmul.f32 %v3754_v17, %v701_v6  ;;  %v5333_v48 = vld [vmem:[#allocation37_spill] sm:$0xff] }
  0x65   : > { %v3829_v50 = vmul.f32 %v3758_v54, %v701_v6  ;;  %v3832_v30 = vmul.f32 %v3762_v8, %v701_v6  ;;  %v3835_v23 = vmul.f32 %v3766_v3, %v701_v6  ;;  %v3841_v10 = vadd.f32 %v372_v7, %v310_v26 }
  0x66   : > { %v3843_v11 = vadd.f32 %v433_v38, %v379_v15  ;;  %v3845_v56 = vadd.f32 %v494_v61, %v440_v63  ;;  %v3847_v49 = vadd.f32 %v555_v1, %v501_v2  ;;  %v801_v12 = vrot.slane %v755_v36, 1  ;;  %v702_v38 = vld [vmem:[#allocation2 + $0xa0] sm:$0x1] }
  0x67   : > { %5290 = vst [vmem:[#allocation80_spill] sm:$0xff] %v3829_v50  ;;  %5291 = vst [vmem:[#allocation81_spill] sm:$0xff] %v3832_v30  ;;  %v642_v51 = vmul.f32 %v3652_v29, %v3837_v37  ;;  %v643_v26 = vmul.f32 %v3709_v16, %v3839_v45  ;;  %v668_v7 = vrot.slane %v638_v14, 1  ;;  %v671_v15 = vrot.slane %v639_v19, 1  ;;  %v5335_v50 = vld [vmem:[#allocation53_spill] sm:$0xff] }
  0x68   : > { %5292 = vst [vmem:[#allocation82_spill] sm:$0xff] %v3835_v23  ;;  %5293 = vst [vmem:[#allocation83_spill] sm:$0xff] %v3847_v49  ;;  %v757_v61 = vmul.f32 %v3379_v32, %v3789_v59  ;;  %v3862_v1 = vmul.f32 %v3456_v27, %v3791_v22  ;;  %v5294_v36 = vrot.slane %v3469_v55, 1  ;;  %v5296_v6 = vrot.slane %v3396_v42, 1  ;;  %v5341_v23 = vld [vmem:[#allocation49_spill] sm:$0xff]  ;;  %v5359_v49 = vld [vmem:[#allocation11_spill] sm:$0xff] }
  0x69   : > { %v680_v16 = vrot.slane %v642_v51, 1  ;;  %v683_v19 = vrot.slane %v643_v26, 1  ;;  %v3875_v32 = vmul.f32 %v3528_v4, %v3800_v24  ;;  %v3879_v27 = vmul.f32 %v3569_v28, %v3802_v43  ;;  %v3156_v14 = vld [vmem:[%s5082_s1 + $0x46] ss:$8 sm:$0xf0] }
  0x6a   : > { %v3867_v29 = vsel %vm660_vm0, %v5294_v36, %v671_v15  ;;  %v669_v53 = vsel %vm660_vm0, %v5296_v6, %v668_v7  ;;  %v3883_v55 = vmul.f32 %v3618_v62, %v3837_v37  ;;  %v5300_v15 = vrot.slane %v3668_v58, 1  ;;  %v5316_v58 = vld [vmem:[#allocation61_spill] sm:$0xff]  ;;  %v5321_v62 = vld [vmem:[#allocation48_spill] sm:$0xff] }
  0x6b   : > { %5295 = vst [vmem:[#allocation84_spill] sm:$0xff] %v3867_v29  ;;  %5297 = vst [vmem:[#allocation85_spill] sm:$0xff] %v3875_v32  ;;  %v3891_v42 = vsel %vm660_vm0, %v682_v20, %v683_v19  ;;  %v762_v4 = vmul.f32 %v3715_v34, %v3839_v45  ;;  %v763_v6 = vmul.f32 %v3754_v17, %v702_v38  ;;  %v784_v26 = vrot.slane %v757_v61, 1  ;;  %v5303_v61 = vld [vmem:[#allocation42_spill] sm:$0xff]  ;;  %v3975_v7 = vld [vmem:[#allocation2 + $0x70] sm:$0x3] }
  0x6c   : > { %5298 = vst [vmem:[#allocation86_spill] sm:$0xff] %v3879_v27  ;;  %5299 = vst [vmem:[#allocation87_spill] sm:$0xff] %v3883_v55  ;;  %v3888_v51 = vsel %vm660_vm0, %v5300_v15, %v680_v16  ;;  %v3897_v28 = vadd.f32 %v669_v53, %v3665_v57  ;;  %v3904_v20 = vmul.f32 %v3410_v47, %v3789_v59  ;;  %v5302_v57 = vld [vmem:[#allocation38_spill] sm:$0xff]  ;;  %v5305_v15 = vrot.slane %v3776_v60, 1  ;;  %v5306_v59 = vld [vmem:[#allocation52_spill] sm:$0xff] }
  0x6d   : > { %v799_v36 = vrot.slane %v762_v4, 1  ;;  %v802_v16 = vrot.slane %v763_v6, 1  ;;  %v3909_v17 = vmul.f32 %v3464_v46, %v3791_v22  ;;  %v3913_v53 = vmul.f32 %v5302_v57, %v3800_v24  ;;  %v5309_v57 = vld [vmem:[#allocation21_spill] sm:$0xff]  ;;  %v5339_v55 = vld [vmem:[#allocation19_spill] sm:$0xff] }
  0x6e   : > { %5301 = vst [vmem:[#allocation88_spill] sm:$0xff] %v3897_v28  ;;  %v3917_v19 = vmul.f32 %v5303_v61, %v3802_v43  ;;  %v3929_v46 = vmul.f32 %v5306_v59, %v3837_v37  ;;  %v3933_v6 = vmul.f32 %v3719_v5, %v3839_v45  ;;  %v5310_v44 = vrot.slane %v5309_v57, 1  ;;  %v5312_v5 = vld [vmem:[#allocation33_spill] sm:$0xff]  ;;  %v3985_v57 = vld [vmem:[#allocation2 + $0x78] sm:$0x3]  ;;  %v5356_v27 = vld [vmem:[#allocation15_spill] sm:$0xff] }
  0x6f   : > { %v3922_v4 = vsel %vm660_vm0, %v5305_v15, %v799_v36  ;;  %v3925_v47 = vsel %vm660_vm0, %v801_v12, %v802_v16  ;;  %v3941_v60 = vmul.f32 %v3758_v54, %v702_v38  ;;  %v994_v34 = vmul.f32 %v5312_v5, %v3791_v22  ;;  %v5314_v54 = vld [vmem:[#allocation43_spill] sm:$0xff]  ;;  %v5320_v16 = vld [vmem:[#allocation41_spill] sm:$0xff]  ;;  %v5322_v15 = vld [vmem:[#allocation62_spill] sm:$0xff] }
  0x70   : > { %5304 = vst [vmem:[#allocation38_spill] sm:$0xff] %v3917_v19  ;;  %5307 = vst [vmem:[#allocation42_spill] sm:$0xff] %v3929_v46  ;;  %v3938_v61 = vsel %vm660_vm0, %v5310_v44, %v784_v26  ;;  %v5313_v44 = vld [vmem:[#allocation39_spill] sm:$0xff]  ;;  %v3957_v63 = vmul.f32 %v5314_v54, %v3802_v43  ;;  %v3961_v2 = vmul.f32 %v5316_v58, %v3837_v37  ;;  %v5326_v12 = vld [vmem:[#allocation20_spill] sm:$0xff]  ;;  %v5334_v9 = vrot.slane %v3825_v40, 1 }
  0x71   : > { %5308 = vst [vmem:[#allocation52_spill] sm:$0xff] %v3933_v6  ;;  %5311 = vst [vmem:[#allocation21_spill] sm:$0xff] %v3941_v60  ;;  %v3953_v26 = vmul.f32 %v5313_v44, %v3800_v24  ;;  %v3966_v22 = vmul.f32 %v3724_v0, %v3839_v45  ;;  %v3969_v5 = vmul.f32 %v3762_v8, %v702_v38  ;;  %v1019_v44 = vrot.slane %v994_v34, 1  ;;  %v3155_v36 = vld [vmem:[%s5082_s1 + $0x46] ss:$8 sm:$0xf] }
  0x72   : > { %5315 = vst [vmem:[#allocation33_spill] sm:$0xff] %v3957_v63  ;;  %5317 = vst [vmem:[#allocation39_spill] sm:$0xff] %v3961_v2  ;;  %v1113_v8 = vmul.f32 %v5320_v16, %v3800_v24  ;;  %v3983_v34 = vmul.f32 %v5321_v62, %v3802_v43  ;;  %v3990_v58 = vmul.f32 %v5322_v15, %v3837_v37  ;;  %v210_v24 = vld [vmem:[%s3290_s9 + $0x38] sm:$0xff]  ;;  %v5336_v60 = vrot.slane %v5335_v50, 1  ;;  %v5338_v6 = vld [vmem:[#allocation27_spill] sm:$0xff] }
  0x73   : > { %5318 = vst [vmem:[#allocation43_spill] sm:$0xff] %v3966_v22  ;;  %5319 = vst [vmem:[#allocation61_spill] sm:$0xff] %v3969_v5  ;;  %v3994_v59 = vmul.f32 %v3728_v13, %v3839_v45  ;;  %v3997_v0 = vmul.f32 %v3766_v3, %v702_v38  ;;  %v4004_v54 = vmul.f32 %v5326_v12, %v3975_v7  ;;  %v5328_v45 = vld [vmem:[#allocation31_spill] sm:$0xff]  ;;  %v5330_v15 = vld [vmem:[#allocation22_spill] sm:$0xff]  ;;  %v226_v43 = vrot.slane %v210_v24, 6 }
  0x74   : > { %5323 = vst [vmem:[#allocation41_spill] sm:$0xff] %v3990_v58  ;;  %v1138_v16 = vrot.slane %v1113_v8, 1  ;;  %v4011_v3 = vmul.f32 %v5328_v45, %v3985_v57  ;;  %v3151_v38 = vld [vmem:[%s5082_s1 + $0x44] ss:$8 sm:$0xf]  ;;  %v4029_v37 = vmul.f32 %v5330_v15, %v3975_v7  ;;  %v534_v35 = vrot.slane %v5333_v48, %v3544_v31 }
  0x75   : > { %5324 = vst [vmem:[#allocation48_spill] sm:$0xff] %v3994_v59  ;;  %5325 = vst [vmem:[#allocation62_spill] sm:$0xff] %v3997_v0  ;;  %v3152_v8 = vld [vmem:[%s5082_s1 + $0x44] ss:$8 sm:$0xf0]  ;;  %v4053_v30 = vsel %vm660_vm0, %v5336_v60, %v5334_v9  ;;  %v1088_v40 = vrot.slane %v3537_v41, %v3544_v31  ;;  %v693_v0 = vadd.f32 %v5342_v52, %v5341_v23  ;;  %v5343_v33 = vrot.slane %v3904_v20, 1 }
  0x76   : > { %5327 = vst [vmem:[#allocation20_spill] sm:$0xff] %v4004_v54  ;;  %5329 = vst [vmem:[#allocation31_spill] sm:$0xff] %v4011_v3  ;;  %v3153_v12 = vld [vmem:[%s5082_s1 + $0x45] ss:$8 sm:$0xf] }
  0x77   : > { %v3154_v62 = vld [vmem:[%s5082_s1 + $0x45] ss:$8 sm:$0xf0]  ;;  %v3158_v13 = vld [vmem:[%s5082_s1 + $0x47] ss:$8 sm:$0xf0] }
  0x78   : > { %v5331_v45 = vld [vmem:[#allocation64_spill] sm:$0xff]  ;;  %v5332_v24 = vld [vmem:[#allocation17_spill] sm:$0xff]  ;;  %242 = vst [vmem:[#allocation2 + $0x48] sm:$0xfc] %v226_v43  ;;  %v5337_v15 = vld [vmem:[#allocation51_spill] sm:$0xff] }
  0x79   : > { %v418_v25 = vrot.slane %v5332_v24, %v5331_v45  ;;  %v3159_v5 = vld [vmem:[%s5082_s1 + $0x80] ss:$8 sm:$0xf]  ;;  %v476_v24 = vrot.slane %v5338_v6, %v5337_v15  ;;  %v858_v48 = vrot.slane %v5339_v55, %v5331_v45  ;;  %250 = vst [vmem:[#allocation2 + $0xa8] sm:$0x3] %v226_v43 }
  0x7a   : > { %v3160_v9 = vld [vmem:[%s5082_s1 + $0x80] ss:$8 sm:$0xf0]  ;;  %v3161_v43 = vld [vmem:[%s5082_s1 + $0x81] ss:$8 sm:$0xf] }
  0x7b   : > { %v5340_v50 = vld [vmem:[#allocation30_spill] sm:$0xff]  ;;  %v5346_v45 = vld [vmem:[#allocation36_spill] sm:$0xff] }
  0x7c   : > { %v973_v60 = vrot.slane %v5340_v50, %v5337_v15  ;;  %v5344_v6 = vld [vmem:[#allocation26_spill] sm:$0xff]  ;;  %v5347_v46 = vrot.slane %v5346_v45, 1  ;;  %v5352_v31 = vld [vmem:[#allocation8_spill] sm:$0xff]  ;;  %v4094_v45 = vor.u32 %v3152_v8, %v3151_v38  ;;  %v4112_v38 = vor.u32 %v3156_v14, %v3155_v36  ;;  %v4116_v8 = vld [vmem:[#allocation2 + $0x20] sm:$0xfc] }
  0x7d   : > { %v5345_v22 = vrot.slane %v5344_v6, 1  ;;  %v3162_v50 = vld [vmem:[%s5082_s1 + $0x81] ss:$8 sm:$0xf0] }
  0x7e   : > { %v1020_v41 = vsel %vm660_vm0, %v5347_v46, %v1019_v44  ;;  %v5348_v15 = vld [vmem:[#allocation50_spill] sm:$0xff]  ;;  %5354 = vst [vmem:[#allocation22_spill] sm:$0xff] %v4094_v45  ;;  %v4096_v46 = vor.u32 %v3154_v62, %v3153_v12  ;;  %5361 = vst [vmem:[#allocation37_spill] sm:$0xff] %v4112_v38  ;;  %v4114_v62 = vor.u32 %v3158_v13, %v3157_v18  ;;  %v4118_v12 = vld [vmem:[#allocation2 + $0x80] sm:$0x3] }
  0x7f   : > { %v901_v55 = vsel %vm660_vm0, %v5345_v22, %v5343_v33  ;;  %v5349_v52 = vrot.slane %v5348_v15, 1  ;;  %v5350_v20 = vld [vmem:[#allocation10_spill] sm:$0xff]  ;;  %v5353_v33 = vrot.slane %v5352_v31, 2  ;;  %v5360_v31 = vrot.slane %v5359_v49, 2  ;;  %5363 = vst [vmem:[#allocation27_spill] sm:$0xff] %v4118_v12 }
  0x80   : > { %v5351_v6 = vrot.slane %v5350_v20, 2  ;;  %5355 = vst [vmem:[#allocation17_spill] sm:$0xff] %v4096_v46  ;;  %v3163_v44 = vld [vmem:[%s5082_s1 + $0x82] ss:$8 sm:$0xf]  ;;  %5362 = vst [vmem:[#allocation53_spill] sm:$0xff] %v4114_v62  ;;  %v4126_v49 = vor.u32 %v3162_v50, %v3161_v43 }
  0x81   : > { %v1139_v23 = vsel %vm660_vm0, %v5349_v52, %v1138_v16  ;;  %v3164_v15 = vld [vmem:[%s5082_s1 + $0x82] ss:$8 sm:$0xf0]  ;;  %v812_v16 = vadd.f32 %v5356_v27, %v693_v0  ;;  %v1787_v0 = vld [vmem:[#allocation2] sm:$0xf8] }
  0x82   : > { %v1273_v22 = vsel %vm1270_vm1, %v5353_v33, %v5351_v6  ;;  %v5357_v52 = vld [vmem:[#allocation16_spill] sm:$0xff]  ;;  %v5364_v33 = vld [vmem:[#allocation3_spill] sm:$0xff]  ;;  %v4132_v36 = vor.u32 %v3164_v15, %v3163_v44  ;;  %v5366_v13 = vld [vmem:[#allocation18_spill] sm:$0xff] }
  0x83   : > { %v5358_v20 = vrot.slane %v5357_v52, 2  ;;  %v1440_v39 = vrot.slane %v4094_v45, %v5364_v33  ;;  %v1559_v27 = vrot.slane %v4096_v46, %v5364_v33  ;;  %v4124_v52 = vor.u32 %v3160_v9, %v3159_v5  ;;  %v381_v9 = vld [vmem:[#allocation2 + $0x48] sm:$0xff] }
  0x84   : > { %v1678_v18 = vrot.slane %v4112_v38, %v5364_v33  ;;  %v1811_v14 = vrot.slane %v4114_v62, %v5364_v33  ;;  %v820_v43 = vld [vmem:[#allocation2 + $0x48] sm:$0xfe]  ;;  %v434_v19 = vmul.f32 %v418_v25, %v381_v9  ;;  %v495_v44 = vmul.f32 %v476_v24, %v381_v9  ;;  %v1795_v24 = vld [vmem:[#allocation2 + $0x60] sm:$0x7] }
  0x85   : > { %v4110_v6 = vsel %vm1270_vm1, %v5360_v31, %v5358_v20  ;;  %5365 = vst [vmem:[#allocation19_spill] sm:$0xff] %v4124_v52  ;;  %v931_v20 = vadd.f32 %v901_v55, %v812_v16  ;;  %v1477_v31 = vmul.f32 %v1440_v39, %v5366_v13  ;;  %v1485_v3 = vmul.f32 %v1440_v39, %v3975_v7  ;;  %v821_v13 = vld [vmem:[#allocation2 + $0xa8] sm:$0x1] }
  0x86   : > { %v1596_v59 = vmul.f32 %v1559_v27, %v5367_v21  ;;  %v1604_v5 = vmul.f32 %v1559_v27, %v3985_v57  ;;  %v1715_v55 = vmul.f32 %v1678_v18, %v4116_v8  ;;  %v1723_v16 = vmul.f32 %v1678_v18, %v4118_v12 }
  0x87   : > { %v1050_v50 = vadd.f32 %v1020_v41, %v931_v20  ;;  %v4140_v2 = vmul.f32 %v1811_v14, %v1787_v0  ;;  %v556_v15 = vmul.f32 %v534_v35, %v381_v9  ;;  %v4142_v32 = vmul.f32 %v858_v48, %v820_v43  ;;  %v5374_v9 = vld [vmem:[#allocation69_spill] sm:$0xff] }
  0x88   : > { %v4144_v39 = vmul.f32 %v973_v60, %v820_v43  ;;  %v4146_v21 = vmul.f32 %v1088_v40, %v820_v43  ;;  %v4148_v7 = vmul.f32 %v858_v48, %v821_v13  ;;  %v4150_v27 = vmul.f32 %v973_v60, %v821_v13  ;;  %v3174_v48 = vld [vmem:[%s5082_s1 + $0x87] ss:$8 sm:$0xf0] }
  0x89   : > { %5368 = vst [vmem:[#allocation30_spill] sm:$0xff] %v4142_v32  ;;  %v442_v41 = vadd.f32 %v434_v19, %v3841_v10  ;;  %v503_v0 = vadd.f32 %v495_v44, %v3843_v11  ;;  %v564_v25 = vadd.f32 %v556_v15, %v3845_v56  ;;  %v5375_v10 = vld [vmem:[#allocation66_spill] sm:$0xff]  ;;  %v4165_v11 = vmul.f32 %v1088_v40, %v821_v13  ;;  %v4173_v13 = vld [vmem:[#allocation2 + $0x10] sm:$0xf8] }
  0x8a   : > { %5369 = vst [vmem:[#allocation49_spill] sm:$0xff] %v4144_v39  ;;  %5370 = vst [vmem:[#allocation12_spill] sm:$0xff] %v4146_v21  ;;  %v1169_v56 = vadd.f32 %v1139_v23, %v1050_v50  ;;  %v1509_v44 = vrot.slane %v1477_v31, 2  ;;  %v1510_v15 = vrot.slane %v1485_v3, 2  ;;  %v1628_v35 = vrot.slane %v1596_v59, 2  ;;  %v5377_v32 = vld [vmem:[#allocation70_spill] sm:$0xff] }
  0x8b   : > { %5371 = vst [vmem:[#allocation26_spill] sm:$0xff] %v4148_v7  ;;  %5372 = vst [vmem:[#allocation36_spill] sm:$0xff] %v4150_v27  ;;  %v4161_v60 = vadd.f32 %v4053_v30, %v564_v25  ;;  %v504_v43 = vadd.f32 %v5374_v9, %v442_v41  ;;  %v565_v19 = vadd.f32 %v5375_v10, %v503_v0  ;;  %v1629_v7 = vrot.slane %v1604_v5, 2  ;;  %v4170_v30 = vld [vmem:[#allocation2 + $0x8] sm:$0xf8] }
  0x8c   : > { %5376 = vst [vmem:[#allocation10_spill] sm:$0xff] %v4165_v11  ;;  %v1303_v25 = vadd.f32 %v1273_v22, %v1169_v56  ;;  %v1511_v41 = vsel %vm1270_vm1, %v1509_v44, %v1510_v15  ;;  %v1747_v0 = vrot.slane %v1715_v55, 2  ;;  %v1748_v40 = vrot.slane %v1723_v16, 2  ;;  %v4175_v23 = vld [vmem:[#allocation2 + $0x68] sm:$0x7]  ;;  %v4295_v11 = vld [vmem:[%s5083_s2] sm:$0xff] }
  0x8d   : > { %5373 = vst [vmem:[#allocation50_spill] sm:$0xff] %v4161_v60  ;;  %v566_v20 = vadd.f32 %v5377_v32, %v504_v43  ;;  %v699_v18 = vadd.f32 %v3888_v51, %v565_v19  ;;  %v1630_v51 = vsel %vm1270_vm1, %v1628_v35, %v1629_v7  ;;  %v1856_v3 = vmul.f32 %v1811_v14, %v1795_v24  ;;  %v3165_v22 = vld [vmem:[%s5082_s1 + $0x83] ss:$8 sm:$0xf]  ;;  %v4200_v7 = vld [vmem:[#allocation2 + $0x78] sm:$0x7] }
  0x8e   : > { %v3166_v31 = vld [vmem:[%s5082_s1 + $0x83] ss:$8 sm:$0xf0]  ;;  %v1422_v5 = vadd.f32 %v4110_v6, %v1303_v25  ;;  %v1749_v50 = vsel %vm1270_vm1, %v1747_v0, %v1748_v40  ;;  %v1931_v14 = vrot.slane %v4124_v52, %v5364_v33  ;;  %v2050_v6 = vrot.slane %v4126_v49, %v5364_v33  ;;  %v4208_v9 = vld [vmem:[#allocation2 + $0x80] sm:$0x7]  ;;  %5380 = vst [vmem:[#allocation16_spill] sm:$0xff] %v4295_v11 }
  0x8f   : > { %v700_v59 = vadd.f32 %v3891_v42, %v566_v20  ;;  %v4179_v32 = vadd.f32 %v3922_v4, %v699_v18  ;;  %v4190_v55 = vld [vmem:[#allocation2 + $0x18] sm:$0xf8]  ;;  %v4192_v42 = vld [vmem:[#allocation2 + $0x70] sm:$0x7]  ;;  %v1881_v4 = vrot.slane %v4140_v2, 3  ;;  %v1882_v35 = vrot.slane %v1856_v3, 3 }
  0x90   : > { %v2169_v24 = vrot.slane %v4132_v36, %v5364_v33  ;;  %v1541_v20 = vadd.f32 %v1511_v41, %v1422_v5  ;;  %v4206_v18 = vld [vmem:[#allocation2 + $0x20] sm:$0xf8]  ;;  %v1968_v2 = vmul.f32 %v1931_v14, %v4170_v30  ;;  %v1976_v43 = vmul.f32 %v1931_v14, %v4175_v23  ;;  %v4279_v21 = vld [vmem:[#allocation2 + $0x78] sm:$0xf] }
  0x91   : > { %5378 = vst [vmem:[#allocation8_spill] sm:$0xff] %v4179_v32  ;;  %v4198_v16 = vadd.f32 %v3925_v47, %v700_v59  ;;  %v4212_v47 = vor.u32 %v3166_v31, %v3165_v22  ;;  %v3167_v10 = vld [vmem:[%s5082_s1 + $0x84] ss:$8 sm:$0xf]  ;;  %v1883_v56 = vsel %vm1880_vm2, %v1881_v4, %v1882_v35  ;;  %v2087_v44 = vmul.f32 %v2050_v6, %v4173_v13  ;;  %v2405_v32 = vld [vmem:[#allocation2 + $0x60] sm:$0xf] }
  0x92   : > { %v3168_v19 = vld [vmem:[%s5082_s1 + $0x84] ss:$8 sm:$0xf0]  ;;  %v2095_v15 = vmul.f32 %v2050_v6, %v4192_v42  ;;  %v2206_v25 = vmul.f32 %v2169_v24, %v4190_v55  ;;  %v3169_v41 = vld [vmem:[%s5082_s1 + $0x85] ss:$8 sm:$0xf]  ;;  %v1660_v40 = vadd.f32 %v1630_v51, %v1541_v20  ;;  %v2214_v22 = vmul.f32 %v2169_v24, %v4200_v7 }
  0x93   : > { %5379 = vst [vmem:[#allocation15_spill] sm:$0xff] %v4198_v16  ;;  %v3170_v0 = vld [vmem:[%s5082_s1 + $0x85] ss:$8 sm:$0xf0]  ;;  %v2000_v59 = vrot.slane %v1968_v2, 3  ;;  %v2001_v3 = vrot.slane %v1976_v43, 3  ;;  %v2288_v6 = vrot.slane %v4212_v47, %v5364_v33  ;;  %v4243_v43 = vor.u32 %v3168_v19, %v3167_v10 }
  0x94   : > { %v3171_v31 = vld [vmem:[%s5082_s1 + $0x86] ss:$8 sm:$0xf]  ;;  %v2119_v4 = vrot.slane %v2087_v44, 3  ;;  %v2120_v14 = vrot.slane %v2095_v15, 3  ;;  %v2238_v35 = vrot.slane %v2206_v25, 3  ;;  %v1779_v20 = vadd.f32 %v1749_v50, %v1660_v40 }
  0x95   : > { %v3172_v5 = vld [vmem:[%s5082_s1 + $0x86] ss:$8 sm:$0xf0]  ;;  %v3173_v51 = vld [vmem:[%s5082_s1 + $0x87] ss:$8 sm:$0xf]  ;;  %v2002_v24 = vsel %vm1880_vm2, %v2000_v59, %v2001_v3  ;;  %v2325_v15 = vmul.f32 %v2288_v6, %v4206_v18  ;;  %v2333_v25 = vmul.f32 %v2288_v6, %v4208_v9  ;;  %v2421_v10 = vrot.slane %v4243_v43, %v5364_v33 }
  0x96   : > { %v2239_v2 = vrot.slane %v2214_v22, 3  ;;  %v2121_v44 = vsel %vm1880_vm2, %v2119_v4, %v2120_v14  ;;  %v2397_v16 = vld [vmem:[#allocation2] sm:$0xf0]  ;;  %v1913_v39 = vadd.f32 %v1883_v56, %v1779_v20  ;;  %v4254_v19 = vor.u32 %v3170_v0, %v3169_v41  ;;  %v3175_v40 = vld [vmem:[%s5082_s1 + $0xc0] ss:$8 sm:$0xf] }
  0x97   : > { %v3176_v59 = vld [vmem:[%s5082_s1 + $0xc0] ss:$8 sm:$0xf0]  ;;  %v2357_v3 = vrot.slane %v2325_v15, 3  ;;  %v2358_v22 = vrot.slane %v2333_v25, 3  ;;  %v4266_v14 = vor.u32 %v3172_v5, %v3171_v31  ;;  %v2466_v27 = vmul.f32 %v2421_v10, %v2405_v32 }
  0x98   : > { %v2240_v50 = vsel %vm1880_vm2, %v2238_v35, %v2239_v2  ;;  %v4262_v4 = vld [vmem:[#allocation2 + $0x8] sm:$0xf0]  ;;  %v4264_v56 = vld [vmem:[#allocation2 + $0x10] sm:$0xf0]  ;;  %v4268_v35 = vor.u32 %v3174_v48, %v3173_v51  ;;  %v2032_v41 = vadd.f32 %v2002_v24, %v1913_v39  ;;  %v4270_v0 = vld [vmem:[#allocation2 + $0x18] sm:$0xf0]  ;;  %v2458_v2 = vmul.f32 %v2421_v10, %v2397_v16 }
  0x99   : > { %v4272_v6 = vld [vmem:[#allocation2 + $0x68] sm:$0xf]  ;;  %v4274_v20 = vld [vmem:[#allocation2 + $0x70] sm:$0xf]  ;;  %v2541_v15 = vrot.slane %v4254_v19, %v5364_v33  ;;  %v2359_v25 = vsel %vm1880_vm2, %v2357_v3, %v2358_v22  ;;  %v2660_v48 = vrot.slane %v4266_v14, %v5364_v33  ;;  %v4285_v31 = vor.u32 %v3176_v59, %v3175_v40  ;;  %v4297_v59 = vld [vmem:[#allocation2 + $0x20] sm:$0xf0] }
  0x9a   : > { %v2779_v39 = vrot.slane %v4268_v35, %v5364_v33  ;;  %v2151_v5 = vadd.f32 %v2121_v44, %v2032_v41  ;;  %v2491_v51 = vrot.slane %v2458_v2, 4  ;;  %v2492_v24 = vrot.slane %v2466_v27, 4  ;;  %v4301_v2 = vld [vmem:[#allocation2 + $0x80] sm:$0xf] }
  0x9b   : > { %v2578_v32 = vmul.f32 %v2541_v15, %v4262_v4  ;;  %v2586_v16 = vmul.f32 %v2541_v15, %v4272_v6  ;;  %v2697_v10 = vmul.f32 %v2660_v48, %v4264_v56  ;;  %v2705_v3 = vmul.f32 %v2660_v48, %v4274_v20 }
  0x9c   : > { %v2816_v22 = vmul.f32 %v2779_v39, %v4270_v0  ;;  %v2270_v40 = vadd.f32 %v2240_v50, %v2151_v5  ;;  %v2493_v27 = vsel %vm2490_vm3, %v2491_v51, %v2492_v24  ;;  %v2824_v41 = vmul.f32 %v2779_v39, %v4279_v21  ;;  %v5381_v24 = vld [vmem:[#allocation57_spill] sm:$0xff] }
  0x9d   : > { %v2610_v44 = vrot.slane %v2578_v32, 4  ;;  %v2611_v15 = vrot.slane %v2586_v16, 4  ;;  %v2729_v60 = vrot.slane %v2697_v10, 4  ;;  %v2730_v48 = vrot.slane %v2705_v3, 4  ;;  %v5382_v39 = vld [vmem:[#allocation13_spill] sm:$0xff]  ;;  %v5384_v10 = vld [vmem:[#allocation32_spill] sm:$0xff] }
  0x9e   : > { %v2848_v29 = vrot.slane %v2816_v22, 4  ;;  %v2389_v54 = vadd.f32 %v2359_v25, %v2270_v40  ;;  %v2849_v58 = vrot.slane %v2824_v41, 4  ;;  %v2898_v63 = vrot.slane %v4285_v31, %v5364_v33 }
  0x9f   : > { %v3012_v50 = vrot.slane %v4295_v11, %v5364_v33  ;;  %v2612_v5 = vsel %vm2490_vm3, %v2610_v44, %v2611_v15  ;;  %v2731_v51 = vsel %vm2490_vm3, %v2729_v60, %v2730_v48  ;;  %v694_v32 = vadd.f32 %v5382_v39, %v5381_v24  ;;  %v5387_v15 = vld [vmem:[#allocation47_spill] sm:$0xff]  ;;  %v5390_v39 = vld [vmem:[#allocation58_spill] sm:$0xff] }
  0xa0   : > { %v5383_v16 = vrot.slane %v3909_v17, 1  ;;  %v5385_v3 = vrot.slane %v5384_v10, 1  ;;  %v2523_v22 = vadd.f32 %v2493_v27, %v2389_v54  ;;  %v2850_v40 = vsel %vm2490_vm3, %v2848_v29, %v2849_v58  ;;  %v5392_v27 = vld [vmem:[#allocation14_spill] sm:$0xff]  ;;  %v5394_v58 = vld [vmem:[#allocation9_spill] sm:$0xff] }
  0xa1   : > { %v2935_v41 = vmul.f32 %v2898_v63, %v4297_v59  ;;  %v2943_v33 = vmul.f32 %v2898_v63, %v4301_v2  ;;  %v813_v44 = vadd.f32 %v3938_v61, %v694_v32  ;;  %v5386_v60 = vrot.slane %v3953_v26, 1 }
  0xa2   : > { %v904_v25 = vsel %vm660_vm0, %v5385_v3, %v5383_v16  ;;  %v5388_v48 = vrot.slane %v5387_v15, 1  ;;  %v5389_v17 = vrot.slane %v3983_v34, 1  ;;  %v5391_v10 = vrot.slane %v5390_v39, 1  ;;  %v5397_v15 = vld [vmem:[#allocation25_spill] sm:$0xff]  ;;  %v4340_v34 = vld [vmem:[#allocation2 + $0x28] sm:$0xfc] }
  0xa3   : > { %v5393_v29 = vrot.slane %v5392_v27, 2  ;;  %v5395_v16 = vrot.slane %v5394_v58, 2  ;;  %v2642_v3 = vadd.f32 %v2612_v5, %v2523_v22  ;;  %v2967_v61 = vrot.slane %v2935_v41, 4  ;;  %5399 = vst [vmem:[#allocation11_spill] sm:$0xff] %v4340_v34  ;;  %v5400_v39 = vld [vmem:[#allocation4_spill] sm:$0xff] }
  0xa4   : > { %v1023_v24 = vsel %vm660_vm0, %v5388_v48, %v5386_v60  ;;  %v1142_v54 = vsel %vm660_vm0, %v5391_v10, %v5389_v17  ;;  %v2968_v32 = vrot.slane %v2943_v33, 4  ;;  %v5396_v26 = vrot.slane %v4029_v37, 2  ;;  %v4342_v48 = vld [vmem:[#allocation2 + $0x88] sm:$0x3] }
  0xa5   : > { %v1276_v63 = vsel %vm1270_vm1, %v5395_v16, %v5393_v29  ;;  %v5398_v28 = vrot.slane %v5397_v15, 2  ;;  %v932_v17 = vadd.f32 %v904_v25, %v813_v44  ;;  %v1444_v10 = vrot.slane %v4094_v45, %v5400_v39  ;;  %v4355_v25 = vld [vmem:[#allocation2 + $0x18] sm:$0xfc] }
  0xa6   : > { %v1563_v27 = vrot.slane %v4096_v46, %v5400_v39  ;;  %v1682_v5 = vrot.slane %v4112_v38, %v5400_v39  ;;  %v2761_v22 = vadd.f32 %v2731_v51, %v2642_v3  ;;  %v2969_v37 = vsel %vm2490_vm3, %v2967_v61, %v2968_v32 }
  0xa7   : > { %v1395_v60 = vsel %vm1270_vm1, %v5398_v28, %v5396_v26  ;;  %v1815_v28 = vrot.slane %v4114_v62, %v5400_v39  ;;  %v1935_v41 = vrot.slane %v4124_v52, %v5400_v39  ;;  %v1051_v33 = vadd.f32 %v1023_v24, %v932_v17 }
  0xa8   : > { %v1478_v44 = vmul.f32 %v4355_v25, %v1444_v10  ;;  %v1486_v29 = vmul.f32 %v1444_v10, %v3985_v57  ;;  %v1597_v58 = vmul.f32 %v1563_v27, %v4116_v8  ;;  %v2880_v16 = vadd.f32 %v2850_v40, %v2761_v22 }
  0xa9   : > { %v1605_v51 = vmul.f32 %v1563_v27, %v4118_v12  ;;  %v1716_v3 = vmul.f32 %v1682_v5, %v4340_v34  ;;  %v1724_v61 = vmul.f32 %v1682_v5, %v4342_v48  ;;  %v1170_v32 = vadd.f32 %v1142_v54, %v1051_v33 }
  0xaa   : > { %v1512_v26 = vrot.slane %v1478_v44, 2  ;;  %v1513_v15 = vrot.slane %v1486_v29, 2  ;;  %v1631_v24 = vrot.slane %v1597_v58, 2  ;;  %v2999_v17 = vadd.f32 %v2969_v37, %v2880_v16 }
  0xab   : > { %v1632_v52 = vrot.slane %v1605_v51, 2  ;;  %v1750_v62 = vrot.slane %v1716_v3, 2  ;;  %v1751_v38 = vrot.slane %v1724_v61, 2  ;;  %v1304_v40 = vadd.f32 %v1276_v63, %v1170_v32  ;;  %v4378_v63 = vld [vmem:[#allocation2 + $0x28] sm:$0xf8] }
  0xac   : > { %v1514_v10 = vsel %vm1270_vm1, %v1512_v26, %v1513_v15  ;;  %v1849_v27 = vmul.f32 %v1815_v28, %v4170_v30  ;;  %v1857_v54 = vmul.f32 %v1815_v28, %v4175_v23  ;;  %v3049_v5 = vadd.f32 %v3012_v50, %v2999_v17  ;;  %v4380_v51 = vld [vmem:[#allocation2 + $0x88] sm:$0x7] }
  0xad   : > { %v1633_v22 = vsel %vm1270_vm1, %v1631_v24, %v1632_v52  ;;  %v1752_v37 = vsel %vm1270_vm1, %v1750_v62, %v1751_v38  ;;  %v1969_v33 = vmul.f32 %v1935_v41, %v4173_v13  ;;  %v1423_v44 = vadd.f32 %v1395_v60, %v1304_v40 }
  0xae   : > { %v1884_v29 = vrot.slane %v1849_v27, 3  ;;  %v1885_v58 = vrot.slane %v1857_v54, 3  ;;  %v1977_v16 = vmul.f32 %v1935_v41, %v4192_v42  ;;  %3057 = vst [vmem:[%s4368_s26] sm:$0xff] %v3049_v5  ;;  %v2054_v23 = vrot.slane %v4126_v49, %v5400_v39 }
  0xaf   : > { %v2003_v30 = vrot.slane %v1969_v33, 3  ;;  %v2173_v52 = vrot.slane %v4132_v36, %v5400_v39  ;;  %v2292_v38 = vrot.slane %v4212_v47, %v5400_v39  ;;  %v1542_v62 = vadd.f32 %v1514_v10, %v1423_v44 }
  0xb0   : > { %v1886_v50 = vsel %vm1880_vm2, %v1884_v29, %v1885_v58  ;;  %v2004_v60 = vrot.slane %v1977_v16, 3  ;;  %v2425_v28 = vrot.slane %v4243_v43, %v5400_v39  ;;  %v2088_v41 = vmul.f32 %v2054_v23, %v4190_v55 }
  0xb1   : > { %v2096_v3 = vmul.f32 %v2054_v23, %v4200_v7  ;;  %v2207_v61 = vmul.f32 %v2173_v52, %v4206_v18  ;;  %v2215_v32 = vmul.f32 %v2173_v52, %v4208_v9  ;;  %v1661_v26 = vadd.f32 %v1633_v22, %v1542_v62 }
  0xb2   : > { %v2005_v15 = vsel %vm1880_vm2, %v2003_v30, %v2004_v60  ;;  %v2326_v24 = vmul.f32 %v2292_v38, %v4378_v63  ;;  %v2334_v17 = vmul.f32 %v2292_v38, %v4380_v51  ;;  %v2122_v40 = vrot.slane %v2088_v41, 3 }
  0xb3   : > { %v2123_v10 = vrot.slane %v2096_v3, 3  ;;  %v2241_v27 = vrot.slane %v2207_v61, 3  ;;  %v2242_v54 = vrot.slane %v2215_v32, 3  ;;  %v1780_v5 = vadd.f32 %v1752_v37, %v1661_v26 }
  0xb4   : > { %v2360_v33 = vrot.slane %v2326_v24, 3  ;;  %v2361_v44 = vrot.slane %v2334_v17, 3  ;;  %v2459_v29 = vmul.f32 %v2425_v28, %v4262_v4  ;;  %v2467_v22 = vmul.f32 %v2425_v28, %v4272_v6  ;;  %v4411_v6 = vld [vmem:[#allocation2 + $0x28] sm:$0xf0]  ;;  %v4413_v28 = vld [vmem:[#allocation2 + $0x88] sm:$0xf] }
  0xb5   : > { %v2124_v58 = vsel %vm1880_vm2, %v2122_v40, %v2123_v10  ;;  %v2243_v16 = vsel %vm1880_vm2, %v2241_v27, %v2242_v54  ;;  %v2545_v30 = vrot.slane %v4254_v19, %v5400_v39  ;;  %v1914_v23 = vadd.f32 %v1886_v50, %v1780_v5 }
  0xb6   : > { %v2362_v52 = vsel %vm1880_vm2, %v2360_v33, %v2361_v44  ;;  %v2494_v38 = vrot.slane %v2459_v29, 4  ;;  %v2664_v37 = vrot.slane %v4266_v14, %v5400_v39  ;;  %v2495_v62 = vrot.slane %v2467_v22, 4 }
  0xb7   : > { %v2579_v60 = vmul.f32 %v2545_v30, %v4264_v56  ;;  %v2587_v4 = vmul.f32 %v2545_v30, %v4274_v20  ;;  %v2783_v41 = vrot.slane %v4268_v35, %v5400_v39  ;;  %v2033_v3 = vadd.f32 %v2005_v15, %v1914_v23 }
  0xb8   : > { %v2698_v50 = vmul.f32 %v2664_v37, %v4270_v0  ;;  %v2706_v61 = vmul.f32 %v2664_v37, %v4279_v21  ;;  %v2902_v32 = vrot.slane %v4285_v31, %v5400_v39  ;;  %v2496_v26 = vsel %vm2490_vm3, %v2494_v38, %v2495_v62 }
  0xb9   : > { %v2613_v24 = vrot.slane %v2579_v60, 4  ;;  %v2614_v17 = vrot.slane %v2587_v4, 4  ;;  %v2817_v40 = vmul.f32 %v2783_v41, %v4297_v59  ;;  %v2152_v10 = vadd.f32 %v2124_v58, %v2033_v3  ;;  %v5402_v60 = vld [vmem:[#allocation29_spill] sm:$0xff] }
  0xba   : > { %v2732_v27 = vrot.slane %v2698_v50, 4  ;;  %v2733_v15 = vrot.slane %v2706_v61, 4  ;;  %v2825_v54 = vmul.f32 %v2783_v41, %v4301_v2  ;;  %v2936_v44 = vmul.f32 %v2902_v32, %v4411_v6  ;;  %v5405_v50 = vld [vmem:[#allocation46_spill] sm:$0xff] }
  0xbb   : > { %v2615_v5 = vsel %vm2490_vm3, %v2613_v24, %v2614_v17  ;;  %v2851_v33 = vrot.slane %v2817_v40, 4  ;;  %v2944_v29 = vmul.f32 %v2902_v32, %v4413_v28  ;;  %v2271_v22 = vadd.f32 %v2243_v16, %v2152_v10  ;;  %v5407_v17 = vld [vmem:[#allocation88_spill] sm:$0xff] }
  0xbc   : > { %v2734_v30 = vsel %vm2490_vm3, %v2732_v27, %v2733_v15  ;;  %v2852_v23 = vrot.slane %v2825_v54, 4  ;;  %v3016_v38 = vrot.slane %v4295_v11, %v5400_v39  ;;  %v2970_v37 = vrot.slane %v2936_v44, 4  ;;  %v5408_v39 = vld [vmem:[#allocation33_spill] sm:$0xff]  ;;  %v5410_v27 = vld [vmem:[#allocation56_spill] sm:$0xff] }
  0xbd   : > { %v2971_v58 = vrot.slane %v2944_v29, 4  ;;  %v5401_v62 = vrot.slane %v3862_v1, 1  ;;  %v5403_v4 = vrot.slane %v5402_v60, 1  ;;  %v5404_v3 = vrot.slane %v3913_v53, 1  ;;  %v5412_v44 = vld [vmem:[#allocation41_spill] sm:$0xff] }
  0xbe   : > { %v5406_v61 = vrot.slane %v5405_v50, 1  ;;  %v2390_v32 = vadd.f32 %v2362_v52, %v2271_v22  ;;  %v2853_v24 = vsel %vm2490_vm3, %v2851_v33, %v2852_v23  ;;  %v5409_v10 = vrot.slane %v5408_v39, 1  ;;  %v5414_v53 = vld [vmem:[#allocation65_spill] sm:$0xff]  ;;  %v5418_v22 = vld [vmem:[#allocation23_spill] sm:$0xff] }
  0xbf   : > { %v788_v41 = vsel %vm660_vm0, %v5403_v4, %v5401_v62  ;;  %v5411_v15 = vrot.slane %v5410_v27, 1  ;;  %v2972_v54 = vsel %vm2490_vm3, %v2970_v37, %v2971_v58  ;;  %v5413_v29 = vrot.slane %v5412_v44, 1  ;;  %v5416_v4 = vld [vmem:[#allocation20_spill] sm:$0xff]  ;;  %v5422_v27 = vld [vmem:[#allocation37_spill] sm:$0xff] }
  0xc0   : > { %v907_v16 = vsel %vm660_vm0, %v5406_v61, %v5404_v3  ;;  %v814_v40 = vadd.f32 %v788_v41, %v5407_v17  ;;  %v5415_v62 = vrot.slane %v5414_v53, 1  ;;  %v5417_v52 = vrot.slane %v5416_v4, 2  ;;  %v5420_v41 = vld [vmem:[#allocation7_spill] sm:$0xff]  ;;  %v5421_v3 = vld [vmem:[#allocation6_spill] sm:$0xff]  ;;  %v5423_v44 = vld [vmem:[#allocation53_spill] sm:$0xff] }
  0xc1   : > { %v1026_v1 = vsel %vm660_vm0, %v5411_v15, %v5409_v10  ;;  %v5419_v33 = vrot.slane %v5418_v22, 2  ;;  %v1329_v50 = vrot.slane %v5421_v3, %v5420_v41  ;;  %v2524_v61 = vadd.f32 %v2496_v26, %v2390_v32  ;;  %v4468_v53 = vld [vmem:[#allocation2 + $0x30] sm:$0xfc] }
  0xc2   : > { %v1145_v60 = vsel %vm660_vm0, %v5415_v62, %v5413_v29  ;;  %v933_v17 = vadd.f32 %v907_v16, %v814_v40  ;;  %v1448_v37 = vrot.slane %v4094_v45, %v5420_v41  ;;  %v1567_v58 = vrot.slane %v4096_v46, %v5420_v41  ;;  %5424 = vst [vmem:[#allocation3_spill] sm:$0xff] %v4468_v53  ;;  %v4472_v62 = vld [vmem:[#allocation2 + $0x90] sm:$0x3] }
  0xc3   : > { %v1279_v23 = vsel %vm1270_vm1, %v5419_v33, %v5417_v52  ;;  %v1360_v39 = vmul.f32 %v4355_v25, %v1329_v50  ;;  %v1368_v10 = vmul.f32 %v1329_v50, %v3985_v57  ;;  %v1686_v15 = vrot.slane %v5422_v27, %v5420_v41 }
  0xc4   : > { %v1819_v29 = vrot.slane %v5423_v44, %v5420_v41  ;;  %v2643_v26 = vadd.f32 %v2615_v5, %v2524_v61  ;;  %v1052_v16 = vadd.f32 %v1026_v1, %v933_v17  ;;  %v1479_v32 = vmul.f32 %v1448_v37, %v4116_v8 }
  0xc5   : > { %v1487_v40 = vmul.f32 %v1448_v37, %v4118_v12  ;;  %v1396_v4 = vrot.slane %v1360_v39, 2  ;;  %v1397_v25 = vrot.slane %v1368_v10, 2  ;;  %v1598_v57 = vmul.f32 %v1567_v58, %v4340_v34 }
  0xc6   : > { %v1606_v52 = vmul.f32 %v1567_v58, %v4342_v48  ;;  %v2762_v22 = vadd.f32 %v2734_v30, %v2643_v26  ;;  %v1171_v33 = vadd.f32 %v1145_v60, %v1052_v16  ;;  %v1515_v50 = vrot.slane %v1479_v32, 2  ;;  %v5425_v32 = vld [vmem:[#allocation19_spill] sm:$0xff] }
  0xc7   : > { %v1516_v44 = vrot.slane %v1487_v40, 2  ;;  %v1398_v27 = vsel %vm1270_vm1, %v1396_v4, %v1397_v25  ;;  %v1634_v5 = vrot.slane %v1598_v57, 2  ;;  %v1717_v61 = vmul.f32 %v1686_v15, %v4468_v53 }
  0xc8   : > { %v1635_v1 = vrot.slane %v1606_v52, 2  ;;  %v2881_v17 = vadd.f32 %v2853_v24, %v2762_v22  ;;  %v1305_v37 = vadd.f32 %v1279_v23, %v1171_v33  ;;  %v1725_v39 = vmul.f32 %v1686_v15, %v4472_v62  ;;  %v4496_v22 = vld [vmem:[#allocation2 + $0x30] sm:$0xf8]  ;;  %v4498_v33 = vld [vmem:[#allocation2 + $0x90] sm:$0x7] }
  0xc9   : > { %v1517_v12 = vsel %vm1270_vm1, %v1515_v50, %v1516_v44  ;;  %v1753_v34 = vrot.slane %v1717_v61, 2  ;;  %v1850_v30 = vmul.f32 %v1819_v29, %v4173_v13  ;;  %v1858_v60 = vmul.f32 %v1819_v29, %v4192_v42 }
  0xca   : > { %v1636_v10 = vsel %vm1270_vm1, %v1634_v5, %v1635_v1  ;;  %v3000_v58 = vadd.f32 %v2972_v54, %v2881_v17  ;;  %v1424_v26 = vadd.f32 %v1398_v27, %v1305_v37  ;;  %v1754_v16 = vrot.slane %v1725_v39, 2 }
  0xcb   : > { %v1939_v40 = vrot.slane %v5425_v32, %v5420_v41  ;;  %v1887_v24 = vrot.slane %v1850_v30, 3  ;;  %v1888_v23 = vrot.slane %v1858_v60, 3  ;;  %v2058_v44 = vrot.slane %v4126_v49, %v5420_v41 }
  0xcc   : > { %v2177_v15 = vrot.slane %v4132_v36, %v5420_v41  ;;  %v3050_v4 = vadd.f32 %v3016_v38, %v3000_v58  ;;  %v1543_v25 = vadd.f32 %v1517_v12, %v1424_v26  ;;  %v1755_v13 = vsel %vm1270_vm1, %v1753_v34, %v1754_v16 }
  0xcd   : > { %v1970_v42 = vmul.f32 %v1939_v40, %v4190_v55  ;;  %v1889_v54 = vsel %vm1880_vm2, %v1887_v24, %v1888_v23  ;;  %v1978_v27 = vmul.f32 %v1939_v40, %v4200_v7  ;;  %v2089_v29 = vmul.f32 %v2058_v44, %v4206_v18 }
  0xce   : > { %v2097_v57 = vmul.f32 %v2058_v44, %v4208_v9  ;;  %3058 = vst [vmem:[%s4368_s26 + $0x8] sm:$0xff] %v3050_v4  ;;  %v1662_v52 = vadd.f32 %v1636_v10, %v1543_v25  ;;  %v2208_v12 = vmul.f32 %v2177_v15, %v4378_v63  ;;  %v2216_v34 = vmul.f32 %v2177_v15, %v4380_v51 }
  0xcf   : > { %v2006_v38 = vrot.slane %v1970_v42, 3  ;;  %v2007_v50 = vrot.slane %v1978_v27, 3  ;;  %v2125_v5 = vrot.slane %v2089_v29, 3  ;;  %v2296_v61 = vrot.slane %v4212_v47, %v5420_v41 }
  0xd0   : > { %v2126_v1 = vrot.slane %v2097_v57, 3  ;;  %v1781_v17 = vadd.f32 %v1755_v13, %v1662_v52  ;;  %v2244_v37 = vrot.slane %v2208_v12, 3  ;;  %v2245_v39 = vrot.slane %v2216_v34, 3 }
  0xd1   : > { %v2429_v10 = vrot.slane %v4243_v43, %v5420_v41  ;;  %v2008_v30 = vsel %vm1880_vm2, %v2006_v38, %v2007_v50  ;;  %v2327_v58 = vmul.f32 %v2296_v61, %v4496_v22  ;;  %v2335_v26 = vmul.f32 %v2296_v61, %v4498_v33  ;;  %v4523_v38 = vld [vmem:[#allocation2 + $0x30] sm:$0xf0] }
  0xd2   : > { %v2127_v60 = vsel %vm1880_vm2, %v2125_v5, %v2126_v1  ;;  %v1915_v16 = vadd.f32 %v1889_v54, %v1781_v17  ;;  %v2246_v40 = vsel %vm1880_vm2, %v2244_v37, %v2245_v39  ;;  %v2549_v4 = vrot.slane %v4254_v19, %v5420_v41  ;;  %v4528_v5 = vld [vmem:[#allocation2 + $0x90] sm:$0xf] }
  0xd3   : > { %v2460_v24 = vmul.f32 %v2429_v10, %v4264_v56  ;;  %v2468_v23 = vmul.f32 %v2429_v10, %v4274_v20  ;;  %v2363_v44 = vrot.slane %v2327_v58, 3  ;;  %v2364_v15 = vrot.slane %v2335_v26, 3 }
  0xd4   : > { %v2668_v25 = vrot.slane %v4266_v14, %v5420_v41  ;;  %v2034_v13 = vadd.f32 %v2008_v30, %v1915_v16  ;;  %v2787_v54 = vrot.slane %v4268_v35, %v5420_v41  ;;  %v2580_v56 = vmul.f32 %v2549_v4, %v4270_v0 }
  0xd5   : > { %v2497_v42 = vrot.slane %v2460_v24, 4  ;;  %v2498_v27 = vrot.slane %v2468_v23, 4  ;;  %v2365_v29 = vsel %vm1880_vm2, %v2363_v44, %v2364_v15  ;;  %v2588_v20 = vmul.f32 %v2549_v4, %v4279_v21  ;;  %v5426_v24 = vld [vmem:[#allocation74_spill] sm:$0xff]  ;;  %v5427_v23 = vld [vmem:[#allocation84_spill] sm:$0xff] }
  0xd6   : > { %v2699_v57 = vmul.f32 %v2668_v25, %v4297_v59  ;;  %v2153_v52 = vadd.f32 %v2127_v60, %v2034_v13  ;;  %v2707_v34 = vmul.f32 %v2668_v25, %v4301_v2  ;;  %v2818_v50 = vmul.f32 %v2787_v54, %v4411_v6 }
  0xd7   : > { %v2499_v12 = vsel %vm2490_vm3, %v2497_v42, %v2498_v27  ;;  %v2616_v1 = vrot.slane %v2580_v56, 4  ;;  %v2617_v61 = vrot.slane %v2588_v20, 4  ;;  %v2826_v37 = vmul.f32 %v2787_v54, %v4413_v28  ;;  %v5428_v42 = vld [vmem:[#allocation85_spill] sm:$0xff] }
  0xd8   : > { %v2735_v17 = vrot.slane %v2699_v57, 4  ;;  %v2272_v39 = vadd.f32 %v2246_v40, %v2153_v52  ;;  %v2736_v10 = vrot.slane %v2707_v34, 4  ;;  %v2854_v30 = vrot.slane %v2818_v50, 4  ;;  %v5430_v54 = vld [vmem:[#allocation45_spill] sm:$0xff]  ;;  %v5432_v57 = vld [vmem:[#allocation38_spill] sm:$0xff]  ;;  %v5434_v52 = vld [vmem:[#allocation55_spill] sm:$0xff] }
  0xd9   : > { %v2906_v60 = vrot.slane %v4285_v31, %v5420_v41  ;;  %v2618_v58 = vsel %vm2490_vm3, %v2616_v1, %v2617_v61  ;;  %v2855_v26 = vrot.slane %v2826_v37, 4  ;;  %v3020_v16 = vrot.slane %v4295_v11, %v5420_v41  ;;  %v5436_v50 = vld [vmem:[#allocation39_spill] sm:$0xff] }
  0xda   : > { %v696_v44 = vadd.f32 %v5427_v23, %v5426_v24  ;;  %v2391_v15 = vadd.f32 %v2365_v29, %v2272_v39  ;;  %v2737_v4 = vsel %vm2490_vm3, %v2735_v17, %v2736_v10  ;;  %v5429_v27 = vrot.slane %v5428_v42, 1  ;;  %v5438_v61 = vld [vmem:[#allocation63_spill] sm:$0xff]  ;;  %v5442_v23 = vld [vmem:[#allocation73_spill] sm:$0xff] }
  0xdb   : > { %v2937_v25 = vmul.f32 %v2906_v60, %v4523_v38  ;;  %v2945_v40 = vmul.f32 %v2906_v60, %v4528_v5  ;;  %v2856_v13 = vsel %vm2490_vm3, %v2854_v30, %v2855_v26  ;;  %v5431_v56 = vrot.slane %v5430_v54, 1  ;;  %v5440_v26 = vld [vmem:[#allocation48_spill] sm:$0xff]  ;;  %v5444_v54 = vld [vmem:[#allocation31_spill] sm:$0xff] }
  0xdc   : > { %v5433_v41 = vrot.slane %v5432_v57, 1  ;;  %v5435_v34 = vrot.slane %v5434_v52, 1  ;;  %v5437_v1 = vrot.slane %v5436_v50, 1  ;;  %v5439_v17 = vrot.slane %v5438_v61, 1  ;;  %v5446_v57 = vld [vmem:[#allocation34_spill] sm:$0xff] }
  0xdd   : > { %v791_v20 = vsel %vm660_vm0, %v5431_v56, %v5429_v27  ;;  %v2525_v39 = vadd.f32 %v2499_v12, %v2391_v15  ;;  %v2973_v10 = vrot.slane %v2937_v25, 4  ;;  %v2974_v30 = vrot.slane %v2945_v40, 4 }
  0xde   : > { %v910_v29 = vsel %vm660_vm0, %v5435_v34, %v5433_v41  ;;  %v1029_v37 = vsel %vm660_vm0, %v5439_v17, %v5437_v1  ;;  %v815_v60 = vadd.f32 %v791_v20, %v696_v44  ;;  %v5441_v24 = vrot.slane %v5440_v26, 1  ;;  %v5448_v34 = vld [vmem:[#allocation24_spill] sm:$0xff]  ;;  %v5449_v1 = vld [vmem:[#allocation27_spill] sm:$0xff] }
  0xdf   : > { %v5443_v42 = vrot.slane %v5442_v23, 1  ;;  %v5445_v56 = vrot.slane %v5444_v54, 2  ;;  %v5447_v41 = vrot.slane %v5446_v57, 2  ;;  %v1333_v50 = vrot.slane %v5421_v3, %v5448_v34  ;;  %v5450_v17 = vld [vmem:[#allocation11_spill] sm:$0xff] }
  0xe0   : > { %v1452_v12 = vrot.slane %v4094_v45, %v5448_v34  ;;  %v2644_v15 = vadd.f32 %v2618_v58, %v2525_v39  ;;  %v2975_v44 = vsel %vm2490_vm3, %v2973_v10, %v2974_v30  ;;  %v934_v25 = vadd.f32 %v910_v29, %v815_v60  ;;  %v4580_v60 = vld [vmem:[#allocation2 + $0x38] sm:$0xfc] }
  0xe1   : > { %v1148_v27 = vsel %vm660_vm0, %v5443_v42, %v5441_v24  ;;  %v1282_v52 = vsel %vm1270_vm1, %v5447_v41, %v5445_v56  ;;  %v1571_v40 = vrot.slane %v4096_v46, %v5448_v34  ;;  %v1361_v20 = vmul.f32 %v1333_v50, %v4116_v8  ;;  %v4582_v56 = vld [vmem:[#allocation2 + $0x98] sm:$0x3] }
  0xe2   : > { %v1369_v61 = vmul.f32 %v1333_v50, %v5449_v1  ;;  %v1480_v26 = vmul.f32 %v1452_v12, %v5450_v17  ;;  %v1488_v24 = vmul.f32 %v1452_v12, %v4342_v48  ;;  %v2763_v23 = vadd.f32 %v2737_v4, %v2644_v15 }
  0xe3   : > { %v1053_v42 = vadd.f32 %v1029_v37, %v934_v25  ;;  %v1599_v54 = vmul.f32 %v1571_v40, %v4468_v53  ;;  %v1607_v58 = vmul.f32 %v1571_v40, %v4472_v62  ;;  %v1399_v39 = vrot.slane %v1361_v20, 2  ;;  %v5451_v37 = vld [vmem:[#allocation37_spill] sm:$0xff] }
  0xe4   : > { %v1400_v10 = vrot.slane %v1369_v61, 2  ;;  %v1518_v29 = vrot.slane %v1480_v26, 2  ;;  %v1519_v30 = vrot.slane %v1488_v24, 2  ;;  %v2882_v8 = vadd.f32 %v2856_v13, %v2763_v23  ;;  %v5452_v25 = vld [vmem:[#allocation53_spill] sm:$0xff] }
  0xe5   : > { %v1172_v57 = vadd.f32 %v1148_v27, %v1053_v42  ;;  %v1637_v41 = vrot.slane %v1599_v54, 2  ;;  %v1638_v50 = vrot.slane %v1607_v58, 2  ;;  %v1690_v15 = vrot.slane %v5451_v37, %v5448_v34 }
  0xe6   : > { %v1401_v12 = vsel %vm1270_vm1, %v1399_v39, %v1400_v10  ;;  %v1520_v4 = vsel %vm1270_vm1, %v1518_v29, %v1519_v30  ;;  %v1823_v40 = vrot.slane %v5452_v25, %v5448_v34  ;;  %v3001_v20 = vadd.f32 %v2975_v44, %v2882_v8  ;;  %v4600_v8 = vld [vmem:[#allocation2 + $0x38] sm:$0xf8] }
  0xe7   : > { %v1306_v1 = vadd.f32 %v1282_v52, %v1172_v57  ;;  %v1639_v61 = vsel %vm1270_vm1, %v1637_v41, %v1638_v50  ;;  %v1943_v13 = vrot.slane %v5425_v32, %v5448_v34  ;;  %v1718_v27 = vmul.f32 %v1690_v15, %v4580_v60  ;;  %v4602_v57 = vld [vmem:[#allocation2 + $0x98] sm:$0x7] }
  0xe8   : > { %v1726_v26 = vmul.f32 %v1690_v15, %v4582_v56  ;;  %v1851_v24 = vmul.f32 %v1823_v40, %v4190_v55  ;;  %v1859_v23 = vmul.f32 %v1823_v40, %v4200_v7  ;;  %v3051_v42 = vadd.f32 %v3020_v16, %v3001_v20 }
  0xe9   : > { %v1425_v54 = vadd.f32 %v1401_v12, %v1306_v1  ;;  %v1971_v58 = vmul.f32 %v1943_v13, %v4206_v18  ;;  %v1979_v44 = vmul.f32 %v1943_v13, %v4208_v9  ;;  %v1756_v52 = vrot.slane %v1718_v27, 2 }
  0xea   : > { %v1757_v39 = vrot.slane %v1726_v26, 2  ;;  %v1890_v10 = vrot.slane %v1851_v24, 3  ;;  %v1891_v29 = vrot.slane %v1859_v23, 3  ;;  %3059 = vst [vmem:[%s4368_s26 + $0x10] sm:$0xff] %v3051_v42  ;;  %v2062_v7 = vrot.slane %v4126_v49, %v5448_v34 }
  0xeb   : > { %v1544_v30 = vadd.f32 %v1520_v4, %v1425_v54  ;;  %v2009_v41 = vrot.slane %v1971_v58, 3  ;;  %v2010_v55 = vrot.slane %v1979_v44, 3  ;;  %v2181_v12 = vrot.slane %v4132_v36, %v5448_v34 }
  0xec   : > { %v1758_v16 = vsel %vm1270_vm1, %v1756_v52, %v1757_v39  ;;  %v1892_v50 = vsel %vm1880_vm2, %v1890_v10, %v1891_v29  ;;  %v2300_v15 = vrot.slane %v4212_v47, %v5448_v34  ;;  %v2090_v20 = vmul.f32 %v2062_v7, %v4378_v63 }
  0xed   : > { %v1663_v4 = vadd.f32 %v1639_v61, %v1544_v30  ;;  %v2011_v40 = vsel %vm1880_vm2, %v2009_v41, %v2010_v55  ;;  %v2098_v1 = vmul.f32 %v2062_v7, %v4380_v51  ;;  %v2209_v13 = vmul.f32 %v2181_v12, %v4496_v22 }
  0xee   : > { %v2217_v27 = vmul.f32 %v2181_v12, %v4498_v33  ;;  %v2328_v26 = vmul.f32 %v2300_v15, %v4600_v8  ;;  %v2336_v24 = vmul.f32 %v2300_v15, %v4602_v57  ;;  %v2128_v42 = vrot.slane %v2090_v20, 3 }
  0xef   : > { %v1782_v23 = vadd.f32 %v1758_v16, %v1663_v4  ;;  %v2129_v54 = vrot.slane %v2098_v1, 3  ;;  %v2433_v61 = vrot.slane %v4243_v43, %v5448_v34  ;;  %v2247_v58 = vrot.slane %v2209_v13, 3 }
  0xf0   : > { %v2248_v44 = vrot.slane %v2217_v27, 3  ;;  %v2366_v52 = vrot.slane %v2328_v26, 3  ;;  %v2367_v39 = vrot.slane %v2336_v24, 3  ;;  %v2553_v16 = vrot.slane %v4254_v19, %v5448_v34  ;;  %v4636_v26 = vld [vmem:[#allocation2 + $0x38] sm:$0xf0] }
  0xf1   : > { %v1916_v10 = vadd.f32 %v1892_v50, %v1782_v23  ;;  %v2130_v29 = vsel %vm1880_vm2, %v2128_v42, %v2129_v54  ;;  %v2461_v30 = vmul.f32 %v2433_v61, %v4270_v0  ;;  %v2469_v41 = vmul.f32 %v2433_v61, %v4279_v21  ;;  %5453 = vst [vmem:[#allocation18_spill] sm:$0xff] %v4636_v26  ;;  %v4641_v42 = vld [vmem:[#allocation2 + $0x98] sm:$0xf] }
  0xf2   : > { %v2249_v55 = vsel %vm1880_vm2, %v2247_v58, %v2248_v44  ;;  %v2368_v7 = vsel %vm1880_vm2, %v2366_v52, %v2367_v39  ;;  %v2672_v12 = vrot.slane %v4266_v14, %v5448_v34  ;;  %v2791_v50 = vrot.slane %v4268_v35, %v5448_v34  ;;  %5454 = vst [vmem:[#allocation28_spill] sm:$0xff] %v4641_v42 }
  0xf3   : > { %v2035_v15 = vadd.f32 %v2011_v40, %v1916_v10  ;;  %v2500_v4 = vrot.slane %v2461_v30, 4  ;;  %v2501_v20 = vrot.slane %v2469_v41, 4  ;;  %v2581_v0 = vmul.f32 %v2553_v16, %v4297_v59 }
  0xf4   : > { %v2589_v21 = vmul.f32 %v2553_v16, %v4301_v2  ;;  %v2700_v1 = vmul.f32 %v2672_v12, %v4411_v6  ;;  %v2708_v13 = vmul.f32 %v2672_v12, %v4413_v28  ;;  %v2819_v40 = vmul.f32 %v2791_v50, %v4523_v38  ;;  %v5455_v12 = vld [vmem:[#allocation79_spill] sm:$0xff] }
  0xf5   : > { %v2154_v27 = vadd.f32 %v2130_v29, %v2035_v15  ;;  %v2502_v24 = vsel %vm2490_vm3, %v2500_v4, %v2501_v20  ;;  %v2827_v23 = vmul.f32 %v2791_v50, %v4528_v5  ;;  %v2619_v54 = vrot.slane %v2581_v0, 4  ;;  %v5457_v4 = vld [vmem:[#allocation44_spill] sm:$0xff] }
  0xf6   : > { %v2620_v61 = vrot.slane %v2589_v21, 4  ;;  %v2738_v58 = vrot.slane %v2700_v1, 4  ;;  %v2739_v44 = vrot.slane %v2708_v13, 4  ;;  %v2857_v39 = vrot.slane %v2819_v40, 4  ;;  %v5459_v13 = vld [vmem:[#allocation83_spill] sm:$0xff]  ;;  %v5460_v40 = vld [vmem:[#allocation86_spill] sm:$0xff] }
  0xf7   : > { %v2273_v52 = vadd.f32 %v2249_v55, %v2154_v27  ;;  %v2858_v10 = vrot.slane %v2827_v23, 4  ;;  %v2910_v29 = vrot.slane %v4285_v31, %v5448_v34  ;;  %v3024_v16 = vrot.slane %v4295_v11, %v5448_v34 }
  0xf8   : > { %v2621_v30 = vsel %vm2490_vm3, %v2619_v54, %v2620_v61  ;;  %v2740_v41 = vsel %vm2490_vm3, %v2738_v58, %v2739_v44  ;;  %v5456_v15 = vrot.slane %v5455_v12, 1  ;;  %v5458_v20 = vrot.slane %v5457_v4, 1  ;;  %v5462_v54 = vld [vmem:[#allocation54_spill] sm:$0xff]  ;;  %v5466_v12 = vld [vmem:[#allocation60_spill] sm:$0xff] }
  0xf9   : > { %v2392_v0 = vadd.f32 %v2368_v7, %v2273_v52  ;;  %v2859_v55 = vsel %vm2490_vm3, %v2857_v39, %v2858_v10  ;;  %v2938_v21 = vmul.f32 %v2910_v29, %v4636_v26  ;;  %v2946_v1 = vmul.f32 %v2910_v29, %v4641_v42  ;;  %v5464_v58 = vld [vmem:[#allocation42_spill] sm:$0xff]  ;;  %v5468_v52 = vld [vmem:[#allocation43_spill] sm:$0xff]  ;;  %v5470_v10 = vld [vmem:[#allocation72_spill] sm:$0xff] }
  0xfa   : > { %v675_v50 = vsel %vm660_vm0, %v5458_v20, %v5456_v15  ;;  %v5461_v23 = vrot.slane %v5460_v40, 1  ;;  %v5463_v61 = vrot.slane %v5462_v54, 1  ;;  %v5465_v44 = vrot.slane %v5464_v58, 1  ;;  %v5472_v40 = vld [vmem:[#allocation62_spill] sm:$0xff]  ;;  %v5476_v58 = vld [vmem:[#allocation35_spill] sm:$0xff] }
  0xfb   : > { %v697_v27 = vadd.f32 %v675_v50, %v5459_v13  ;;  %v5467_v4 = vrot.slane %v5466_v12, 1  ;;  %v5469_v39 = vrot.slane %v5468_v52, 1  ;;  %v5471_v15 = vrot.slane %v5470_v10, 1  ;;  %v5474_v54 = vld [vmem:[#allocation82_spill] sm:$0xff]  ;;  %v5477_v12 = vld [vmem:[#allocation5_spill] sm:$0xff] }
  0xfc   : > { %v794_v34 = vsel %vm660_vm0, %v5463_v61, %v5461_v23  ;;  %v2526_v20 = vadd.f32 %v2502_v24, %v2392_v0  ;;  %v2976_v50 = vrot.slane %v2938_v21, 4  ;;  %v2977_v13 = vrot.slane %v2946_v1, 4 }
  0xfd   : > { %v913_v7 = vsel %vm660_vm0, %v5467_v4, %v5465_v44  ;;  %v1032_v29 = vsel %vm660_vm0, %v5471_v15, %v5469_v39  ;;  %v5473_v11 = vrot.slane %v5472_v40, 1  ;;  %v5475_v42 = vrot.slane %v5474_v54, 1 }
  0xfe   : > { %v816_v61 = vadd.f32 %v794_v34, %v697_v27  ;;  %v1217_v26 = vrot.slane %v5477_v12, %v5476_v58  ;;  %v1337_v44 = vrot.slane %v5421_v3, %v5476_v58  ;;  %v1456_v4 = vrot.slane %v4094_v45, %v5476_v58  ;;  %v3192_v27 = vld [vmem:[#allocation2 + $0x80] sm:$0x3] }
  0xff   : > { %v1151_v23 = vsel %vm660_vm0, %v5475_v42, %v5473_v11  ;;  %v2645_v52 = vadd.f32 %v2621_v30, %v2526_v20  ;;  %v2978_v24 = vsel %vm2490_vm3, %v2976_v50, %v2977_v13  ;;  %v1575_v0 = vrot.slane %v4096_v46, %v5476_v58  ;;  %v3191_v42 = vld [vmem:[#allocation2 + $0x20] sm:$0xfc] }
 0x100   : > { %v1694_v21 = vrot.slane %v5451_v37, %v5476_v58  ;;  %v935_v11 = vadd.f32 %v913_v7, %v816_v61  ;;  %v1242_v1 = vmul.f32 %v3191_v42, %v1217_v26  ;;  %v1250_v34 = vmul.f32 %v3192_v27, %v1217_v26  ;;  %v4693_v50 = vld [vmem:[#allocation2 + $0x40] sm:$0xfc]  ;;  %v4695_v7 = vld [vmem:[#allocation2 + $0xa0] sm:$0x3] }
 0x101   : > { %v1362_v39 = vmul.f32 %v1337_v44, %v5450_v17  ;;  %v2764_v10 = vadd.f32 %v2740_v41, %v2645_v52  ;;  %v1370_v15 = vmul.f32 %v1337_v44, %v4342_v48  ;;  %v1481_v30 = vmul.f32 %v1456_v4, %v4468_v53 }
 0x102   : > { %v1489_v20 = vmul.f32 %v1456_v4, %v4472_v62  ;;  %v1054_v13 = vadd.f32 %v1032_v29, %v935_v11  ;;  %v1283_v40 = vrot.slane %v1242_v1, 2  ;;  %v1284_v54 = vrot.slane %v1250_v34, 2 }
 0x103   : > { %v1402_v37 = vrot.slane %v1362_v39, 2  ;;  %v2883_v61 = vadd.f32 %v2859_v55, %v2764_v10  ;;  %v1403_v42 = vrot.slane %v1370_v15, 2  ;;  %v1521_v26 = vrot.slane %v1481_v30, 2 }
 0x104   : > { %v1522_v27 = vrot.slane %v1489_v20, 2  ;;  %v1173_v17 = vadd.f32 %v1151_v23, %v1054_v13  ;;  %v1285_v41 = vsel %vm1270_vm1, %v1283_v40, %v1284_v54  ;;  %v1600_v44 = vmul.f32 %v1575_v0, %v4580_v60 }
 0x105   : > { %v1608_v52 = vmul.f32 %v1575_v0, %v4582_v56  ;;  %v3002_v4 = vadd.f32 %v2978_v24, %v2883_v61  ;;  %v1404_v29 = vsel %vm1270_vm1, %v1402_v37, %v1403_v42  ;;  %v1719_v1 = vmul.f32 %v1694_v21, %v4693_v50 }
 0x106   : > { %v1523_v11 = vsel %vm1270_vm1, %v1521_v26, %v1522_v27  ;;  %v1307_v34 = vadd.f32 %v1285_v41, %v1173_v17  ;;  %v1640_v55 = vrot.slane %v1600_v44, 2  ;;  %v1727_v10 = vmul.f32 %v1694_v21, %v4695_v7 }
 0x107   : > { %v1641_v39 = vrot.slane %v1608_v52, 2  ;;  %v3052_v23 = vadd.f32 %v3024_v16, %v3002_v4  ;;  %v1759_v15 = vrot.slane %v1719_v1, 2  ;;  %v1827_v30 = vrot.slane %v5452_v25, %v5476_v58 }
 0x108   : > { %v1947_v24 = vrot.slane %v5425_v32, %v5476_v58  ;;  %v1426_v0 = vadd.f32 %v1404_v29, %v1307_v34  ;;  %v1760_v20 = vrot.slane %v1727_v10, 2  ;;  %v2066_v13 = vrot.slane %v4126_v49, %v5476_v58  ;;  %v4719_v29 = vld [vmem:[#allocation2 + $0x40] sm:$0xf8] }
 0x109   : > { %v1642_v37 = vsel %vm1270_vm1, %v1640_v55, %v1641_v39  ;;  %3060 = vst [vmem:[%s4368_s26 + $0x18] sm:$0xff] %v3052_v23  ;;  %v1852_v17 = vmul.f32 %v1827_v30, %v4206_v18  ;;  %v1860_v21 = vmul.f32 %v1827_v30, %v4208_v9  ;;  %v4721_v18 = vld [vmem:[#allocation2 + $0xa0] sm:$0x7]  ;;  %v2304_v39 = vrot.slane %v4212_v47, %v5476_v58 }
 0x10a   : > { %v1972_v16 = vmul.f32 %v1947_v24, %v4378_v63  ;;  %v1980_v40 = vmul.f32 %v1947_v24, %v4380_v51  ;;  %v1545_v54 = vadd.f32 %v1523_v11, %v1426_v0  ;;  %v1761_v61 = vsel %vm1270_vm1, %v1759_v15, %v1760_v20 }
 0x10b   : > { %v2091_v42 = vmul.f32 %v2066_v13, %v4496_v22  ;;  %v2099_v26 = vmul.f32 %v2066_v13, %v4498_v33  ;;  %v1893_v27 = vrot.slane %v1852_v17, 3  ;;  %v1894_v41 = vrot.slane %v1860_v21, 3 }
 0x10c   : > { %v2012_v44 = vrot.slane %v1972_v16, 3  ;;  %v2013_v52 = vrot.slane %v1980_v40, 3  ;;  %v1664_v4 = vadd.f32 %v1642_v37, %v1545_v54  ;;  %v2185_v11 = vrot.slane %v4132_v36, %v5476_v58 }
 0x10d   : > { %v2131_v9 = vrot.slane %v2091_v42, 3  ;;  %v2132_v1 = vrot.slane %v2099_v26, 3  ;;  %v1895_v34 = vsel %vm1880_vm2, %v1893_v27, %v1894_v41  ;;  %v2437_v10 = vrot.slane %v4243_v43, %v5476_v58 }
 0x10e   : > { %v2014_v55 = vsel %vm1880_vm2, %v2012_v44, %v2013_v52  ;;  %v1783_v23 = vadd.f32 %v1761_v61, %v1664_v4  ;;  %v2210_v30 = vmul.f32 %v2185_v11, %v4600_v8  ;;  %v2218_v24 = vmul.f32 %v2185_v11, %v4602_v57  ;;  %v4745_v4 = vld [vmem:[#allocation2 + $0x40] sm:$0xf0] }
 0x10f   : > { %v2133_v15 = vsel %vm1880_vm2, %v2131_v9, %v2132_v1  ;;  %v2329_v0 = vmul.f32 %v2304_v39, %v4719_v29  ;;  %v2337_v37 = vmul.f32 %v2304_v39, %v4721_v18  ;;  %v2462_v20 = vmul.f32 %v2437_v10, %v4297_v59  ;;  %v4747_v9 = vld [vmem:[#allocation2 + $0xa0] sm:$0xf] }
 0x110   : > { %v2470_v13 = vmul.f32 %v2437_v10, %v4301_v2  ;;  %v1917_v17 = vadd.f32 %v1895_v34, %v1783_v23  ;;  %v2250_v21 = vrot.slane %v2210_v30, 3  ;;  %v2251_v16 = vrot.slane %v2218_v24, 3  ;;  %v5478_v24 = vld [vmem:[#allocation18_spill] sm:$0xff] }
 0x111   : > { %v2557_v40 = vrot.slane %v4254_v19, %v5476_v58  ;;  %v2369_v54 = vrot.slane %v2329_v0, 3  ;;  %v2370_v61 = vrot.slane %v2337_v37, 3  ;;  %v2503_v42 = vrot.slane %v2462_v20, 4  ;;  %v5479_v37 = vld [vmem:[#allocation28_spill] sm:$0xff] }
 0x112   : > { %v2504_v26 = vrot.slane %v2470_v13, 4  ;;  %v2036_v27 = vadd.f32 %v2014_v55, %v1917_v17  ;;  %v2252_v41 = vsel %vm1880_vm2, %v2250_v21, %v2251_v16  ;;  %v2676_v1 = vrot.slane %v4266_v14, %v5476_v58 }
 0x113   : > { %v2582_v44 = vmul.f32 %v2557_v40, %v4411_v6  ;;  %v2590_v52 = vmul.f32 %v2557_v40, %v4413_v28  ;;  %v2371_v59 = vsel %vm1880_vm2, %v2369_v54, %v2370_v61  ;;  %v2795_v11 = vrot.slane %v4268_v35, %v5476_v58 }
 0x114   : > { %v2505_v2 = vsel %vm2490_vm3, %v2503_v42, %v2504_v26  ;;  %v2155_v34 = vadd.f32 %v2133_v15, %v2036_v27  ;;  %v2914_v10 = vrot.slane %v4285_v31, %v5476_v58  ;;  %v2701_v23 = vmul.f32 %v2676_v1, %v4523_v38 }
 0x115   : > { %v2622_v55 = vrot.slane %v2582_v44, 4  ;;  %v2623_v39 = vrot.slane %v2590_v52, 4  ;;  %v2709_v30 = vmul.f32 %v2676_v1, %v4528_v5  ;;  %v2820_v0 = vmul.f32 %v2795_v11, %v5478_v24  ;;  %v5480_v44 = vld [vmem:[#allocation16_spill] sm:$0xff] }
 0x116   : > { %v2828_v20 = vmul.f32 %v2795_v11, %v5479_v37  ;;  %v2274_v13 = vadd.f32 %v2252_v41, %v2155_v34  ;;  %v2939_v21 = vmul.f32 %v2914_v10, %v4745_v4  ;;  %v2947_v15 = vmul.f32 %v2914_v10, %v4747_v9  ;;  %v5481_v11 = vld [vmem:[#allocation87_spill] sm:$0xff] }
 0x117   : > { %v2624_v17 = vsel %vm2490_vm3, %v2622_v55, %v2623_v39  ;;  %v2741_v16 = vrot.slane %v2701_v23, 4  ;;  %v2742_v40 = vrot.slane %v2709_v30, 4  ;;  %v2860_v54 = vrot.slane %v2820_v0, 4  ;;  %v5483_v55 = vld [vmem:[#allocation59_spill] sm:$0xff]  ;;  %v5485_v23 = vld [vmem:[#allocation52_spill] sm:$0xff] }
 0x118   : > { %v2861_v61 = vrot.slane %v2828_v20, 4  ;;  %v2393_v42 = vadd.f32 %v2371_v59, %v2274_v13  ;;  %v2979_v26 = vrot.slane %v2939_v21, 4  ;;  %v2980_v27 = vrot.slane %v2947_v15, 4  ;;  %v5487_v0 = vld [vmem:[#allocation71_spill] sm:$0xff] }
 0x119   : > { %v3028_v52 = vrot.slane %v5480_v44, %v5476_v58  ;;  %v2743_v1 = vsel %vm2490_vm3, %v2741_v16, %v2742_v40  ;;  %v5482_v34 = vrot.slane %v5481_v11, 1  ;;  %v5484_v39 = vrot.slane %v5483_v55, 1  ;;  %v5489_v58 = vld [vmem:[#allocation50_spill] sm:$0xff]  ;;  %v5490_v16 = vld [vmem:[#allocation61_spill] sm:$0xff] }
 0x11a   : > { %v2862_v41 = vsel %vm2490_vm3, %v2860_v54, %v2861_v61  ;;  %v5486_v30 = vrot.slane %v5485_v23, 1  ;;  %v5488_v20 = vrot.slane %v5487_v0, 1  ;;  %v2527_v13 = vadd.f32 %v2505_v2, %v2393_v42  ;;  %v5492_v54 = vld [vmem:[#allocation81_spill] sm:$0xff]  ;;  %v5494_v11 = vld [vmem:[#allocation10_spill] sm:$0xff]  ;;  %v5498_v0 = vld [vmem:[#allocation40_spill] sm:$0xff] }
 0x11b   : > { %v797_v10 = vsel %vm660_vm0, %v5484_v39, %v5482_v34  ;;  %v2981_v21 = vsel %vm2490_vm3, %v2979_v26, %v2980_v27  ;;  %v5491_v40 = vrot.slane %v5490_v16, 1  ;;  %v5493_v61 = vrot.slane %v5492_v54, 1  ;;  %v5496_v34 = vld [vmem:[#allocation12_spill] sm:$0xff]  ;;  %v5500_v16 = vld [vmem:[#allocation11_spill] sm:$0xff] }
 0x11c   : > { %v916_v59 = vsel %vm660_vm0, %v5488_v20, %v5486_v30  ;;  %v817_v15 = vadd.f32 %v797_v10, %v5489_v58  ;;  %v5495_v55 = vrot.slane %v5494_v11, 1  ;;  %v5497_v39 = vrot.slane %v5496_v34, 1  ;;  %v5499_v20 = vld [vmem:[#allocation37_spill] sm:$0xff] }
 0x11d   : > { %v1035_v44 = vsel %vm660_vm0, %v5493_v61, %v5491_v40  ;;  %v1221_v30 = vrot.slane %v5477_v12, %v5498_v0  ;;  %v1341_v2 = vrot.slane %v5421_v3, %v5498_v0  ;;  %v1460_v42 = vrot.slane %v4094_v45, %v5498_v0  ;;  %v4806_v45 = vld [vmem:[#allocation2 + $0xa8] sm:$0x3] }
 0x11e   : > { %v1154_v23 = vsel %vm660_vm0, %v5497_v39, %v5495_v55  ;;  %v2646_v26 = vadd.f32 %v2624_v17, %v2527_v13  ;;  %v936_v27 = vadd.f32 %v916_v59, %v817_v15  ;;  %v1579_v10 = vrot.slane %v4096_v46, %v5498_v0  ;;  %v4804_v59 = vld [vmem:[#allocation2 + $0x48] sm:$0xfc] }
 0x11f   : > { %v1698_v58 = vrot.slane %v5499_v20, %v5498_v0  ;;  %v1243_v40 = vmul.f32 %v1221_v30, %v5500_v16  ;;  %v1251_v54 = vmul.f32 %v1221_v30, %v4342_v48  ;;  %v1363_v61 = vmul.f32 %v1341_v2, %v4468_v53 }
 0x120   : > { %v1371_v11 = vmul.f32 %v1341_v2, %v4472_v62  ;;  %v2765_v55 = vadd.f32 %v2743_v1, %v2646_v26  ;;  %v1055_v34 = vadd.f32 %v1035_v44, %v936_v27  ;;  %v1482_v39 = vmul.f32 %v1460_v42, %v4580_v60 }
 0x121   : > { %v1490_v17 = vmul.f32 %v1460_v42, %v4582_v56  ;;  %v1286_v13 = vrot.slane %v1243_v40, 2  ;;  %v1287_v15 = vrot.slane %v1251_v54, 2  ;;  %v1405_v46 = vrot.slane %v1363_v61, 2 }
 0x122   : > { %v1406_v20 = vrot.slane %v1371_v11, 2  ;;  %v2884_v16 = vadd.f32 %v2862_v41, %v2765_v55  ;;  %v1174_v48 = vadd.f32 %v1154_v23, %v1055_v34  ;;  %v1524_v30 = vrot.slane %v1482_v39, 2 }
 0x123   : > { %v1525_v53 = vrot.slane %v1490_v17, 2  ;;  %v1288_v2 = vsel %vm1270_vm1, %v1286_v13, %v1287_v15  ;;  %v1601_v44 = vmul.f32 %v1579_v10, %v4693_v50  ;;  %v1609_v42 = vmul.f32 %v1579_v10, %v4695_v7 }
 0x124   : > { %v1407_v1 = vsel %vm1270_vm1, %v1405_v46, %v1406_v20  ;;  %v3003_v26 = vadd.f32 %v2981_v21, %v2884_v16  ;;  %v1308_v27 = vadd.f32 %v1288_v2, %v1174_v48  ;;  %v1720_v54 = vmul.f32 %v1698_v58, %v4804_v59 }
 0x125   : > { %v1526_v40 = vsel %vm1270_vm1, %v1524_v30, %v1525_v53  ;;  %v1643_v61 = vrot.slane %v1601_v44, 2  ;;  %v1644_v41 = vrot.slane %v1609_v42, 2  ;;  %v1728_v23 = vmul.f32 %v1698_v58, %v4806_v45  ;;  %v4832_v42 = vld [vmem:[#allocation2 + $0x48] sm:$0xf8] }
 0x126   : > { %v1831_v11 = vrot.slane %v5452_v25, %v5498_v0  ;;  %v3053_v55 = vadd.f32 %v3028_v52, %v3003_v26  ;;  %v1427_v46 = vadd.f32 %v1407_v1, %v1308_v27  ;;  %v1762_v20 = vrot.slane %v1720_v54, 2  ;;  %v4834_v26 = vld [vmem:[#allocation2 + $0xa8] sm:$0x7] }
 0x127   : > { %v1951_v10 = vrot.slane %v5425_v32, %v5498_v0  ;;  %v1645_v21 = vsel %vm1270_vm1, %v1643_v61, %v1644_v41  ;;  %v1763_v34 = vrot.slane %v1728_v23, 2  ;;  %v2070_v52 = vrot.slane %v4126_v49, %v5498_v0 }
 0x128   : > { %v1853_v53 = vmul.f32 %v1831_v11, %v4378_v63  ;;  %v1861_v39 = vmul.f32 %v1831_v11, %v4380_v51  ;;  %3061 = vst [vmem:[%s4368_s26 + $0x20] sm:$0xff] %v3053_v55  ;;  %v1546_v17 = vadd.f32 %v1526_v40, %v1427_v46  ;;  %v2189_v30 = vrot.slane %v4132_v36, %v5498_v0 }
 0x129   : > { %v1973_v58 = vmul.f32 %v1951_v10, %v4496_v22  ;;  %v1981_v13 = vmul.f32 %v1951_v10, %v4498_v33  ;;  %v1764_v15 = vsel %vm1270_vm1, %v1762_v20, %v1763_v34  ;;  %v2092_v51 = vmul.f32 %v2070_v52, %v4600_v8 }
 0x12a   : > { %v1896_v16 = vrot.slane %v1853_v53, 3  ;;  %v1897_v48 = vrot.slane %v1861_v39, 3  ;;  %v1665_v2 = vadd.f32 %v1645_v21, %v1546_v17  ;;  %v2100_v27 = vmul.f32 %v2070_v52, %v4602_v57 }
 0x12b   : > { %v2015_v63 = vrot.slane %v1973_v58, 3  ;;  %v2016_v1 = vrot.slane %v1981_v13, 3  ;;  %v2211_v40 = vmul.f32 %v2189_v30, %v4719_v29  ;;  %v2219_v54 = vmul.f32 %v2189_v30, %v4721_v18 }
 0x12c   : > { %v1898_v44 = vsel %vm1880_vm2, %v1896_v16, %v1897_v48  ;;  %v1784_v61 = vadd.f32 %v1764_v15, %v1665_v2  ;;  %v2134_v23 = vrot.slane %v2092_v51, 3  ;;  %v2308_v11 = vrot.slane %v4212_v47, %v5498_v0 }
 0x12d   : > { %v2017_v41 = vsel %vm1880_vm2, %v2015_v63, %v2016_v1  ;;  %v2135_v55 = vrot.slane %v2100_v27, 3  ;;  %v2253_v46 = vrot.slane %v2211_v40, 3  ;;  %v2254_v20 = vrot.slane %v2219_v54, 3 }
 0x12e   : > { %v2441_v10 = vrot.slane %v4243_v43, %v5498_v0  ;;  %v1918_v21 = vadd.f32 %v1898_v44, %v1784_v61  ;;  %v2330_v34 = vmul.f32 %v2308_v11, %v4832_v42  ;;  %v2338_v53 = vmul.f32 %v2308_v11, %v4834_v26  ;;  %v4860_v61 = vld [vmem:[#allocation2 + $0x48] sm:$0xf0] }
 0x12f   : > { %v2561_v39 = vrot.slane %v4254_v19, %v5498_v0  ;;  %v2136_v17 = vsel %vm1880_vm2, %v2134_v23, %v2135_v55  ;;  %v2255_v58 = vsel %vm1880_vm2, %v2253_v46, %v2254_v20  ;;  %v2680_v51 = vrot.slane %v4266_v14, %v5498_v0  ;;  %v4864_v55 = vld [vmem:[#allocation2 + $0xa8] sm:$0xf] }
 0x130   : > { %v2463_v13 = vmul.f32 %v2441_v10, %v4411_v6  ;;  %v2471_v52 = vmul.f32 %v2441_v10, %v4413_v28  ;;  %v2037_v15 = vadd.f32 %v2017_v41, %v1918_v21  ;;  %v2372_v16 = vrot.slane %v2330_v34, 3 }
 0x131   : > { %v2373_v48 = vrot.slane %v2338_v53, 3  ;;  %v2583_v30 = vmul.f32 %v2561_v39, %v4523_v38  ;;  %v2591_v1 = vmul.f32 %v2561_v39, %v4528_v5  ;;  %v2799_v6 = vrot.slane %v4268_v35, %v5498_v0  ;;  %v4874_v39 = vld [vmem:[%s5083_s2] sm:$0xff] }
 0x132   : > { %v2506_v2 = vrot.slane %v2463_v13, 4  ;;  %v2507_v63 = vrot.slane %v2471_v52, 4  ;;  %v2156_v44 = vadd.f32 %v2136_v17, %v2037_v15  ;;  %v2702_v41 = vmul.f32 %v2680_v51, %v5478_v24 }
 0x133   : > { %v2374_v27 = vsel %vm1880_vm2, %v2372_v16, %v2373_v48  ;;  %v2625_v40 = vrot.slane %v2583_v30, 4  ;;  %v2626_v54 = vrot.slane %v2591_v1, 4  ;;  %v2710_v23 = vmul.f32 %v2680_v51, %v5479_v37  ;;  %v5501_v30 = vld [vmem:[#allocation21_spill] sm:$0xff] }
 0x134   : > { %v2508_v28 = vsel %vm2490_vm3, %v2506_v2, %v2507_v63  ;;  %v2275_v11 = vadd.f32 %v2255_v58, %v2156_v44  ;;  %v2821_v46 = vmul.f32 %v2799_v6, %v4745_v4  ;;  %v2829_v20 = vmul.f32 %v2799_v6, %v4747_v9  ;;  %v5503_v63 = vld [vmem:[#allocation80_spill] sm:$0xff]  ;;  %v5507_v6 = vld [vmem:[#allocation49_spill] sm:$0xff] }
 0x135   : > { %v2918_v10 = vrot.slane %v4285_v31, %v5498_v0  ;;  %v2627_v21 = vsel %vm2490_vm3, %v2625_v40, %v2626_v54  ;;  %v2744_v34 = vrot.slane %v2702_v41, 4  ;;  %v2745_v53 = vrot.slane %v2710_v23, 4  ;;  %v5505_v44 = vld [vmem:[#allocation36_spill] sm:$0xff] }
 0x136   : > { %v3032_v17 = vrot.slane %v4874_v39, %v5498_v0  ;;  %v2394_v58 = vadd.f32 %v2374_v27, %v2275_v11  ;;  %v2863_v13 = vrot.slane %v2821_v46, 4  ;;  %v2864_v52 = vrot.slane %v2829_v20, 4  ;;  %v5509_v11 = vld [vmem:[#allocation8_spill] sm:$0xff] }
 0x137   : > { %v2940_v15 = vmul.f32 %v2918_v10, %v4860_v61  ;;  %v2746_v16 = vsel %vm2490_vm3, %v2744_v34, %v2745_v53  ;;  %v2948_v48 = vmul.f32 %v2918_v10, %v4864_v55  ;;  %v5502_v2 = vrot.slane %v5501_v30, 1  ;;  %v5510_v10 = vld [vmem:[#allocation68_spill] sm:$0xff]  ;;  %v5512_v53 = vld [vmem:[#allocation67_spill] sm:$0xff] }
 0x138   : > { %v5504_v1 = vrot.slane %v5503_v63, 1  ;;  %v5506_v40 = vrot.slane %v5505_v44, 1  ;;  %v5508_v54 = vrot.slane %v5507_v6, 1  ;;  %v2528_v27 = vadd.f32 %v2508_v28, %v2394_v58  ;;  %v5515_v58 = vld [vmem:[#allocation22_spill] sm:$0xff] }
 0x139   : > { %v2865_v41 = vsel %vm2490_vm3, %v2863_v13, %v2864_v52  ;;  %v2982_v23 = vrot.slane %v2940_v15, 4  ;;  %v2983_v20 = vrot.slane %v2948_v48, 4  ;;  %v5511_v34 = vrot.slane %v5510_v10, 1  ;;  %v5516_v52 = vld [vmem:[#allocation17_spill] sm:$0xff] }
 0x13a   : > { %v919_v51 = vsel %vm660_vm0, %v5504_v1, %v5502_v2  ;;  %v1038_v0 = vsel %vm660_vm0, %v5508_v54, %v5506_v40  ;;  %v5513_v30 = vrot.slane %v5512_v53, 1  ;;  %v5514_v2 = vld [vmem:[#allocation51_spill] sm:$0xff]  ;;  %v2647_v40 = vadd.f32 %v2627_v21, %v2528_v27 }
 0x13b   : > { %v937_v46 = vadd.f32 %v919_v51, %v5509_v11  ;;  %v1225_v1 = vrot.slane %v5477_v12, %v5514_v2  ;;  %v1345_v44 = vrot.slane %v5421_v3, %v5514_v2  ;;  %v1464_v13 = vrot.slane %v5515_v58, %v5514_v2  ;;  %v5517_v51 = vld [vmem:[#allocation3_spill] sm:$0xff] }
 0x13c   : > { %v1157_v63 = vsel %vm660_vm0, %v5513_v30, %v5511_v34  ;;  %v1583_v15 = vrot.slane %v5516_v52, %v5514_v2  ;;  %v2984_v48 = vsel %vm2490_vm3, %v2982_v23, %v2983_v20  ;;  %v2766_v10 = vadd.f32 %v2746_v16, %v2647_v40  ;;  %v4913_v20 = vld [vmem:[#allocation2 + $0x50] sm:$0xfc] }
 0x13d   : > { %v1056_v28 = vadd.f32 %v1038_v0, %v937_v46  ;;  %v1244_v6 = vmul.f32 %v1225_v1, %v5517_v51  ;;  %v1252_v54 = vmul.f32 %v1225_v1, %v4472_v62  ;;  %v1364_v11 = vmul.f32 %v1345_v44, %v4580_v60  ;;  %v4915_v51 = vld [vmem:[#allocation2 + $0xb0] sm:$0x3] }
 0x13e   : > { %v1372_v53 = vmul.f32 %v1345_v44, %v4582_v56  ;;  %v1483_v21 = vmul.f32 %v1464_v13, %v4693_v50  ;;  %v1491_v30 = vmul.f32 %v1464_v13, %v4695_v7  ;;  %v2885_v52 = vadd.f32 %v2865_v41, %v2766_v10  ;;  %v5518_v44 = vld [vmem:[#allocation37_spill] sm:$0xff] }
 0x13f   : > { %v1175_v34 = vadd.f32 %v1157_v63, %v1056_v28  ;;  %v1289_v0 = vrot.slane %v1244_v6, 2  ;;  %v1290_v27 = vrot.slane %v1252_v54, 2  ;;  %v1408_v46 = vrot.slane %v1364_v11, 2 }
 0x140   : > { %v1409_v58 = vrot.slane %v1372_v53, 2  ;;  %v1527_v23 = vrot.slane %v1483_v21, 2  ;;  %v1602_v62 = vmul.f32 %v1583_v15, %v4804_v59  ;;  %v1528_v63 = vrot.slane %v1491_v30, 2 }
 0x141   : > { %v1291_v16 = vsel %vm1270_vm1, %v1289_v0, %v1290_v27  ;;  %v1610_v1 = vmul.f32 %v1583_v15, %v4806_v45  ;;  %v1702_v40 = vrot.slane %v5518_v44, %v5514_v2  ;;  %v3004_v28 = vadd.f32 %v2984_v48, %v2885_v52 }
 0x142   : > { %v1309_v13 = vadd.f32 %v1291_v16, %v1175_v34  ;;  %v1410_v41 = vsel %vm1270_vm1, %v1408_v46, %v1409_v58  ;;  %v1646_v6 = vrot.slane %v1602_v62, 2  ;;  %v1529_v54 = vsel %vm1270_vm1, %v1527_v23, %v1528_v63 }
 0x143   : > { %v1647_v11 = vrot.slane %v1610_v1, 2  ;;  %v1721_v10 = vmul.f32 %v1702_v40, %v4913_v20  ;;  %v1729_v53 = vmul.f32 %v1702_v40, %v4915_v51  ;;  %v3054_v21 = vadd.f32 %v3032_v17, %v3004_v28 }
 0x144   : > { %v1428_v0 = vadd.f32 %v1410_v41, %v1309_v13  ;;  %v1835_v15 = vrot.slane %v5452_v25, %v5514_v2  ;;  %v1955_v52 = vrot.slane %v5425_v32, %v5514_v2  ;;  %v2074_v27 = vrot.slane %v4126_v49, %v5514_v2 }
 0x145   : > { %v1648_v48 = vsel %vm1270_vm1, %v1646_v6, %v1647_v11  ;;  %v1765_v34 = vrot.slane %v1721_v10, 2  ;;  %v1766_v58 = vrot.slane %v1729_v53, 2  ;;  %3062 = vst [vmem:[%s4368_s26 + $0x28] sm:$0xff] %v3054_v21  ;;  %v4941_v6 = vld [vmem:[#allocation2 + $0x50] sm:$0xf8]  ;;  %v2193_v10 = vrot.slane %v4132_v36, %v5514_v2 }
 0x146   : > { %v1547_v46 = vadd.f32 %v1529_v54, %v1428_v0  ;;  %v1854_v30 = vmul.f32 %v1835_v15, %v4496_v22  ;;  %v1862_v17 = vmul.f32 %v1835_v15, %v4498_v33  ;;  %v1974_v23 = vmul.f32 %v1955_v52, %v4600_v8  ;;  %v4943_v33 = vld [vmem:[#allocation2 + $0xb0] sm:$0x7] }
 0x147   : > { %v1767_v62 = vsel %vm1270_vm1, %v1765_v34, %v1766_v58  ;;  %v1982_v16 = vmul.f32 %v1955_v52, %v4602_v57  ;;  %v2093_v63 = vmul.f32 %v2074_v27, %v4719_v29  ;;  %v2101_v1 = vmul.f32 %v2074_v27, %v4721_v18 }
 0x148   : > { %v1666_v40 = vadd.f32 %v1648_v48, %v1547_v46  ;;  %v1899_v28 = vrot.slane %v1854_v30, 3  ;;  %v1900_v13 = vrot.slane %v1862_v17, 3  ;;  %v2018_v41 = vrot.slane %v1974_v23, 3 }
 0x149   : > { %v2019_v54 = vrot.slane %v1982_v16, 3  ;;  %v2137_v22 = vrot.slane %v2093_v63, 3  ;;  %v2138_v11 = vrot.slane %v2101_v1, 3  ;;  %v2312_v0 = vrot.slane %v4212_v47, %v5514_v2 }
 0x14a   : > { %v1785_v53 = vadd.f32 %v1767_v62, %v1666_v40  ;;  %v1901_v21 = vsel %vm1880_vm2, %v1899_v28, %v1900_v13  ;;  %v2445_v15 = vrot.slane %v4243_v43, %v5514_v2  ;;  %v2212_v34 = vmul.f32 %v2193_v10, %v4832_v42 }
 0x14b   : > { %v2020_v52 = vsel %vm1880_vm2, %v2018_v41, %v2019_v54  ;;  %v2139_v48 = vsel %vm1880_vm2, %v2137_v22, %v2138_v11  ;;  %v2220_v58 = vmul.f32 %v2193_v10, %v4834_v26  ;;  %v2331_v46 = vmul.f32 %v2312_v0, %v4941_v6 }
 0x14c   : > { %v1919_v27 = vadd.f32 %v1901_v21, %v1785_v53  ;;  %v2339_v30 = vmul.f32 %v2312_v0, %v4943_v33  ;;  %v2464_v17 = vmul.f32 %v2445_v15, %v4523_v38  ;;  %v2256_v23 = vrot.slane %v2212_v34, 3  ;;  %v4968_v53 = vld [vmem:[#allocation2 + $0x50] sm:$0xf0]  ;;  %v4970_v21 = vld [vmem:[#allocation2 + $0xb0] sm:$0xf] }
 0x14d   : > { %v2257_v62 = vrot.slane %v2220_v58, 3  ;;  %v2472_v16 = vmul.f32 %v2445_v15, %v4528_v5  ;;  %v2565_v63 = vrot.slane %v4254_v19, %v5514_v2  ;;  %v2375_v40 = vrot.slane %v2331_v46, 3  ;;  %5519 = vst [vmem:[#allocation69_spill] sm:$0xff] %v4968_v53 }
 0x14e   : > { %v2038_v1 = vadd.f32 %v2020_v52, %v1919_v27  ;;  %v2376_v28 = vrot.slane %v2339_v30, 3  ;;  %v2509_v13 = vrot.slane %v2464_v17, 4  ;;  %v2684_v5 = vrot.slane %v4266_v14, %v5514_v2 }
 0x14f   : > { %v2258_v41 = vsel %vm1880_vm2, %v2256_v23, %v2257_v62  ;;  %v2510_v54 = vrot.slane %v2472_v16, 4  ;;  %v2584_v22 = vmul.f32 %v2565_v63, %v5478_v24  ;;  %v2592_v11 = vmul.f32 %v2565_v63, %v5479_v37 }
 0x150   : > { %v2157_v10 = vadd.f32 %v2139_v48, %v2038_v1  ;;  %v2377_v38 = vsel %vm1880_vm2, %v2375_v40, %v2376_v28  ;;  %v2803_v0 = vrot.slane %v4268_v35, %v5514_v2  ;;  %v2922_v58 = vrot.slane %v4285_v31, %v5514_v2 }
 0x151   : > { %v2511_v15 = vsel %vm2490_vm3, %v2509_v13, %v2510_v54  ;;  %v2628_v52 = vrot.slane %v2584_v22, 4  ;;  %v2629_v34 = vrot.slane %v2592_v11, 4  ;;  %v2703_v27 = vmul.f32 %v2684_v5, %v4745_v4 }
 0x152   : > { %v2276_v48 = vadd.f32 %v2258_v41, %v2157_v10  ;;  %v2711_v46 = vmul.f32 %v2684_v5, %v4747_v9  ;;  %v2822_v30 = vmul.f32 %v2803_v0, %v4860_v61  ;;  %v2830_v23 = vmul.f32 %v2803_v0, %v4864_v55  ;;  %v5520_v5 = vld [vmem:[#allocation26_spill] sm:$0xff] }
 0x153   : > { %v2630_v17 = vsel %vm2490_vm3, %v2628_v52, %v2629_v34  ;;  %v2941_v62 = vmul.f32 %v2922_v58, %v4968_v53  ;;  %v2949_v16 = vmul.f32 %v2922_v58, %v4970_v21  ;;  %v2747_v1 = vrot.slane %v2703_v27, 4  ;;  %v5522_v0 = vld [vmem:[#allocation30_spill] sm:$0xff]  ;;  %v5524_v58 = vld [vmem:[#allocation76_spill] sm:$0xff] }
 0x154   : > { %v2395_v63 = vadd.f32 %v2377_v38, %v2276_v48  ;;  %v2748_v40 = vrot.slane %v2711_v46, 4  ;;  %v2866_v28 = vrot.slane %v2822_v30, 4  ;;  %v2867_v13 = vrot.slane %v2830_v23, 4  ;;  %v5526_v48 = vld [vmem:[#allocation75_spill] sm:$0xff] }
 0x155   : > { %v2985_v41 = vrot.slane %v2941_v62, 4  ;;  %v2986_v54 = vrot.slane %v2949_v16, 4  ;;  %v3036_v22 = vrot.slane %v4874_v39, %v5514_v2  ;;  %v5521_v52 = vrot.slane %v5520_v5, 1  ;;  %v5528_v2 = vld [vmem:[#allocation15_spill] sm:$0xff]  ;;  %v5529_v62 = vld [vmem:[#allocation78_spill] sm:$0xff] }
 0x156   : > { %v2529_v11 = vadd.f32 %v2511_v15, %v2395_v63  ;;  %v2749_v10 = vsel %vm2490_vm3, %v2747_v1, %v2748_v40  ;;  %v5523_v34 = vrot.slane %v5522_v0, 1  ;;  %v5525_v38 = vrot.slane %v5524_v58, 1  ;;  %v5531_v63 = vld [vmem:[#allocation77_spill] sm:$0xff]  ;;  %v5534_v58 = vld [vmem:[#allocation22_spill] sm:$0xff] }
 0x157   : > { %v5527_v27 = vrot.slane %v5526_v48, 1  ;;  %v2868_v30 = vsel %vm2490_vm3, %v2866_v28, %v2867_v13  ;;  %v2987_v23 = vsel %vm2490_vm3, %v2985_v41, %v2986_v54  ;;  %v5530_v16 = vrot.slane %v5529_v62, 1  ;;  %v5535_v41 = vld [vmem:[#allocation17_spill] sm:$0xff] }
 0x158   : > { %v922_v53 = vsel %vm660_vm0, %v5523_v34, %v5521_v52  ;;  %v5532_v1 = vrot.slane %v5531_v63, 1  ;;  %v2648_v5 = vadd.f32 %v2630_v17, %v2529_v11  ;;  %v5533_v52 = vld [vmem:[#allocation64_spill] sm:$0xff] }
 0x159   : > { %v1041_v46 = vsel %vm660_vm0, %v5527_v27, %v5525_v38  ;;  %v938_v15 = vadd.f32 %v922_v53, %v5528_v2  ;;  %v1229_v0 = vrot.slane %v5477_v12, %v5533_v52  ;;  %v1349_v34 = vrot.slane %v5421_v3, %v5533_v52 }
 0x15a   : > { %v1160_v40 = vsel %vm660_vm0, %v5532_v1, %v5530_v16  ;;  %v1468_v28 = vrot.slane %v5534_v58, %v5533_v52  ;;  %v1587_v53 = vrot.slane %v5535_v41, %v5533_v52  ;;  %v1706_v54 = vrot.slane %v5518_v44, %v5533_v52 }
 0x15b   : > { %v1057_v13 = vadd.f32 %v1041_v46, %v938_v15  ;;  %v1839_v38 = vrot.slane %v5452_v25, %v5533_v52  ;;  %v2767_v17 = vadd.f32 %v2749_v10, %v2648_v5  ;;  %v1245_v11 = vmul.f32 %v1229_v0, %v4580_v60  ;;  %v1668_v15 = vld [vmem:[#allocation2 + $0x58] sm:$0xfc] }
 0x15c   : > { %v1253_v12 = vmul.f32 %v1229_v0, %v4582_v56  ;;  %v1365_v3 = vmul.f32 %v1349_v34, %v4693_v50  ;;  %v1373_v27 = vmul.f32 %v1349_v34, %v4695_v7  ;;  %v1484_v46 = vmul.f32 %v1468_v28, %v4804_v59  ;;  %v1669_v56 = vld [vmem:[#allocation2 + $0xb8] sm:$0x3] }
 0x15d   : > { %v1176_v48 = vadd.f32 %v1160_v40, %v1057_v13  ;;  %v1492_v2 = vmul.f32 %v1468_v28, %v4806_v45  ;;  %v2886_v62 = vadd.f32 %v2868_v30, %v2767_v17  ;;  %v1292_v44 = vrot.slane %v1245_v11, 2 }
 0x15e   : > { %v1293_v16 = vrot.slane %v1253_v12, 2  ;;  %v1411_v63 = vrot.slane %v1365_v3, 2  ;;  %v1412_v25 = vrot.slane %v1373_v27, 2  ;;  %v1530_v10 = vrot.slane %v1484_v46, 2 }
 0x15f   : > { %v1531_v1 = vrot.slane %v1492_v2, 2  ;;  %v1603_v60 = vmul.f32 %v1587_v53, %v4913_v20  ;;  %v3005_v50 = vadd.f32 %v2987_v23, %v2886_v62  ;;  %v1611_v7 = vmul.f32 %v1587_v53, %v4915_v51  ;;  %v2278_v62 = vld [vmem:[#allocation2 + $0x58] sm:$0xf8] }
 0x160   : > { %v1294_v40 = vsel %vm1270_vm1, %v1292_v44, %v1293_v16  ;;  %v1722_v59 = vmul.f32 %v1706_v54, %v1668_v15  ;;  %v1413_v45 = vsel %vm1270_vm1, %v1411_v63, %v1412_v25  ;;  %v1730_v58 = vmul.f32 %v1706_v54, %v1669_v56  ;;  %v2279_v44 = vld [vmem:[#allocation2 + $0xb8] sm:$0x7] }
 0x161   : > { %v1310_v5 = vadd.f32 %v1294_v40, %v1176_v48  ;;  %v1649_v30 = vrot.slane %v1603_v60, 2  ;;  %v3055_v0 = vadd.f32 %v3036_v22, %v3005_v50  ;;  %v1650_v34 = vrot.slane %v1611_v7, 2 }
 0x162   : > { %v1768_v28 = vrot.slane %v1722_v59, 2  ;;  %v1855_v41 = vmul.f32 %v1839_v38, %v4600_v8  ;;  %v1863_v20 = vmul.f32 %v1839_v38, %v4602_v57  ;;  %v1959_v23 = vrot.slane %v5425_v32, %v5533_v52 }
 0x163   : > { %v1429_v13 = vadd.f32 %v1413_v45, %v1310_v5  ;;  %3063 = vst [vmem:[%s4368_s26 + $0x30] sm:$0xff] %v3055_v0  ;;  %v1532_v51 = vsel %vm1270_vm1, %v1530_v10, %v1531_v1  ;;  %v1769_v53 = vrot.slane %v1730_v58, 2  ;;  %v2078_v17 = vrot.slane %v4126_v49, %v5533_v52 }
 0x164   : > { %v2197_v22 = vrot.slane %v4132_v36, %v5533_v52  ;;  %v1651_v11 = vsel %vm1270_vm1, %v1649_v30, %v1650_v34  ;;  %v1902_v12 = vrot.slane %v1855_v41, 3  ;;  %v1975_v8 = vmul.f32 %v1959_v23, %v4719_v29  ;;  %v2889_v41 = vld [vmem:[#allocation2 + $0xb8] sm:$0xf] }
 0x165   : > { %v1548_v54 = vadd.f32 %v1532_v51, %v1429_v13  ;;  %v1903_v57 = vrot.slane %v1863_v20, 3  ;;  %v1983_v38 = vmul.f32 %v1959_v23, %v4721_v18  ;;  %v2094_v32 = vmul.f32 %v2078_v17, %v4832_v42  ;;  %v2888_v13 = vld [vmem:[#allocation2 + $0x58] sm:$0xf0]  ;;  %v5536_v23 = vld [vmem:[#allocation69_spill] sm:$0xff] }
 0x166   : > { %v2102_v3 = vmul.f32 %v2078_v17, %v4834_v26  ;;  %v1770_v27 = vsel %vm1270_vm1, %v1768_v28, %v1769_v53  ;;  %v2021_v49 = vrot.slane %v1975_v8, 3  ;;  %v2213_v36 = vmul.f32 %v2197_v22, %v4941_v6 }
 0x167   : > { %v1667_v48 = vadd.f32 %v1651_v11, %v1548_v54  ;;  %v2022_v46 = vrot.slane %v1983_v38, 3  ;;  %v2140_v2 = vrot.slane %v2094_v32, 3  ;;  %v2221_v15 = vmul.f32 %v2197_v22, %v4943_v33 }
 0x168   : > { %v2141_v16 = vrot.slane %v2102_v3, 3  ;;  %v2316_v18 = vrot.slane %v4212_v47, %v5533_v52  ;;  %v2449_v42 = vrot.slane %v4243_v43, %v5533_v52  ;;  %v1904_v26 = vsel %vm1880_vm2, %v1902_v12, %v1903_v57 }
 0x169   : > { %v1786_v29 = vadd.f32 %v1770_v27, %v1667_v48  ;;  %v2569_v63 = vrot.slane %v4254_v19, %v5533_v52  ;;  %v2023_v1 = vsel %vm1880_vm2, %v2021_v49, %v2022_v46  ;;  %v2259_v60 = vrot.slane %v2213_v36, 3 }
 0x16a   : > { %v2332_v10 = vmul.f32 %v2316_v18, %v2278_v62  ;;  %v2340_v6 = vmul.f32 %v2316_v18, %v2279_v44  ;;  %v2465_v33 = vmul.f32 %v2449_v42, %v5478_v24  ;;  %v2260_v56 = vrot.slane %v2221_v15, 3 }
 0x16b   : > { %v1920_v25 = vadd.f32 %v1904_v26, %v1786_v29  ;;  %v2473_v50 = vmul.f32 %v2449_v42, %v5479_v37  ;;  %v2142_v40 = vsel %vm1880_vm2, %v2140_v2, %v2141_v16  ;;  %v2585_v43 = vmul.f32 %v2569_v63, %v4745_v4 }
 0x16c   : > { %v2378_v7 = vrot.slane %v2332_v10, 3  ;;  %v2379_v59 = vrot.slane %v2340_v6, 3  ;;  %v2593_v19 = vmul.f32 %v2569_v63, %v4747_v9  ;;  %v2688_v5 = vrot.slane %v4266_v14, %v5533_v52 }
 0x16d   : > { %v2039_v47 = vadd.f32 %v2023_v1, %v1920_v25  ;;  %v2512_v24 = vrot.slane %v2465_v33, 4  ;;  %v2513_v30 = vrot.slane %v2473_v50, 4  ;;  %v2807_v0 = vrot.slane %v4268_v35, %v5533_v52 }
 0x16e   : > { %v2261_v37 = vsel %vm1880_vm2, %v2259_v60, %v2260_v56  ;;  %v2704_v34 = vmul.f32 %v2688_v5, %v4860_v61  ;;  %v2712_v58 = vmul.f32 %v2688_v5, %v4864_v55  ;;  %v2926_v4 = vrot.slane %v4285_v31, %v5533_v52 }
 0x16f   : > { %v2158_v45 = vadd.f32 %v2142_v40, %v2039_v47  ;;  %v2631_v9 = vrot.slane %v2585_v43, 4  ;;  %v2380_v14 = vsel %vm1880_vm2, %v2378_v7, %v2379_v59  ;;  %v2632_v20 = vrot.slane %v2593_v19, 4 }
 0x170   : > { %v2823_v51 = vmul.f32 %v2807_v0, %v5536_v23  ;;  %v2831_v35 = vmul.f32 %v2807_v0, %v4970_v21  ;;  %v2514_v17 = vsel %vm2490_vm3, %v2512_v24, %v2513_v30  ;;  %v2750_v61 = vrot.slane %v2704_v34, 4 }
 0x171   : > { %v2277_v28 = vadd.f32 %v2261_v37, %v2158_v45  ;;  %v2751_v22 = vrot.slane %v2712_v58, 4  ;;  %v2942_v55 = vmul.f32 %v2926_v4, %v2888_v13  ;;  %v2950_v54 = vmul.f32 %v2926_v4, %v2889_v41 }
 0x172   : > { %v2633_v11 = vsel %vm2490_vm3, %v2631_v9, %v2632_v20  ;;  %v2869_v12 = vrot.slane %v2823_v51, 4  ;;  %v2870_v8 = vrot.slane %v2831_v35, 4  ;;  %v3040_v49 = vrot.slane %v4874_v39, %v5533_v52 }
 0x173   : > { %v2396_v53 = vadd.f32 %v2380_v14, %v2277_v28  ;;  %v2752_v38 = vsel %vm2490_vm3, %v2750_v61, %v2751_v22  ;;  %v2988_v32 = vrot.slane %v2942_v55, 4  ;;  %v2989_v3 = vrot.slane %v2950_v54, 4 }
 0x174   : > { %v2871_v21 = vsel %vm2490_vm3, %v2869_v12, %v2870_v8 }
 0x175   : > { %v2530_v31 = vadd.f32 %v2514_v17, %v2396_v53  ;;  %v2990_v46 = vsel %vm2490_vm3, %v2988_v32, %v2989_v3 }
 0x177   : > { %v2649_v57 = vadd.f32 %v2633_v11, %v2530_v31 }
 0x179   : > { %v2768_v48 = vadd.f32 %v2752_v38, %v2649_v57 }
 0x17b   : > { %v2887_v27 = vadd.f32 %v2871_v21, %v2768_v48 }
 0x17d   : > { %v3006_v2 = vadd.f32 %v2990_v46, %v2887_v27 }
 0x17f   : > { %v3056_v36 = vadd.f32 %v3040_v49, %v3006_v2 }
 0x181   : > { %3064 = vst [vmem:[%s4368_s26 + $0x38] sm:$0xff] %v3056_v36 }
 0x182 PF: > { %s13_s12 = sadd.s32 1, %s3200_s12  }
 0x183   : > { %p10_p4 = scmp.ge.s32.totalorder %s13_s12, 4  }
 0x185   :  { %12 = sbr.rel (!%p10_p4) target bundleno = 1 (0x1), region = 86 }

</bundles_post_ra>
